<compile_context>
chip_gen: v7x
topology: tpu7x:2x2x1
jax: 0.10.0
libtpu: 0.0.40
codegen_flags: <defaults>
</compile_context>

<pallas_src>
import functools

import jax
import jax.numpy as jnp
from jax.experimental import pallas as pl
from jax.experimental.pallas import tpu as pltpu

NEG_SLOPE = 0.01          # nn.LeakyReLU default
OUT_DIM = 201 * 4         # 804
OUT_PAD = 896             # 7 * 128 (lane-aligned head output)
C = 256                   # node / edge channel width


def _round_up(a, m):
    return (a + m - 1) // m * m


def _leaky_relu(x):
    return jnp.where(x >= 0, x, NEG_SLOPE * x)


def _softplus(x):
    # matches F.softplus(beta=1, threshold=20)
    return jnp.where(x > 20.0, x, jnp.log1p(jnp.exp(jnp.minimum(x, 20.0))))


def _sigmoid(x):
    return 1.0 / (1.0 + jnp.exp(-x))


def _pad2(a, rows, cols, value=0):
    return jnp.pad(a, ((0, rows - a.shape[0]), (0, cols - a.shape[1])),
                   constant_values=value)


def _tpu_config():
    """Generation-dependent VMEM budget / tile caps (safe fallback = small)."""
    kind = ""
    try:
        kind = jax.devices()[0].device_kind.lower()
    except Exception:
        pass
    big_vmem = ("v5" in kind) or ("v6" in kind)   # 128 MiB VMEM parts
    two_cores = "v7" in kind                      # 2 TensorCores / chip
    vmem_limit = (100 if big_vmem else 40) * 1024 * 1024
    max_te = 2048 if big_vmem else 512
    max_tn = 2048 if big_vmem else 1024
    return vmem_limit, max_te, max_tn, two_cores


# ---------------------------------------------------------------------------
# Kernel 1: edge_embedding MLP  (Linear -> LeakyReLU -> Linear), tiled over E.
# ---------------------------------------------------------------------------
def edge_mlp_kernel(ea_ref, w1_ref, b1_ref, w2_ref, b2_ref, o_ref):
    h = jnp.dot(ea_ref[...], w1_ref[...],
                preferred_element_type=jnp.float32) + b1_ref[...]
    h = _leaky_relu(h).astype(jnp.bfloat16)
    o = jnp.dot(h, w2_ref[...], preferred_element_type=jnp.float32) + b2_ref[...]
    o_ref[...] = o.astype(o_ref.dtype)


def edge_mlp(ea_pad, dp, *, TE, vmem_limit):
    E_pad = ea_pad.shape[0]
    return pl.pallas_call(
        edge_mlp_kernel,
        out_shape=jax.ShapeDtypeStruct((E_pad, C), jnp.bfloat16),
        grid=(E_pad // TE,),
        in_specs=[
            pl.BlockSpec((TE, 128), lambda k: (k, 0)),
            pl.BlockSpec((128, 128), lambda k: (0, 0)),
            pl.BlockSpec((1, 128), lambda k: (0, 0)),
            pl.BlockSpec((128, C), lambda k: (0, 0)),
            pl.BlockSpec((1, C), lambda k: (0, 0)),
        ],
        out_specs=pl.BlockSpec((TE, C), lambda k: (k, 0)),
        compiler_params=pltpu.CompilerParams(
            dimension_semantics=("parallel",),
            vmem_limit_bytes=vmem_limit),
    )(ea_pad, dp["ee_w1"], dp["ee_b1"], dp["ee_w2"], dp["ee_b2"])


# ---------------------------------------------------------------------------
# Kernel 2a: per-edge messages, computed once per layer (E-parallel grid).
#   [f | s] = x_i @ [Wf_i|Ws_i] + x_j @ [Wf_j|Ws_j] + e @ [Wf_e|Ws_e]
#   msg     = sigmoid(f) * softplus(s)            (bf16 output)
# ---------------------------------------------------------------------------
def message_kernel(xi_ref, xj_ref, e_ref, wi_ref, wj_ref, we_ref, m_ref):
    fs = (jnp.dot(xi_ref[...], wi_ref[...], preferred_element_type=jnp.float32)
          + jnp.dot(xj_ref[...], wj_ref[...], preferred_element_type=jnp.float32)
          + jnp.dot(e_ref[...], we_ref[...], preferred_element_type=jnp.float32))
    c = m_ref.shape[1]
    f = fs[:, :c]                        # lane-aligned split (256 = 2 * 128)
    s = fs[:, c:]
    m_ref[...] = (_sigmoid(f) * _softplus(s)).astype(m_ref.dtype)


def compute_messages(x_i, x_j, e, lw, *, TE, vmem_limit):
    E_pad = x_i.shape[0]
    edge_spec = pl.BlockSpec((TE, C), lambda k: (k, 0))
    w_spec = pl.BlockSpec((C, 2 * C), lambda k: (0, 0))
    return pl.pallas_call(
        message_kernel,
        out_shape=jax.ShapeDtypeStruct((E_pad, C), jnp.bfloat16),
        grid=(E_pad // TE,),
        in_specs=[edge_spec, edge_spec, edge_spec, w_spec, w_spec, w_spec],
        out_specs=edge_spec,
        compiler_params=pltpu.CompilerParams(
            dimension_semantics=("parallel",),
            vmem_limit_bytes=vmem_limit),
    )(x_i, x_j, e, lw["w_i"], lw["w_j"], lw["w_e"])


# ---------------------------------------------------------------------------
# Kernel 2b: scatter-add of the precomputed messages + skip connection.
#   grid = (N-tiles [parallel], E-tiles [arbitrary])
#   agg += onehot(dst in this N-tile) @ msg       (one-hot built in-kernel)
#   out  = agg + x @ Wskip                        (bf16, on the last E-tile)
# ---------------------------------------------------------------------------
def scatter_skip_kernel(msg_ref, dst_ref, x_ref, wsk_ref, o_ref, acc_ref):
    k = pl.program_id(1)

    @pl.when(k == 0)
    def _():
        acc_ref[...] = jnp.zeros_like(acc_ref)

    TN = acc_ref.shape[0]
    # (TN,1) iota vs (1,TE) dst -> (TN,TE) one-hot without int32 temporaries.
    node_ids = (jax.lax.broadcasted_iota(jnp.int32, (TN, 1), 0)
                + pl.program_id(0) * TN)
    onehot = (node_ids == dst_ref[...]).astype(jnp.bfloat16)          # (TN, TE)
    acc_ref[...] += jnp.dot(onehot, msg_ref[...],
                            preferred_element_type=jnp.float32)

    @pl.when(k == pl.num_programs(1) - 1)
    def _():
        skip = jnp.dot(x_ref[...], wsk_ref[...],
                       preferred_element_type=jnp.float32)
        o_ref[...] = (acc_ref[...] + skip).astype(o_ref.dtype)


def scatter_skip(msg, dst_row, x, wskip, *, TN, TE, vmem_limit):
    N_pad = x.shape[0]
    E_pad = msg.shape[0]
    # TODO(synk): single-buffer the constant wskip block (pipeline_mode) once
    #             Buffered(1) support is verified on all target generations.
    return pl.pallas_call(
        scatter_skip_kernel,
        out_shape=jax.ShapeDtypeStruct((N_pad, C), jnp.bfloat16),
        grid=(N_pad // TN, E_pad // TE),
        in_specs=[
            pl.BlockSpec((TE, C), lambda i, k: (k, 0)),     # msg tile
            pl.BlockSpec((1, TE), lambda i, k: (0, k)),     # dst indices
            pl.BlockSpec((TN, C), lambda i, k: (i, 0)),     # x for the skip
            pl.BlockSpec((C, C), lambda i, k: (0, 0)),      # Wskip
        ],
        out_specs=pl.BlockSpec((TN, C), lambda i, k: (i, 0)),
        scratch_shapes=[pltpu.VMEM((TN, C), jnp.float32)],
        compiler_params=pltpu.CompilerParams(
            dimension_semantics=("parallel", "arbitrary"),
            vmem_limit_bytes=vmem_limit),
    )(msg, dst_row, x, wskip)


# ---------------------------------------------------------------------------
# Kernel 3: global mean/max/sum pooling + fc_energies + fc head, tiled over N.
#   Running (G_pad, C) sum / max / count accumulators in VMEM scratch; the
#   dense head runs once under pl.when(last tile).
# ---------------------------------------------------------------------------
def pool_head_kernel(G_real, x_ref, brow_ref, bcol_ref, en_ref,
                     few1_ref, feb1_ref, few2_ref, feb2_ref,
                     w3m_ref, w3x_ref, w3s_ref, w3e_ref, b3_ref,
                     w4_ref, b4_ref, o_ref,
                     sum_sc, max_sc, cnt_sc):
    k = pl.program_id(0)

    @pl.when(k == 0)
    def _():
        sum_sc[...] = jnp.zeros_like(sum_sc)
        cnt_sc[...] = jnp.zeros_like(cnt_sc)
        max_sc[...] = jnp.full_like(max_sc, -1e30)

    x = x_ref[...]                                   # (TN, C) bf16
    G_pad = sum_sc.shape[0]

    # sum / count via one-hot matmul; padded nodes carry batch id -1.
    g_iota = jax.lax.broadcasted_iota(jnp.int32, (G_pad, 1), 0)
    member = g_iota == brow_ref[...]                 # (G_pad, TN) bool
    onehot = member.astype(jnp.bfloat16)
    sum_sc[...] += jnp.dot(onehot, x, preferred_element_type=jnp.float32)
    cnt_sc[...] += jnp.sum(member.astype(jnp.float32), axis=1, keepdims=True)

    # running max per graph (G is tiny; static loop, bf16 masking, f32 accum)
    for g in range(G_real):
        mask = bcol_ref[...] == g                    # (TN, 1)
        mg = jnp.max(jnp.where(mask, x, jnp.bfloat16(-1e30)),
                     axis=0, keepdims=True).astype(jnp.float32)
        max_sc[g:g + 1, :] = jnp.maximum(max_sc[g:g + 1, :], mg)

    @pl.when(k == pl.num_programs(0) - 1)
    def _():
        sum_p = sum_sc[...]
        mean_p = sum_p / jnp.maximum(cnt_sc[...], 1.0)
        max_p = jnp.where(max_sc[...] > -1e29, max_sc[...], 0.0)

        # fc_energies: Linear(201->256) -> LeakyReLU -> Linear(256->128)
        h = jnp.dot(en_ref[...], few1_ref[...],
                    preferred_element_type=jnp.float32) + feb1_ref[...]
        h = _leaky_relu(h).astype(jnp.bfloat16)
        en = (jnp.dot(h, few2_ref[...], preferred_element_type=jnp.float32)
              + feb2_ref[...])

        # fc head: concat([mean|max|sum|energies]) @ W3 as split matmuls
        z = (jnp.dot(mean_p.astype(jnp.bfloat16), w3m_ref[...],
                     preferred_element_type=jnp.float32)
             + jnp.dot(max_p.astype(jnp.bfloat16), w3x_ref[...],
                       preferred_element_type=jnp.float32)
             + jnp.dot(sum_p.astype(jnp.bfloat16), w3s_ref[...],
                       preferred_element_type=jnp.float32)
             + jnp.dot(en.astype(jnp.bfloat16), w3e_ref[...],
                       preferred_element_type=jnp.float32)
             + b3_ref[...])
        z = _leaky_relu(z).astype(jnp.bfloat16)
        o_ref[...] = jnp.dot(z, w4_ref[...],
                             preferred_element_type=jnp.float32) + b4_ref[...]


def pool_head(x_bf, batch_row, batch_col, energies_p, dp,
              *, G_real, G_pad, TN, vmem_limit):
    N_pad = x_bf.shape[0]
    kernel = functools.partial(pool_head_kernel, G_real)
    const = lambda k: (0, 0)
    return pl.pallas_call(
        kernel,
        out_shape=jax.ShapeDtypeStruct((G_pad, OUT_PAD), jnp.float32),
        grid=(N_pad // TN,),
        in_specs=[
            pl.BlockSpec((TN, C), lambda k: (k, 0)),        # x tile
            pl.BlockSpec((1, TN), lambda k: (0, k)),        # batch (row layout)
            pl.BlockSpec((TN, 1), lambda k: (k, 0)),        # batch (col layout)
            pl.BlockSpec((G_pad, C), const),                # energies (padded)
            pl.BlockSpec((C, C), const),                    # fe_w1
            pl.BlockSpec((1, C), const),                    # fe_b1
            pl.BlockSpec((C, 128), const),                  # fe_w2
            pl.BlockSpec((1, 128), const),                  # fe_b2
            pl.BlockSpec((C, 1024), const),                 # w3_mean
            pl.BlockSpec((C, 1024), const),                 # w3_max
            pl.BlockSpec((C, 1024), const),                 # w3_sum
            pl.BlockSpec((128, 1024), const),               # w3_e
            pl.BlockSpec((1, 1024), const),                 # fc_b3
            pl.BlockSpec((1024, OUT_PAD), const),           # fc_w4
            pl.BlockSpec((1, OUT_PAD), const),              # fc_b4
        ],
        out_specs=pl.BlockSpec((G_pad, OUT_PAD), const),
        scratch_shapes=[pltpu.VMEM((G_pad, C), jnp.float32),    # running sum
                        pltpu.VMEM((G_pad, C), jnp.float32),    # running max
                        pltpu.VMEM((G_pad, 1), jnp.float32)],   # counts
        compiler_params=pltpu.CompilerParams(
            dimension_semantics=("arbitrary",),
            vmem_limit_bytes=vmem_limit),
    )(x_bf, batch_row, batch_col, energies_p,
      dp["fe_w1"], dp["fe_b1"], dp["fe_w2"], dp["fe_b2"],
      dp["w3_mean"], dp["w3_max"], dp["w3_sum"], dp["w3_e"], dp["fc_b3"],
      dp["fc_w4"], dp["fc_b4"])


# ---------------------------------------------------------------------------
# Parameter construction (deterministic, synthetic — shapes follow __init__).
# Linear weights are stored pre-transposed as [in_dim, out_dim].
# ---------------------------------------------------------------------------
def init_params(key, edge_dim=14, out_dim=OUT_DIM, n_layers=3):
    def lin(k, fan_in, fan_out):
        return (jax.random.normal(k, (fan_in, fan_out), jnp.float32)
                / jnp.sqrt(jnp.float32(fan_in)))

    ks = iter(jax.random.split(key, 32))
    p = {}
    p["emb"] = jax.random.normal(next(ks), (118, 256), jnp.float32) * 0.1
    p["ee_w1"] = lin(next(ks), edge_dim, 128)
    p["ee_b1"] = jnp.zeros((128,), jnp.float32)
    p["ee_w2"] = lin(next(ks), 128, 256)
    p["ee_b2"] = jnp.zeros((256,), jnp.float32)
    # CGConv layers: bias=False in the reference module (lin_f / lin_s / skip)
    p["layers"] = [{"wf": lin(next(ks), 768, 256),
                    "ws": lin(next(ks), 768, 256),
                    "wskip": lin(next(ks), 256, 256)} for _ in range(n_layers)]
    p["fe_w1"] = lin(next(ks), 201, 256)
    p["fe_b1"] = jnp.zeros((256,), jnp.float32)
    p["fe_w2"] = lin(next(ks), 256, 128)
    p["fe_b2"] = jnp.zeros((128,), jnp.float32)
    p["fc_w3"] = lin(next(ks), 256 * 3 + 128, 1024)
    p["fc_b3"] = jnp.zeros((1024,), jnp.float32)
    p["fc_w4"] = lin(next(ks), 1024, out_dim)
    p["fc_b4"] = jnp.zeros((out_dim,), jnp.float32)
    return p


def prepare_params(p):
    """Pad / split / fuse / cast weights once for the TPU kernels."""
    bf = jnp.bfloat16
    d = {"emb": p["emb"]}                                      # f32 gather table
    # edge_embedding: pad in_dim 14 -> 128 with zero rows
    d["ee_w1"] = _pad2(p["ee_w1"], 128, 128).astype(bf)
    d["ee_b1"] = p["ee_b1"].reshape(1, -1)
    d["ee_w2"] = p["ee_w2"].astype(bf)
    d["ee_b2"] = p["ee_b2"].reshape(1, -1)
    # CGConv layers: split the 768-row weights into x_i / x_j / e blocks and
    # fuse lin_f / lin_s column-wise into single (256, 512) operands.
    d["layers"] = []
    for lp in p["layers"]:
        wf, ws = lp["wf"], lp["ws"]
        d["layers"].append({
            "w_i": jnp.concatenate([wf[0:256], ws[0:256]], axis=1).astype(bf),
            "w_j": jnp.concatenate([wf[256:512], ws[256:512]], axis=1).astype(bf),
            "w_e": jnp.concatenate([wf[512:768], ws[512:768]], axis=1).astype(bf),
            "wskip": lp["wskip"].astype(bf),
        })
    # fc_energies: pad in_dim 201 -> 256 with zero rows
    d["fe_w1"] = _pad2(p["fe_w1"], 256, 256).astype(bf)
    d["fe_b1"] = p["fe_b1"].reshape(1, -1)
    d["fe_w2"] = p["fe_w2"].astype(bf)
    d["fe_b2"] = p["fe_b2"].reshape(1, -1)
    # fc: split 896-row weight into mean / max / sum / energy blocks
    w3 = p["fc_w3"]
    d["w3_mean"] = w3[0:256].astype(bf)
    d["w3_max"] = w3[256:512].astype(bf)
    d["w3_sum"] = w3[512:768].astype(bf)
    d["w3_e"] = w3[768:896].astype(bf)
    d["fc_b3"] = p["fc_b3"].reshape(1, -1)
    # head output padded 804 -> 896 lanes
    d["fc_w4"] = _pad2(p["fc_w4"], 1024, OUT_PAD).astype(bf)
    d["fc_b4"] = jnp.pad(p["fc_b4"], (0, OUT_PAD - p["fc_b4"].shape[0])
                         ).reshape(1, -1)
    return d


# ---------------------------------------------------------------------------
# Full forward pass
# ---------------------------------------------------------------------------
def cgcnn_forward(dp, node_z, edge_index, edge_attr, energies, batch, num_graphs):
    N = node_z.shape[0]
    E = edge_attr.shape[0]
    G = num_graphs

    VMEM_LIMIT, MAX_TE, MAX_TN, TWO_CORES = _tpu_config()

    # Tile sizes: 256-aligned node tiles, 128-aligned edge tiles.
    TE = min(_round_up(E, 128), MAX_TE)
    E_pad = _round_up(E, TE)
    N256 = _round_up(N, 256)
    TN = min(N256, MAX_TN)
    if TWO_CORES and N256 >= 512:
        # keep >= 2 steps on the "parallel" axis so both TensorCores work
        TN = min(TN, _round_up(N256 // 2, 256))
    N_pad = _round_up(N, TN)
    G_pad = _round_up(G, 8)

    # node embedding lookup (XLA gather) + pad, kept bf16 between layers
    x = jnp.take(dp["emb"], node_z, axis=0)                      # (N, 256) f32
    x = jnp.pad(x, ((0, N_pad - N), (0, 0))).astype(jnp.bfloat16)

    # edge embedding MLP (tiled Pallas kernel), output kept in bf16
    ea = jnp.pad(edge_attr, ((0, E_pad - E), (0, 128 - edge_attr.shape[1])))
    e = edge_mlp(ea.astype(jnp.bfloat16), dp, TE=TE,
                 vmem_limit=VMEM_LIMIT)                          # (E_pad,256) bf16

    src = edge_index[0].astype(jnp.int32)   # j (source)
    dst = edge_index[1].astype(jnp.int32)   # i (target; aggr='add' lands here)
    dst_row = jnp.pad(dst, (0, E_pad - E), constant_values=-1).reshape(1, E_pad)
    dst_g = jnp.pad(dst, (0, E_pad - E))    # padded edges gather node 0 (harmless)
    src_g = jnp.pad(src, (0, E_pad - E))

    # 3 x CGConv: per-edge messages once (E-parallel), then scatter + skip.
    for lw in dp["layers"]:
        x_i = jnp.take(x, dst_g, axis=0)                         # (E_pad,256) bf16
        x_j = jnp.take(x, src_g, axis=0)
        msg = compute_messages(x_i, x_j, e, lw, TE=TE, vmem_limit=VMEM_LIMIT)
        x = scatter_skip(msg, dst_row, x, lw["wskip"],
                         TN=TN, TE=TE, vmem_limit=VMEM_LIMIT)    # (N_pad,256) bf16

    # fused pooling + fc_energies + fc head (single Pallas kernel, tiled over N)
    batch_p = jnp.pad(batch.astype(jnp.int32), (0, N_pad - N), constant_values=-1)
    batch_row = batch_p.reshape(1, N_pad)
    batch_col = batch_p.reshape(N_pad, 1)
    energies_p = _pad2(energies, G_pad, 256).astype(jnp.bfloat16)  # (G_pad, 256)
    out = pool_head(x, batch_row, batch_col, energies_p, dp,
                    G_real=G, G_pad=G_pad, TN=TN,
                    vmem_limit=VMEM_LIMIT)                         # (G_pad, 896)

    return out[:G, :OUT_DIM].reshape(G, 4, 201)


if __name__ == "__main__":
    key = jax.random.PRNGKey(0)
    k_param, k_z, k_e1, k_e2, k_attr, k_en = jax.random.split(key, 6)

    # Small synthetic graph batch: 2 graphs, 8 nodes each, 16 edges each.
    N, E, G = 16, 32, 2
    edge_dim = 14

    params = init_params(k_param, edge_dim=edge_dim, out_dim=OUT_DIM, n_layers=3)
    dev_params = prepare_params(params)

    node_z = jax.random.randint(k_z, (N,), 0, 118)               # atomic numbers
    batch = jnp.concatenate([jnp.zeros((8,), jnp.int32),
                             jnp.ones((8,), jnp.int32)])
    # edges confined within each graph
    src0 = jax.random.randint(k_e1, (16,), 0, 8)
    dst0 = jax.random.randint(k_e2, (16,), 0, 8)
    src = jnp.concatenate([src0, src0 + 8])
    dst = jnp.concatenate([dst0, dst0 + 8])
    edge_index = jnp.stack([src, dst], axis=0)                   # (2, E)
    edge_attr = jax.random.normal(k_attr, (E, edge_dim), jnp.float32)
    energies = jax.random.normal(k_en, (G, 201), jnp.float32)

    fwd = jax.jit(cgcnn_forward, static_argnames=("num_graphs",))
    out = fwd(dev_params, node_z, edge_index, edge_attr, energies, batch,
              num_graphs=G)
    out = jax.block_until_ready(out)
    assert out.shape == (G, 4, 201) and out.dtype == jnp.float32
    assert bool(jnp.isfinite(out).all())
    print("KERNEL_OK")
</pallas_src>

<mosaic_0001>
module attributes {stable_mosaic.version = 11 : i64} {
  func.func @edge_mlp_kernel(%arg0: i32, %arg1: memref<128x128xbf16, #tpu.memory_space<vmem>>, %arg2: memref<128x128xbf16, #tpu.memory_space<vmem>>, %arg3: memref<1x128xf32, #tpu.memory_space<vmem>>, %arg4: memref<128x256xbf16, #tpu.memory_space<vmem>>, %arg5: memref<1x256xf32, #tpu.memory_space<vmem>>, %arg6: memref<128x256xbf16, #tpu.memory_space<vmem>>) attributes {dimension_semantics = [#tpu.dimension_semantics<parallel>], iteration_bounds = array<i64: 1>, scalar_prefetch = 0 : i64, scratch_operands = 0 : i64, tpu.core_type = #tpu.core_type<tc>, window_params = [{transform_indices = @transform_0, window_bounds = array<i64: 128, 128>}, {pipeline_mode = #tpu.pipeline_mode<synchronous>, transform_indices = @transform_1, window_bounds = array<i64: 128, 128>}, {pipeline_mode = #tpu.pipeline_mode<synchronous>, transform_indices = @transform_2, window_bounds = array<i64: 1, 128>}, {pipeline_mode = #tpu.pipeline_mode<synchronous>, transform_indices = @transform_3, window_bounds = array<i64: 128, 256>}, {pipeline_mode = #tpu.pipeline_mode<synchronous>, transform_indices = @transform_4, window_bounds = array<i64: 1, 256>}, {transform_indices = @transform_5, window_bounds = array<i64: 128, 256>}]} {
    %c0 = arith.constant 0 : index
    %c0_0 = arith.constant 0 : index
    %0 = vector.load %arg1[%c0, %c0_0] : memref<128x128xbf16, #tpu.memory_space<vmem>>, vector<128x128xbf16>
    %c0_1 = arith.constant 0 : index
    %c0_2 = arith.constant 0 : index
    %1 = vector.load %arg2[%c0_1, %c0_2] : memref<128x128xbf16, #tpu.memory_space<vmem>>, vector<128x128xbf16>
    %cst = arith.constant dense<0.000000e+00> : vector<128x128xf32>
    %2 = tpu.matmul %0, %1, %cst {dimension_numbers = #tpu.dot_dimension_numbers<[1], [0], [0], [1], [0, 0, 1, 1], [], []>} : vector<128x128xbf16>, vector<128x128xbf16>, vector<128x128xf32> -> vector<128x128xf32>
    %c0_3 = arith.constant 0 : index
    %c0_4 = arith.constant 0 : index
    %3 = vector.load %arg3[%c0_3, %c0_4] : memref<1x128xf32, #tpu.memory_space<vmem>>, vector<1x128xf32>
    %4 = vector.broadcast %3 : vector<1x128xf32> to vector<128x128xf32>
    %5 = arith.addf %2, %4 : vector<128x128xf32>
    %cst_5 = arith.constant 0.000000e+00 : f32
    %6 = vector.broadcast %cst_5 : f32 to vector<128x128xf32>
    %7 = arith.cmpf oge, %5, %6 : vector<128x128xf32>
    %cst_6 = arith.constant 0.00999999977 : f32
    %8 = vector.broadcast %cst_6 : f32 to vector<128x128xf32>
    %9 = arith.mulf %8, %5 : vector<128x128xf32>
    %10 = arith.select %7, %5, %9 : vector<128x128xi1>, vector<128x128xf32>
    %11 = arith.truncf %10 : vector<128x128xf32> to vector<128x128xbf16>
    %c0_7 = arith.constant 0 : index
    %c0_8 = arith.constant 0 : index
    %12 = vector.load %arg4[%c0_7, %c0_8] : memref<128x256xbf16, #tpu.memory_space<vmem>>, vector<128x256xbf16>
    %cst_9 = arith.constant dense<0.000000e+00> : vector<128x256xf32>
    %13 = tpu.matmul %11, %12, %cst_9 {dimension_numbers = #tpu.dot_dimension_numbers<[1], [0], [0], [1], [0, 0, 1, 1], [], []>} : vector<128x128xbf16>, vector<128x256xbf16>, vector<128x256xf32> -> vector<128x256xf32>
    %c0_10 = arith.constant 0 : index
    %c0_11 = arith.constant 0 : index
    %14 = vector.load %arg5[%c0_10, %c0_11] : memref<1x256xf32, #tpu.memory_space<vmem>>, vector<1x256xf32>
    %15 = vector.broadcast %14 : vector<1x256xf32> to vector<128x256xf32>
    %16 = arith.addf %13, %15 : vector<128x256xf32>
    %17 = arith.truncf %16 : vector<128x256xf32> to vector<128x256xbf16>
    %c0_12 = arith.constant 0 : index
    %c0_13 = arith.constant 0 : index
    %18 = vector.load %arg6[%c0_12, %c0_13] : memref<128x256xbf16, #tpu.memory_space<vmem>>, vector<128x256xbf16>
    tpu.vector_store %arg6[%c0_12, %c0_13], %17 {strides = array<i32>} : memref<128x256xbf16, #tpu.memory_space<vmem>>, vector<128x256xbf16>,
    return
  }
  func.func @transform_0(%arg0: i32) -> (i32, i32) {
    %c0_i32 = arith.constant 0 : i32
    %c0_i32_0 = arith.constant 0 : i32
    return %arg0, %c0_i32 : i32, i32
  }
  func.func @transform_1(%arg0: i32) -> (i32, i32) {
    %c0_i32 = arith.constant 0 : i32
    %c0_i32_0 = arith.constant 0 : i32
    %c0_i32_1 = arith.constant 0 : i32
    return %c0_i32, %c0_i32_0 : i32, i32
  }
  func.func @transform_2(%arg0: i32) -> (i32, i32) {
    %c0_i32 = arith.constant 0 : i32
    %c0_i32_0 = arith.constant 0 : i32
    %c0_i32_1 = arith.constant 0 : i32
    return %c0_i32, %c0_i32_0 : i32, i32
  }
  func.func @transform_3(%arg0: i32) -> (i32, i32) {
    %c0_i32 = arith.constant 0 : i32
    %c0_i32_0 = arith.constant 0 : i32
    %c0_i32_1 = arith.constant 0 : i32
    return %c0_i32, %c0_i32_0 : i32, i32
  }
  func.func @transform_4(%arg0: i32) -> (i32, i32) {
    %c0_i32 = arith.constant 0 : i32
    %c0_i32_0 = arith.constant 0 : i32
    %c0_i32_1 = arith.constant 0 : i32
    return %c0_i32, %c0_i32_0 : i32, i32
  }
  func.func @transform_5(%arg0: i32) -> (i32, i32) {
    %c0_i32 = arith.constant 0 : i32
    %c0_i32_0 = arith.constant 0 : i32
    return %arg0, %c0_i32 : i32, i32
  }
}

module attributes {stable_mosaic.version = 11 : i64} {
  func.func @message_kernel(%arg0: i32, %arg1: memref<128x256xbf16, #tpu.memory_space<vmem>>, %arg2: memref<128x256xbf16, #tpu.memory_space<vmem>>, %arg3: memref<128x256xbf16, #tpu.memory_space<vmem>>, %arg4: memref<256x512xbf16, #tpu.memory_space<vmem>>, %arg5: memref<256x512xbf16, #tpu.memory_space<vmem>>, %arg6: memref<256x512xbf16, #tpu.memory_space<vmem>>, %arg7: memref<128x256xbf16, #tpu.memory_space<vmem>>) attributes {dimension_semantics = [#tpu.dimension_semantics<parallel>], iteration_bounds = array<i64: 1>, scalar_prefetch = 0 : i64, scratch_operands = 0 : i64, tpu.core_type = #tpu.core_type<tc>, window_params = [{transform_indices = @transform_0, window_bounds = array<i64: 128, 256>}, {transform_indices = @transform_1, window_bounds = array<i64: 128, 256>}, {transform_indices = @transform_2, window_bounds = array<i64: 128, 256>}, {pipeline_mode = #tpu.pipeline_mode<synchronous>, transform_indices = @transform_3, window_bounds = array<i64: 256, 512>}, {pipeline_mode = #tpu.pipeline_mode<synchronous>, transform_indices = @transform_4, window_bounds = array<i64: 256, 512>}, {pipeline_mode = #tpu.pipeline_mode<synchronous>, transform_indices = @transform_5, window_bounds = array<i64: 256, 512>}, {transform_indices = @transform_6, window_bounds = array<i64: 128, 256>}]} {
    %c0 = arith.constant 0 : index
    %c0_0 = arith.constant 0 : index
    %0 = vector.load %arg1[%c0, %c0_0] : memref<128x256xbf16, #tpu.memory_space<vmem>>, vector<128x256xbf16>
    %c0_1 = arith.constant 0 : index
    %c0_2 = arith.constant 0 : index
    %1 = vector.load %arg4[%c0_1, %c0_2] : memref<256x512xbf16, #tpu.memory_space<vmem>>, vector<256x512xbf16>
    %cst = arith.constant dense<0.000000e+00> : vector<128x512xf32>
    %2 = tpu.matmul %0, %1, %cst {dimension_numbers = #tpu.dot_dimension_numbers<[1], [0], [0], [1], [0, 0, 1, 1], [], []>} : vector<128x256xbf16>, vector<256x512xbf16>, vector<128x512xf32> -> vector<128x512xf32>
    %c0_3 = arith.constant 0 : index
    %c0_4 = arith.constant 0 : index
    %3 = vector.load %arg2[%c0_3, %c0_4] : memref<128x256xbf16, #tpu.memory_space<vmem>>, vector<128x256xbf16>
    %c0_5 = arith.constant 0 : index
    %c0_6 = arith.constant 0 : index
    %4 = vector.load %arg5[%c0_5, %c0_6] : memref<256x512xbf16, #tpu.memory_space<vmem>>, vector<256x512xbf16>
    %cst_7 = arith.constant dense<0.000000e+00> : vector<128x512xf32>
    %5 = tpu.matmul %3, %4, %cst_7 {dimension_numbers = #tpu.dot_dimension_numbers<[1], [0], [0], [1], [0, 0, 1, 1], [], []>} : vector<128x256xbf16>, vector<256x512xbf16>, vector<128x512xf32> -> vector<128x512xf32>
    %6 = arith.addf %2, %5 : vector<128x512xf32>
    %c0_8 = arith.constant 0 : index
    %c0_9 = arith.constant 0 : index
    %7 = vector.load %arg3[%c0_8, %c0_9] : memref<128x256xbf16, #tpu.memory_space<vmem>>, vector<128x256xbf16>
    %c0_10 = arith.constant 0 : index
    %c0_11 = arith.constant 0 : index
    %8 = vector.load %arg6[%c0_10, %c0_11] : memref<256x512xbf16, #tpu.memory_space<vmem>>, vector<256x512xbf16>
    %cst_12 = arith.constant dense<0.000000e+00> : vector<128x512xf32>
    %9 = tpu.matmul %7, %8, %cst_12 {dimension_numbers = #tpu.dot_dimension_numbers<[1], [0], [0], [1], [0, 0, 1, 1], [], []>} : vector<128x256xbf16>, vector<256x512xbf16>, vector<128x512xf32> -> vector<128x512xf32>
    %10 = arith.addf %6, %9 : vector<128x512xf32>
    %11 = vector.extract_strided_slice %10 {offsets = [0, 0], sizes = [128, 256], strides = [1, 1]} : vector<128x512xf32> to vector<128x256xf32>
    %12 = vector.extract_strided_slice %10 {offsets = [0, 256], sizes = [128, 256], strides = [1, 1]} : vector<128x512xf32> to vector<128x256xf32>
    %cst_13 = arith.constant 0.000000e+00 : f32
    %13 = vector.broadcast %cst_13 : f32 to vector<128x256xf32>
    %14 = arith.subf %13, %11 : vector<128x256xf32>
    %15 = math.exp %14 : vector<128x256xf32>
    %cst_14 = arith.constant 1.000000e+00 : f32
    %16 = vector.broadcast %cst_14 : f32 to vector<128x256xf32>
    %17 = arith.addf %16, %15 : vector<128x256xf32>
    %cst_15 = arith.constant 1.000000e+00 : f32
    %18 = vector.broadcast %cst_15 : f32 to vector<128x256xf32>
    %19 = arith.divf %18, %17 : vector<128x256xf32>
    %cst_16 = arith.constant 2.000000e+01 : f32
    %20 = vector.broadcast %cst_16 : f32 to vector<128x256xf32>
    %21 = arith.cmpf ogt, %12, %20 : vector<128x256xf32>
    %cst_17 = arith.constant 2.000000e+01 : f32
    %22 = vector.broadcast %cst_17 : f32 to vector<128x256xf32>
    %23 = arith.minimumf %12, %22 : vector<128x256xf32>
    %24 = math.exp %23 : vector<128x256xf32>
    %25 = math.log1p %24 : vector<128x256xf32>
    %26 = arith.select %21, %12, %25 : vector<128x256xi1>, vector<128x256xf32>
    %27 = arith.mulf %19, %26 : vector<128x256xf32>
    %28 = arith.truncf %27 : vector<128x256xf32> to vector<128x256xbf16>
    %c0_18 = arith.constant 0 : index
    %c0_19 = arith.constant 0 : index
    %29 = vector.load %arg7[%c0_18, %c0_19] : memref<128x256xbf16, #tpu.memory_space<vmem>>, vector<128x256xbf16>
    tpu.vector_store %arg7[%c0_18, %c0_19], %28 {strides = array<i32>} : memref<128x256xbf16, #tpu.memory_space<vmem>>, vector<128x256xbf16>,
    return
  }
  func.func @transform_0(%arg0: i32) -> (i32, i32) {
    %c0_i32 = arith.constant 0 : i32
    %c0_i32_0 = arith.constant 0 : i32
    return %arg0, %c0_i32 : i32, i32
  }
  func.func @transform_1(%arg0: i32) -> (i32, i32) {
    %c0_i32 = arith.constant 0 : i32
    %c0_i32_0 = arith.constant 0 : i32
    return %arg0, %c0_i32 : i32, i32
  }
  func.func @transform_2(%arg0: i32) -> (i32, i32) {
    %c0_i32 = arith.constant 0 : i32
    %c0_i32_0 = arith.constant 0 : i32
    return %arg0, %c0_i32 : i32, i32
  }
  func.func @transform_3(%arg0: i32) -> (i32, i32) {
    %c0_i32 = arith.constant 0 : i32
    %c0_i32_0 = arith.constant 0 : i32
    %c0_i32_1 = arith.constant 0 : i32
    return %c0_i32, %c0_i32_0 : i32, i32
  }
  func.func @transform_4(%arg0: i32) -> (i32, i32) {
    %c0_i32 = arith.constant 0 : i32
    %c0_i32_0 = arith.constant 0 : i32
    %c0_i32_1 = arith.constant 0 : i32
    return %c0_i32, %c0_i32_0 : i32, i32
  }
  func.func @transform_5(%arg0: i32) -> (i32, i32) {
    %c0_i32 = arith.constant 0 : i32
    %c0_i32_0 = arith.constant 0 : i32
    %c0_i32_1 = arith.constant 0 : i32
    return %c0_i32, %c0_i32_0 : i32, i32
  }
  func.func @transform_6(%arg0: i32) -> (i32, i32) {
    %c0_i32 = arith.constant 0 : i32
    %c0_i32_0 = arith.constant 0 : i32
    return %arg0, %c0_i32 : i32, i32
  }
}

module attributes {stable_mosaic.version = 11 : i64} {
  func.func @scatter_skip_kernel(%arg0: i32, %arg1: i32, %arg2: memref<128x256xbf16, #tpu.memory_space<vmem>>, %arg3: memref<1x128xi32, #tpu.memory_space<vmem>>, %arg4: memref<256x256xbf16, #tpu.memory_space<vmem>>, %arg5: memref<256x256xbf16, #tpu.memory_space<vmem>>, %arg6: memref<256x256xbf16, #tpu.memory_space<vmem>>, %arg7: memref<256x256xf32, #tpu.memory_space<vmem>>) attributes {dimension_semantics = [#tpu.dimension_semantics<parallel>, #tpu.dimension_semantics<arbitrary>], iteration_bounds = array<i64: 1, 1>, scalar_prefetch = 0 : i64, scratch_operands = 1 : i64, tpu.core_type = #tpu.core_type<tc>, window_params = [{transform_indices = @transform_0, window_bounds = array<i64: 128, 256>}, {transform_indices = @transform_1, window_bounds = array<i64: 1, 128>}, {transform_indices = @transform_2, window_bounds = array<i64: 256, 256>}, {pipeline_mode = #tpu.pipeline_mode<synchronous>, transform_indices = @transform_3, window_bounds = array<i64: 256, 256>}, {transform_indices = @transform_4, window_bounds = array<i64: 256, 256>}]} {
    %c0_i32 = arith.constant 0 : i32
    %0 = arith.cmpi eq, %arg1, %c0_i32 : i32
    %1 = arith.extui %0 : i1 to i32
    %c0_i32_0 = arith.constant 0 : i32
    %2 = arith.cmpi ne, %1, %c0_i32_0 : i32
    scf.if %2 {
      %cst_10 = arith.constant 0.000000e+00 : f32
      %22 = vector.broadcast %cst_10 : f32 to vector<256x256xf32>
      %c0_11 = arith.constant 0 : index
      %c0_12 = arith.constant 0 : index
      %23 = vector.load %arg7[%c0_11, %c0_12] : memref<256x256xf32, #tpu.memory_space<vmem>>, vector<256x256xf32>
      tpu.vector_store %arg7[%c0_11, %c0_12], %22 {strides = array<i32>} : memref<256x256xf32, #tpu.memory_space<vmem>>, vector<256x256xf32>,
    } else {
    }
    %3 = tpu.iota {dimensions = array<i32: 0>} : vector<256x1xi32>
    %c256_i32 = arith.constant 256 : i32
    %4 = arith.muli %arg0, %c256_i32 : i32
    %5 = vector.broadcast %4 : i32 to vector<256x1xi32>
    %6 = arith.addi %3, %5 : vector<256x1xi32>
    %c0 = arith.constant 0 : index
    %c0_1 = arith.constant 0 : index
    %7 = vector.load %arg3[%c0, %c0_1] : memref<1x128xi32, #tpu.memory_space<vmem>>, vector<1x128xi32>
    %8 = vector.broadcast %6 : vector<256x1xi32> to vector<256x128xi32>
    %9 = vector.broadcast %7 : vector<1x128xi32> to vector<256x128xi32>
    %10 = arith.cmpi eq, %8, %9 : vector<256x128xi32>
    %11 = arith.extui %10 : vector<256x128xi1> to vector<256x128xi32>
    %12 = arith.sitofp %11 : vector<256x128xi32> to vector<256x128xf32>
    %13 = arith.truncf %12 : vector<256x128xf32> to vector<256x128xbf16>
    %c0_2 = arith.constant 0 : index
    %c0_3 = arith.constant 0 : index
    %14 = vector.load %arg7[%c0_2, %c0_3] : memref<256x256xf32, #tpu.memory_space<vmem>>, vector<256x256xf32>
    %c0_4 = arith.constant 0 : index
    %c0_5 = arith.constant 0 : index
    %15 = vector.load %arg2[%c0_4, %c0_5] : memref<128x256xbf16, #tpu.memory_space<vmem>>, vector<128x256xbf16>
    %cst = arith.constant dense<0.000000e+00> : vector<256x256xf32>
    %16 = tpu.matmul %13, %15, %cst {dimension_numbers = #tpu.dot_dimension_numbers<[1], [0], [0], [1], [0, 0, 1, 1], [], []>} : vector<256x128xbf16>, vector<128x256xbf16>, vector<256x256xf32> -> vector<256x256xf32>
    %17 = arith.addf %14, %16 : vector<256x256xf32>
    %c0_6 = arith.constant 0 : index
    %c0_7 = arith.constant 0 : index
    %18 = vector.load %arg7[%c0_6, %c0_7] : memref<256x256xf32, #tpu.memory_space<vmem>>, vector<256x256xf32>
    tpu.vector_store %arg7[%c0_6, %c0_7], %17 {strides = array<i32>} : memref<256x256xf32, #tpu.memory_space<vmem>>, vector<256x256xf32>,
    %c0_i32_8 = arith.constant 0 : i32
    %19 = arith.cmpi eq, %arg1, %c0_i32_8 : i32
    %20 = arith.extui %19 : i1 to i32
    %c0_i32_9 = arith.constant 0 : i32
    %21 = arith.cmpi ne, %20, %c0_i32_9 : i32
    scf.if %21 {
      %c0_10 = arith.constant 0 : index
      %c0_11 = arith.constant 0 : index
      %22 = vector.load %arg4[%c0_10, %c0_11] : memref<256x256xbf16, #tpu.memory_space<vmem>>, vector<256x256xbf16>
      %c0_12 = arith.constant 0 : index
      %c0_13 = arith.constant 0 : index
      %23 = vector.load %arg5[%c0_12, %c0_13] : memref<256x256xbf16, #tpu.memory_space<vmem>>, vector<256x256xbf16>
      %cst_14 = arith.constant dense<0.000000e+00> : vector<256x256xf32>
      %24 = tpu.matmul %22, %23, %cst_14 {dimension_numbers = #tpu.dot_dimension_numbers<[1], [0], [0], [1], [0, 0, 1, 1], [], []>} : vector<256x256xbf16>, vector<256x256xbf16>, vector<256x256xf32> -> vector<256x256xf32>
      %c0_15 = arith.constant 0 : index
      %c0_16 = arith.constant 0 : index
      %25 = vector.load %arg7[%c0_15, %c0_16] : memref<256x256xf32, #tpu.memory_space<vmem>>, vector<256x256xf32>
      %26 = arith.addf %25, %24 : vector<256x256xf32>
      %27 = arith.truncf %26 : vector<256x256xf32> to vector<256x256xbf16>
      %c0_17 = arith.constant 0 : index
      %c0_18 = arith.constant 0 : index
      %28 = vector.load %arg6[%c0_17, %c0_18] : memref<256x256xbf16, #tpu.memory_space<vmem>>, vector<256x256xbf16>
      tpu.vector_store %arg6[%c0_17, %c0_18], %27 {strides = array<i32>} : memref<256x256xbf16, #tpu.memory_space<vmem>>, vector<256x256xbf16>,
    } else {
    }
    return
  }
  func.func @transform_0(%arg0: i32, %arg1: i32) -> (i32, i32) {
    %c0_i32 = arith.constant 0 : i32
    %c0_i32_0 = arith.constant 0 : i32
    return %arg1, %c0_i32 : i32, i32
  }
  func.func @transform_1(%arg0: i32, %arg1: i32) -> (i32, i32) {
    %c0_i32 = arith.constant 0 : i32
    %c0_i32_0 = arith.constant 0 : i32
    return %c0_i32, %arg1 : i32, i32
  }
  func.func @transform_2(%arg0: i32, %arg1: i32) -> (i32, i32) {
    %c0_i32 = arith.constant 0 : i32
    %c0_i32_0 = arith.constant 0 : i32
    return %arg0, %c0_i32 : i32, i32
  }
  func.func @transform_3(%arg0: i32, %arg1: i32) -> (i32, i32) {
    %c0_i32 = arith.constant 0 : i32
    %c0_i32_0 = arith.constant 0 : i32
    %c0_i32_1 = arith.constant 0 : i32
    return %c0_i32, %c0_i32_0 : i32, i32
  }
  func.func @transform_4(%arg0: i32, %arg1: i32) -> (i32, i32) {
    %c0_i32 = arith.constant 0 : i32
    %c0_i32_0 = arith.constant 0 : i32
    return %arg0, %c0_i32 : i32, i32
  }
}

module attributes {stable_mosaic.version = 11 : i64} {
  func.func @pool_head_kernel(%arg0: i32, %arg1: memref<256x256xbf16, #tpu.memory_space<vmem>>, %arg2: memref<1x256xi32, #tpu.memory_space<vmem>>, %arg3: memref<256x1xi32, #tpu.memory_space<vmem>>, %arg4: memref<8x256xbf16, #tpu.memory_space<vmem>>, %arg5: memref<256x256xbf16, #tpu.memory_space<vmem>>, %arg6: memref<1x256xf32, #tpu.memory_space<vmem>>, %arg7: memref<256x128xbf16, #tpu.memory_space<vmem>>, %arg8: memref<1x128xf32, #tpu.memory_space<vmem>>, %arg9: memref<256x1024xbf16, #tpu.memory_space<vmem>>, %arg10: memref<256x1024xbf16, #tpu.memory_space<vmem>>, %arg11: memref<256x1024xbf16, #tpu.memory_space<vmem>>, %arg12: memref<128x1024xbf16, #tpu.memory_space<vmem>>, %arg13: memref<1x1024xf32, #tpu.memory_space<vmem>>, %arg14: memref<1024x896xbf16, #tpu.memory_space<vmem>>, %arg15: memref<1x896xf32, #tpu.memory_space<vmem>>, %arg16: memref<8x896xf32, #tpu.memory_space<vmem>>, %arg17: memref<8x256xf32, #tpu.memory_space<vmem>>, %arg18: memref<8x256xf32, #tpu.memory_space<vmem>>, %arg19: memref<8x1xf32, #tpu.memory_space<vmem>>) attributes {dimension_semantics = [#tpu.dimension_semantics<arbitrary>], iteration_bounds = array<i64: 1>, scalar_prefetch = 0 : i64, scratch_operands = 3 : i64, tpu.core_type = #tpu.core_type<tc>, window_params = [{transform_indices = @transform_0, window_bounds = array<i64: 256, 256>}, {transform_indices = @transform_1, window_bounds = array<i64: 1, 256>}, {transform_indices = @transform_2, window_bounds = array<i64: 256, 1>}, {pipeline_mode = #tpu.pipeline_mode<synchronous>, transform_indices = @transform_3, window_bounds = array<i64: 8, 256>}, {pipeline_mode = #tpu.pipeline_mode<synchronous>, transform_indices = @transform_4, window_bounds = array<i64: 256, 256>}, {pipeline_mode = #tpu.pipeline_mode<synchronous>, transform_indices = @transform_5, window_bounds = array<i64: 1, 256>}, {pipeline_mode = #tpu.pipeline_mode<synchronous>, transform_indices = @transform_6, window_bounds = array<i64: 256, 128>}, {pipeline_mode = #tpu.pipeline_mode<synchronous>, transform_indices = @transform_7, window_bounds = array<i64: 1, 128>}, {pipeline_mode = #tpu.pipeline_mode<synchronous>, transform_indices = @transform_8, window_bounds = array<i64: 256, 1024>}, {pipeline_mode = #tpu.pipeline_mode<synchronous>, transform_indices = @transform_9, window_bounds = array<i64: 256, 1024>}, {pipeline_mode = #tpu.pipeline_mode<synchronous>, transform_indices = @transform_10, window_bounds = array<i64: 256, 1024>}, {pipeline_mode = #tpu.pipeline_mode<synchronous>, transform_indices = @transform_11, window_bounds = array<i64: 128, 1024>}, {pipeline_mode = #tpu.pipeline_mode<synchronous>, transform_indices = @transform_12, window_bounds = array<i64: 1, 1024>}, {pipeline_mode = #tpu.pipeline_mode<synchronous>, transform_indices = @transform_13, window_bounds = array<i64: 1024, 896>}, {pipeline_mode = #tpu.pipeline_mode<synchronous>, transform_indices = @transform_14, window_bounds = array<i64: 1, 896>}, {pipeline_mode = #tpu.pipeline_mode<synchronous>, transform_indices = @transform_15, window_bounds = array<i64: 8, 896>}]} {
    %c0_i32 = arith.constant 0 : i32
    %0 = arith.cmpi eq, %arg0, %c0_i32 : i32
    %1 = arith.extui %0 : i1 to i32
    %c0_i32_0 = arith.constant 0 : i32
    %2 = arith.cmpi ne, %1, %c0_i32_0 : i32
    scf.if %2 {
      %cst_31 = arith.constant 0.000000e+00 : f32
      %52 = vector.broadcast %cst_31 : f32 to vector<8x256xf32>
      %c0_32 = arith.constant 0 : index
      %c0_33 = arith.constant 0 : index
      %53 = vector.load %arg17[%c0_32, %c0_33] : memref<8x256xf32, #tpu.memory_space<vmem>>, vector<8x256xf32>
      tpu.vector_store %arg17[%c0_32, %c0_33], %52 {strides = array<i32>} : memref<8x256xf32, #tpu.memory_space<vmem>>, vector<8x256xf32>,
      %cst_34 = arith.constant 0.000000e+00 : f32
      %54 = vector.broadcast %cst_34 : f32 to vector<8x1xf32>
      %c0_35 = arith.constant 0 : index
      %c0_36 = arith.constant 0 : index
      %55 = vector.load %arg19[%c0_35, %c0_36] : memref<8x1xf32, #tpu.memory_space<vmem>>, vector<8x1xf32>
      tpu.vector_store %arg19[%c0_35, %c0_36], %54 {strides = array<i32>} : memref<8x1xf32, #tpu.memory_space<vmem>>, vector<8x1xf32>,
      %cst_37 = arith.constant -1.000000e+30 : f32
      %56 = vector.broadcast %cst_37 : f32 to vector<8x256xf32>
      %c0_38 = arith.constant 0 : index
      %c0_39 = arith.constant 0 : index
      %57 = vector.load %arg18[%c0_38, %c0_39] : memref<8x256xf32, #tpu.memory_space<vmem>>, vector<8x256xf32>
      tpu.vector_store %arg18[%c0_38, %c0_39], %56 {strides = array<i32>} : memref<8x256xf32, #tpu.memory_space<vmem>>, vector<8x256xf32>,
    } else {
    }
    %c0 = arith.constant 0 : index
    %c0_1 = arith.constant 0 : index
    %3 = vector.load %arg1[%c0, %c0_1] : memref<256x256xbf16, #tpu.memory_space<vmem>>, vector<256x256xbf16>
    %4 = tpu.iota {dimensions = array<i32: 0>} : vector<8x1xi32>
    %c0_2 = arith.constant 0 : index
    %c0_3 = arith.constant 0 : index
    %5 = vector.load %arg2[%c0_2, %c0_3] : memref<1x256xi32, #tpu.memory_space<vmem>>, vector<1x256xi32>
    %6 = vector.broadcast %4 : vector<8x1xi32> to vector<8x256xi32>
    %7 = vector.broadcast %5 : vector<1x256xi32> to vector<8x256xi32>
    %8 = arith.cmpi eq, %6, %7 : vector<8x256xi32>
    %9 = arith.extui %8 : vector<8x256xi1> to vector<8x256xi32>
    %10 = arith.sitofp %9 : vector<8x256xi32> to vector<8x256xf32>
    %11 = arith.truncf %10 : vector<8x256xf32> to vector<8x256xbf16>
    %c0_4 = arith.constant 0 : index
    %c0_5 = arith.constant 0 : index
    %12 = vector.load %arg17[%c0_4, %c0_5] : memref<8x256xf32, #tpu.memory_space<vmem>>, vector<8x256xf32>
    %cst = arith.constant dense<0.000000e+00> : vector<8x256xf32>
    %13 = tpu.matmul %11, %3, %cst {dimension_numbers = #tpu.dot_dimension_numbers<[1], [0], [0], [1], [0, 0, 1, 1], [], []>} : vector<8x256xbf16>, vector<256x256xbf16>, vector<8x256xf32> -> vector<8x256xf32>
    %14 = arith.addf %12, %13 : vector<8x256xf32>
    %c0_6 = arith.constant 0 : index
    %c0_7 = arith.constant 0 : index
    %15 = vector.load %arg17[%c0_6, %c0_7] : memref<8x256xf32, #tpu.memory_space<vmem>>, vector<8x256xf32>
    tpu.vector_store %arg17[%c0_6, %c0_7], %14 {strides = array<i32>} : memref<8x256xf32, #tpu.memory_space<vmem>>, vector<8x256xf32>,
    %c0_8 = arith.constant 0 : index
    %c0_9 = arith.constant 0 : index
    %16 = vector.load %arg19[%c0_8, %c0_9] : memref<8x1xf32, #tpu.memory_space<vmem>>, vector<8x1xf32>
    %17 = arith.extui %8 : vector<8x256xi1> to vector<8x256xi32>
    %18 = arith.sitofp %17 : vector<8x256xi32> to vector<8x256xf32>
    %cst_10 = arith.constant dense<0.000000e+00> : vector<8xf32>
    %19 = vector.multi_reduction <add>, %18, %cst_10 [1] : vector<8x256xf32> to vector<8xf32>
    %20 = vector.shape_cast %19 : vector<8xf32> to vector<8x1xf32>
    %21 = arith.addf %16, %20 : vector<8x1xf32>
    %c0_11 = arith.constant 0 : index
    %c0_12 = arith.constant 0 : index
    %22 = vector.load %arg19[%c0_11, %c0_12] : memref<8x1xf32, #tpu.memory_space<vmem>>, vector<8x1xf32>
    tpu.vector_store %arg19[%c0_11, %c0_12], %21 {strides = array<i32>} : memref<8x1xf32, #tpu.memory_space<vmem>>, vector<8x1xf32>,
    %c0_13 = arith.constant 0 : index
    %c0_14 = arith.constant 0 : index
    %23 = vector.load %arg3[%c0_13, %c0_14] : memref<256x1xi32, #tpu.memory_space<vmem>>, vector<256x1xi32>
    %c0_i32_15 = arith.constant 0 : i32
    %24 = vector.broadcast %c0_i32_15 : i32 to vector<256x1xi32>
    %25 = arith.cmpi eq, %23, %24 : vector<256x1xi32>
    %cst_16 = arith.constant -1.000260e+30 : bf16
    %26 = vector.shape_cast %25 : vector<256x1xi1> to vector<256x1xi1>
    %27 = vector.broadcast %26 : vector<256x1xi1> to vector<256x256xi1>
    %28 = vector.broadcast %cst_16 : bf16 to vector<256x256xbf16>
    %29 = arith.select %27, %3, %28 : vector<256x256xi1>, vector<256x256xbf16>
    %cst_17 = arith.constant dense<0xFF80> : vector<256xbf16>
    %30 = vector.multi_reduction <maximumf>, %29, %cst_17 [0] : vector<256x256xbf16> to vector<256xbf16>
    %31 = vector.shape_cast %30 : vector<256xbf16> to vector<1x256xbf16>
    %32 = arith.extf %31 : vector<1x256xbf16> to vector<1x256xf32>
    %c0_18 = arith.constant 0 : index
    %c0_19 = arith.constant 0 : index
    %33 = vector.load %arg18[%c0_18, %c0_19] : memref<8x256xf32, #tpu.memory_space<vmem>>, vector<1x256xf32>
    %34 = arith.maximumf %33, %32 : vector<1x256xf32>
    %c0_20 = arith.constant 0 : index
    %c0_21 = arith.constant 0 : index
    %35 = vector.load %arg18[%c0_20, %c0_21] : memref<8x256xf32, #tpu.memory_space<vmem>>, vector<1x256xf32>
    tpu.vector_store %arg18[%c0_20, %c0_21], %34 {strides = array<i32>} : memref<8x256xf32, #tpu.memory_space<vmem>>, vector<1x256xf32>,
    %c0_22 = arith.constant 0 : index
    %c0_23 = arith.constant 0 : index
    %36 = vector.load %arg3[%c0_22, %c0_23] : memref<256x1xi32, #tpu.memory_space<vmem>>, vector<256x1xi32>
    %c1_i32 = arith.constant 1 : i32
    %37 = vector.broadcast %c1_i32 : i32 to vector<256x1xi32>
    %38 = arith.cmpi eq, %36, %37 : vector<256x1xi32>
    %cst_24 = arith.constant -1.000260e+30 : bf16
    %39 = vector.shape_cast %38 : vector<256x1xi1> to vector<256x1xi1>
    %40 = vector.broadcast %39 : vector<256x1xi1> to vector<256x256xi1>
    %41 = vector.broadcast %cst_24 : bf16 to vector<256x256xbf16>
    %42 = arith.select %40, %3, %41 : vector<256x256xi1>, vector<256x256xbf16>
    %cst_25 = arith.constant dense<0xFF80> : vector<256xbf16>
    %43 = vector.multi_reduction <maximumf>, %42, %cst_25 [0] : vector<256x256xbf16> to vector<256xbf16>
    %44 = vector.shape_cast %43 : vector<256xbf16> to vector<1x256xbf16>
    %45 = arith.extf %44 : vector<1x256xbf16> to vector<1x256xf32>
    %c1 = arith.constant 1 : index
    %c0_26 = arith.constant 0 : index
    %46 = vector.load %arg18[%c1, %c0_26] : memref<8x256xf32, #tpu.memory_space<vmem>>, vector<1x256xf32>
    %47 = arith.maximumf %46, %45 : vector<1x256xf32>
    %c1_27 = arith.constant 1 : index
    %c0_28 = arith.constant 0 : index
    %48 = vector.load %arg18[%c1_27, %c0_28] : memref<8x256xf32, #tpu.memory_space<vmem>>, vector<1x256xf32>
    tpu.vector_store %arg18[%c1_27, %c0_28], %47 {strides = array<i32>} : memref<8x256xf32, #tpu.memory_space<vmem>>, vector<1x256xf32>,
    %c0_i32_29 = arith.constant 0 : i32
    %49 = arith.cmpi eq, %arg0, %c0_i32_29 : i32
    %50 = arith.extui %49 : i1 to i32
    %c0_i32_30 = arith.constant 0 : i32
    %51 = arith.cmpi ne, %50, %c0_i32_30 : i32
    scf.if %51 {
      %c0_31 = arith.constant 0 : index
      %c0_32 = arith.constant 0 : index
      %52 = vector.load %arg17[%c0_31, %c0_32] : memref<8x256xf32, #tpu.memory_space<vmem>>, vector<8x256xf32>
      %c0_33 = arith.constant 0 : index
      %c0_34 = arith.constant 0 : index
      %53 = vector.load %arg19[%c0_33, %c0_34] : memref<8x1xf32, #tpu.memory_space<vmem>>, vector<8x1xf32>
      %cst_35 = arith.constant 1.000000e+00 : f32
      %54 = vector.broadcast %cst_35 : f32 to vector<8x1xf32>
      %55 = arith.maximumf %53, %54 : vector<8x1xf32>
      %56 = vector.broadcast %55 : vector<8x1xf32> to vector<8x256xf32>
      %57 = arith.divf %52, %56 : vector<8x256xf32>
      %c0_36 = arith.constant 0 : index
      %c0_37 = arith.constant 0 : index
      %58 = vector.load %arg18[%c0_36, %c0_37] : memref<8x256xf32, #tpu.memory_space<vmem>>, vector<8x256xf32>
      %cst_38 = arith.constant -1.000000e+29 : f32
      %59 = vector.broadcast %cst_38 : f32 to vector<8x256xf32>
      %60 = arith.cmpf ogt, %58, %59 : vector<8x256xf32>
      %c0_39 = arith.constant 0 : index
      %c0_40 = arith.constant 0 : index
      %61 = vector.load %arg18[%c0_39, %c0_40] : memref<8x256xf32, #tpu.memory_space<vmem>>, vector<8x256xf32>
      %cst_41 = arith.constant 0.000000e+00 : f32
      %62 = vector.broadcast %cst_41 : f32 to vector<8x256xf32>
      %63 = arith.select %60, %61, %62 : vector<8x256xi1>, vector<8x256xf32>
      %c0_42 = arith.constant 0 : index
      %c0_43 = arith.constant 0 : index
      %64 = vector.load %arg4[%c0_42, %c0_43] : memref<8x256xbf16, #tpu.memory_space<vmem>>, vector<8x256xbf16>
      %c0_44 = arith.constant 0 : index
      %c0_45 = arith.constant 0 : index
      %65 = vector.load %arg5[%c0_44, %c0_45] : memref<256x256xbf16, #tpu.memory_space<vmem>>, vector<256x256xbf16>
      %cst_46 = arith.constant dense<0.000000e+00> : vector<8x256xf32>
      %66 = tpu.matmul %64, %65, %cst_46 {dimension_numbers = #tpu.dot_dimension_numbers<[1], [0], [0], [1], [0, 0, 1, 1], [], []>} : vector<8x256xbf16>, vector<256x256xbf16>, vector<8x256xf32> -> vector<8x256xf32>
      %c0_47 = arith.constant 0 : index
      %c0_48 = arith.constant 0 : index
      %67 = vector.load %arg6[%c0_47, %c0_48] : memref<1x256xf32, #tpu.memory_space<vmem>>, vector<1x256xf32>
      %68 = vector.broadcast %67 : vector<1x256xf32> to vector<8x256xf32>
      %69 = arith.addf %66, %68 : vector<8x256xf32>
      %cst_49 = arith.constant 0.000000e+00 : f32
      %70 = vector.broadcast %cst_49 : f32 to vector<8x256xf32>
      %71 = arith.cmpf oge, %69, %70 : vector<8x256xf32>
      %cst_50 = arith.constant 0.00999999977 : f32
      %72 = vector.broadcast %cst_50 : f32 to vector<8x256xf32>
      %73 = arith.mulf %72, %69 : vector<8x256xf32>
      %74 = arith.select %71, %69, %73 : vector<8x256xi1>, vector<8x256xf32>
      %75 = arith.truncf %74 : vector<8x256xf32> to vector<8x256xbf16>
      %c0_51 = arith.constant 0 : index
      %c0_52 = arith.constant 0 : index
      %76 = vector.load %arg7[%c0_51, %c0_52] : memref<256x128xbf16, #tpu.memory_space<vmem>>, vector<256x128xbf16>
      %cst_53 = arith.constant dense<0.000000e+00> : vector<8x128xf32>
      %77 = tpu.matmul %75, %76, %cst_53 {dimension_numbers = #tpu.dot_dimension_numbers<[1], [0], [0], [1], [0, 0, 1, 1], [], []>} : vector<8x256xbf16>, vector<256x128xbf16>, vector<8x128xf32> -> vector<8x128xf32>
      %c0_54 = arith.constant 0 : index
      %c0_55 = arith.constant 0 : index
      %78 = vector.load %arg8[%c0_54, %c0_55] : memref<1x128xf32, #tpu.memory_space<vmem>>, vector<1x128xf32>
      %79 = vector.broadcast %78 : vector<1x128xf32> to vector<8x128xf32>
      %80 = arith.addf %77, %79 : vector<8x128xf32>
      %81 = arith.truncf %57 : vector<8x256xf32> to vector<8x256xbf16>
      %c0_56 = arith.constant 0 : index
      %c0_57 = arith.constant 0 : index
      %82 = vector.load %arg9[%c0_56, %c0_57] : memref<256x1024xbf16, #tpu.memory_space<vmem>>, vector<256x1024xbf16>
      %cst_58 = arith.constant dense<0.000000e+00> : vector<8x1024xf32>
      %83 = tpu.matmul %81, %82, %cst_58 {dimension_numbers = #tpu.dot_dimension_numbers<[1], [0], [0], [1], [0, 0, 1, 1], [], []>} : vector<8x256xbf16>, vector<256x1024xbf16>, vector<8x1024xf32> -> vector<8x1024xf32>
      %84 = arith.truncf %63 : vector<8x256xf32> to vector<8x256xbf16>
      %c0_59 = arith.constant 0 : index
      %c0_60 = arith.constant 0 : index
      %85 = vector.load %arg10[%c0_59, %c0_60] : memref<256x1024xbf16, #tpu.memory_space<vmem>>, vector<256x1024xbf16>
      %cst_61 = arith.constant dense<0.000000e+00> : vector<8x1024xf32>
      %86 = tpu.matmul %84, %85, %cst_61 {dimension_numbers = #tpu.dot_dimension_numbers<[1], [0], [0], [1], [0, 0, 1, 1], [], []>} : vector<8x256xbf16>, vector<256x1024xbf16>, vector<8x1024xf32> -> vector<8x1024xf32>
      %87 = arith.addf %83, %86 : vector<8x1024xf32>
      %88 = arith.truncf %52 : vector<8x256xf32> to vector<8x256xbf16>
      %c0_62 = arith.constant 0 : index
      %c0_63 = arith.constant 0 : index
      %89 = vector.load %arg11[%c0_62, %c0_63] : memref<256x1024xbf16, #tpu.memory_space<vmem>>, vector<256x1024xbf16>
      %cst_64 = arith.constant dense<0.000000e+00> : vector<8x1024xf32>
      %90 = tpu.matmul %88, %89, %cst_64 {dimension_numbers = #tpu.dot_dimension_numbers<[1], [0], [0], [1], [0, 0, 1, 1], [], []>} : vector<8x256xbf16>, vector<256x1024xbf16>, vector<8x1024xf32> -> vector<8x1024xf32>
      %91 = arith.addf %87, %90 : vector<8x1024xf32>
      %92 = arith.truncf %80 : vector<8x128xf32> to vector<8x128xbf16>
      %c0_65 = arith.constant 0 : index
      %c0_66 = arith.constant 0 : index
      %93 = vector.load %arg12[%c0_65, %c0_66] : memref<128x1024xbf16, #tpu.memory_space<vmem>>, vector<128x1024xbf16>
      %cst_67 = arith.constant dense<0.000000e+00> : vector<8x1024xf32>
      %94 = tpu.matmul %92, %93, %cst_67 {dimension_numbers = #tpu.dot_dimension_numbers<[1], [0], [0], [1], [0, 0, 1, 1], [], []>} : vector<8x128xbf16>, vector<128x1024xbf16>, vector<8x1024xf32> -> vector<8x1024xf32>
      %95 = arith.addf %91, %94 : vector<8x1024xf32>
      %c0_68 = arith.constant 0 : index
      %c0_69 = arith.constant 0 : index
      %96 = vector.load %arg13[%c0_68, %c0_69] : memref<1x1024xf32, #tpu.memory_space<vmem>>, vector<1x1024xf32>
      %97 = vector.broadcast %96 : vector<1x1024xf32> to vector<8x1024xf32>
      %98 = arith.addf %95, %97 : vector<8x1024xf32>
      %cst_70 = arith.constant 0.000000e+00 : f32
      %99 = vector.broadcast %cst_70 : f32 to vector<8x1024xf32>
      %100 = arith.cmpf oge, %98, %99 : vector<8x1024xf32>
      %cst_71 = arith.constant 0.00999999977 : f32
      %101 = vector.broadcast %cst_71 : f32 to vector<8x1024xf32>
      %102 = arith.mulf %101, %98 : vector<8x1024xf32>
      %103 = arith.select %100, %98, %102 : vector<8x1024xi1>, vector<8x1024xf32>
      %104 = arith.truncf %103 : vector<8x1024xf32> to vector<8x1024xbf16>
      %c0_72 = arith.constant 0 : index
      %c0_73 = arith.constant 0 : index
      %105 = vector.load %arg14[%c0_72, %c0_73] : memref<1024x896xbf16, #tpu.memory_space<vmem>>, vector<1024x896xbf16>
      %cst_74 = arith.constant dense<0.000000e+00> : vector<8x896xf32>
      %106 = tpu.matmul %104, %105, %cst_74 {dimension_numbers = #tpu.dot_dimension_numbers<[1], [0], [0], [1], [0, 0, 1, 1], [], []>} : vector<8x1024xbf16>, vector<1024x896xbf16>, vector<8x896xf32> -> vector<8x896xf32>
      %c0_75 = arith.constant 0 : index
      %c0_76 = arith.constant 0 : index
      %107 = vector.load %arg15[%c0_75, %c0_76] : memref<1x896xf32, #tpu.memory_space<vmem>>, vector<1x896xf32>
      %108 = vector.broadcast %107 : vector<1x896xf32> to vector<8x896xf32>
      %109 = arith.addf %106, %108 : vector<8x896xf32>
      %c0_77 = arith.constant 0 : index
      %c0_78 = arith.constant 0 : index
      %110 = vector.load %arg16[%c0_77, %c0_78] : memref<8x896xf32, #tpu.memory_space<vmem>>, vector<8x896xf32>
      tpu.vector_store %arg16[%c0_77, %c0_78], %109 {strides = array<i32>} : memref<8x896xf32, #tpu.memory_space<vmem>>, vector<8x896xf32>,
    } else {
    }
    return
  }
  func.func @transform_0(%arg0: i32) -> (i32, i32) {
    %c0_i32 = arith.constant 0 : i32
    %c0_i32_0 = arith.constant 0 : i32
    return %arg0, %c0_i32 : i32, i32
  }
  func.func @transform_1(%arg0: i32) -> (i32, i32) {
    %c0_i32 = arith.constant 0 : i32
    %c0_i32_0 = arith.constant 0 : i32
    return %c0_i32, %arg0 : i32, i32
  }
  func.func @transform_2(%arg0: i32) -> (i32, i32) {
    %c0_i32 = arith.constant 0 : i32
    %c0_i32_0 = arith.constant 0 : i32
    return %arg0, %c0_i32 : i32, i32
  }
  func.func @transform_3(%arg0: i32) -> (i32, i32) {
    %c0_i32 = arith.constant 0 : i32
    %c0_i32_0 = arith.constant 0 : i32
    %c0_i32_1 = arith.constant 0 : i32
    return %c0_i32, %c0_i32_0 : i32, i32
  }
  func.func @transform_4(%arg0: i32) -> (i32, i32) {
    %c0_i32 = arith.constant 0 : i32
    %c0_i32_0 = arith.constant 0 : i32
    %c0_i32_1 = arith.constant 0 : i32
    return %c0_i32, %c0_i32_0 : i32, i32
  }
  func.func @transform_5(%arg0: i32) -> (i32, i32) {
    %c0_i32 = arith.constant 0 : i32
    %c0_i32_0 = arith.constant 0 : i32
    %c0_i32_1 = arith.constant 0 : i32
    return %c0_i32, %c0_i32_0 : i32, i32
  }
  func.func @transform_6(%arg0: i32) -> (i32, i32) {
    %c0_i32 = arith.constant 0 : i32
    %c0_i32_0 = arith.constant 0 : i32
    %c0_i32_1 = arith.constant 0 : i32
    return %c0_i32, %c0_i32_0 : i32, i32
  }
  func.func @transform_7(%arg0: i32) -> (i32, i32) {
    %c0_i32 = arith.constant 0 : i32
    %c0_i32_0 = arith.constant 0 : i32
    %c0_i32_1 = arith.constant 0 : i32
    return %c0_i32, %c0_i32_0 : i32, i32
  }
  func.func @transform_8(%arg0: i32) -> (i32, i32) {
    %c0_i32 = arith.constant 0 : i32
    %c0_i32_0 = arith.constant 0 : i32
    %c0_i32_1 = arith.constant 0 : i32
    return %c0_i32, %c0_i32_0 : i32, i32
  }
  func.func @transform_9(%arg0: i32) -> (i32, i32) {
    %c0_i32 = arith.constant 0 : i32
    %c0_i32_0 = arith.constant 0 : i32
    %c0_i32_1 = arith.constant 0 : i32
    return %c0_i32, %c0_i32_0 : i32, i32
  }
  func.func @transform_10(%arg0: i32) -> (i32, i32) {
    %c0_i32 = arith.constant 0 : i32
    %c0_i32_0 = arith.constant 0 : i32
    %c0_i32_1 = arith.constant 0 : i32
    return %c0_i32, %c0_i32_0 : i32, i32
  }
  func.func @transform_11(%arg0: i32) -> (i32, i32) {
    %c0_i32 = arith.constant 0 : i32
    %c0_i32_0 = arith.constant 0 : i32
    %c0_i32_1 = arith.constant 0 : i32
    return %c0_i32, %c0_i32_0 : i32, i32
  }
  func.func @transform_12(%arg0: i32) -> (i32, i32) {
    %c0_i32 = arith.constant 0 : i32
    %c0_i32_0 = arith.constant 0 : i32
    %c0_i32_1 = arith.constant 0 : i32
    return %c0_i32, %c0_i32_0 : i32, i32
  }
  func.func @transform_13(%arg0: i32) -> (i32, i32) {
    %c0_i32 = arith.constant 0 : i32
    %c0_i32_0 = arith.constant 0 : i32
    %c0_i32_1 = arith.constant 0 : i32
    return %c0_i32, %c0_i32_0 : i32, i32
  }
  func.func @transform_14(%arg0: i32) -> (i32, i32) {
    %c0_i32 = arith.constant 0 : i32
    %c0_i32_0 = arith.constant 0 : i32
    %c0_i32_1 = arith.constant 0 : i32
    return %c0_i32, %c0_i32_0 : i32, i32
  }
  func.func @transform_15(%arg0: i32) -> (i32, i32) {
    %c0_i32 = arith.constant 0 : i32
    %c0_i32_0 = arith.constant 0 : i32
    %c0_i32_1 = arith.constant 0 : i32
    return %c0_i32, %c0_i32_0 : i32, i32
  }
}

</mosaic_0001>

<bundles_post_ra>
// kernel: cgcnn_forward.8
= control target key start
LH: loop header
LB: loop body
LE: loop exit
PB: predicated region body
PF: predicated region fallthrough
CT: control target
= control target key end

     0   :  { %10 = vsyncpa [#allocation3], 0  ;;  %s1155_s0 = inlined_call_operand.vmem [shape: bf16[128,128], index: 0, kind: input, shape index: {}]   ;;  %s1156_s1 = inlined_call_operand.vmem [shape: bf16[128,128], index: 1, kind: input, shape index: {}]   ;;  %s1157_s2 = inlined_call_operand.hbm [shape: f32[1,128], index: 2, kind: input, shape index: {}]   ;;  %s1158_s3 = inlined_call_operand.vmem [shape: bf16[128,256], index: 3, kind: input, shape index: {}]   ;;  %s1159_s4 = inlined_call_operand.hbm [shape: f32[1,256], index: 4, kind: input, shape index: {}]   ;;  %s1160_s5 = inlined_call_operand.vmem [shape: bf16[128,256], index: 5, kind: output, shape index: {}]  }
   0x1   :  { %11 = vsyncpa [#allocation5], 0  ;;  %s892_s18 = smov [#allocation2]   ;;  %s893_s20 = smov [#allocation4]  }
   0x2   :  { %s22_s19 = sshll.u32 %s892_s18, 4  ;;  %s34_s21 = sshll.u32 %s893_s20, 4  ;;  %s23_s19 = int_to_ptr.vmem [resolvable:$true] %s22_s19  ;;  %s35_s21 = int_to_ptr.vmem [resolvable:$true] %s34_s21 }
   0x3   :  { %s844_s24 = scalar_lea.hbm %s1157_s2, 16 }
   0x4   :  { %p845_p0 = scmp.ne.s32.totalorder %s1157_s2, %s844_s24  ;;  %p848_p1 = scmp.lt.u32.totalorder %s844_s24, %s1157_s2 }
   0x6   :  { %p850_p2 = pnand %p848_p1, %p845_p0 }
   0x8   :  { %853 = shalt.err (!%p850_p2)
}
   0x9   :  { %s854_s29 = scalar_lea.vmem %s23_s19, 16  ;;  %s858_s30 = scalar_lea.vmem %s23_s19, 32 }
   0xa   :  { %p855_p3 = scmp.ne.s32.totalorder %s23_s19, %s854_s29  ;;  %p859_p4 = scmp.lt.s32.totalorder %s23_s19, %s23_s19 }
   0xb   :  { %p860_p5 = scmp.lt.s32.totalorder %s858_s30, %s854_s29 }
   0xd   :  { %p861_p6 = por %p860_p5, %p859_p4 }
   0xf   :  { %p862_p7 = pnand %p861_p6, %p855_p3 }
  0x11   :  { %865 = shalt.err (!%p862_p7)
}
  0x12   :  { %25 = dma.hbm_to_vmem [thread:$0]  %s1157_s2, 16, %s23_s19, [#allocation3]  }
  0x13   :  { %s866_s10 = scalar_lea.hbm %s1159_s4, 32 }
  0x14   :  { %p867_p8 = scmp.ne.s32.totalorder %s1159_s4, %s866_s10  ;;  %p870_p9 = scmp.lt.u32.totalorder %s866_s10, %s1159_s4 }
  0x16   :  { %p872_p10 = pnand %p870_p9, %p867_p8 }
  0x18   :  { %875 = shalt.err (!%p872_p10)
}
  0x19   :  { %s876_s15 = scalar_lea.vmem %s35_s21, 32  ;;  %p881_p12 = scmp.lt.s32.totalorder %s35_s21, %s35_s21 }
  0x1a   :  { %p877_p11 = scmp.ne.s32.totalorder %s35_s21, %s876_s15  ;;  %p882_p13 = scmp.lt.s32.totalorder %s876_s15, %s876_s15 }
  0x1c   :  { %p883_p0 = por %p882_p13, %p881_p12 }
  0x1e   :  { %p884_p1 = pnand %p883_p0, %p877_p11 }
  0x20   :  { %887 = shalt.err (!%p884_p1)
}
  0x21   :  { %37 = dma.hbm_to_vmem [thread:$0]  %s1159_s4, 32, %s35_s21, [#allocation5]  }
  0x22   :  { %888 = dma.done.wait [#allocation3], 16  }
  0x23   :  { %889 = vsyncadd [#allocation3], 4294967280 }
  0x24   :  { %890 = dma.done.wait [#allocation5], 32  }
  0x25   :  { %891 = vsyncadd [#allocation5], 4294967264  ;;  %v804_v0 = vld [vmem:[%s1156_s1] sm:$0xff]   ;;  %v805_v1 = vld [vmem:[%s1156_s1 + $0x8] sm:$0xff]   ;;  %v894_v32 = vmov 0  }
  0x26   :  { %753 = vmatprep.subr.bf16.mxu0 %v804_v0  ;;  %v806_v2 = vld [vmem:[%s1156_s1 + $0x10] sm:$0xff]   ;;  %v807_v3 = vld [vmem:[%s1156_s1 + $0x18] sm:$0xff]   ;;  %v812_v4 = vld [vmem:[%s1155_s0] sm:$0xff]   ;;  %493 = vmatprep.mubr.bf16.mxu1 %v894_v32 }
  0x27   :  { %754 = vmatpush3.bf16.msra.mxu0 %v804_v0  ;;  %769 = vmatprep.mubr.bf16.mxu0 %v812_v4  ;;  %v808_v5 = vld [vmem:[%s1156_s1 + $0x20] sm:$0xff]   ;;  %v809_v6 = vld [vmem:[%s1156_s1 + $0x28] sm:$0xff]   ;;  %v825_v9 = vld [vmem:[%s1158_s3 + $0x14] ss:$8 sps:$4 sm:$0xff]  }
  0x28   :  { %755 = vmatprep.subr.bf16.mxu0 %v805_v1  ;;  %v822_v7 = vld [vmem:[%s1158_s3 + $0x4] ss:$8 sps:$4 sm:$0xff]   ;;  %v820_v8 = vld [vmem:[%s1158_s3] ss:$8 sps:$4 sm:$0xff]   ;;  %v810_v10 = vld [vmem:[%s1156_s1 + $0x30] sm:$0xff]  }
  0x29   :  { %785 = vmatprep.subr.bf16.mxu1 %v822_v7  ;;  %v823_v11 = vld [vmem:[%s1158_s3 + $0x10] ss:$8 sps:$4 sm:$0xff]   ;;  %v828_v13 = vld [vmem:[%s1158_s3 + $0x24] ss:$8 sps:$4 sm:$0xff]   ;;  %v826_v14 = vld [vmem:[%s1158_s3 + $0x20] ss:$8 sps:$4 sm:$0xff]  }
  0x2a   :  { %793 = vmatpush1.bf16.msra.mxu1 %v820_v8  ;;  %v811_v12 = vld [vmem:[%s1156_s1 + $0x38] sm:$0xff]   ;;  %v813_v16 = vld [vmem:[%s1155_s0 + $0x8] sm:$0xff]   ;;  %v814_v18 = vld [vmem:[%s1155_s0 + $0x10] sm:$0xff]  }
  0x2b   :  { %756 = vmatpush3.bf16.msra.mxu0 %v805_v1  ;;  %786 = vmatprep.subr.bf16.mxu1 %v825_v9  ;;  %v831_v15 = vld [vmem:[%s1158_s3 + $0x34] ss:$8 sps:$4 sm:$0xff]   ;;  %v829_v17 = vld [vmem:[%s1158_s3 + $0x30] ss:$8 sps:$4 sm:$0xff]   ;;  %v834_v19 = vld [vmem:[%s1158_s3 + $0x44] ss:$8 sps:$4 sm:$0xff]  }
  0x2c   :  { %757 = vmatprep.subr.bf16.mxu0 %v806_v2  ;;  %v832_v20 = vld [vmem:[%s1158_s3 + $0x40] ss:$8 sps:$4 sm:$0xff]   ;;  %v837_v21 = vld [vmem:[%s1158_s3 + $0x54] ss:$8 sps:$4 sm:$0xff]   ;;  %v835_v23 = vld [vmem:[%s1158_s3 + $0x50] ss:$8 sps:$4 sm:$0xff]  }
  0x2d   :  { %v815_v22 = vld [vmem:[%s1155_s0 + $0x18] sm:$0xff]   ;;  %v816_v24 = vld [vmem:[%s1155_s0 + $0x20] sm:$0xff]   ;;  %v817_v25 = vld [vmem:[%s1155_s0 + $0x28] sm:$0xff]  }
  0x2e   :  { %794 = vmatpush1.bf16.msra.mxu1 %v823_v11  ;;  %v818_v26 = vld [vmem:[%s1155_s0 + $0x30] sm:$0xff]   ;;  %v819_v27 = vld [vmem:[%s1155_s0 + $0x38] sm:$0xff]   ;;  %v840_v28 = vld [vmem:[%s1158_s3 + $0x64] ss:$8 sps:$4 sm:$0xff]  }
  0x2f   :  { %758 = vmatpush3.bf16.msra.mxu0 %v806_v2  ;;  %787 = vmatprep.subr.bf16.mxu1 %v828_v13  ;;  %v838_v29 = vld [vmem:[%s1158_s3 + $0x60] ss:$8 sps:$4 sm:$0xff]   ;;  %v843_v30 = vld [vmem:[%s1158_s3 + $0x74] ss:$8 sps:$4 sm:$0xff]   ;;  %v841_v31 = vld [vmem:[%s1158_s3 + $0x70] ss:$8 sps:$4 sm:$0xff]  }
  0x30   :  { %759 = vmatprep.subr.bf16.mxu0 %v807_v3  ;;  %v1047_v33 = vld [vmem:[#allocation2] ss:$0 sm:$0xff] }
  0x32   :  { %795 = vmatpush1.bf16.msra.mxu1 %v826_v14 }
  0x33   :  { %760 = vmatpush3.bf16.msra.mxu0 %v807_v3  ;;  %788 = vmatprep.subr.bf16.mxu1 %v831_v15 }
  0x34   :  { %761 = vmatprep.subr.bf16.mxu0 %v808_v5 }
  0x36   :  { %796 = vmatpush1.bf16.msra.mxu1 %v829_v17 }
  0x37   :  { %762 = vmatpush3.bf16.msra.mxu0 %v808_v5  ;;  %789 = vmatprep.subr.bf16.mxu1 %v834_v19 }
  0x38   :  { %763 = vmatprep.subr.bf16.mxu0 %v809_v6 }
  0x3a   :  { %797 = vmatpush1.bf16.msra.mxu1 %v832_v20 }
  0x3b   :  { %764 = vmatpush3.bf16.msra.mxu0 %v809_v6  ;;  %790 = vmatprep.subr.bf16.mxu1 %v837_v21 }
  0x3c   :  { %765 = vmatprep.subr.bf16.mxu0 %v810_v10 }
  0x3e   :  { %798 = vmatpush1.bf16.msra.mxu1 %v835_v23 }
  0x3f   :  { %766 = vmatpush3.bf16.msra.mxu0 %v810_v10  ;;  %791 = vmatprep.subr.bf16.mxu1 %v840_v28 }
  0x40   :  { %767 = vmatprep.subr.bf16.mxu0 %v811_v12 }
  0x42   :  { %799 = vmatpush1.bf16.msra.mxu1 %v838_v29 }
  0x43   :  { %768 = vmatpush3.bf16.msra.mxu0 %v811_v12  ;;  %792 = vmatprep.subr.bf16.mxu1 %v843_v30 }
  0x44   :  { %441 = vmatprep.subr.bf16.mxu0 %v822_v7 }
  0x46   :  { %770 = vmatmul.mubr.bf16.vlgmr.msra.gmra.mrb[0].mxu0 %v813_v16  ;;  %800 = vmatpush1.bf16.msra.mxu1 %v841_v31 }
  0x47   :  { %773 = vmatprep.mubr.bf16.mxu0 %v814_v18  ;;  %442 = vmatpush1.bf16.msra.mxu0 %v820_v8 }
  0x48   :  { %443 = vmatprep.subr.bf16.mxu0 %v825_v9 }
  0x4b   :  { %444 = vmatpush1.bf16.msra.mxu0 %v823_v11 }
  0x4c   :  { %445 = vmatprep.subr.bf16.mxu0 %v828_v13 }
  0x4e   :  { %774 = vmatmul.mubr.bf16.gmra.mrb[4].mxu0 %v815_v22 }
  0x4f   :  { %777 = vmatprep.mubr.bf16.mxu0 %v816_v24  ;;  %446 = vmatpush1.bf16.msra.mxu0 %v826_v14 }
  0x50   :  { %447 = vmatprep.subr.bf16.mxu0 %v831_v15 }
  0x53   :  { %448 = vmatpush1.bf16.msra.mxu0 %v829_v17 }
  0x54   :  { %449 = vmatprep.subr.bf16.mxu0 %v834_v19 }
  0x56   :  { %778 = vmatmul.mubr.bf16.gmra.mrb[8].mxu0 %v817_v25 }
  0x57   :  { %781 = vmatprep.mubr.bf16.mxu0 %v818_v26  ;;  %450 = vmatpush1.bf16.msra.mxu0 %v832_v20 }
  0x58   :  { %451 = vmatprep.subr.bf16.mxu0 %v837_v21 }
  0x5b   :  { %452 = vmatpush1.bf16.msra.mxu0 %v835_v23 }
  0x5c   :  { %453 = vmatprep.subr.bf16.mxu0 %v840_v28 }
  0x5e   :  { %782 = vmatmul.mubr.bf16.gmra.mrb[12].mxu0 %v819_v27 }
  0x5f   :  { %454 = vmatpush1.bf16.msra.mxu0 %v838_v29  ;;  %473 = vmatprep.mubr.bf16.mxu0 %v894_v32 }
  0x60   :  { %455 = vmatprep.subr.bf16.mxu0 %v843_v30 }
  0x63   :  { %456 = vmatpush1.bf16.msra.mxu0 %v841_v31 }
 0x119   :  { %v771_v34 = vpop.f32.mrb[0].mxu0 }
 0x11a   :  { %v223_v35 = vadd.f32 %v771_v34, %v1047_v33  ;;  %v214_v36 = vpop.f32.mrb[1].mxu0 }
 0x11b   :  { %v215_v37 = vadd.f32 %v1047_v33, %v214_v36  ;;  %v772_v38 = vpop.f32.mrb[2].mxu0 }
 0x11c   :  { %v295_v39 = vmul.f32 0.01, %v223_v35  ;;  %v226_v40 = vadd.f32 %v772_v38, %v1047_v33  ;;  %v217_v41 = vpop.f32.mrb[3].mxu0  ;;  %vm279_vm0 = vcmp.ge.f32.partialorder %v223_v35, 0.0 }
 0x11d   :  { %v293_v42 = vmul.f32 0.01, %v215_v37  ;;  %v218_v43 = vadd.f32 %v1047_v33, %v217_v41  ;;  %vm277_vm1 = vcmp.ge.f32.partialorder %v215_v37, 0.0 }
 0x11e   :  { %vm280_vm2 = vcmp.ge.f32.partialorder %v226_v40, 0.0  ;;  %v296_v44 = vmul.f32 0.01, %v226_v40  ;;  %v311_v46 = vsel %vm279_vm0, %v223_v35, %v295_v39 }
 0x11f   :  { %vm278_vm3 = vcmp.ge.f32.partialorder %v218_v43, 0.0  ;;  %v294_v45 = vmul.f32 0.01, %v218_v43  ;;  %v309_v48 = vsel %vm277_vm1, %v215_v37, %v293_v42 }
 0x120   :  { %v312_v47 = vsel %vm280_vm2, %v226_v40, %v296_v44 }
 0x121   :  { %v310_v49 = vsel %vm278_vm3, %v218_v43, %v294_v45  ;;  %v775_v50 = vpop.f32.mrb[4].mxu0  ;;  %v326_v51 = vpack.c.bf16 %v312_v47, %v311_v46  ;;  %v349_v46 = vld [vmem:[#allocation4] sm:$0x3] }
 0x122   :  { %v325_v52 = vpack.c.bf16 %v310_v49, %v309_v48  ;;  %v239_v53 = vadd.f32 %v775_v50, %v1047_v33  ;;  %v230_v54 = vpop.f32.mrb[5].mxu0 }
 0x123   :  { %v231_v55 = vadd.f32 %v1047_v33, %v230_v54  ;;  %v776_v56 = vpop.f32.mrb[6].mxu0 }
 0x124   :  { %v299_v57 = vmul.f32 0.01, %v239_v53  ;;  %v242_v58 = vadd.f32 %v776_v56, %v1047_v33  ;;  %v233_v59 = vpop.f32.mrb[7].mxu0  ;;  %474 = vmatmul.mubr.bf16.vlgmr.msra.gmra.mrb[16].mxu0 %v325_v52  ;;  %vm283_vm4 = vcmp.ge.f32.partialorder %v239_v53, 0.0 }
 0x125   :  { %v297_v60 = vmul.f32 0.01, %v231_v55  ;;  %v234_v61 = vadd.f32 %v1047_v33, %v233_v59  ;;  %483 = vmatprep.mubr.bf16.mxu0 %v894_v32  ;;  %vm281_vm5 = vcmp.ge.f32.partialorder %v231_v55, 0.0 }
 0x126   :  { %vm284_vm6 = vcmp.ge.f32.partialorder %v242_v58, 0.0  ;;  %v300_v62 = vmul.f32 0.01, %v242_v58  ;;  %v315_v0 = vsel %vm283_vm4, %v239_v53, %v299_v57 }
 0x127   :  { %vm282_vm7 = vcmp.ge.f32.partialorder %v234_v61, 0.0  ;;  %v298_v63 = vmul.f32 0.01, %v234_v61  ;;  %v313_v3 = vsel %vm281_vm5, %v231_v55, %v297_v60 }
 0x128   :  { %v316_v1 = vsel %vm284_vm6, %v242_v58, %v300_v62 }
 0x129   :  { %v779_v2 = vpop.f32.mrb[8].mxu0  ;;  %v314_v4 = vsel %vm282_vm7, %v234_v61, %v298_v63  ;;  %v328_v5 = vpack.c.bf16 %v316_v1, %v315_v0 }
 0x12a   :  { %v255_v6 = vadd.f32 %v779_v2, %v1047_v33  ;;  %v327_v7 = vpack.c.bf16 %v314_v4, %v313_v3  ;;  %v246_v8 = vpop.f32.mrb[9].mxu0 }
 0x12b   :  { %v247_v9 = vadd.f32 %v1047_v33, %v246_v8  ;;  %v780_v10 = vpop.f32.mrb[10].mxu0 }
 0x12c   :  { %vm287_vm8 = vcmp.ge.f32.partialorder %v255_v6, 0.0  ;;  %v303_v11 = vmul.f32 0.01, %v255_v6  ;;  %484 = vmatmul.mubr.bf16.gmra.mrb[20].mxu0 %v326_v51  ;;  %494 = vmatmul.mubr.bf16.vlgmr.msra.gmra.mrb[0].mxu1 %v327_v7  ;;  %v258_v12 = vadd.f32 %v780_v10, %v1047_v33  ;;  %v249_v13 = vpop.f32.mrb[11].mxu0 }
 0x12d   :  { %vm285_vm9 = vcmp.ge.f32.partialorder %v247_v9, 0.0  ;;  %v301_v14 = vmul.f32 0.01, %v247_v9  ;;  %v250_v15 = vadd.f32 %v1047_v33, %v249_v13  ;;  %503 = vmatprep.mubr.bf16.mxu1 %v894_v32 }
 0x12e   :  { %vm288_vm10 = vcmp.ge.f32.partialorder %v258_v12, 0.0  ;;  %v304_v16 = vmul.f32 0.01, %v258_v12  ;;  %v319_v17 = vsel %vm287_vm8, %v255_v6, %v303_v11 }
 0x12f   :  { %vm286_vm11 = vcmp.ge.f32.partialorder %v250_v15, 0.0  ;;  %v302_v18 = vmul.f32 0.01, %v250_v15  ;;  %v317_v19 = vsel %vm285_vm9, %v247_v9, %v301_v14 }
 0x130   :  { %v320_v20 = vsel %vm288_vm10, %v258_v12, %v304_v16 }
 0x131   :  { %v783_v21 = vpop.f32.mrb[12].mxu0  ;;  %v318_v22 = vsel %vm286_vm11, %v250_v15, %v302_v18  ;;  %v330_v23 = vpack.c.bf16 %v320_v20, %v319_v17 }
 0x132   :  { %v271_v24 = vadd.f32 %v783_v21, %v1047_v33  ;;  %v329_v25 = vpack.c.bf16 %v318_v22, %v317_v19  ;;  %v262_v26 = vpop.f32.mrb[13].mxu0 }
 0x133   :  { %v263_v27 = vadd.f32 %v1047_v33, %v262_v26  ;;  %v784_v28 = vpop.f32.mrb[14].mxu0 }
 0x134   :  { %504 = vmatmul.mubr.bf16.gmra.mrb[4].mxu1 %v328_v5  ;;  %vm291_vm12 = vcmp.ge.f32.partialorder %v271_v24, 0.0  ;;  %v307_v29 = vmul.f32 0.01, %v271_v24  ;;  %v274_v30 = vadd.f32 %v784_v28, %v1047_v33  ;;  %v265_v31 = vpop.f32.mrb[15].mxu0 }
 0x135   :  { %513 = vmatprep.mubr.bf16.mxu1 %v894_v32  ;;  %vm289_vm13 = vcmp.ge.f32.partialorder %v263_v27, 0.0  ;;  %v305_v34 = vmul.f32 0.01, %v263_v27  ;;  %v266_v35 = vadd.f32 %v1047_v33, %v265_v31  ;;  %v351_v33 = vlaneseq }
 0x136   :  { %vm292_vm14 = vcmp.ge.f32.partialorder %v274_v30, 0.0  ;;  %v308_v36 = vmul.f32 0.01, %v274_v30  ;;  %v323_v37 = vsel %vm291_vm12, %v271_v24, %v307_v29 }
 0x137   :  { %vm290_vm15 = vcmp.ge.f32.partialorder %v266_v35, 0.0  ;;  %v306_v38 = vmul.f32 0.01, %v266_v35  ;;  %v321_v39 = vsel %vm289_vm13, %v263_v27, %v305_v34  ;;  %v352_v44 = vshrl.u32 %v351_v33, 7 }
 0x138   :  { %v324_v40 = vsel %vm292_vm14, %v274_v30, %v308_v36 }
 0x139   :  { %v322_v41 = vsel %vm290_vm15, %v266_v35, %v306_v38  ;;  %v332_v42 = vpack.c.bf16 %v324_v40, %v323_v37  ;;  %v353_v45 = vsub.s32 0, %v352_v44  ;;  %v357_v47 = vsub.s32 1, %v352_v44 }
 0x13a   :  { %v331_v43 = vpack.c.bf16 %v322_v41, %v321_v39 }
 0x13b   :  { %v1071_v48 = vrot.slane %v349_v46, %v353_v45  ;;  %v1073_v49 = vrot.slane %v349_v46, %v357_v47 }
 0x13c   :  { %514 = vmatmul.mubr.bf16.gmra.mrb[8].mxu1 %v329_v25 }
 0x13d   :  { %523 = vmatprep.mubr.bf16.mxu1 %v894_v32 }
 0x144   :  { %524 = vmatmul.mubr.bf16.gmra.mrb[12].mxu1 %v330_v23 }
 0x145   :  { %533 = vmatprep.mubr.bf16.mxu1 %v894_v32 }
 0x14c   :  { %534 = vmatmul.mubr.bf16.gmra.mrb[16].mxu1 %v331_v43 }
 0x14d   :  { %543 = vmatprep.mubr.bf16.mxu1 %v894_v32 }
 0x154   :  { %544 = vmatmul.mubr.bf16.gmra.mrb[20].mxu1 %v332_v42 }
 0x1f7   :  { %v475_v50 = vpop.f32.mrb[16].mxu0 }
 0x1f8   :  { %v476_v51 = vadd.f32 %v475_v50, %v1071_v48  ;;  %v477_v52 = vpop.f32.mrb[17].mxu0 }
 0x1f9   :  { %v478_v53 = vadd.f32 %v477_v52, %v1073_v49  ;;  %v479_v54 = vpop.f32.mrb[18].mxu0 }
 0x1fa   :  { %v480_v55 = vadd.f32 %v479_v54, %v1071_v48  ;;  %v481_v32 = vpop.f32.mrb[19].mxu0 }
 0x1fb   :  { %v721_v56 = vpack.c.bf16 %v478_v53, %v476_v51  ;;  %v482_v57 = vadd.f32 %v481_v32, %v1073_v49 }
 0x1fd   :  { %650 = vst [vmem:[%s1160_s5] sm:$0xff] %v721_v56  ;;  %v722_v58 = vpack.c.bf16 %v482_v57, %v480_v55 }
 0x1ff   :  { %651 = vst [vmem:[%s1160_s5 + $0x8] sm:$0xff] %v722_v58  ;;  %v485_v59 = vpop.f32.mrb[20].mxu0  ;;  %v495_v60 = vpop.f32.mrb[0].mxu1 }
 0x200   :  { %v486_v61 = vadd.f32 %v485_v59, %v1071_v48  ;;  %v496_v62 = vadd.f32 %v495_v60, %v1071_v48  ;;  %v487_v63 = vpop.f32.mrb[21].mxu0  ;;  %v497_v0 = vpop.f32.mrb[1].mxu1 }
 0x201   :  { %v488_v1 = vadd.f32 %v487_v63, %v1073_v49  ;;  %v498_v2 = vadd.f32 %v497_v0, %v1073_v49  ;;  %v489_v3 = vpop.f32.mrb[22].mxu0  ;;  %v499_v4 = vpop.f32.mrb[2].mxu1 }
 0x202   :  { %v490_v5 = vadd.f32 %v489_v3, %v1071_v48  ;;  %v500_v6 = vadd.f32 %v499_v4, %v1071_v48  ;;  %v491_v7 = vpop.f32.mrb[23].mxu0  ;;  %v501_v8 = vpop.f32.mrb[3].mxu1 }
 0x203   :  { %v723_v9 = vpack.c.bf16 %v488_v1, %v486_v61  ;;  %v725_v10 = vpack.c.bf16 %v498_v2, %v496_v62  ;;  %v492_v11 = vadd.f32 %v491_v7, %v1073_v49  ;;  %v502_v12 = vadd.f32 %v501_v8, %v1073_v49 }
 0x205   :  { %652 = vst [vmem:[%s1160_s5 + $0x10] sm:$0xff] %v723_v9  ;;  %654 = vst [vmem:[%s1160_s5 + $0x20] sm:$0xff] %v725_v10  ;;  %v724_v13 = vpack.c.bf16 %v492_v11, %v490_v5  ;;  %v726_v14 = vpack.c.bf16 %v502_v12, %v500_v6 }
 0x207   :  { %653 = vst [vmem:[%s1160_s5 + $0x18] sm:$0xff] %v724_v13  ;;  %655 = vst [vmem:[%s1160_s5 + $0x28] sm:$0xff] %v726_v14  ;;  %v505_v15 = vpop.f32.mrb[4].mxu1 }
 0x208   :  { %v506_v16 = vadd.f32 %v505_v15, %v1071_v48  ;;  %v507_v17 = vpop.f32.mrb[5].mxu1 }
 0x209   :  { %v508_v18 = vadd.f32 %v507_v17, %v1073_v49  ;;  %v509_v19 = vpop.f32.mrb[6].mxu1 }
 0x20a   :  { %v510_v20 = vadd.f32 %v509_v19, %v1071_v48  ;;  %v511_v21 = vpop.f32.mrb[7].mxu1 }
 0x20b   :  { %v727_v22 = vpack.c.bf16 %v508_v18, %v506_v16  ;;  %v512_v23 = vadd.f32 %v511_v21, %v1073_v49 }
 0x20d   :  { %656 = vst [vmem:[%s1160_s5 + $0x30] sm:$0xff] %v727_v22  ;;  %v728_v24 = vpack.c.bf16 %v512_v23, %v510_v20 }
 0x20f   :  { %657 = vst [vmem:[%s1160_s5 + $0x38] sm:$0xff] %v728_v24  ;;  %v515_v25 = vpop.f32.mrb[8].mxu1 }
 0x210   :  { %v516_v26 = vadd.f32 %v515_v25, %v1071_v48  ;;  %v517_v27 = vpop.f32.mrb[9].mxu1 }
 0x211   :  { %v518_v28 = vadd.f32 %v517_v27, %v1073_v49  ;;  %v519_v29 = vpop.f32.mrb[10].mxu1 }
 0x212   :  { %v520_v30 = vadd.f32 %v519_v29, %v1071_v48  ;;  %v521_v31 = vpop.f32.mrb[11].mxu1 }
 0x213   :  { %v729_v34 = vpack.c.bf16 %v518_v28, %v516_v26  ;;  %v522_v35 = vadd.f32 %v521_v31, %v1073_v49 }
 0x215   :  { %658 = vst [vmem:[%s1160_s5 + $0x40] sm:$0xff] %v729_v34  ;;  %v730_v36 = vpack.c.bf16 %v522_v35, %v520_v30 }
 0x217   :  { %659 = vst [vmem:[%s1160_s5 + $0x48] sm:$0xff] %v730_v36  ;;  %v525_v37 = vpop.f32.mrb[12].mxu1 }
 0x218   :  { %v526_v38 = vadd.f32 %v525_v37, %v1071_v48  ;;  %v527_v39 = vpop.f32.mrb[13].mxu1 }
 0x219   :  { %v528_v40 = vadd.f32 %v527_v39, %v1073_v49  ;;  %v529_v41 = vpop.f32.mrb[14].mxu1 }
 0x21a   :  { %v530_v42 = vadd.f32 %v529_v41, %v1071_v48  ;;  %v531_v43 = vpop.f32.mrb[15].mxu1 }
 0x21b   :  { %v731_v33 = vpack.c.bf16 %v528_v40, %v526_v38  ;;  %v532_v44 = vadd.f32 %v531_v43, %v1073_v49 }
 0x21d   :  { %660 = vst [vmem:[%s1160_s5 + $0x50] sm:$0xff] %v731_v33  ;;  %v732_v45 = vpack.c.bf16 %v532_v44, %v530_v42 }
 0x21f   :  { %661 = vst [vmem:[%s1160_s5 + $0x58] sm:$0xff] %v732_v45  ;;  %v535_v46 = vpop.f32.mrb[16].mxu1 }
 0x220   :  { %v536_v47 = vadd.f32 %v535_v46, %v1071_v48  ;;  %v537_v50 = vpop.f32.mrb[17].mxu1 }
 0x221   :  { %v538_v51 = vadd.f32 %v537_v50, %v1073_v49  ;;  %v539_v52 = vpop.f32.mrb[18].mxu1 }
 0x222   :  { %v540_v53 = vadd.f32 %v539_v52, %v1071_v48  ;;  %v541_v54 = vpop.f32.mrb[19].mxu1 }
 0x223   :  { %v733_v55 = vpack.c.bf16 %v538_v51, %v536_v47  ;;  %v542_v32 = vadd.f32 %v541_v54, %v1073_v49 }
 0x225   :  { %662 = vst [vmem:[%s1160_s5 + $0x60] sm:$0xff] %v733_v55  ;;  %v734_v56 = vpack.c.bf16 %v542_v32, %v540_v53 }
 0x227   :  { %663 = vst [vmem:[%s1160_s5 + $0x68] sm:$0xff] %v734_v56  ;;  %v545_v57 = vpop.f32.mrb[20].mxu1 }
 0x228   :  { %v546_v58 = vadd.f32 %v545_v57, %v1071_v48  ;;  %v547_v59 = vpop.f32.mrb[21].mxu1 }
 0x229   :  { %v548_v60 = vadd.f32 %v547_v59, %v1073_v49  ;;  %v549_v61 = vpop.f32.mrb[22].mxu1 }
 0x22a   :  { %v550_v62 = vadd.f32 %v549_v61, %v1071_v48  ;;  %v551_v63 = vpop.f32.mrb[23].mxu1 }
 0x22b   :  { %v735_v0 = vpack.c.bf16 %v548_v60, %v546_v58  ;;  %v552_v1 = vadd.f32 %v551_v63, %v1073_v49 }
 0x22d   :  { %664 = vst [vmem:[%s1160_s5 + $0x70] sm:$0xff] %v735_v0  ;;  %v736_v2 = vpack.c.bf16 %v552_v1, %v550_v62 }
 0x22f   :  { %665 = vst [vmem:[%s1160_s5 + $0x78] sm:$0xff] %v736_v2 }
 0x230   :  { %670 = vsyncpa [#allocation3], 1 }
 0x231   :  { %671 = vsyncpa [#allocation5], 1 }

// kernel: cgcnn_forward.10
= control target key start
LH: loop header
LB: loop body
LE: loop exit
PB: predicated region body
PF: predicated region fallthrough
CT: control target
= control target key end

     0   :  { %v2114_v1 = vmov 0   ;;  %v86_v16 = vlaneseq  ;;  %v2115_v59 = vmov 1.0|1.0   ;;  %s2861_s0 = inlined_call_operand.vmem [shape: bf16[128,256], index: 0, kind: input, shape index: {}]   ;;  %s2862_s3 = inlined_call_operand.vmem [shape: bf16[256,256], index: 3, kind: input, shape index: {}]   ;;  %s2863_s1 = inlined_call_operand.vmem [shape: s32[1,128], index: 1, kind: input, shape index: {}]   ;;  %s2864_s2 = inlined_call_operand.vmem [shape: bf16[256,256], index: 2, kind: input, shape index: {}]   ;;  %s2865_s4 = inlined_call_operand.vmem [shape: bf16[256,256], index: 4, kind: output, shape index: {}]  }
   0x1   :  { %v1994_v0 = vld [vmem:[%s2861_s0 + $0x4] ss:$8 sps:$4 sm:$0xff]   ;;  %462 = vmatprep.mubr.bf16.mxu0 %v2114_v1  ;;  %v1998_v3 = vld [vmem:[%s2861_s0] ss:$8 sps:$4 sm:$0xff]   ;;  %v2000_v5 = vld [vmem:[%s2861_s0 + $0x14] ss:$8 sps:$4 sm:$0xff]  }
   0x2   :  { %v2148_v2 = vld [vmem:[%s2862_s3 + $0x4] ss:$8 sps:$4 sm:$0xff]   ;;  %430 = vmatprep.subr.bf16.mxu0 %v1994_v0  ;;  %v2156_v4 = vld [vmem:[%s2862_s3] ss:$8 sps:$4 sm:$0xff]   ;;  %v2166_v6 = vld [vmem:[%s2862_s3 + $0x14] ss:$8 sps:$4 sm:$0xff]  }
   0x3   :  { %1896 = vmatprep.subr.bf16.mxu1 %v2148_v2  ;;  %431 = vmatpush1.bf16.msra.mxu0 %v1998_v3  ;;  %v2004_v7 = vld [vmem:[%s2861_s0 + $0x10] ss:$8 sps:$4 sm:$0xff]   ;;  %v2006_v9 = vld [vmem:[%s2861_s0 + $0x24] ss:$8 sps:$4 sm:$0xff]   ;;  %v2010_v11 = vld [vmem:[%s2861_s0 + $0x20] ss:$8 sps:$4 sm:$0xff]  }
   0x4   :  { %1912 = vmatpush1.bf16.msra.mxu1 %v2156_v4  ;;  %432 = vmatprep.subr.bf16.mxu0 %v2000_v5  ;;  %v2174_v8 = vld [vmem:[%s2862_s3 + $0x10] ss:$8 sps:$4 sm:$0xff]   ;;  %v2183_v10 = vld [vmem:[%s2862_s3 + $0x24] ss:$8 sps:$4 sm:$0xff]   ;;  %v2191_v12 = vld [vmem:[%s2862_s3 + $0x20] ss:$8 sps:$4 sm:$0xff]  }
   0x5   :  { %1897 = vmatprep.subr.bf16.mxu1 %v2166_v6  ;;  %v2012_v13 = vld [vmem:[%s2861_s0 + $0x34] ss:$8 sps:$4 sm:$0xff]   ;;  %v2016_v15 = vld [vmem:[%s2861_s0 + $0x30] ss:$8 sps:$4 sm:$0xff]   ;;  %v2018_v18 = vld [vmem:[%s2861_s0 + $0x44] ss:$8 sps:$4 sm:$0xff]  }
   0x6   :  { %v2201_v14 = vld [vmem:[%s2862_s3 + $0x34] ss:$8 sps:$4 sm:$0xff]   ;;  %v2210_v17 = vld [vmem:[%s2862_s3 + $0x30] ss:$8 sps:$4 sm:$0xff]   ;;  %v2219_v19 = vld [vmem:[%s2862_s3 + $0x44] ss:$8 sps:$4 sm:$0xff]  }
   0x7   :  { %433 = vmatpush1.bf16.msra.mxu0 %v2004_v7  ;;  %v2022_v20 = vld [vmem:[%s2861_s0 + $0x40] ss:$8 sps:$4 sm:$0xff]   ;;  %v2229_v22 = vshrl.u32 %v86_v16, 7  ;;  %v2024_v23 = vld [vmem:[%s2861_s0 + $0x54] ss:$8 sps:$4 sm:$0xff]  }
   0x8   :  { %1913 = vmatpush1.bf16.msra.mxu1 %v2174_v8  ;;  %434 = vmatprep.subr.bf16.mxu0 %v2006_v9  ;;  %v2227_v21 = vld [vmem:[%s2862_s3 + $0x40] ss:$8 sps:$4 sm:$0xff]   ;;  %v2239_v24 = vld [vmem:[%s2862_s3 + $0x54] ss:$8 sps:$4 sm:$0xff]   ;;  %v2028_v28 = vld [vmem:[%s2861_s0 + $0x50] ss:$8 sps:$4 sm:$0xff]  }
   0x9   :  { %1898 = vmatprep.subr.bf16.mxu1 %v2183_v10  ;;  %v2242_v25 = vadd.s32 8, %v2229_v22  ;;  %v2245_v26 = vadd.s32 128, %v2229_v22  ;;  %v2248_v27 = vadd.s32 136, %v2229_v22  ;;  %v2257_v29 = vld [vmem:[%s2862_s3 + $0x50] ss:$8 sps:$4 sm:$0xff]   ;;  %v2260_v30 = vadd.s32 144, %v2229_v22 }
   0xa   :  { %v2030_v31 = vld [vmem:[%s2861_s0 + $0x64] ss:$8 sps:$4 sm:$0xff]   ;;  %v2272_v33 = vadd.s32 152, %v2229_v22  ;;  %v2034_v34 = vld [vmem:[%s2861_s0 + $0x60] ss:$8 sps:$4 sm:$0xff]   ;;  %v2283_v36 = vadd.s32 160, %v2229_v22 }
   0xb   :  { %435 = vmatpush1.bf16.msra.mxu0 %v2010_v11  ;;  %v2269_v32 = vld [vmem:[%s2862_s3 + $0x64] ss:$8 sps:$4 sm:$0xff]   ;;  %v2280_v35 = vld [vmem:[%s2863_s1] ss:$0 sm:$0xff]  ;;  %v2291_v38 = vadd.s32 168, %v2229_v22  ;;  %v2294_v39 = vadd.s32 176, %v2229_v22 }
   0xc   :  { %1914 = vmatpush1.bf16.msra.mxu1 %v2191_v12  ;;  %436 = vmatprep.subr.bf16.mxu0 %v2012_v13  ;;  %v2288_v37 = vld [vmem:[%s2862_s3 + $0x60] ss:$8 sps:$4 sm:$0xff]   ;;  %v2036_v40 = vld [vmem:[%s2861_s0 + $0x74] ss:$8 sps:$4 sm:$0xff]   ;;  %v2301_v41 = vadd.s32 184, %v2229_v22  ;;  %v2304_v42 = vadd.s32 192, %v2229_v22  ;;  %vm158_vm0 = vcmp.eq.s32.totalorder %v2229_v22, %v2280_v35  ;;  %vm159_vm1 = vcmp.eq.s32.totalorder %v2242_v25, %v2280_v35 }
   0xd   :  { %1899 = vmatprep.subr.bf16.mxu1 %v2201_v14  ;;  %v2307_v43 = vadd.s32 200, %v2229_v22  ;;  %v2310_v44 = vadd.s32 208, %v2229_v22  ;;  %v2316_v45 = vld [vmem:[%s2862_s3 + $0x74] ss:$8 sps:$4 sm:$0xff]   ;;  %v2323_v46 = vadd.s32 216, %v2229_v22  ;;  %v2326_v47 = vadd.s32 224, %v2229_v22  ;;  %vm1736_vm15 = vmpackc.low %vm159_vm1, %vm158_vm0 }
   0xe   :  { %vm174_vm2 = vcmp.eq.s32.totalorder %v2245_v26, %v2280_v35  ;;  %vm175_vm3 = vcmp.eq.s32.totalorder %v2248_v27, %v2280_v35  ;;  %v2333_v48 = vadd.s32 232, %v2229_v22  ;;  %v2336_v49 = vadd.s32 240, %v2229_v22  ;;  %v2040_v50 = vld [vmem:[%s2861_s0 + $0x70] ss:$8 sps:$4 sm:$0xff]   ;;  %v2368_v53 = vld [vmem:[%s2862_s3 + $0x84] ss:$8 sps:$4 sm:$0xff]  }
   0xf   :  { %437 = vmatpush1.bf16.msra.mxu0 %v2016_v15  ;;  %vm176_vm4 = vcmp.eq.s32.totalorder %v2260_v30, %v2280_v35  ;;  %vm177_vm5 = vcmp.eq.s32.totalorder %v2272_v33, %v2280_v35  ;;  %vm178_vm6 = vcmp.eq.s32.totalorder %v2283_v36, %v2280_v35  ;;  %vm179_vm7 = vcmp.eq.s32.totalorder %v2291_v38, %v2280_v35  ;;  %v2353_v51 = vld [vmem:[%s2862_s3 + $0x70] ss:$8 sps:$4 sm:$0xff]   ;;  %v2387_v54 = vld [vmem:[%s2862_s3 + $0x80] ss:$8 sps:$4 sm:$0xff]   ;;  %v2403_v57 = vld [vmem:[%s2862_s3 + $0x94] ss:$8 sps:$4 sm:$0xff]  }
  0x10   :  { %1915 = vmatpush1.bf16.msra.mxu1 %v2210_v17  ;;  %438 = vmatprep.subr.bf16.mxu0 %v2018_v18  ;;  %vm180_vm8 = vcmp.eq.s32.totalorder %v2294_v39, %v2280_v35  ;;  %v2362_v52 = vadd.s32 248, %v2229_v22  ;;  %vm183_vm11 = vcmp.eq.s32.totalorder %v2307_v43, %v2280_v35  ;;  %vm184_vm12 = vcmp.eq.s32.totalorder %v2310_v44, %v2280_v35  ;;  %v2068_v58 = vld [vmem:[%s2864_s2 + $0x24] ss:$8 sps:$4 sm:$0xff]   ;;  %v2414_v60 = vld [vmem:[%s2862_s3 + $0x90] ss:$8 sps:$4 sm:$0xff]  }
  0x11   :  { %1900 = vmatprep.subr.bf16.mxu1 %v2219_v19  ;;  %vm185_vm13 = vcmp.eq.s32.totalorder %v2323_v46, %v2280_v35  ;;  %vm186_vm14 = vcmp.eq.s32.totalorder %v2326_v47, %v2280_v35  ;;  %vm188_vm10 = vcmp.eq.s32.totalorder %v2336_v49, %v2280_v35  ;;  %v89_v55 = vadd.s32 16, %v2229_v22  ;;  %v2423_v61 = vld [vmem:[%s2862_s3 + $0xa4] ss:$8 sps:$4 sm:$0xff]   ;;  %1190 = vmatprep.mubr.bf16.mxu1 %v2068_v58  ;;  %v2430_v62 = vld [vmem:[%s2862_s3 + $0xa0] ss:$8 sps:$4 sm:$0xff]  }
  0x12   :  { %vm189_vm9 = vcmp.eq.s32.totalorder %v2362_v52, %v2280_v35  ;;  %v90_v56 = vadd.s32 24, %v2229_v22  ;;  %v91_v63 = vadd.s32 32, %v2229_v22  ;;  %v92_v0 = vadd.s32 40, %v2229_v22  ;;  %v2467_v5 = vld [vmem:[%s2862_s3 + $0xb0] ss:$8 sps:$4 sm:$0xff]  }
  0x13   :  { %439 = vmatpush1.bf16.msra.mxu0 %v2022_v20  ;;  %vm160_vm0 = vcmp.eq.s32.totalorder %v89_v55, %v2280_v35  ;;  %v2486_v7 = vld [vmem:[%s2862_s3 + $0xc4] ss:$8 sps:$4 sm:$0xff]   ;;  %v2504_v9 = vld [vmem:[%s2862_s3 + $0xc0] ss:$8 sps:$4 sm:$0xff]   ;;  %v94_v11 = vadd.s32 56, %v2229_v22  ;;  %v97_v27 = vadd.s32 80, %v2229_v22 }
  0x14   :  { %1916 = vmatpush1.bf16.msra.mxu1 %v2227_v21  ;;  %440 = vmatprep.subr.bf16.mxu0 %v2024_v23  ;;  %vm161_vm1 = vcmp.eq.s32.totalorder %v90_v56, %v2280_v35  ;;  %v2522_v13 = vld [vmem:[%s2862_s3 + $0xd4] ss:$8 sps:$4 sm:$0xff]   ;;  %v2551_v16 = vld [vmem:[%s2862_s3 + $0xd0] ss:$8 sps:$4 sm:$0xff]   ;;  %v96_v23 = vadd.s32 72, %v2229_v22  ;;  %v101_v36 = vadd.s32 112, %v2229_v22 }
  0x15   :  { %1901 = vmatprep.subr.bf16.mxu1 %v2239_v24  ;;  %v2584_v20 = vld [vmem:[%s2862_s3 + $0xf4] ss:$8 sps:$4 sm:$0xff]   ;;  %v2066_v25 = vld [vmem:[%s2864_s2 + $0x20] ss:$8 sps:$4 sm:$0xff]   ;;  %v2072_v30 = vld [vmem:[%s2864_s2 + $0x44] ss:$8 sps:$4 sm:$0xff]  }
  0x16   :  { %v2069_v26 = vld [vmem:[%s2864_s2 + $0x34] ss:$8 sps:$4 sm:$0xff]   ;;  %v2074_v33 = vld [vmem:[%s2864_s2 + $0x40] ss:$8 sps:$4 sm:$0xff]   ;;  %v2078_v38 = vld [vmem:[%s2864_s2 + $0x64] ss:$8 sps:$4 sm:$0xff]  }
  0x17   :  { %441 = vmatpush1.bf16.msra.mxu0 %v2028_v28  ;;  %v98_v28 = vadd.s32 88, %v2229_v22  ;;  %v2081_v39 = vld [vmem:[%s2864_s2 + $0x74] ss:$8 sps:$4 sm:$0xff]   ;;  %v2089_v44 = vld [vmem:[%s2864_s2 + $0x90] ss:$8 sps:$4 sm:$0xff]  }
  0x18   :  { %1917 = vmatpush1.bf16.msra.mxu1 %v2257_v29  ;;  %442 = vmatprep.subr.bf16.mxu0 %v2030_v31  ;;  %v99_v31 = vadd.s32 96, %v2229_v22  ;;  %v2087_v43 = vld [vmem:[%s2864_s2 + $0x94] ss:$8 sps:$4 sm:$0xff]   ;;  %v2092_v46 = vld [vmem:[%s2864_s2 + $0xa0] ss:$8 sps:$4 sm:$0xff]  }
  0x19   :  { %1902 = vmatprep.subr.bf16.mxu1 %v2269_v32  ;;  %v2093_v47 = vld [vmem:[%s2864_s2 + $0xb4] ss:$8 sps:$4 sm:$0xff]   ;;  %v2096_v49 = vld [vmem:[%s2864_s2 + $0xc4] ss:$8 sps:$4 sm:$0xff]   ;;  %v2101_v52 = vld [vmem:[%s2864_s2 + $0xd0] ss:$8 sps:$4 sm:$0xff]  }
  0x1a   :  { %v2107_v55 = vld [vmem:[%s2864_s2 + $0xe0] ss:$8 sps:$4 sm:$0xff]   ;;  %v2108_v56 = vld [vmem:[%s2864_s2 + $0x14] ss:$8 sps:$4 sm:$0xff]   ;;  %v2112_v58 = vld [vmem:[%s2864_s2 + $0x10] ss:$8 sps:$4 sm:$0xff]  }
  0x1b   :  { %443 = vmatpush1.bf16.msra.mxu0 %v2034_v34  ;;  %v2075_v34 = vld [vmem:[%s2864_s2 + $0x54] ss:$8 sps:$4 sm:$0xff]  }
  0x1c   :  { %1918 = vmatpush1.bf16.msra.mxu1 %v2288_v37  ;;  %444 = vmatprep.subr.bf16.mxu0 %v2036_v40  ;;  %v2083_v40 = vld [vmem:[%s2864_s2 + $0x70] ss:$8 sps:$4 sm:$0xff]  }
  0x1d   :  { %1903 = vmatprep.subr.bf16.mxu1 %v2316_v45 }
  0x1f   :  { %445 = vmatpush1.bf16.msra.mxu0 %v2040_v50  ;;  %v2098_v50 = vld [vmem:[%s2864_s2 + $0xc0] ss:$8 sps:$4 sm:$0xff]  }
  0x20   :  { %1919 = vmatpush1.bf16.msra.mxu1 %v2353_v51  ;;  %1138 = vmatprep.subr.bf16.mxu0 %v2148_v2  ;;  %v2439_v2 = vld [vmem:[%s2862_s3 + $0xb4] ss:$8 sps:$4 sm:$0xff]  }
  0x21   :  { %1904 = vmatprep.subr.bf16.mxu1 %v2368_v53 }
  0x22   :  { %1737 = vmatmul.mubr.msk.bf16.vlgmr.msra.gmra.mrb[0].mxu0 %vm1736_vm15, %v2115_v59  ;;  %vm1738_vm15 = vmpackc.low %vm161_vm1, %vm160_vm0 }
  0x23   :  { %1139 = vmatpush1.bf16.msra.mxu0 %v2156_v4  ;;  %472 = vmatprep.mubr.bf16.mxu0 %v2114_v1  ;;  %vm2448_vm0 = vmpackc.low %vm175_vm3, %vm174_vm2  ;;  %vm162_vm2 = vcmp.eq.s32.totalorder %v91_v63, %v2280_v35  ;;  %vm163_vm3 = vcmp.eq.s32.totalorder %v92_v0, %v2280_v35 }
  0x24   :  { %1920 = vmatpush1.bf16.msra.mxu1 %v2387_v54  ;;  %1140 = vmatprep.subr.bf16.mxu0 %v2166_v6  ;;  %vm2459_vm1 = vmpackc.low %vm177_vm5, %vm176_vm4  ;;  %vm2872_vm5 = vcmp.eq.s32.totalorder %v2301_v41, %v2280_v35  ;;  %v2084_v41 = vld [vmem:[%s2864_s2 + $0x84] ss:$8 sps:$4 sm:$0xff]  }
  0x25   :  { %1905 = vmatprep.subr.bf16.mxu1 %v2403_v57  ;;  %vm2478_vm4 = vmpackc.low %vm179_vm7, %vm178_vm6 }
  0x26   :  { %vm2496_vm6 = vmpackc.low %vm2872_vm5, %vm180_vm8 }
  0x27   :  { %1141 = vmatpush1.bf16.msra.mxu0 %v2174_v8  ;;  %vm1740_vm7 = vmpackc.low %vm163_vm3, %vm162_vm2 }
  0x28   :  { %1921 = vmatpush1.bf16.msra.mxu1 %v2414_v60  ;;  %1142 = vmatprep.subr.bf16.mxu0 %v2183_v10  ;;  %v93_v10 = vadd.s32 48, %v2229_v22  ;;  %vm2531_vm2 = vmpackc.low %vm185_vm13, %vm184_vm12  ;;  %vm165_vm13 = vcmp.eq.s32.totalorder %v94_v11, %v2280_v35 }
  0x29   :  { %1906 = vmatprep.subr.bf16.mxu1 %v2423_v61 }
  0x2a   :  { %1739 = vmatmul.mubr.msk.bf16.gmra.mrb[4].mxu0 %vm1738_vm15, %v2115_v59  ;;  %vm2875_vm15 = vcmp.eq.s32.totalorder %v2304_v42, %v2280_v35  ;;  %vm164_vm12 = vcmp.eq.s32.totalorder %v93_v10, %v2280_v35  ;;  %v2086_v42 = vld [vmem:[%s2864_s2 + $0x80] ss:$8 sps:$4 sm:$0xff]  }
  0x2b   :  { %482 = vmatprep.mubr.bf16.mxu0 %v2114_v1  ;;  %1143 = vmatpush1.bf16.msra.mxu0 %v2191_v12  ;;  %vm2514_vm8 = vmpackc.low %vm183_vm11, %vm2875_vm15  ;;  %vm2880_vm11 = vcmp.eq.s32.totalorder %v2333_v48, %v2280_v35  ;;  %vm168_vm15 = vcmp.eq.s32.totalorder %v97_v27, %v2280_v35  ;;  %v2095_v48 = vld [vmem:[%s2864_s2 + $0xb0] ss:$8 sps:$4 sm:$0xff]  }
  0x2c   :  { %1922 = vmatpush1.bf16.msra.mxu1 %v2430_v62  ;;  %1144 = vmatprep.subr.bf16.mxu0 %v2201_v14  ;;  %vm2543_vm3 = vmpackc.low %vm2880_vm11, %vm186_vm14  ;;  %vm169_vm11 = vcmp.eq.s32.totalorder %v98_v28, %v2280_v35 }
  0x2d   :  { %1907 = vmatprep.subr.bf16.mxu1 %v2439_v2  ;;  %vm2569_vm14 = vmpackc.low %vm189_vm9, %vm188_vm10  ;;  %vm167_vm10 = vcmp.eq.s32.totalorder %v96_v23, %v2280_v35 }
  0x2e   :  { %vm1742_vm5 = vmpackc.low %vm165_vm13, %vm164_vm12  ;;  %vm170_vm13 = vcmp.eq.s32.totalorder %v99_v31, %v2280_v35 }
  0x2f   :  { %1145 = vmatpush1.bf16.msra.mxu0 %v2210_v17  ;;  %v2560_v17 = vld [vmem:[%s2862_s3 + $0xe4] ss:$8 sps:$4 sm:$0xff]   ;;  %vm1746_vm12 = vmpackc.low %vm169_vm11, %vm168_vm15 }
  0x30   :  { %1923 = vmatpush1.bf16.msra.mxu1 %v2467_v5  ;;  %1146 = vmatprep.subr.bf16.mxu0 %v2219_v19  ;;  %v2578_v19 = vld [vmem:[%s2862_s3 + $0xe0] ss:$8 sps:$4 sm:$0xff]  }
  0x31   :  { %1908 = vmatprep.subr.bf16.mxu1 %v2486_v7 }
  0x32   :  { %1741 = vmatmul.mubr.msk.bf16.gmra.mrb[8].mxu0 %vm1740_vm7, %v2115_v59 }
  0x33   :  { %492 = vmatprep.mubr.bf16.mxu0 %v2114_v1  ;;  %1147 = vmatpush1.bf16.msra.mxu0 %v2227_v21  ;;  %v95_v21 = vadd.s32 64, %v2229_v22 }
  0x34   :  { %1924 = vmatpush1.bf16.msra.mxu1 %v2504_v9  ;;  %1148 = vmatprep.subr.bf16.mxu0 %v2239_v24  ;;  %v2595_v24 = vld [vmem:[%s2862_s3 + $0xf0] ss:$8 sps:$4 sm:$0xff]  }
  0x35   :  { %1909 = vmatprep.subr.bf16.mxu1 %v2522_v13  ;;  %vm166_vm9 = vcmp.eq.s32.totalorder %v95_v21, %v2280_v35 }
  0x36   :  { %vm1744_vm7 = vmpackc.low %vm167_vm10, %vm166_vm9  ;;  %vm172_vm10 = vcmp.eq.s32.totalorder %v101_v36, %v2280_v35 }
  0x37   :  { %1149 = vmatpush1.bf16.msra.mxu0 %v2257_v29  ;;  %v2071_v29 = vld [vmem:[%s2864_s2 + $0x30] ss:$8 sps:$4 sm:$0xff]  }
  0x38   :  { %1925 = vmatpush1.bf16.msra.mxu1 %v2551_v16  ;;  %1150 = vmatprep.subr.bf16.mxu0 %v2269_v32  ;;  %v100_v32 = vadd.s32 104, %v2229_v22 }
  0x39   :  { %1910 = vmatprep.subr.bf16.mxu1 %v2560_v17 }
  0x3a   :  { %1743 = vmatmul.mubr.msk.bf16.gmra.mrb[12].mxu0 %vm1742_vm5, %v2115_v59  ;;  %vm171_vm5 = vcmp.eq.s32.totalorder %v100_v32, %v2280_v35 }
  0x3b   :  { %502 = vmatprep.mubr.bf16.mxu0 %v2114_v1  ;;  %1151 = vmatpush1.bf16.msra.mxu0 %v2288_v37  ;;  %vm1748_vm9 = vmpackc.low %vm171_vm5, %vm170_vm13  ;;  %v102_v37 = vadd.s32 120, %v2229_v22  ;;  %v2077_v22 = vld [vmem:[%s2864_s2 + $0x50] ss:$8 sps:$4 sm:$0xff]  }
  0x3c   :  { %1926 = vmatpush1.bf16.msra.mxu1 %v2578_v19  ;;  %1152 = vmatprep.subr.bf16.mxu0 %v2316_v45  ;;  %v2090_v45 = vld [vmem:[%s2864_s2 + $0xa4] ss:$8 sps:$4 sm:$0xff]  }
  0x3d   :  { %1911 = vmatprep.subr.bf16.mxu1 %v2584_v20 }
  0x3f   :  { %1153 = vmatpush1.bf16.msra.mxu0 %v2353_v51  ;;  %v2099_v51 = vld [vmem:[%s2864_s2 + $0xd4] ss:$8 sps:$4 sm:$0xff]  }
  0x40   :  { %1927 = vmatpush1.bf16.msra.mxu1 %v2595_v24  ;;  %1154 = vmatprep.subr.bf16.mxu0 %v2368_v53  ;;  %v2104_v53 = vld [vmem:[%s2864_s2 + $0x4] ss:$8 sps:$4 sm:$0xff]  }
  0x42   :  { %1745 = vmatmul.mubr.msk.bf16.gmra.mrb[16].mxu0 %vm1744_vm7, %v2115_v59  ;;  %vm173_vm7 = vcmp.eq.s32.totalorder %v102_v37, %v2280_v35  ;;  %v2080_v35 = vld [vmem:[%s2864_s2 + $0x60] ss:$8 sps:$4 sm:$0xff]  }
  0x43   :  { %1191 = vmatmul.mubr.bf16.vlgmr.msra.gmra.mrb[0].mxu1 %v2066_v25  ;;  %512 = vmatprep.mubr.bf16.mxu0 %v2114_v1  ;;  %vm1750_vm15 = vmpackc.low %vm173_vm7, %vm172_vm10 }
  0x44   :  { %1200 = vmatprep.mubr.bf16.mxu1 %v2069_v26  ;;  %1155 = vmatpush1.bf16.msra.mxu0 %v2387_v54  ;;  %v2105_v54 = vld [vmem:[%s2864_s2 + $0xe4] ss:$8 sps:$4 sm:$0xff]  }
  0x45   :  { %1156 = vmatprep.subr.bf16.mxu0 %v2403_v57  ;;  %v2110_v57 = vld [vmem:[%s2864_s2 + $0xf4] ss:$8 sps:$4 sm:$0xff]  }
  0x48   :  { %1157 = vmatpush1.bf16.msra.mxu0 %v2414_v60 }
  0x49   :  { %1158 = vmatprep.subr.bf16.mxu0 %v2423_v61 }
  0x4a   :  { %1747 = vmatmul.mubr.msk.bf16.gmra.mrb[20].mxu0 %vm1746_vm12, %v2115_v59 }
  0x4b   :  { %1201 = vmatmul.mubr.bf16.gmra.mrb[4].mxu1 %v2071_v29  ;;  %522 = vmatprep.mubr.bf16.mxu0 %v2114_v1 }
  0x4c   :  { %1210 = vmatprep.mubr.bf16.mxu1 %v2072_v30  ;;  %1159 = vmatpush1.bf16.msra.mxu0 %v2430_v62 }
  0x4d   :  { %1160 = vmatprep.subr.bf16.mxu0 %v2439_v2 }
  0x50   :  { %1161 = vmatpush1.bf16.msra.mxu0 %v2467_v5 }
  0x51   :  { %1162 = vmatprep.subr.bf16.mxu0 %v2486_v7 }
  0x52   :  { %1749 = vmatmul.mubr.msk.bf16.gmra.mrb[24].mxu0 %vm1748_vm9, %v2115_v59 }
  0x53   :  { %1211 = vmatmul.mubr.bf16.gmra.mrb[8].mxu1 %v2074_v33  ;;  %532 = vmatprep.mubr.bf16.mxu0 %v2114_v1 }
  0x54   :  { %1220 = vmatprep.mubr.bf16.mxu1 %v2075_v34  ;;  %1163 = vmatpush1.bf16.msra.mxu0 %v2504_v9 }
  0x55   :  { %1164 = vmatprep.subr.bf16.mxu0 %v2522_v13 }
  0x58   :  { %1165 = vmatpush1.bf16.msra.mxu0 %v2551_v16 }
  0x59   :  { %1166 = vmatprep.subr.bf16.mxu0 %v2560_v17 }
  0x5a   :  { %1751 = vmatmul.mubr.msk.bf16.gmra.mrb[28].mxu0 %vm1750_vm15, %v2115_v59 }
  0x5b   :  { %1221 = vmatmul.mubr.bf16.gmra.mrb[12].mxu1 %v2077_v22  ;;  %542 = vmatprep.mubr.bf16.mxu0 %v2114_v1 }
  0x5c   :  { %1230 = vmatprep.mubr.bf16.mxu1 %v2078_v38  ;;  %1167 = vmatpush1.bf16.msra.mxu0 %v2578_v19 }
  0x5d   :  { %1168 = vmatprep.subr.bf16.mxu0 %v2584_v20 }
  0x60   :  { %1169 = vmatpush1.bf16.msra.mxu0 %v2595_v24 }
  0x62   :  { %1753 = vmatmul.mubr.msk.bf16.gmra.mrb[32].mxu0 %vm2448_vm0, %v2115_v59 }
  0x63   :  { %1231 = vmatmul.mubr.bf16.gmra.mrb[16].mxu1 %v2080_v35  ;;  %552 = vmatprep.mubr.bf16.mxu0 %v2114_v1 }
  0x64   :  { %1240 = vmatprep.mubr.bf16.mxu1 %v2081_v39 }
  0x6a   :  { %1755 = vmatmul.mubr.msk.bf16.gmra.mrb[36].mxu0 %vm2459_vm1, %v2115_v59 }
  0x6b   :  { %1241 = vmatmul.mubr.bf16.gmra.mrb[20].mxu1 %v2083_v40  ;;  %562 = vmatprep.mubr.bf16.mxu0 %v2114_v1 }
  0x6c   :  { %1250 = vmatprep.mubr.bf16.mxu1 %v2084_v41 }
  0x72   :  { %1757 = vmatmul.mubr.msk.bf16.gmra.mrb[40].mxu0 %vm2478_vm4, %v2115_v59 }
  0x73   :  { %1251 = vmatmul.mubr.bf16.gmra.mrb[24].mxu1 %v2086_v42  ;;  %572 = vmatprep.mubr.bf16.mxu0 %v2114_v1 }
  0x74   :  { %1260 = vmatprep.mubr.bf16.mxu1 %v2087_v43 }
  0x7a   :  { %1759 = vmatmul.mubr.msk.bf16.gmra.mrb[44].mxu0 %vm2496_vm6, %v2115_v59 }
  0x7b   :  { %1261 = vmatmul.mubr.bf16.gmra.mrb[28].mxu1 %v2089_v44  ;;  %582 = vmatprep.mubr.bf16.mxu0 %v2114_v1 }
  0x7c   :  { %1270 = vmatprep.mubr.bf16.mxu1 %v2090_v45 }
  0x82   :  { %1761 = vmatmul.mubr.msk.bf16.gmra.mrb[48].mxu0 %vm2514_vm8, %v2115_v59 }
  0x83   :  { %1271 = vmatmul.mubr.bf16.gmra.mrb[32].mxu1 %v2092_v46  ;;  %592 = vmatprep.mubr.bf16.mxu0 %v2114_v1 }
  0x84   :  { %1280 = vmatprep.mubr.bf16.mxu1 %v2093_v47 }
  0x8a   :  { %1763 = vmatmul.mubr.msk.bf16.gmra.mrb[52].mxu0 %vm2531_vm2, %v2115_v59 }
  0x8b   :  { %1281 = vmatmul.mubr.bf16.gmra.mrb[36].mxu1 %v2095_v48  ;;  %602 = vmatprep.mubr.bf16.mxu0 %v2114_v1 }
  0x8c   :  { %1290 = vmatprep.mubr.bf16.mxu1 %v2096_v49 }
  0x92   :  { %1765 = vmatmul.mubr.msk.bf16.gmra.mrb[56].mxu0 %vm2543_vm3, %v2115_v59 }
  0x93   :  { %1291 = vmatmul.mubr.bf16.gmra.mrb[40].mxu1 %v2098_v50  ;;  %612 = vmatprep.mubr.bf16.mxu0 %v2114_v1  ;;  %v2102_v1 = vld [vmem:[%s2864_s2] ss:$8 sps:$4 sm:$0xff]  }
  0x94   :  { %1300 = vmatprep.mubr.bf16.mxu1 %v2099_v51 }
  0x9a   :  { %1767 = vmatmul.mubr.msk.bf16.gmra.mrb[60].mxu0 %vm2569_vm14, %v2115_v59  ;;  %v2113_v59 = vld [vmem:[%s2864_s2 + $0xf0] ss:$8 sps:$4 sm:$0xff]  }
  0x9b   :  { %1301 = vmatmul.mubr.bf16.gmra.mrb[44].mxu1 %v2101_v52  ;;  %1170 = vmatprep.mubr.bf16.mxu0 %v2104_v53 }
  0x9c   :  { %1310 = vmatprep.mubr.bf16.mxu1 %v2105_v54 }
  0xa2   :  { %1171 = vmatmul.mubr.bf16.vlgmr.msra.gmra.mrb[0].mxu0 %v2102_v1 }
  0xa3   :  { %1311 = vmatmul.mubr.bf16.gmra.mrb[48].mxu1 %v2107_v55  ;;  %1180 = vmatprep.mubr.bf16.mxu0 %v2108_v56 }
  0xa4   :  { %1320 = vmatprep.mubr.bf16.mxu1 %v2110_v57 }
  0xaa   :  { %1181 = vmatmul.mubr.bf16.gmra.mrb[4].mxu0 %v2112_v58 }
  0xab   :  { %1321 = vmatmul.mubr.bf16.gmra.mrb[52].mxu1 %v2113_v59 }
 0x105   :  { %v484_v60 = vpop.f32.mrb[8].mxu0 }
 0x106   :  { %v486_v61 = vpop.f32.mrb[9].mxu0 }
 0x107   :  { %v488_v62 = vpop.f32.mrb[10].mxu0 }
 0x108   :  { %v490_v63 = vpop.f32.mrb[11].mxu0 }
 0x10d   :  { %v494_v0 = vpop.f32.mrb[12].mxu0 }
 0x10e   :  { %v496_v2 = vpop.f32.mrb[13].mxu0 }
 0x10f   :  { %v498_v3 = vpop.f32.mrb[14].mxu0 }
 0x110   :  { %v500_v4 = vpop.f32.mrb[15].mxu0 }
 0x115   :  { %v504_v5 = vpop.f32.mrb[16].mxu0 }
 0x116   :  { %v1192_v6 = vpop.f32.mrb[0].mxu1  ;;  %v506_v8 = vpop.f32.mrb[17].mxu0 }
 0x117   :  { %v1403_v7 = vadd.f32 %v1192_v6, %v484_v60  ;;  %v1194_v9 = vpop.f32.mrb[1].mxu1  ;;  %v508_v11 = vpop.f32.mrb[18].mxu0 }
 0x118   :  { %v1404_v10 = vadd.f32 %v1194_v9, %v486_v61  ;;  %v1196_v12 = vpop.f32.mrb[2].mxu1  ;;  %v510_v14 = vpop.f32.mrb[19].mxu0 }
 0x119   :  { %v1405_v13 = vadd.f32 %v1196_v12, %v488_v62  ;;  %v1198_v15 = vpop.f32.mrb[3].mxu1 }
 0x11a   :  { %v1868_v16 = vpack.c.bf16 %v1404_v10, %v1403_v7  ;;  %v1406_v17 = vadd.f32 %v1198_v15, %v490_v63 }
 0x11c   :  { %1655 = vst [vmem:[%s2865_s4 + $0x20] sm:$0xff] %v1868_v16  ;;  %v1869_v18 = vpack.c.bf16 %v1406_v17, %v1405_v13 }
 0x11d   :  { %v514_v19 = vpop.f32.mrb[20].mxu0 }
 0x11e   :  { %1656 = vst [vmem:[%s2865_s4 + $0x28] sm:$0xff] %v1869_v18  ;;  %v1202_v20 = vpop.f32.mrb[4].mxu1  ;;  %v516_v23 = vpop.f32.mrb[21].mxu0 }
 0x11f   :  { %v1407_v21 = vadd.f32 %v1202_v20, %v494_v0  ;;  %v1204_v24 = vpop.f32.mrb[5].mxu1  ;;  %v518_v26 = vpop.f32.mrb[22].mxu0 }
 0x120   :  { %v1408_v25 = vadd.f32 %v1204_v24, %v496_v2  ;;  %v1206_v27 = vpop.f32.mrb[6].mxu1  ;;  %v520_v29 = vpop.f32.mrb[23].mxu0 }
 0x121   :  { %v1409_v28 = vadd.f32 %v1206_v27, %v498_v3  ;;  %v1208_v30 = vpop.f32.mrb[7].mxu1 }
 0x122   :  { %v1870_v31 = vpack.c.bf16 %v1408_v25, %v1407_v21  ;;  %v1410_v32 = vadd.f32 %v1208_v30, %v500_v4 }
 0x124   :  { %1657 = vst [vmem:[%s2865_s4 + $0x30] sm:$0xff] %v1870_v31  ;;  %v1871_v33 = vpack.c.bf16 %v1410_v32, %v1409_v28 }
 0x125   :  { %v524_v34 = vpop.f32.mrb[24].mxu0 }
 0x126   :  { %1658 = vst [vmem:[%s2865_s4 + $0x38] sm:$0xff] %v1871_v33  ;;  %v1212_v36 = vpop.f32.mrb[8].mxu1  ;;  %v526_v22 = vpop.f32.mrb[25].mxu0 }
 0x127   :  { %v1411_v37 = vadd.f32 %v1212_v36, %v504_v5  ;;  %v1214_v38 = vpop.f32.mrb[9].mxu1  ;;  %v528_v39 = vpop.f32.mrb[26].mxu0 }
 0x128   :  { %v1412_v35 = vadd.f32 %v1214_v38, %v506_v8  ;;  %v1216_v40 = vpop.f32.mrb[10].mxu1  ;;  %v530_v42 = vpop.f32.mrb[27].mxu0 }
 0x129   :  { %v1413_v41 = vadd.f32 %v1216_v40, %v508_v11  ;;  %v1218_v43 = vpop.f32.mrb[11].mxu1 }
 0x12a   :  { %v1872_v44 = vpack.c.bf16 %v1412_v35, %v1411_v37  ;;  %v1414_v45 = vadd.f32 %v1218_v43, %v510_v14 }
 0x12c   :  { %1659 = vst [vmem:[%s2865_s4 + $0x40] sm:$0xff] %v1872_v44  ;;  %v1873_v46 = vpack.c.bf16 %v1414_v45, %v1413_v41 }
 0x12d   :  { %v534_v47 = vpop.f32.mrb[28].mxu0 }
 0x12e   :  { %1660 = vst [vmem:[%s2865_s4 + $0x48] sm:$0xff] %v1873_v46  ;;  %v1222_v48 = vpop.f32.mrb[12].mxu1  ;;  %v536_v50 = vpop.f32.mrb[29].mxu0 }
 0x12f   :  { %v1415_v49 = vadd.f32 %v1222_v48, %v514_v19  ;;  %v1224_v51 = vpop.f32.mrb[13].mxu1  ;;  %v538_v53 = vpop.f32.mrb[30].mxu0 }
 0x130   :  { %v1416_v52 = vadd.f32 %v1224_v51, %v516_v23  ;;  %v1226_v54 = vpop.f32.mrb[14].mxu1  ;;  %v540_v55 = vpop.f32.mrb[31].mxu0 }
 0x131   :  { %v1417_v1 = vadd.f32 %v1226_v54, %v518_v26  ;;  %v1228_v56 = vpop.f32.mrb[15].mxu1 }
 0x132   :  { %v1874_v57 = vpack.c.bf16 %v1416_v52, %v1415_v49  ;;  %v1418_v58 = vadd.f32 %v1228_v56, %v520_v29 }
 0x134   :  { %1661 = vst [vmem:[%s2865_s4 + $0x50] sm:$0xff] %v1874_v57  ;;  %v1875_v59 = vpack.c.bf16 %v1418_v58, %v1417_v1 }
 0x135   :  { %v544_v60 = vpop.f32.mrb[32].mxu0 }
 0x136   :  { %1662 = vst [vmem:[%s2865_s4 + $0x58] sm:$0xff] %v1875_v59  ;;  %v1232_v61 = vpop.f32.mrb[16].mxu1  ;;  %v546_v63 = vpop.f32.mrb[33].mxu0 }
 0x137   :  { %v1419_v62 = vadd.f32 %v1232_v61, %v524_v34  ;;  %v1234_v0 = vpop.f32.mrb[17].mxu1  ;;  %v548_v3 = vpop.f32.mrb[34].mxu0 }
 0x138   :  { %v1420_v2 = vadd.f32 %v1234_v0, %v526_v22  ;;  %v1236_v4 = vpop.f32.mrb[18].mxu1  ;;  %v550_v6 = vpop.f32.mrb[35].mxu0 }
 0x139   :  { %v1421_v5 = vadd.f32 %v1236_v4, %v528_v39  ;;  %v1238_v7 = vpop.f32.mrb[19].mxu1 }
 0x13a   :  { %v1876_v8 = vpack.c.bf16 %v1420_v2, %v1419_v62  ;;  %v1422_v9 = vadd.f32 %v1238_v7, %v530_v42 }
 0x13c   :  { %1663 = vst [vmem:[%s2865_s4 + $0x60] sm:$0xff] %v1876_v8  ;;  %v1877_v10 = vpack.c.bf16 %v1422_v9, %v1421_v5 }
 0x13d   :  { %v554_v11 = vpop.f32.mrb[36].mxu0 }
 0x13e   :  { %1664 = vst [vmem:[%s2865_s4 + $0x68] sm:$0xff] %v1877_v10  ;;  %v1242_v12 = vpop.f32.mrb[20].mxu1  ;;  %v556_v14 = vpop.f32.mrb[37].mxu0 }
 0x13f   :  { %v1423_v13 = vadd.f32 %v1242_v12, %v534_v47  ;;  %v1244_v15 = vpop.f32.mrb[21].mxu1  ;;  %v558_v17 = vpop.f32.mrb[38].mxu0 }
 0x140   :  { %v1424_v16 = vadd.f32 %v1244_v15, %v536_v50  ;;  %v1246_v18 = vpop.f32.mrb[22].mxu1  ;;  %v560_v20 = vpop.f32.mrb[39].mxu0 }
 0x141   :  { %v1425_v19 = vadd.f32 %v1246_v18, %v538_v53  ;;  %v1248_v21 = vpop.f32.mrb[23].mxu1 }
 0x142   :  { %v1878_v23 = vpack.c.bf16 %v1424_v16, %v1423_v13  ;;  %v1426_v24 = vadd.f32 %v1248_v21, %v540_v55 }
 0x144   :  { %1665 = vst [vmem:[%s2865_s4 + $0x70] sm:$0xff] %v1878_v23  ;;  %v1879_v25 = vpack.c.bf16 %v1426_v24, %v1425_v19 }
 0x145   :  { %v564_v26 = vpop.f32.mrb[40].mxu0 }
 0x146   :  { %1666 = vst [vmem:[%s2865_s4 + $0x78] sm:$0xff] %v1879_v25  ;;  %v1252_v27 = vpop.f32.mrb[24].mxu1  ;;  %v566_v29 = vpop.f32.mrb[41].mxu0 }
 0x147   :  { %v1427_v28 = vadd.f32 %v1252_v27, %v544_v60  ;;  %v1254_v30 = vpop.f32.mrb[25].mxu1  ;;  %v568_v32 = vpop.f32.mrb[42].mxu0 }
 0x148   :  { %v1428_v31 = vadd.f32 %v1254_v30, %v546_v63  ;;  %v1256_v33 = vpop.f32.mrb[26].mxu1  ;;  %v570_v36 = vpop.f32.mrb[43].mxu0 }
 0x149   :  { %v1429_v34 = vadd.f32 %v1256_v33, %v548_v3  ;;  %v1258_v37 = vpop.f32.mrb[27].mxu1 }
 0x14a   :  { %v1880_v22 = vpack.c.bf16 %v1428_v31, %v1427_v28  ;;  %v1430_v38 = vadd.f32 %v1258_v37, %v550_v6 }
 0x14c   :  { %1667 = vst [vmem:[%s2865_s4 + $0x80] sm:$0xff] %v1880_v22  ;;  %v1881_v35 = vpack.c.bf16 %v1430_v38, %v1429_v34 }
 0x14d   :  { %v574_v39 = vpop.f32.mrb[44].mxu0 }
 0x14e   :  { %1668 = vst [vmem:[%s2865_s4 + $0x88] sm:$0xff] %v1881_v35  ;;  %v1262_v40 = vpop.f32.mrb[28].mxu1  ;;  %v576_v42 = vpop.f32.mrb[45].mxu0 }
 0x14f   :  { %v1431_v41 = vadd.f32 %v1262_v40, %v554_v11  ;;  %v1264_v43 = vpop.f32.mrb[29].mxu1  ;;  %v578_v45 = vpop.f32.mrb[46].mxu0 }
 0x150   :  { %v1432_v44 = vadd.f32 %v1264_v43, %v556_v14  ;;  %v1266_v46 = vpop.f32.mrb[30].mxu1  ;;  %v580_v48 = vpop.f32.mrb[47].mxu0 }
 0x151   :  { %v1433_v47 = vadd.f32 %v1266_v46, %v558_v17  ;;  %v1268_v49 = vpop.f32.mrb[31].mxu1 }
 0x152   :  { %v1882_v50 = vpack.c.bf16 %v1432_v44, %v1431_v41  ;;  %v1434_v51 = vadd.f32 %v1268_v49, %v560_v20 }
 0x154   :  { %1669 = vst [vmem:[%s2865_s4 + $0x90] sm:$0xff] %v1882_v50  ;;  %v1883_v52 = vpack.c.bf16 %v1434_v51, %v1433_v47 }
 0x155   :  { %v584_v53 = vpop.f32.mrb[48].mxu0 }
 0x156   :  { %1670 = vst [vmem:[%s2865_s4 + $0x98] sm:$0xff] %v1883_v52  ;;  %v1272_v54 = vpop.f32.mrb[32].mxu1  ;;  %v586_v55 = vpop.f32.mrb[49].mxu0 }
 0x157   :  { %v1435_v1 = vadd.f32 %v1272_v54, %v564_v26  ;;  %v1274_v56 = vpop.f32.mrb[33].mxu1  ;;  %v588_v58 = vpop.f32.mrb[50].mxu0 }
 0x158   :  { %v1436_v57 = vadd.f32 %v1274_v56, %v566_v29  ;;  %v1276_v59 = vpop.f32.mrb[34].mxu1  ;;  %v590_v61 = vpop.f32.mrb[51].mxu0 }
 0x159   :  { %v1437_v60 = vadd.f32 %v1276_v59, %v568_v32  ;;  %v1278_v62 = vpop.f32.mrb[35].mxu1 }
 0x15a   :  { %v1884_v63 = vpack.c.bf16 %v1436_v57, %v1435_v1  ;;  %v1438_v0 = vadd.f32 %v1278_v62, %v570_v36 }
 0x15c   :  { %1671 = vst [vmem:[%s2865_s4 + $0xa0] sm:$0xff] %v1884_v63  ;;  %v1885_v2 = vpack.c.bf16 %v1438_v0, %v1437_v60 }
 0x15d   :  { %v594_v3 = vpop.f32.mrb[52].mxu0 }
 0x15e   :  { %1672 = vst [vmem:[%s2865_s4 + $0xa8] sm:$0xff] %v1885_v2  ;;  %v1282_v4 = vpop.f32.mrb[36].mxu1  ;;  %v596_v6 = vpop.f32.mrb[53].mxu0 }
 0x15f   :  { %v1439_v5 = vadd.f32 %v1282_v4, %v574_v39  ;;  %v1284_v7 = vpop.f32.mrb[37].mxu1  ;;  %v598_v9 = vpop.f32.mrb[54].mxu0 }
 0x160   :  { %v1440_v8 = vadd.f32 %v1284_v7, %v576_v42  ;;  %v1286_v10 = vpop.f32.mrb[38].mxu1  ;;  %v600_v12 = vpop.f32.mrb[55].mxu0 }
 0x161   :  { %v1441_v11 = vadd.f32 %v1286_v10, %v578_v45  ;;  %v1288_v13 = vpop.f32.mrb[39].mxu1 }
 0x162   :  { %v1886_v14 = vpack.c.bf16 %v1440_v8, %v1439_v5  ;;  %v1442_v15 = vadd.f32 %v1288_v13, %v580_v48 }
 0x164   :  { %1673 = vst [vmem:[%s2865_s4 + $0xb0] sm:$0xff] %v1886_v14  ;;  %v1887_v16 = vpack.c.bf16 %v1442_v15, %v1441_v11 }
 0x165   :  { %v604_v17 = vpop.f32.mrb[56].mxu0 }
 0x166   :  { %1674 = vst [vmem:[%s2865_s4 + $0xb8] sm:$0xff] %v1887_v16  ;;  %v1292_v18 = vpop.f32.mrb[40].mxu1  ;;  %v606_v20 = vpop.f32.mrb[57].mxu0 }
 0x167   :  { %v1443_v19 = vadd.f32 %v1292_v18, %v584_v53  ;;  %v1294_v21 = vpop.f32.mrb[41].mxu1  ;;  %v608_v24 = vpop.f32.mrb[58].mxu0 }
 0x168   :  { %v1444_v23 = vadd.f32 %v1294_v21, %v586_v55  ;;  %v1296_v25 = vpop.f32.mrb[42].mxu1  ;;  %v610_v27 = vpop.f32.mrb[59].mxu0 }
 0x169   :  { %v1445_v26 = vadd.f32 %v1296_v25, %v588_v58  ;;  %v1298_v28 = vpop.f32.mrb[43].mxu1 }
 0x16a   :  { %v1888_v29 = vpack.c.bf16 %v1444_v23, %v1443_v19  ;;  %v1446_v30 = vadd.f32 %v1298_v28, %v590_v61 }
 0x16c   :  { %1675 = vst [vmem:[%s2865_s4 + $0xc0] sm:$0xff] %v1888_v29  ;;  %v1889_v31 = vpack.c.bf16 %v1446_v30, %v1445_v26 }
 0x16d   :  { %v614_v32 = vpop.f32.mrb[60].mxu0 }
 0x16e   :  { %1676 = vst [vmem:[%s2865_s4 + $0xc8] sm:$0xff] %v1889_v31  ;;  %v1302_v33 = vpop.f32.mrb[44].mxu1  ;;  %v616_v36 = vpop.f32.mrb[61].mxu0 }
 0x16f   :  { %v1447_v34 = vadd.f32 %v1302_v33, %v594_v3  ;;  %v1304_v37 = vpop.f32.mrb[45].mxu1  ;;  %v618_v38 = vpop.f32.mrb[62].mxu0 }
 0x170   :  { %v1448_v22 = vadd.f32 %v1304_v37, %v596_v6  ;;  %v1306_v35 = vpop.f32.mrb[46].mxu1  ;;  %v620_v40 = vpop.f32.mrb[63].mxu0 }
 0x171   :  { %v1449_v39 = vadd.f32 %v1306_v35, %v598_v9  ;;  %v1308_v41 = vpop.f32.mrb[47].mxu1 }
 0x172   :  { %v1890_v42 = vpack.c.bf16 %v1448_v22, %v1447_v34  ;;  %v1450_v43 = vadd.f32 %v1308_v41, %v600_v12 }
 0x174   :  { %1677 = vst [vmem:[%s2865_s4 + $0xd0] sm:$0xff] %v1890_v42  ;;  %v1891_v44 = vpack.c.bf16 %v1450_v43, %v1449_v39 }
 0x175   :  { %v1172_v45 = vpop.f32.mrb[0].mxu0 }
 0x176   :  { %1678 = vst [vmem:[%s2865_s4 + $0xd8] sm:$0xff] %v1891_v44  ;;  %v1312_v46 = vpop.f32.mrb[48].mxu1  ;;  %v1174_v48 = vpop.f32.mrb[1].mxu0 }
 0x177   :  { %v1451_v47 = vadd.f32 %v1312_v46, %v604_v17  ;;  %v1314_v49 = vpop.f32.mrb[49].mxu1  ;;  %v1864_v50 = vpack.c.bf16 %v1174_v48, %v1172_v45  ;;  %v1176_v52 = vpop.f32.mrb[2].mxu0 }
 0x178   :  { %v1452_v51 = vadd.f32 %v1314_v49, %v606_v20  ;;  %v1316_v53 = vpop.f32.mrb[50].mxu1  ;;  %v1178_v1 = vpop.f32.mrb[3].mxu0 }
 0x179   :  { %v1453_v54 = vadd.f32 %v1316_v53, %v608_v24  ;;  %v1318_v55 = vpop.f32.mrb[51].mxu1  ;;  %1651 = vst [vmem:[%s2865_s4] sm:$0xff] %v1864_v50  ;;  %v1865_v57 = vpack.c.bf16 %v1178_v1, %v1176_v52 }
 0x17a   :  { %v1892_v56 = vpack.c.bf16 %v1452_v51, %v1451_v47  ;;  %v1454_v58 = vadd.f32 %v1318_v55, %v610_v27 }
 0x17b   :  { %1652 = vst [vmem:[%s2865_s4 + $0x8] sm:$0xff] %v1865_v57 }
 0x17c   :  { %1679 = vst [vmem:[%s2865_s4 + $0xe0] sm:$0xff] %v1892_v56  ;;  %v1893_v59 = vpack.c.bf16 %v1454_v58, %v1453_v54 }
 0x17d   :  { %v1182_v60 = vpop.f32.mrb[4].mxu0 }
 0x17e   :  { %1680 = vst [vmem:[%s2865_s4 + $0xe8] sm:$0xff] %v1893_v59  ;;  %v1322_v61 = vpop.f32.mrb[52].mxu1  ;;  %v1184_v63 = vpop.f32.mrb[5].mxu0 }
 0x17f   :  { %v1455_v62 = vadd.f32 %v1322_v61, %v614_v32  ;;  %v1324_v0 = vpop.f32.mrb[53].mxu1  ;;  %v1866_v2 = vpack.c.bf16 %v1184_v63, %v1182_v60  ;;  %v1186_v4 = vpop.f32.mrb[6].mxu0 }
 0x180   :  { %v1456_v3 = vadd.f32 %v1324_v0, %v616_v36  ;;  %v1326_v5 = vpop.f32.mrb[54].mxu1  ;;  %v1188_v7 = vpop.f32.mrb[7].mxu0 }
 0x181   :  { %v1457_v6 = vadd.f32 %v1326_v5, %v618_v38  ;;  %v1328_v8 = vpop.f32.mrb[55].mxu1  ;;  %1653 = vst [vmem:[%s2865_s4 + $0x10] sm:$0xff] %v1866_v2  ;;  %v1867_v10 = vpack.c.bf16 %v1188_v7, %v1186_v4 }
 0x182   :  { %v1894_v9 = vpack.c.bf16 %v1456_v3, %v1455_v62  ;;  %v1458_v11 = vadd.f32 %v1328_v8, %v620_v40 }
 0x183   :  { %1654 = vst [vmem:[%s2865_s4 + $0x18] sm:$0xff] %v1867_v10 }
 0x184   :  { %1681 = vst [vmem:[%s2865_s4 + $0xf0] sm:$0xff] %v1894_v9  ;;  %v1895_v12 = vpack.c.bf16 %v1458_v11, %v1457_v6 }
 0x186   :  { %1682 = vst [vmem:[%s2865_s4 + $0xf8] sm:$0xff] %v1895_v12 }

// kernel: cgcnn_forward.9
= control target key start
LH: loop header
LB: loop body
LE: loop exit
PB: predicated region body
PF: predicated region fallthrough
CT: control target
= control target key end

     0   :  { %s5320_s4 = inlined_call_operand.vmem [shape: bf16[256,512], index: 4, kind: input, shape index: {}]   ;;  %s5321_s1 = inlined_call_operand.vmem [shape: bf16[128,256], index: 1, kind: input, shape index: {}]   ;;  %s5322_s3 = inlined_call_operand.vmem [shape: bf16[256,512], index: 3, kind: input, shape index: {}]   ;;  %s5323_s0 = inlined_call_operand.vmem [shape: bf16[128,256], index: 0, kind: input, shape index: {}]   ;;  %s5324_s5 = inlined_call_operand.vmem [shape: bf16[256,512], index: 5, kind: input, shape index: {}]   ;;  %s5325_s2 = inlined_call_operand.vmem [shape: bf16[128,256], index: 2, kind: input, shape index: {}]   ;;  %s5326_s6 = inlined_call_operand.vmem [shape: bf16[128,256], index: 6, kind: output, shape index: {}]  }
   0x1   :  { %v3393_v0 = vld [vmem:[%s5320_s4 + $0x4] ss:$16 sps:$4 sm:$0xff]   ;;  %v3395_v1 = vld [vmem:[%s5320_s4 + $0xc] ss:$16 sps:$4 sm:$0xff]   ;;  %v3397_v2 = vld [vmem:[%s5320_s4] ss:$16 sps:$4 sm:$0xff]  }
   0x2   :  { %583 = vmatprep.subr.bf16.mxu0 %v3393_v0  ;;  %v3398_v3 = vld [vmem:[%s5320_s4 + $0x8] ss:$16 sps:$4 sm:$0xff]   ;;  %696 = vmatprep.subr.bf16.mxu1 %v3395_v1  ;;  %v3399_v4 = vld [vmem:[%s5320_s4 + $0x24] ss:$16 sps:$4 sm:$0xff]   ;;  %v3401_v5 = vld [vmem:[%s5320_s4 + $0x2c] ss:$16 sps:$4 sm:$0xff]  }
   0x3   :  { %584 = vmatpush1.bf16.msra.mxu0 %v3397_v2  ;;  %697 = vmatpush1.bf16.msra.mxu1 %v3398_v3  ;;  %v3403_v6 = vld [vmem:[%s5320_s4 + $0x20] ss:$16 sps:$4 sm:$0xff]   ;;  %v3404_v7 = vld [vmem:[%s5320_s4 + $0x28] ss:$16 sps:$4 sm:$0xff]   ;;  %v3405_v8 = vld [vmem:[%s5320_s4 + $0x44] ss:$16 sps:$4 sm:$0xff]  }
   0x4   :  { %585 = vmatprep.subr.bf16.mxu0 %v3399_v4  ;;  %698 = vmatprep.subr.bf16.mxu1 %v3401_v5  ;;  %v3407_v9 = vld [vmem:[%s5320_s4 + $0x4c] ss:$16 sps:$4 sm:$0xff]   ;;  %v3409_v10 = vld [vmem:[%s5320_s4 + $0x40] ss:$16 sps:$4 sm:$0xff]   ;;  %v3410_v11 = vld [vmem:[%s5320_s4 + $0x48] ss:$16 sps:$4 sm:$0xff]  }
   0x5   :  { %v3411_v12 = vld [vmem:[%s5320_s4 + $0x64] ss:$16 sps:$4 sm:$0xff]   ;;  %v3413_v13 = vld [vmem:[%s5320_s4 + $0x6c] ss:$16 sps:$4 sm:$0xff]   ;;  %v3415_v14 = vld [vmem:[%s5320_s4 + $0x60] ss:$16 sps:$4 sm:$0xff]  }
   0x6   :  { %v3416_v15 = vld [vmem:[%s5320_s4 + $0x68] ss:$16 sps:$4 sm:$0xff]   ;;  %v3417_v16 = vld [vmem:[%s5320_s4 + $0x84] ss:$16 sps:$4 sm:$0xff]   ;;  %v3419_v17 = vld [vmem:[%s5320_s4 + $0x8c] ss:$16 sps:$4 sm:$0xff]  }
   0x7   :  { %586 = vmatpush1.bf16.msra.mxu0 %v3403_v6  ;;  %699 = vmatpush1.bf16.msra.mxu1 %v3404_v7  ;;  %v3421_v18 = vld [vmem:[%s5320_s4 + $0x80] ss:$16 sps:$4 sm:$0xff]   ;;  %v3422_v19 = vld [vmem:[%s5320_s4 + $0x88] ss:$16 sps:$4 sm:$0xff]   ;;  %v3423_v20 = vld [vmem:[%s5320_s4 + $0xa4] ss:$16 sps:$4 sm:$0xff]  }
   0x8   :  { %587 = vmatprep.subr.bf16.mxu0 %v3405_v8  ;;  %700 = vmatprep.subr.bf16.mxu1 %v3407_v9  ;;  %v3425_v21 = vld [vmem:[%s5320_s4 + $0xac] ss:$16 sps:$4 sm:$0xff]   ;;  %v3427_v22 = vld [vmem:[%s5320_s4 + $0xa0] ss:$16 sps:$4 sm:$0xff]   ;;  %v3428_v23 = vld [vmem:[%s5320_s4 + $0xa8] ss:$16 sps:$4 sm:$0xff]  }
   0x9   :  { %v3429_v24 = vld [vmem:[%s5320_s4 + $0xc4] ss:$16 sps:$4 sm:$0xff]   ;;  %v3431_v25 = vld [vmem:[%s5320_s4 + $0xcc] ss:$16 sps:$4 sm:$0xff]   ;;  %v3433_v26 = vld [vmem:[%s5320_s4 + $0xc0] ss:$16 sps:$4 sm:$0xff]  }
   0xa   :  { %v3434_v27 = vld [vmem:[%s5320_s4 + $0xc8] ss:$16 sps:$4 sm:$0xff]   ;;  %v3435_v28 = vld [vmem:[%s5320_s4 + $0xe4] ss:$16 sps:$4 sm:$0xff]   ;;  %v3437_v29 = vld [vmem:[%s5320_s4 + $0xec] ss:$16 sps:$4 sm:$0xff]  }
   0xb   :  { %588 = vmatpush1.bf16.msra.mxu0 %v3409_v10  ;;  %701 = vmatpush1.bf16.msra.mxu1 %v3410_v11  ;;  %v3439_v30 = vld [vmem:[%s5320_s4 + $0xe0] ss:$16 sps:$4 sm:$0xff]   ;;  %v3440_v31 = vld [vmem:[%s5320_s4 + $0xe8] ss:$16 sps:$4 sm:$0xff]   ;;  %v3441_v32 = vld [vmem:[%s5320_s4 + $0x104] ss:$16 sps:$4 sm:$0xff]  }
   0xc   :  { %589 = vmatprep.subr.bf16.mxu0 %v3411_v12  ;;  %702 = vmatprep.subr.bf16.mxu1 %v3413_v13  ;;  %v3443_v33 = vld [vmem:[%s5320_s4 + $0x10c] ss:$16 sps:$4 sm:$0xff]   ;;  %v3445_v34 = vld [vmem:[%s5320_s4 + $0x100] ss:$16 sps:$4 sm:$0xff]   ;;  %v3446_v35 = vld [vmem:[%s5320_s4 + $0x108] ss:$16 sps:$4 sm:$0xff]  }
   0xd   :  { %v3447_v36 = vld [vmem:[%s5320_s4 + $0x124] ss:$16 sps:$4 sm:$0xff]   ;;  %v3449_v37 = vld [vmem:[%s5320_s4 + $0x12c] ss:$16 sps:$4 sm:$0xff]   ;;  %v3451_v38 = vld [vmem:[%s5320_s4 + $0x120] ss:$16 sps:$4 sm:$0xff]  }
   0xe   :  { %v3452_v39 = vld [vmem:[%s5320_s4 + $0x128] ss:$16 sps:$4 sm:$0xff]   ;;  %v3453_v40 = vld [vmem:[%s5320_s4 + $0x144] ss:$16 sps:$4 sm:$0xff]   ;;  %v3455_v41 = vld [vmem:[%s5320_s4 + $0x14c] ss:$16 sps:$4 sm:$0xff]  }
   0xf   :  { %590 = vmatpush1.bf16.msra.mxu0 %v3415_v14  ;;  %703 = vmatpush1.bf16.msra.mxu1 %v3416_v15  ;;  %v3457_v42 = vld [vmem:[%s5320_s4 + $0x140] ss:$16 sps:$4 sm:$0xff]   ;;  %v3458_v43 = vld [vmem:[%s5320_s4 + $0x148] ss:$16 sps:$4 sm:$0xff]   ;;  %v3459_v44 = vld [vmem:[%s5320_s4 + $0x164] ss:$16 sps:$4 sm:$0xff]  }
  0x10   :  { %591 = vmatprep.subr.bf16.mxu0 %v3417_v16  ;;  %704 = vmatprep.subr.bf16.mxu1 %v3419_v17  ;;  %v3461_v45 = vld [vmem:[%s5320_s4 + $0x16c] ss:$16 sps:$4 sm:$0xff]   ;;  %v3463_v46 = vld [vmem:[%s5320_s4 + $0x160] ss:$16 sps:$4 sm:$0xff]   ;;  %v3464_v47 = vld [vmem:[%s5320_s4 + $0x168] ss:$16 sps:$4 sm:$0xff]  }
  0x11   :  { %v3491_v48 = vld [vmem:[%s5321_s1 + $0x4] ss:$8 sps:$4 sm:$0xff]   ;;  %v3469_v51 = vld [vmem:[%s5320_s4 + $0x180] ss:$16 sps:$4 sm:$0xff]   ;;  %v3470_v52 = vld [vmem:[%s5320_s4 + $0x188] ss:$16 sps:$4 sm:$0xff]  }
  0x12   :  { %v3465_v49 = vld [vmem:[%s5320_s4 + $0x184] ss:$16 sps:$4 sm:$0xff]   ;;  %v3467_v50 = vld [vmem:[%s5320_s4 + $0x18c] ss:$16 sps:$4 sm:$0xff]   ;;  %615 = vmatprep.mubr.bf16.mxu0 %v3491_v48  ;;  %728 = vmatprep.mubr.bf16.mxu1 %v3491_v48  ;;  %v3475_v55 = vld [vmem:[%s5320_s4 + $0x1a0] ss:$16 sps:$4 sm:$0xff]  }
  0x13   :  { %592 = vmatpush1.bf16.msra.mxu0 %v3421_v18  ;;  %705 = vmatpush1.bf16.msra.mxu1 %v3422_v19  ;;  %v3471_v53 = vld [vmem:[%s5320_s4 + $0x1a4] ss:$16 sps:$4 sm:$0xff]   ;;  %v3473_v54 = vld [vmem:[%s5320_s4 + $0x1ac] ss:$16 sps:$4 sm:$0xff]   ;;  %v3476_v56 = vld [vmem:[%s5320_s4 + $0x1a8] ss:$16 sps:$4 sm:$0xff]  }
  0x14   :  { %593 = vmatprep.subr.bf16.mxu0 %v3423_v20  ;;  %706 = vmatprep.subr.bf16.mxu1 %v3425_v21  ;;  %v3477_v57 = vld [vmem:[%s5320_s4 + $0x1c4] ss:$16 sps:$4 sm:$0xff]   ;;  %v3479_v58 = vld [vmem:[%s5320_s4 + $0x1cc] ss:$16 sps:$4 sm:$0xff]   ;;  %v3481_v59 = vld [vmem:[%s5320_s4 + $0x1c0] ss:$16 sps:$4 sm:$0xff]  }
  0x15   :  { %v3482_v60 = vld [vmem:[%s5320_s4 + $0x1c8] ss:$16 sps:$4 sm:$0xff]   ;;  %v3483_v61 = vld [vmem:[%s5320_s4 + $0x1e4] ss:$16 sps:$4 sm:$0xff]   ;;  %v3485_v62 = vld [vmem:[%s5320_s4 + $0x1ec] ss:$16 sps:$4 sm:$0xff]  }
  0x16   :  { %v3487_v63 = vld [vmem:[%s5320_s4 + $0x1e0] ss:$16 sps:$4 sm:$0xff]   ;;  %v3488_v0 = vld [vmem:[%s5320_s4 + $0x1e8] ss:$16 sps:$4 sm:$0xff]   ;;  %v3494_v1 = vld [vmem:[%s5322_s3 + $0x4] ss:$16 sps:$4 sm:$0xff]  }
  0x17   :  { %594 = vmatpush1.bf16.msra.mxu0 %v3427_v22  ;;  %707 = vmatpush1.bf16.msra.mxu1 %v3428_v23  ;;  %v3497_v2 = vld [vmem:[%s5322_s3 + $0xc] ss:$16 sps:$4 sm:$0xff]   ;;  %v3489_v3 = vld [vmem:[%s5321_s1] ss:$8 sps:$4 sm:$0xff]   ;;  %v3500_v6 = vld [vmem:[%s5322_s3 + $0x24] ss:$16 sps:$4 sm:$0xff]  }
  0x18   :  { %595 = vmatprep.subr.bf16.mxu0 %v3429_v24  ;;  %708 = vmatprep.subr.bf16.mxu1 %v3431_v25  ;;  %v3492_v4 = vld [vmem:[%s5322_s3] ss:$16 sps:$4 sm:$0xff]   ;;  %v3495_v5 = vld [vmem:[%s5322_s3 + $0x8] ss:$16 sps:$4 sm:$0xff]   ;;  %v3503_v7 = vld [vmem:[%s5322_s3 + $0x2c] ss:$16 sps:$4 sm:$0xff]  }
  0x19   :  { %v3504_v8 = vld [vmem:[%s5321_s1 + $0x14] ss:$8 sps:$4 sm:$0xff]   ;;  %v3498_v9 = vld [vmem:[%s5322_s3 + $0x20] ss:$16 sps:$4 sm:$0xff]   ;;  %v3501_v10 = vld [vmem:[%s5322_s3 + $0x28] ss:$16 sps:$4 sm:$0xff]  }
  0x1a   :  { %v3509_v11 = vld [vmem:[%s5322_s3 + $0x44] ss:$16 sps:$4 sm:$0xff]   ;;  %v3512_v12 = vld [vmem:[%s5322_s3 + $0x4c] ss:$16 sps:$4 sm:$0xff]   ;;  %v3506_v13 = vld [vmem:[%s5321_s1 + $0x10] ss:$8 sps:$4 sm:$0xff]  }
  0x1b   :  { %596 = vmatpush1.bf16.msra.mxu0 %v3433_v26  ;;  %709 = vmatpush1.bf16.msra.mxu1 %v3434_v27  ;;  %v3507_v14 = vld [vmem:[%s5322_s3 + $0x40] ss:$16 sps:$4 sm:$0xff]   ;;  %v3510_v15 = vld [vmem:[%s5322_s3 + $0x48] ss:$16 sps:$4 sm:$0xff]   ;;  %v3515_v16 = vld [vmem:[%s5322_s3 + $0x64] ss:$16 sps:$4 sm:$0xff]  }
  0x1c   :  { %597 = vmatprep.subr.bf16.mxu0 %v3435_v28  ;;  %710 = vmatprep.subr.bf16.mxu1 %v3437_v29  ;;  %v3518_v17 = vld [vmem:[%s5322_s3 + $0x6c] ss:$16 sps:$4 sm:$0xff]   ;;  %v3513_v19 = vld [vmem:[%s5322_s3 + $0x60] ss:$16 sps:$4 sm:$0xff]   ;;  %v3516_v20 = vld [vmem:[%s5322_s3 + $0x68] ss:$16 sps:$4 sm:$0xff]  }
  0x1d   :  { %v3519_v18 = vld [vmem:[%s5321_s1 + $0x24] ss:$8 sps:$4 sm:$0xff]   ;;  %v3521_v23 = vld [vmem:[%s5321_s1 + $0x20] ss:$8 sps:$4 sm:$0xff]   ;;  %v3534_v28 = vld [vmem:[%s5321_s1 + $0x34] ss:$8 sps:$4 sm:$0xff]  }
  0x1e   :  { %v3524_v21 = vld [vmem:[%s5322_s3 + $0x84] ss:$16 sps:$4 sm:$0xff]   ;;  %v3527_v22 = vld [vmem:[%s5322_s3 + $0x8c] ss:$16 sps:$4 sm:$0xff]   ;;  %v3522_v24 = vld [vmem:[%s5322_s3 + $0x80] ss:$16 sps:$4 sm:$0xff]  }
  0x1f   :  { %598 = vmatpush1.bf16.msra.mxu0 %v3439_v30  ;;  %711 = vmatpush1.bf16.msra.mxu1 %v3440_v31  ;;  %v3525_v25 = vld [vmem:[%s5322_s3 + $0x88] ss:$16 sps:$4 sm:$0xff]   ;;  %v3530_v26 = vld [vmem:[%s5322_s3 + $0xa4] ss:$16 sps:$4 sm:$0xff]   ;;  %v3533_v27 = vld [vmem:[%s5322_s3 + $0xac] ss:$16 sps:$4 sm:$0xff]  }
  0x20   :  { %599 = vmatprep.subr.bf16.mxu0 %v3441_v32  ;;  %712 = vmatprep.subr.bf16.mxu1 %v3443_v33  ;;  %v3528_v29 = vld [vmem:[%s5322_s3 + $0xa0] ss:$16 sps:$4 sm:$0xff]   ;;  %v3531_v30 = vld [vmem:[%s5322_s3 + $0xa8] ss:$16 sps:$4 sm:$0xff]   ;;  %v3539_v31 = vld [vmem:[%s5322_s3 + $0xc4] ss:$16 sps:$4 sm:$0xff]  }
  0x21   :  { %v3542_v32 = vld [vmem:[%s5322_s3 + $0xcc] ss:$16 sps:$4 sm:$0xff]   ;;  %v3536_v33 = vld [vmem:[%s5321_s1 + $0x30] ss:$8 sps:$4 sm:$0xff]  }
  0x22   :  { %v3564_v48 = vld [vmem:[%s5321_s1 + $0x54] ss:$8 sps:$4 sm:$0xff]  }
  0x23   :  { %600 = vmatpush1.bf16.msra.mxu0 %v3445_v34  ;;  %713 = vmatpush1.bf16.msra.mxu1 %v3446_v35  ;;  %v3537_v34 = vld [vmem:[%s5322_s3 + $0xc0] ss:$16 sps:$4 sm:$0xff]   ;;  %v3540_v35 = vld [vmem:[%s5322_s3 + $0xc8] ss:$16 sps:$4 sm:$0xff]  }
  0x24   :  { %601 = vmatprep.subr.bf16.mxu0 %v3447_v36  ;;  %714 = vmatprep.subr.bf16.mxu1 %v3449_v37  ;;  %v3545_v36 = vld [vmem:[%s5322_s3 + $0xe4] ss:$16 sps:$4 sm:$0xff]   ;;  %v3548_v37 = vld [vmem:[%s5322_s3 + $0xec] ss:$16 sps:$4 sm:$0xff]  }
  0x27   :  { %602 = vmatpush1.bf16.msra.mxu0 %v3451_v38  ;;  %715 = vmatpush1.bf16.msra.mxu1 %v3452_v39  ;;  %v3549_v38 = vld [vmem:[%s5321_s1 + $0x44] ss:$8 sps:$4 sm:$0xff]   ;;  %v3543_v39 = vld [vmem:[%s5322_s3 + $0xe0] ss:$16 sps:$4 sm:$0xff]  }
  0x28   :  { %603 = vmatprep.subr.bf16.mxu0 %v3453_v40  ;;  %716 = vmatprep.subr.bf16.mxu1 %v3455_v41  ;;  %v3546_v40 = vld [vmem:[%s5322_s3 + $0xe8] ss:$16 sps:$4 sm:$0xff]   ;;  %v3554_v41 = vld [vmem:[%s5322_s3 + $0x104] ss:$16 sps:$4 sm:$0xff]  }
  0x2b   :  { %604 = vmatpush1.bf16.msra.mxu0 %v3457_v42  ;;  %717 = vmatpush1.bf16.msra.mxu1 %v3458_v43  ;;  %v3557_v42 = vld [vmem:[%s5322_s3 + $0x10c] ss:$16 sps:$4 sm:$0xff]   ;;  %v3551_v43 = vld [vmem:[%s5321_s1 + $0x40] ss:$8 sps:$4 sm:$0xff]  }
  0x2c   :  { %605 = vmatprep.subr.bf16.mxu0 %v3459_v44  ;;  %718 = vmatprep.subr.bf16.mxu1 %v3461_v45  ;;  %v3552_v44 = vld [vmem:[%s5322_s3 + $0x100] ss:$16 sps:$4 sm:$0xff]   ;;  %v3555_v45 = vld [vmem:[%s5322_s3 + $0x108] ss:$16 sps:$4 sm:$0xff]  }
  0x2f   :  { %606 = vmatpush1.bf16.msra.mxu0 %v3463_v46  ;;  %719 = vmatpush1.bf16.msra.mxu1 %v3464_v47  ;;  %v3560_v46 = vld [vmem:[%s5322_s3 + $0x124] ss:$16 sps:$4 sm:$0xff]   ;;  %v3563_v47 = vld [vmem:[%s5322_s3 + $0x12c] ss:$16 sps:$4 sm:$0xff]  }
  0x30   :  { %607 = vmatprep.subr.bf16.mxu0 %v3465_v49  ;;  %720 = vmatprep.subr.bf16.mxu1 %v3467_v50  ;;  %v3558_v49 = vld [vmem:[%s5322_s3 + $0x120] ss:$16 sps:$4 sm:$0xff]   ;;  %v3561_v50 = vld [vmem:[%s5322_s3 + $0x128] ss:$16 sps:$4 sm:$0xff]  }
  0x33   :  { %608 = vmatpush1.bf16.msra.mxu0 %v3469_v51  ;;  %721 = vmatpush1.bf16.msra.mxu1 %v3470_v52  ;;  %v3569_v51 = vld [vmem:[%s5322_s3 + $0x144] ss:$16 sps:$4 sm:$0xff]   ;;  %v3572_v52 = vld [vmem:[%s5322_s3 + $0x14c] ss:$16 sps:$4 sm:$0xff]  }
  0x34   :  { %609 = vmatprep.subr.bf16.mxu0 %v3471_v53  ;;  %722 = vmatprep.subr.bf16.mxu1 %v3473_v54  ;;  %v3566_v53 = vld [vmem:[%s5321_s1 + $0x50] ss:$8 sps:$4 sm:$0xff]  }
  0x35   :  { %v3567_v54 = vld [vmem:[%s5322_s3 + $0x140] ss:$16 sps:$4 sm:$0xff]  }
  0x37   :  { %610 = vmatpush1.bf16.msra.mxu0 %v3475_v55  ;;  %723 = vmatpush1.bf16.msra.mxu1 %v3476_v56  ;;  %v3570_v55 = vld [vmem:[%s5322_s3 + $0x148] ss:$16 sps:$4 sm:$0xff]   ;;  %v3575_v56 = vld [vmem:[%s5322_s3 + $0x164] ss:$16 sps:$4 sm:$0xff]  }
  0x38   :  { %611 = vmatprep.subr.bf16.mxu0 %v3477_v57  ;;  %724 = vmatprep.subr.bf16.mxu1 %v3479_v58  ;;  %v3578_v57 = vld [vmem:[%s5322_s3 + $0x16c] ss:$16 sps:$4 sm:$0xff]  }
  0x39   :  { %v3579_v58 = vld [vmem:[%s5321_s1 + $0x64] ss:$8 sps:$4 sm:$0xff]  }
  0x3b   :  { %612 = vmatpush1.bf16.msra.mxu0 %v3481_v59  ;;  %725 = vmatpush1.bf16.msra.mxu1 %v3482_v60  ;;  %v3573_v59 = vld [vmem:[%s5322_s3 + $0x160] ss:$16 sps:$4 sm:$0xff]   ;;  %v3576_v60 = vld [vmem:[%s5322_s3 + $0x168] ss:$16 sps:$4 sm:$0xff]  }
  0x3c   :  { %613 = vmatprep.subr.bf16.mxu0 %v3483_v61  ;;  %726 = vmatprep.subr.bf16.mxu1 %v3485_v62  ;;  %v3584_v61 = vld [vmem:[%s5322_s3 + $0x184] ss:$16 sps:$4 sm:$0xff]   ;;  %v3587_v62 = vld [vmem:[%s5322_s3 + $0x18c] ss:$16 sps:$4 sm:$0xff]  }
  0x3f   :  { %614 = vmatpush1.bf16.msra.mxu0 %v3487_v63  ;;  %727 = vmatpush1.bf16.msra.mxu1 %v3488_v0  ;;  %v3581_v63 = vld [vmem:[%s5321_s1 + $0x60] ss:$8 sps:$4 sm:$0xff]  }
  0x40   :  { %1209 = vmatprep.subr.bf16.mxu0 %v3494_v1  ;;  %1322 = vmatprep.subr.bf16.mxu1 %v3497_v2  ;;  %v3582_v0 = vld [vmem:[%s5322_s3 + $0x180] ss:$16 sps:$4 sm:$0xff]   ;;  %v3585_v1 = vld [vmem:[%s5322_s3 + $0x188] ss:$16 sps:$4 sm:$0xff]   ;;  %v3590_v2 = vld [vmem:[%s5322_s3 + $0x1a4] ss:$16 sps:$4 sm:$0xff]  }
  0x42   :  { %616 = vmatmul.mubr.bf16.vlgmr.msra.gmra.mrb[0].mxu0 %v3489_v3  ;;  %729 = vmatmul.mubr.bf16.vlgmr.msra.gmra.mrb[0].mxu1 %v3489_v3  ;;  %v3593_v3 = vld [vmem:[%s5322_s3 + $0x1ac] ss:$16 sps:$4 sm:$0xff]  }
  0x43   :  { %1210 = vmatpush1.bf16.msra.mxu0 %v3492_v4  ;;  %1323 = vmatpush1.bf16.msra.mxu1 %v3495_v5  ;;  %v3594_v4 = vld [vmem:[%s5321_s1 + $0x74] ss:$8 sps:$4 sm:$0xff]   ;;  %v3588_v5 = vld [vmem:[%s5322_s3 + $0x1a0] ss:$16 sps:$4 sm:$0xff]  }
  0x44   :  { %1211 = vmatprep.subr.bf16.mxu0 %v3500_v6  ;;  %1324 = vmatprep.subr.bf16.mxu1 %v3503_v7  ;;  %v3591_v6 = vld [vmem:[%s5322_s3 + $0x1a8] ss:$16 sps:$4 sm:$0xff]   ;;  %v3599_v7 = vld [vmem:[%s5322_s3 + $0x1c4] ss:$16 sps:$4 sm:$0xff]  }
  0x45   :  { %625 = vmatprep.mubr.bf16.mxu0 %v3504_v8  ;;  %738 = vmatprep.mubr.bf16.mxu1 %v3504_v8  ;;  %v3602_v8 = vld [vmem:[%s5322_s3 + $0x1cc] ss:$16 sps:$4 sm:$0xff]  }
  0x47   :  { %1212 = vmatpush1.bf16.msra.mxu0 %v3498_v9  ;;  %1325 = vmatpush1.bf16.msra.mxu1 %v3501_v10  ;;  %v3596_v9 = vld [vmem:[%s5321_s1 + $0x70] ss:$8 sps:$4 sm:$0xff]  }
  0x48   :  { %1213 = vmatprep.subr.bf16.mxu0 %v3509_v11  ;;  %1326 = vmatprep.subr.bf16.mxu1 %v3512_v12  ;;  %v3597_v10 = vld [vmem:[%s5322_s3 + $0x1c0] ss:$16 sps:$4 sm:$0xff]   ;;  %v3600_v11 = vld [vmem:[%s5322_s3 + $0x1c8] ss:$16 sps:$4 sm:$0xff]   ;;  %v3605_v12 = vld [vmem:[%s5322_s3 + $0x1e4] ss:$16 sps:$4 sm:$0xff]  }
  0x4a   :  { %626 = vmatmul.mubr.bf16.gmra.mrb[4].mxu0 %v3506_v13  ;;  %739 = vmatmul.mubr.bf16.gmra.mrb[4].mxu1 %v3506_v13  ;;  %v3608_v13 = vld [vmem:[%s5322_s3 + $0x1ec] ss:$16 sps:$4 sm:$0xff]  }
  0x4b   :  { %1214 = vmatpush1.bf16.msra.mxu0 %v3507_v14  ;;  %1327 = vmatpush1.bf16.msra.mxu1 %v3510_v15  ;;  %v3611_v14 = vld [vmem:[%s5323_s0 + $0x4] ss:$8 sps:$4 sm:$0xff]   ;;  %v3603_v15 = vld [vmem:[%s5322_s3 + $0x1e0] ss:$16 sps:$4 sm:$0xff]  }
  0x4c   :  { %1215 = vmatprep.subr.bf16.mxu0 %v3515_v16  ;;  %1328 = vmatprep.subr.bf16.mxu1 %v3518_v17  ;;  %v3606_v16 = vld [vmem:[%s5322_s3 + $0x1e8] ss:$16 sps:$4 sm:$0xff]   ;;  %v3614_v17 = vld [vmem:[%s5324_s5 + $0x4] ss:$16 sps:$4 sm:$0xff]  }
  0x4d   :  { %635 = vmatprep.mubr.bf16.mxu0 %v3519_v18  ;;  %748 = vmatprep.mubr.bf16.mxu1 %v3519_v18  ;;  %v3617_v18 = vld [vmem:[%s5324_s5 + $0xc] ss:$16 sps:$4 sm:$0xff]  }
  0x4f   :  { %1216 = vmatpush1.bf16.msra.mxu0 %v3513_v19  ;;  %1329 = vmatpush1.bf16.msra.mxu1 %v3516_v20  ;;  %v3609_v19 = vld [vmem:[%s5323_s0] ss:$8 sps:$4 sm:$0xff]  }
  0x50   :  { %1217 = vmatprep.subr.bf16.mxu0 %v3524_v21  ;;  %1330 = vmatprep.subr.bf16.mxu1 %v3527_v22  ;;  %v3612_v20 = vld [vmem:[%s5324_s5] ss:$16 sps:$4 sm:$0xff]   ;;  %v3615_v21 = vld [vmem:[%s5324_s5 + $0x8] ss:$16 sps:$4 sm:$0xff]   ;;  %v3620_v22 = vld [vmem:[%s5324_s5 + $0x24] ss:$16 sps:$4 sm:$0xff]  }
  0x52   :  { %636 = vmatmul.mubr.bf16.gmra.mrb[8].mxu0 %v3521_v23  ;;  %749 = vmatmul.mubr.bf16.gmra.mrb[8].mxu1 %v3521_v23  ;;  %v3623_v23 = vld [vmem:[%s5324_s5 + $0x2c] ss:$16 sps:$4 sm:$0xff]  }
  0x53   :  { %1218 = vmatpush1.bf16.msra.mxu0 %v3522_v24  ;;  %1331 = vmatpush1.bf16.msra.mxu1 %v3525_v25  ;;  %v3624_v24 = vld [vmem:[%s5323_s0 + $0x14] ss:$8 sps:$4 sm:$0xff]   ;;  %v3618_v25 = vld [vmem:[%s5324_s5 + $0x20] ss:$16 sps:$4 sm:$0xff]  }
  0x54   :  { %1219 = vmatprep.subr.bf16.mxu0 %v3530_v26  ;;  %1332 = vmatprep.subr.bf16.mxu1 %v3533_v27  ;;  %v3621_v26 = vld [vmem:[%s5324_s5 + $0x28] ss:$16 sps:$4 sm:$0xff]   ;;  %v3629_v27 = vld [vmem:[%s5324_s5 + $0x44] ss:$16 sps:$4 sm:$0xff]  }
  0x55   :  { %645 = vmatprep.mubr.bf16.mxu0 %v3534_v28  ;;  %758 = vmatprep.mubr.bf16.mxu1 %v3534_v28  ;;  %v3632_v28 = vld [vmem:[%s5324_s5 + $0x4c] ss:$16 sps:$4 sm:$0xff]  }
  0x57   :  { %1220 = vmatpush1.bf16.msra.mxu0 %v3528_v29  ;;  %1333 = vmatpush1.bf16.msra.mxu1 %v3531_v30  ;;  %v3626_v29 = vld [vmem:[%s5323_s0 + $0x10] ss:$8 sps:$4 sm:$0xff]  }
  0x58   :  { %1221 = vmatprep.subr.bf16.mxu0 %v3539_v31  ;;  %1334 = vmatprep.subr.bf16.mxu1 %v3542_v32  ;;  %v3627_v30 = vld [vmem:[%s5324_s5 + $0x40] ss:$16 sps:$4 sm:$0xff]   ;;  %v3630_v31 = vld [vmem:[%s5324_s5 + $0x48] ss:$16 sps:$4 sm:$0xff]   ;;  %v3635_v32 = vld [vmem:[%s5324_s5 + $0x64] ss:$16 sps:$4 sm:$0xff]  }
  0x5a   :  { %646 = vmatmul.mubr.bf16.gmra.mrb[12].mxu0 %v3536_v33  ;;  %759 = vmatmul.mubr.bf16.gmra.mrb[12].mxu1 %v3536_v33  ;;  %v3638_v33 = vld [vmem:[%s5324_s5 + $0x6c] ss:$16 sps:$4 sm:$0xff]  }
  0x5b   :  { %1222 = vmatpush1.bf16.msra.mxu0 %v3537_v34  ;;  %1335 = vmatpush1.bf16.msra.mxu1 %v3540_v35  ;;  %v3639_v34 = vld [vmem:[%s5323_s0 + $0x24] ss:$8 sps:$4 sm:$0xff]   ;;  %v3633_v35 = vld [vmem:[%s5324_s5 + $0x60] ss:$16 sps:$4 sm:$0xff]  }
  0x5c   :  { %1223 = vmatprep.subr.bf16.mxu0 %v3545_v36  ;;  %1336 = vmatprep.subr.bf16.mxu1 %v3548_v37  ;;  %v3636_v36 = vld [vmem:[%s5324_s5 + $0x68] ss:$16 sps:$4 sm:$0xff]   ;;  %v3644_v37 = vld [vmem:[%s5324_s5 + $0x84] ss:$16 sps:$4 sm:$0xff]  }
  0x5d   :  { %655 = vmatprep.mubr.bf16.mxu0 %v3549_v38  ;;  %768 = vmatprep.mubr.bf16.mxu1 %v3549_v38  ;;  %v3647_v38 = vld [vmem:[%s5324_s5 + $0x8c] ss:$16 sps:$4 sm:$0xff]  }
  0x5f   :  { %1224 = vmatpush1.bf16.msra.mxu0 %v3543_v39  ;;  %1337 = vmatpush1.bf16.msra.mxu1 %v3546_v40  ;;  %v3641_v39 = vld [vmem:[%s5323_s0 + $0x20] ss:$8 sps:$4 sm:$0xff]  }
  0x60   :  { %1225 = vmatprep.subr.bf16.mxu0 %v3554_v41  ;;  %1338 = vmatprep.subr.bf16.mxu1 %v3557_v42  ;;  %v3642_v40 = vld [vmem:[%s5324_s5 + $0x80] ss:$16 sps:$4 sm:$0xff]   ;;  %v3645_v41 = vld [vmem:[%s5324_s5 + $0x88] ss:$16 sps:$4 sm:$0xff]   ;;  %v3650_v42 = vld [vmem:[%s5324_s5 + $0xa4] ss:$16 sps:$4 sm:$0xff]  }
  0x62   :  { %656 = vmatmul.mubr.bf16.gmra.mrb[16].mxu0 %v3551_v43  ;;  %769 = vmatmul.mubr.bf16.gmra.mrb[16].mxu1 %v3551_v43  ;;  %v3653_v43 = vld [vmem:[%s5324_s5 + $0xac] ss:$16 sps:$4 sm:$0xff]  }
  0x63   :  { %1226 = vmatpush1.bf16.msra.mxu0 %v3552_v44  ;;  %1339 = vmatpush1.bf16.msra.mxu1 %v3555_v45  ;;  %v3654_v44 = vld [vmem:[%s5323_s0 + $0x34] ss:$8 sps:$4 sm:$0xff]   ;;  %v3648_v45 = vld [vmem:[%s5324_s5 + $0xa0] ss:$16 sps:$4 sm:$0xff]  }
  0x64   :  { %1227 = vmatprep.subr.bf16.mxu0 %v3560_v46  ;;  %1340 = vmatprep.subr.bf16.mxu1 %v3563_v47  ;;  %v3651_v46 = vld [vmem:[%s5324_s5 + $0xa8] ss:$16 sps:$4 sm:$0xff]   ;;  %v3659_v47 = vld [vmem:[%s5324_s5 + $0xc4] ss:$16 sps:$4 sm:$0xff]  }
  0x65   :  { %665 = vmatprep.mubr.bf16.mxu0 %v3564_v48  ;;  %778 = vmatprep.mubr.bf16.mxu1 %v3564_v48  ;;  %v3662_v48 = vld [vmem:[%s5324_s5 + $0xcc] ss:$16 sps:$4 sm:$0xff]  }
  0x67   :  { %1228 = vmatpush1.bf16.msra.mxu0 %v3558_v49  ;;  %1341 = vmatpush1.bf16.msra.mxu1 %v3561_v50  ;;  %v3656_v49 = vld [vmem:[%s5323_s0 + $0x30] ss:$8 sps:$4 sm:$0xff]  }
  0x68   :  { %1229 = vmatprep.subr.bf16.mxu0 %v3569_v51  ;;  %1342 = vmatprep.subr.bf16.mxu1 %v3572_v52  ;;  %v3657_v50 = vld [vmem:[%s5324_s5 + $0xc0] ss:$16 sps:$4 sm:$0xff]   ;;  %v3660_v51 = vld [vmem:[%s5324_s5 + $0xc8] ss:$16 sps:$4 sm:$0xff]   ;;  %v3665_v52 = vld [vmem:[%s5324_s5 + $0xe4] ss:$16 sps:$4 sm:$0xff]  }
  0x6a   :  { %666 = vmatmul.mubr.bf16.gmra.mrb[20].mxu0 %v3566_v53  ;;  %779 = vmatmul.mubr.bf16.gmra.mrb[20].mxu1 %v3566_v53  ;;  %v3668_v53 = vld [vmem:[%s5324_s5 + $0xec] ss:$16 sps:$4 sm:$0xff]  }
  0x6b   :  { %1230 = vmatpush1.bf16.msra.mxu0 %v3567_v54  ;;  %1343 = vmatpush1.bf16.msra.mxu1 %v3570_v55  ;;  %v3669_v54 = vld [vmem:[%s5323_s0 + $0x44] ss:$8 sps:$4 sm:$0xff]   ;;  %v3663_v55 = vld [vmem:[%s5324_s5 + $0xe0] ss:$16 sps:$4 sm:$0xff]  }
  0x6c   :  { %1231 = vmatprep.subr.bf16.mxu0 %v3575_v56  ;;  %1344 = vmatprep.subr.bf16.mxu1 %v3578_v57  ;;  %v3666_v56 = vld [vmem:[%s5324_s5 + $0xe8] ss:$16 sps:$4 sm:$0xff]   ;;  %v3674_v57 = vld [vmem:[%s5324_s5 + $0x104] ss:$16 sps:$4 sm:$0xff]  }
  0x6d   :  { %675 = vmatprep.mubr.bf16.mxu0 %v3579_v58  ;;  %788 = vmatprep.mubr.bf16.mxu1 %v3579_v58  ;;  %v3677_v58 = vld [vmem:[%s5324_s5 + $0x10c] ss:$16 sps:$4 sm:$0xff]  }
  0x6f   :  { %1232 = vmatpush1.bf16.msra.mxu0 %v3573_v59  ;;  %1345 = vmatpush1.bf16.msra.mxu1 %v3576_v60  ;;  %v3671_v59 = vld [vmem:[%s5323_s0 + $0x40] ss:$8 sps:$4 sm:$0xff]  }
  0x70   :  { %1233 = vmatprep.subr.bf16.mxu0 %v3584_v61  ;;  %1346 = vmatprep.subr.bf16.mxu1 %v3587_v62  ;;  %v3672_v60 = vld [vmem:[%s5324_s5 + $0x100] ss:$16 sps:$4 sm:$0xff]   ;;  %v3675_v61 = vld [vmem:[%s5324_s5 + $0x108] ss:$16 sps:$4 sm:$0xff]   ;;  %v3680_v62 = vld [vmem:[%s5324_s5 + $0x124] ss:$16 sps:$4 sm:$0xff]  }
  0x72   :  { %676 = vmatmul.mubr.bf16.gmra.mrb[24].mxu0 %v3581_v63  ;;  %789 = vmatmul.mubr.bf16.gmra.mrb[24].mxu1 %v3581_v63  ;;  %v3683_v63 = vld [vmem:[%s5324_s5 + $0x12c] ss:$16 sps:$4 sm:$0xff]  }
  0x73   :  { %1234 = vmatpush1.bf16.msra.mxu0 %v3582_v0  ;;  %1347 = vmatpush1.bf16.msra.mxu1 %v3585_v1  ;;  %v3684_v0 = vld [vmem:[%s5323_s0 + $0x54] ss:$8 sps:$4 sm:$0xff]   ;;  %v3678_v1 = vld [vmem:[%s5324_s5 + $0x120] ss:$16 sps:$4 sm:$0xff]  }
  0x74   :  { %1235 = vmatprep.subr.bf16.mxu0 %v3590_v2  ;;  %1348 = vmatprep.subr.bf16.mxu1 %v3593_v3  ;;  %v3681_v2 = vld [vmem:[%s5324_s5 + $0x128] ss:$16 sps:$4 sm:$0xff]   ;;  %v3689_v3 = vld [vmem:[%s5324_s5 + $0x144] ss:$16 sps:$4 sm:$0xff]  }
  0x75   :  { %685 = vmatprep.mubr.bf16.mxu0 %v3594_v4  ;;  %798 = vmatprep.mubr.bf16.mxu1 %v3594_v4  ;;  %v3692_v4 = vld [vmem:[%s5324_s5 + $0x14c] ss:$16 sps:$4 sm:$0xff]  }
  0x77   :  { %1236 = vmatpush1.bf16.msra.mxu0 %v3588_v5  ;;  %1349 = vmatpush1.bf16.msra.mxu1 %v3591_v6  ;;  %v3686_v5 = vld [vmem:[%s5323_s0 + $0x50] ss:$8 sps:$4 sm:$0xff]  }
  0x78   :  { %1237 = vmatprep.subr.bf16.mxu0 %v3599_v7  ;;  %1350 = vmatprep.subr.bf16.mxu1 %v3602_v8  ;;  %v3687_v6 = vld [vmem:[%s5324_s5 + $0x140] ss:$16 sps:$4 sm:$0xff]   ;;  %v3690_v7 = vld [vmem:[%s5324_s5 + $0x148] ss:$16 sps:$4 sm:$0xff]   ;;  %v3695_v8 = vld [vmem:[%s5324_s5 + $0x164] ss:$16 sps:$4 sm:$0xff]  }
  0x7a   :  { %686 = vmatmul.mubr.bf16.gmra.mrb[28].mxu0 %v3596_v9  ;;  %799 = vmatmul.mubr.bf16.gmra.mrb[28].mxu1 %v3596_v9  ;;  %v3698_v9 = vld [vmem:[%s5324_s5 + $0x16c] ss:$16 sps:$4 sm:$0xff]  }
  0x7b   :  { %1238 = vmatpush1.bf16.msra.mxu0 %v3597_v10  ;;  %1351 = vmatpush1.bf16.msra.mxu1 %v3600_v11  ;;  %v3699_v10 = vld [vmem:[%s5323_s0 + $0x64] ss:$8 sps:$4 sm:$0xff]   ;;  %v3693_v11 = vld [vmem:[%s5324_s5 + $0x160] ss:$16 sps:$4 sm:$0xff]  }
  0x7c   :  { %1239 = vmatprep.subr.bf16.mxu0 %v3605_v12  ;;  %1352 = vmatprep.subr.bf16.mxu1 %v3608_v13  ;;  %v3696_v12 = vld [vmem:[%s5324_s5 + $0x168] ss:$16 sps:$4 sm:$0xff]   ;;  %v3704_v13 = vld [vmem:[%s5324_s5 + $0x184] ss:$16 sps:$4 sm:$0xff]  }
  0x7d   :  { %1241 = vmatprep.mubr.bf16.mxu0 %v3611_v14  ;;  %1354 = vmatprep.mubr.bf16.mxu1 %v3611_v14  ;;  %v3707_v14 = vld [vmem:[%s5324_s5 + $0x18c] ss:$16 sps:$4 sm:$0xff]  }
  0x7f   :  { %1240 = vmatpush1.bf16.msra.mxu0 %v3603_v15  ;;  %1353 = vmatpush1.bf16.msra.mxu1 %v3606_v16  ;;  %v3701_v15 = vld [vmem:[%s5323_s0 + $0x60] ss:$8 sps:$4 sm:$0xff]  }
  0x80   :  { %1915 = vmatprep.subr.bf16.mxu0 %v3614_v17  ;;  %2028 = vmatprep.subr.bf16.mxu1 %v3617_v18  ;;  %v3702_v16 = vld [vmem:[%s5324_s5 + $0x180] ss:$16 sps:$4 sm:$0xff]   ;;  %v3705_v17 = vld [vmem:[%s5324_s5 + $0x188] ss:$16 sps:$4 sm:$0xff]   ;;  %v3710_v18 = vld [vmem:[%s5324_s5 + $0x1a4] ss:$16 sps:$4 sm:$0xff]  }
  0x82   :  { %1242 = vmatmul.mubr.bf16.vlgmr.msra.gmra.mrb[0].mxu0 %v3609_v19  ;;  %1355 = vmatmul.mubr.bf16.vlgmr.msra.gmra.mrb[0].mxu1 %v3609_v19  ;;  %v3713_v19 = vld [vmem:[%s5324_s5 + $0x1ac] ss:$16 sps:$4 sm:$0xff]  }
  0x83   :  { %1916 = vmatpush1.bf16.msra.mxu0 %v3612_v20  ;;  %2029 = vmatpush1.bf16.msra.mxu1 %v3615_v21  ;;  %v3714_v20 = vld [vmem:[%s5323_s0 + $0x74] ss:$8 sps:$4 sm:$0xff]   ;;  %v3708_v21 = vld [vmem:[%s5324_s5 + $0x1a0] ss:$16 sps:$4 sm:$0xff]  }
  0x84   :  { %1917 = vmatprep.subr.bf16.mxu0 %v3620_v22  ;;  %2030 = vmatprep.subr.bf16.mxu1 %v3623_v23  ;;  %v3711_v22 = vld [vmem:[%s5324_s5 + $0x1a8] ss:$16 sps:$4 sm:$0xff]   ;;  %v3719_v23 = vld [vmem:[%s5324_s5 + $0x1c4] ss:$16 sps:$4 sm:$0xff]  }
  0x85   :  { %1251 = vmatprep.mubr.bf16.mxu0 %v3624_v24  ;;  %1364 = vmatprep.mubr.bf16.mxu1 %v3624_v24  ;;  %v3722_v24 = vld [vmem:[%s5324_s5 + $0x1cc] ss:$16 sps:$4 sm:$0xff]  }
  0x87   :  { %1918 = vmatpush1.bf16.msra.mxu0 %v3618_v25  ;;  %2031 = vmatpush1.bf16.msra.mxu1 %v3621_v26  ;;  %v3716_v25 = vld [vmem:[%s5323_s0 + $0x70] ss:$8 sps:$4 sm:$0xff]  }
  0x88   :  { %1919 = vmatprep.subr.bf16.mxu0 %v3629_v27  ;;  %2032 = vmatprep.subr.bf16.mxu1 %v3632_v28  ;;  %v3717_v26 = vld [vmem:[%s5324_s5 + $0x1c0] ss:$16 sps:$4 sm:$0xff]   ;;  %v3720_v27 = vld [vmem:[%s5324_s5 + $0x1c8] ss:$16 sps:$4 sm:$0xff]   ;;  %v3725_v28 = vld [vmem:[%s5324_s5 + $0x1e4] ss:$16 sps:$4 sm:$0xff]  }
  0x8a   :  { %1252 = vmatmul.mubr.bf16.gmra.mrb[4].mxu0 %v3626_v29  ;;  %1365 = vmatmul.mubr.bf16.gmra.mrb[4].mxu1 %v3626_v29  ;;  %v3728_v29 = vld [vmem:[%s5324_s5 + $0x1ec] ss:$16 sps:$4 sm:$0xff]  }
  0x8b   :  { %1920 = vmatpush1.bf16.msra.mxu0 %v3627_v30  ;;  %2033 = vmatpush1.bf16.msra.mxu1 %v3630_v31  ;;  %v3731_v30 = vld [vmem:[%s5325_s2 + $0x4] ss:$8 sps:$4 sm:$0xff]   ;;  %v3723_v31 = vld [vmem:[%s5324_s5 + $0x1e0] ss:$16 sps:$4 sm:$0xff]  }
  0x8c   :  { %1921 = vmatprep.subr.bf16.mxu0 %v3635_v32  ;;  %2034 = vmatprep.subr.bf16.mxu1 %v3638_v33  ;;  %v3726_v32 = vld [vmem:[%s5324_s5 + $0x1e8] ss:$16 sps:$4 sm:$0xff]  }
  0x8d   :  { %1261 = vmatprep.mubr.bf16.mxu0 %v3639_v34  ;;  %1374 = vmatprep.mubr.bf16.mxu1 %v3639_v34  ;;  %v3729_v33 = vld [vmem:[%s5325_s2] ss:$8 sps:$4 sm:$0xff]   ;;  %v3732_v34 = vld [vmem:[%s5325_s2 + $0x14] ss:$8 sps:$4 sm:$0xff]  }
  0x8f   :  { %1922 = vmatpush1.bf16.msra.mxu0 %v3633_v35  ;;  %2035 = vmatpush1.bf16.msra.mxu1 %v3636_v36  ;;  %v3734_v35 = vld [vmem:[%s5325_s2 + $0x10] ss:$8 sps:$4 sm:$0xff]   ;;  %v3735_v36 = vld [vmem:[%s5325_s2 + $0x24] ss:$8 sps:$4 sm:$0xff]  }
  0x90   :  { %1923 = vmatprep.subr.bf16.mxu0 %v3644_v37  ;;  %2036 = vmatprep.subr.bf16.mxu1 %v3647_v38  ;;  %v3737_v37 = vld [vmem:[%s5325_s2 + $0x20] ss:$8 sps:$4 sm:$0xff]   ;;  %v3738_v38 = vld [vmem:[%s5325_s2 + $0x34] ss:$8 sps:$4 sm:$0xff]  }
  0x92   :  { %1262 = vmatmul.mubr.bf16.gmra.mrb[8].mxu0 %v3641_v39  ;;  %1375 = vmatmul.mubr.bf16.gmra.mrb[8].mxu1 %v3641_v39  ;;  %v3740_v39 = vld [vmem:[%s5325_s2 + $0x30] ss:$8 sps:$4 sm:$0xff]  }
  0x93   :  { %1924 = vmatpush1.bf16.msra.mxu0 %v3642_v40  ;;  %2037 = vmatpush1.bf16.msra.mxu1 %v3645_v41  ;;  %v3741_v40 = vld [vmem:[%s5325_s2 + $0x44] ss:$8 sps:$4 sm:$0xff]   ;;  %v3743_v41 = vld [vmem:[%s5325_s2 + $0x40] ss:$8 sps:$4 sm:$0xff]  }
  0x94   :  { %1925 = vmatprep.subr.bf16.mxu0 %v3650_v42  ;;  %2038 = vmatprep.subr.bf16.mxu1 %v3653_v43  ;;  %v3744_v42 = vld [vmem:[%s5325_s2 + $0x54] ss:$8 sps:$4 sm:$0xff]   ;;  %v3746_v43 = vld [vmem:[%s5325_s2 + $0x50] ss:$8 sps:$4 sm:$0xff]  }
  0x95   :  { %1271 = vmatprep.mubr.bf16.mxu0 %v3654_v44  ;;  %1384 = vmatprep.mubr.bf16.mxu1 %v3654_v44  ;;  %v3747_v44 = vld [vmem:[%s5325_s2 + $0x64] ss:$8 sps:$4 sm:$0xff]  }
  0x97   :  { %1926 = vmatpush1.bf16.msra.mxu0 %v3648_v45  ;;  %2039 = vmatpush1.bf16.msra.mxu1 %v3651_v46  ;;  %v3749_v45 = vld [vmem:[%s5325_s2 + $0x60] ss:$8 sps:$4 sm:$0xff]   ;;  %v3750_v46 = vld [vmem:[%s5325_s2 + $0x74] ss:$8 sps:$4 sm:$0xff]  }
  0x98   :  { %1927 = vmatprep.subr.bf16.mxu0 %v3659_v47  ;;  %2040 = vmatprep.subr.bf16.mxu1 %v3662_v48  ;;  %v3752_v47 = vld [vmem:[%s5325_s2 + $0x70] ss:$8 sps:$4 sm:$0xff]  }
  0x9a   :  { %1272 = vmatmul.mubr.bf16.gmra.mrb[12].mxu0 %v3656_v49  ;;  %1385 = vmatmul.mubr.bf16.gmra.mrb[12].mxu1 %v3656_v49 }
  0x9b   :  { %1928 = vmatpush1.bf16.msra.mxu0 %v3657_v50  ;;  %2041 = vmatpush1.bf16.msra.mxu1 %v3660_v51 }
  0x9c   :  { %1929 = vmatprep.subr.bf16.mxu0 %v3665_v52  ;;  %2042 = vmatprep.subr.bf16.mxu1 %v3668_v53 }
  0x9d   :  { %1281 = vmatprep.mubr.bf16.mxu0 %v3669_v54  ;;  %1394 = vmatprep.mubr.bf16.mxu1 %v3669_v54 }
  0x9f   :  { %1930 = vmatpush1.bf16.msra.mxu0 %v3663_v55  ;;  %2043 = vmatpush1.bf16.msra.mxu1 %v3666_v56 }
  0xa0   :  { %1931 = vmatprep.subr.bf16.mxu0 %v3674_v57  ;;  %2044 = vmatprep.subr.bf16.mxu1 %v3677_v58 }
  0xa2   :  { %1282 = vmatmul.mubr.bf16.gmra.mrb[16].mxu0 %v3671_v59  ;;  %1395 = vmatmul.mubr.bf16.gmra.mrb[16].mxu1 %v3671_v59 }
  0xa3   :  { %1932 = vmatpush1.bf16.msra.mxu0 %v3672_v60  ;;  %2045 = vmatpush1.bf16.msra.mxu1 %v3675_v61 }
  0xa4   :  { %1933 = vmatprep.subr.bf16.mxu0 %v3680_v62  ;;  %2046 = vmatprep.subr.bf16.mxu1 %v3683_v63 }
  0xa5   :  { %1291 = vmatprep.mubr.bf16.mxu0 %v3684_v0  ;;  %1404 = vmatprep.mubr.bf16.mxu1 %v3684_v0 }
  0xa7   :  { %1934 = vmatpush1.bf16.msra.mxu0 %v3678_v1  ;;  %2047 = vmatpush1.bf16.msra.mxu1 %v3681_v2 }
  0xa8   :  { %1935 = vmatprep.subr.bf16.mxu0 %v3689_v3  ;;  %2048 = vmatprep.subr.bf16.mxu1 %v3692_v4 }
  0xaa   :  { %1292 = vmatmul.mubr.bf16.gmra.mrb[20].mxu0 %v3686_v5  ;;  %1405 = vmatmul.mubr.bf16.gmra.mrb[20].mxu1 %v3686_v5 }
  0xab   :  { %1936 = vmatpush1.bf16.msra.mxu0 %v3687_v6  ;;  %2049 = vmatpush1.bf16.msra.mxu1 %v3690_v7 }
  0xac   :  { %1937 = vmatprep.subr.bf16.mxu0 %v3695_v8  ;;  %2050 = vmatprep.subr.bf16.mxu1 %v3698_v9 }
  0xad   :  { %1301 = vmatprep.mubr.bf16.mxu0 %v3699_v10  ;;  %1414 = vmatprep.mubr.bf16.mxu1 %v3699_v10 }
  0xaf   :  { %1938 = vmatpush1.bf16.msra.mxu0 %v3693_v11  ;;  %2051 = vmatpush1.bf16.msra.mxu1 %v3696_v12 }
  0xb0   :  { %1939 = vmatprep.subr.bf16.mxu0 %v3704_v13  ;;  %2052 = vmatprep.subr.bf16.mxu1 %v3707_v14 }
  0xb2   :  { %1302 = vmatmul.mubr.bf16.gmra.mrb[24].mxu0 %v3701_v15  ;;  %1415 = vmatmul.mubr.bf16.gmra.mrb[24].mxu1 %v3701_v15 }
  0xb3   :  { %1940 = vmatpush1.bf16.msra.mxu0 %v3702_v16  ;;  %2053 = vmatpush1.bf16.msra.mxu1 %v3705_v17 }
  0xb4   :  { %1941 = vmatprep.subr.bf16.mxu0 %v3710_v18  ;;  %2054 = vmatprep.subr.bf16.mxu1 %v3713_v19 }
  0xb5   :  { %1311 = vmatprep.mubr.bf16.mxu0 %v3714_v20  ;;  %1424 = vmatprep.mubr.bf16.mxu1 %v3714_v20 }
  0xb7   :  { %1942 = vmatpush1.bf16.msra.mxu0 %v3708_v21  ;;  %2055 = vmatpush1.bf16.msra.mxu1 %v3711_v22 }
  0xb8   :  { %1943 = vmatprep.subr.bf16.mxu0 %v3719_v23  ;;  %2056 = vmatprep.subr.bf16.mxu1 %v3722_v24 }
  0xba   :  { %1312 = vmatmul.mubr.bf16.gmra.mrb[28].mxu0 %v3716_v25  ;;  %1425 = vmatmul.mubr.bf16.gmra.mrb[28].mxu1 %v3716_v25 }
  0xbb   :  { %1944 = vmatpush1.bf16.msra.mxu0 %v3717_v26  ;;  %2057 = vmatpush1.bf16.msra.mxu1 %v3720_v27 }
  0xbc   :  { %1945 = vmatprep.subr.bf16.mxu0 %v3725_v28  ;;  %2058 = vmatprep.subr.bf16.mxu1 %v3728_v29 }
  0xbd   :  { %1947 = vmatprep.mubr.bf16.mxu0 %v3731_v30  ;;  %2060 = vmatprep.mubr.bf16.mxu1 %v3731_v30 }
  0xbf   :  { %1946 = vmatpush1.bf16.msra.mxu0 %v3723_v31  ;;  %2059 = vmatpush1.bf16.msra.mxu1 %v3726_v32 }
  0xc2   :  { %1948 = vmatmul.mubr.bf16.vlgmr.msra.gmra.mrb[0].mxu0 %v3729_v33  ;;  %2061 = vmatmul.mubr.bf16.vlgmr.msra.gmra.mrb[0].mxu1 %v3729_v33 }
  0xc3   :  { %1957 = vmatprep.mubr.bf16.mxu0 %v3732_v34  ;;  %2070 = vmatprep.mubr.bf16.mxu1 %v3732_v34 }
  0xca   :  { %1958 = vmatmul.mubr.bf16.gmra.mrb[4].mxu0 %v3734_v35  ;;  %2071 = vmatmul.mubr.bf16.gmra.mrb[4].mxu1 %v3734_v35 }
  0xcb   :  { %1967 = vmatprep.mubr.bf16.mxu0 %v3735_v36  ;;  %2080 = vmatprep.mubr.bf16.mxu1 %v3735_v36 }
  0xd2   :  { %1968 = vmatmul.mubr.bf16.gmra.mrb[8].mxu0 %v3737_v37  ;;  %2081 = vmatmul.mubr.bf16.gmra.mrb[8].mxu1 %v3737_v37 }
  0xd3   :  { %1977 = vmatprep.mubr.bf16.mxu0 %v3738_v38  ;;  %2090 = vmatprep.mubr.bf16.mxu1 %v3738_v38 }
  0xda   :  { %1978 = vmatmul.mubr.bf16.gmra.mrb[12].mxu0 %v3740_v39  ;;  %2091 = vmatmul.mubr.bf16.gmra.mrb[12].mxu1 %v3740_v39 }
  0xdb   :  { %1987 = vmatprep.mubr.bf16.mxu0 %v3741_v40  ;;  %2100 = vmatprep.mubr.bf16.mxu1 %v3741_v40 }
  0xe2   :  { %1988 = vmatmul.mubr.bf16.gmra.mrb[16].mxu0 %v3743_v41  ;;  %2101 = vmatmul.mubr.bf16.gmra.mrb[16].mxu1 %v3743_v41 }
  0xe3   :  { %1997 = vmatprep.mubr.bf16.mxu0 %v3744_v42  ;;  %2110 = vmatprep.mubr.bf16.mxu1 %v3744_v42 }
  0xea   :  { %1998 = vmatmul.mubr.bf16.gmra.mrb[20].mxu0 %v3746_v43  ;;  %2111 = vmatmul.mubr.bf16.gmra.mrb[20].mxu1 %v3746_v43 }
  0xeb   :  { %2007 = vmatprep.mubr.bf16.mxu0 %v3747_v44  ;;  %2120 = vmatprep.mubr.bf16.mxu1 %v3747_v44 }
  0xf2   :  { %2008 = vmatmul.mubr.bf16.gmra.mrb[24].mxu0 %v3749_v45  ;;  %2121 = vmatmul.mubr.bf16.gmra.mrb[24].mxu1 %v3749_v45 }
  0xf3   :  { %2017 = vmatprep.mubr.bf16.mxu0 %v3750_v46  ;;  %2130 = vmatprep.mubr.bf16.mxu1 %v3750_v46 }
  0xfa   :  { %2018 = vmatmul.mubr.bf16.gmra.mrb[28].mxu0 %v3752_v47  ;;  %2131 = vmatmul.mubr.bf16.gmra.mrb[28].mxu1 %v3752_v47 }
 0x195   :  { %v1949_v48 = vpop.f32.mrb[0].mxu0  ;;  %v4764_v49 = vpop.f32.mrb[0].mxu1 }
 0x196   :  { %v2205_v50 = vsub.f32 0.0, %v1949_v48  ;;  %v2429_v51 = vmin.f32 %v4764_v49, 20.0  ;;  %v1951_v52 = vpop.f32.mrb[1].mxu0  ;;  %v4767_v53 = vpop.f32.mrb[1].mxu1  ;;  %vm2397_vm0 = vcmp.gt.f32.partialorder %v4764_v49, 20.0 }
 0x197   :  { %v2206_v54 = vsub.f32 0.0, %v1951_v52  ;;  %v2430_v55 = vmin.f32 %v4767_v53, 20.0  ;;  %v1953_v56 = vpop.f32.mrb[2].mxu0  ;;  %v4770_v57 = vpop.f32.mrb[2].mxu1  ;;  %vm2398_vm1 = vcmp.gt.f32.partialorder %v4767_v53, 20.0 }
 0x198   :  { %v2237_v58 = vmul.f32 1.442695, %v2205_v50  ;;  %v2461_v59 = vmul.f32 1.442695, %v2429_v51  ;;  %v2207_v60 = vsub.f32 0.0, %v1953_v56  ;;  %v2431_v63 = vmin.f32 %v4770_v57, 20.0 }
 0x199   :  { %v2239_v61 = vmul.f32 1.442695, %v2206_v54  ;;  %v2463_v62 = vmul.f32 1.442695, %v2430_v55  ;;  %v1955_v0 = vpop.f32.mrb[3].mxu0  ;;  %v4773_v3 = vpop.f32.mrb[3].mxu1 }
 0x19a   :  { %3753 = vpow2.f32 %v2237_v58  ;;  %v2241_v1 = vmul.f32 1.442695, %v2207_v60  ;;  %v2208_v2 = vsub.f32 0.0, %v1955_v0  ;;  %v2465_v4 = vmul.f32 1.442695, %v2431_v63 }
 0x19b   :  { %3755 = vpow2.f32 %v2461_v59  ;;  %v2432_v5 = vmin.f32 %v4773_v3, 20.0  ;;  %vm2399_vm4 = vcmp.gt.f32.partialorder %v4770_v57, 20.0  ;;  %vm2400_vm7 = vcmp.gt.f32.partialorder %v4773_v3, 20.0 }
 0x19c   :  { %3757 = vpow2.f32 %v2239_v61  ;;  %v2243_v6 = vmul.f32 1.442695, %v2208_v2 }
 0x19d   :  { %3759 = vpow2.f32 %v2463_v62  ;;  %v2467_v7 = vmul.f32 1.442695, %v2432_v5  ;;  %v1959_v8 = vpop.f32.mrb[4].mxu0  ;;  %v4776_v9 = vpop.f32.mrb[4].mxu1 }
 0x19e   :  { %3761 = vpow2.f32 %v2241_v1  ;;  %v2209_v10 = vsub.f32 0.0, %v1959_v8  ;;  %v2433_v11 = vmin.f32 %v4776_v9, 20.0  ;;  %v1961_v12 = vpop.f32.mrb[5].mxu0  ;;  %v4779_v13 = vpop.f32.mrb[5].mxu1  ;;  %vm2401_vm8 = vcmp.gt.f32.partialorder %v4776_v9, 20.0 }
 0x19f   :  { %3763 = vpow2.f32 %v2465_v4  ;;  %v2210_v14 = vsub.f32 0.0, %v1961_v12  ;;  %v2434_v15 = vmin.f32 %v4779_v13, 20.0  ;;  %v1963_v16 = vpop.f32.mrb[6].mxu0  ;;  %v4782_v17 = vpop.f32.mrb[6].mxu1  ;;  %vm2402_vm9 = vcmp.gt.f32.partialorder %v4779_v13, 20.0 }
 0x1a0   :  { %3765 = vpow2.f32 %v2243_v6  ;;  %v2245_v18 = vmul.f32 1.442695, %v2209_v10  ;;  %v2469_v19 = vmul.f32 1.442695, %v2433_v11  ;;  %v1965_v20 = vpop.f32.mrb[7].mxu0  ;;  %v2211_v23 = vsub.f32 0.0, %v1963_v16 }
 0x1a1   :  { %3767 = vpow2.f32 %v2467_v7  ;;  %v2247_v21 = vmul.f32 1.442695, %v2210_v14  ;;  %v2471_v22 = vmul.f32 1.442695, %v2434_v15  ;;  %v4784_v24 = vpop.f32.mrb[7].mxu1  ;;  %v2435_v26 = vmin.f32 %v4782_v17, 20.0 }
 0x1a2   :  { %3769 = vpow2.f32 %v2245_v18  ;;  %v2249_v28 = vmul.f32 1.442695, %v2211_v23  ;;  %v2212_v29 = vsub.f32 0.0, %v1965_v20  ;;  %v2436_v39 = vmin.f32 %v4784_v24, 20.0 }
 0x1a3   :  { %3771 = vpow2.f32 %v2469_v19  ;;  %v4807_v44 = vmul.f32 1.442695, %v2435_v26  ;;  %vm2403_vm12 = vcmp.gt.f32.partialorder %v4782_v17, 20.0  ;;  %vm2404_vm14 = vcmp.gt.f32.partialorder %v4784_v24, 20.0 }
 0x1a4   :  { %v3754_v25 = vpop.eup %3753  ;;  %3773 = vpow2.f32 %v2247_v21  ;;  %v4814_v51 = vmul.f32 1.442695, %v2212_v29  ;;  %v4817_v61 = vmul.f32 1.442695, %v2436_v39 }
 0x1a5   :  { %v4787_v27 = vpop.eup %3755  ;;  %3775 = vpow2.f32 %v2471_v22  ;;  %v4789_v30 = vpop.f32.mrb[8].mxu0  ;;  %v2301_v37 = vadd.f32 1.0, %v3754_v25 }
 0x1a6   :  { %v4791_v31 = vpop.f32.mrb[8].mxu1  ;;  %v3758_v32 = vpop.eup %3757  ;;  %v2525_v33 = vadd.f32 1.0, %v4787_v27  ;;  %v2528_v38 = vmul.f32 -0.5, %v4787_v27  ;;  %v2531_v60 = vand.u32 2147483647, %v4787_v27  ;;  %v2213_v20 = vsub.f32 0.0, %v4789_v30 }
 0x1a7   :  { %v4794_v34 = vpop.f32.mrb[9].mxu0  ;;  %v4796_v35 = vpop.f32.mrb[9].mxu1  ;;  %v2302_v48 = vadd.f32 1.0, %v3758_v32 }
 0x1a8   :  { %v4798_v36 = vpop.eup %3759  ;;  %v4802_v40 = vpop.f32.mrb[10].mxu0  ;;  %3777 = vlog2.f32 %v2525_v33  ;;  %v2529_v59 = vadd.f32 1.0, %v2528_v38  ;;  %vm4845_vm2 = vcmp.lt.f32.partialorder %v2531_v60, 0.0004427343  ;;  %v2438_v30 = vmin.f32 %v4796_v35, 20.0 }
 0x1a9   :  { %v4804_v41 = vpop.f32.mrb[10].mxu1  ;;  %v3762_v42 = vpop.eup %3761  ;;  %v2534_v43 = vadd.f32 1.0, %v4798_v36  ;;  %v2537_v50 = vmul.f32 -0.5, %v4798_v36  ;;  %3779 = vpow2.f32 %v2249_v28  ;;  %v2540_v63 = vand.u32 2147483647, %v4798_v36 }
 0x1aa   :  { %v4809_v45 = vpop.f32.mrb[11].mxu0  ;;  %v4811_v46 = vpop.f32.mrb[11].mxu1  ;;  %v2303_v54 = vadd.f32 1.0, %v3762_v42  ;;  %v2530_v32 = vmul.f32 %v4787_v27, %v2529_v59 }
 0x1ab   :  { %v3764_v47 = vpop.eup %3763  ;;  %3781 = vlog2.f32 %v2534_v43  ;;  %v2538_v4 = vadd.f32 1.0, %v2537_v50  ;;  %vm4849_vm3 = vcmp.lt.f32.partialorder %v2540_v63, 0.0004427343 }
 0x1ac   :  { %v3766_v52 = vpop.eup %3765  ;;  %v2543_v55 = vadd.f32 1.0, %v3764_v47  ;;  %v2546_v56 = vmul.f32 -0.5, %v3764_v47  ;;  %3783 = vrcp.f32 %v2301_v37  ;;  %v2549_v5 = vand.u32 2147483647, %v3764_v47 }
 0x1ad   :  { %v3768_v58 = vpop.eup %3767  ;;  %v2304_v0 = vadd.f32 1.0, %v3766_v52  ;;  %v4823_v7 = vpop.f32.mrb[12].mxu0  ;;  %v2539_v39 = vmul.f32 %v4798_v36, %v2538_v4 }
 0x1ae   :  { %v3770_v62 = vpop.eup %3769  ;;  %3785 = vlog2.f32 %v2543_v55  ;;  %v2552_v1 = vadd.f32 1.0, %v3768_v58  ;;  %v2555_v6 = vmul.f32 -0.5, %v3768_v58  ;;  %v2547_v10 = vadd.f32 1.0, %v2546_v56  ;;  %v4826_v14 = vpop.f32.mrb[12].mxu1 }
 0x1af   :  { %v4820_v2 = vpop.eup %3771  ;;  %3787 = vrcp.f32 %v2302_v48  ;;  %v2305_v11 = vadd.f32 1.0, %v3770_v62  ;;  %v4828_v15 = vpop.f32.mrb[13].mxu0  ;;  %v2558_v19 = vand.u32 2147483647, %v3768_v58  ;;  %vm4857_vm5 = vcmp.lt.f32.partialorder %v2549_v5, 0.0004427343 }
 0x1b0   :  { %v3774_v8 = vpop.eup %3773  ;;  %3789 = vrcp.f32 %v2303_v54  ;;  %v2561_v12 = vadd.f32 1.0, %v4820_v2  ;;  %v2556_v18 = vadd.f32 1.0, %v2555_v6  ;;  %v4834_v21 = vpop.f32.mrb[13].mxu1  ;;  %v2564_v23 = vmul.f32 -0.5, %v4820_v2 }
 0x1b1   :  { %v4830_v16 = vpop.eup %3775  ;;  %3791 = vlog2.f32 %v2552_v1  ;;  %v4836_v22 = vpop.f32.mrb[14].mxu0  ;;  %v2306_v25 = vadd.f32 1.0, %v3774_v8  ;;  %v2548_v42 = vmul.f32 %v3764_v47, %v2547_v10  ;;  %vm4865_vm6 = vcmp.lt.f32.partialorder %v2558_v19, 0.0004427343 }
 0x1b2   :  { %3793 = vrcp.f32 %v2304_v0  ;;  %v2570_v26 = vadd.f32 1.0, %v4830_v16  ;;  %v4840_v28 = vpop.f32.mrb[14].mxu1  ;;  %v4842_v29 = vpop.f32.mrb[15].mxu0  ;;  %v4863_v50 = vmul.f32 %v3768_v58, %v2556_v18  ;;  %v2567_v54 = vand.u32 2147483647, %v4820_v2 }
 0x1b3   :  { %3795 = vlog2.f32 %v2561_v12  ;;  %v4854_v37 = vpop.f32.mrb[15].mxu1  ;;  %v3778_v38 = vpop.eup %3777  ;;  %v2565_v36 = vadd.f32 1.0, %v2564_v23  ;;  %v2253_v47 = vmul.f32 1.442695, %v2213_v20  ;;  %v2437_v56 = vmin.f32 %v4791_v31, 20.0 }
 0x1b4   :  { %3797 = vrcp.f32 %v2305_v11  ;;  %v4861_v27 = vpop.eup %3779  ;;  %v2527_v48 = vmul.f32 0.6931472, %v3778_v38  ;;  %v2573_v62 = vmul.f32 -0.5, %v4830_v16  ;;  %v2214_v6 = vsub.f32 0.0, %v4794_v34 }
 0x1b5   :  { %3799 = vlog2.f32 %v2570_v26  ;;  %v3782_v55 = vpop.eup %3781  ;;  %v4876_v63 = vpop.f32.mrb[16].mxu0  ;;  %v2477_v5 = vmul.f32 1.442695, %v2437_v56  ;;  %v2576_v20 = vand.u32 2147483647, %v4830_v16 }
 0x1b6   :  { %3801 = vrcp.f32 %v2306_v25  ;;  %v3784_v59 = vpop.eup %3783  ;;  %v2533_v58 = vsel %vm4845_vm2, %v2530_v32, %v2527_v48  ;;  %v2536_v60 = vmul.f32 0.6931472, %v3782_v55  ;;  %v4878_v0 = vpop.f32.mrb[16].mxu1  ;;  %v2255_v23 = vmul.f32 1.442695, %v2214_v6 }
 0x1b7   :  { %3803 = vpow2.f32 %v4807_v44  ;;  %v2813_v4 = vsel %vm2397_vm0, %v4764_v49, %v2533_v58  ;;  %v4886_v8 = vpop.f32.mrb[17].mxu0  ;;  %v4888_v10 = vpop.f32.mrb[17].mxu1  ;;  %v2574_v48 = vadd.f32 1.0, %v2573_v62  ;;  %v2215_v58 = vsub.f32 0.0, %v4802_v40 }
 0x1b8   :  { %v3786_v1 = vpop.eup %3785  ;;  %3805 = vpow2.f32 %v4814_v51  ;;  %v2845_v11 = vmul.f32 %v3784_v59, %v2813_v4  ;;  %v2542_v12 = vsel %vm4849_vm3, %v2539_v39, %v2536_v60  ;;  %v4893_v49 = vpop.f32.mrb[18].mxu0  ;;  %v2479_v59 = vmul.f32 1.442695, %v2438_v30 }
 0x1b9   :  { %v3788_v44 = vpop.eup %3787  ;;  %v2545_v18 = vmul.f32 0.6931472, %v3786_v1  ;;  %3807 = vpow2.f32 %v4817_v61  ;;  %v4895_v19 = vpop.f32.mrb[18].mxu1  ;;  %v2814_v34 = vsel %vm2398_vm1, %v4767_v53, %v2542_v12  ;;  %v2566_v1 = vmul.f32 %v4820_v2, %v2565_v36 }
 0x1ba   :  { %v3790_v51 = vpop.eup %3789  ;;  %3809 = vpow2.f32 %v2253_v47  ;;  %v4901_v25 = vpop.f32.mrb[19].mxu0  ;;  %v2846_v33 = vmul.f32 %v3788_v44, %v2814_v34  ;;  %vm2568_vm10 = vcmp.lt.f32.partialorder %v2567_v54, 0.0004427343  ;;  %v2307_v40 = vadd.f32 1.0, %v4861_v27 }
 0x1bb   :  { %v4903_v26 = vpop.f32.mrb[19].mxu1  ;;  %v3792_v32 = vpop.eup %3791  ;;  %v2551_v61 = vsel %vm4857_vm5, %v2548_v42, %v2545_v18  ;;  %3811 = vpow2.f32 %v2477_v5  ;;  %v2575_v6 = vmul.f32 %v4830_v16, %v2574_v48  ;;  %vm2577_vm11 = vcmp.lt.f32.partialorder %v2576_v20, 0.0004427343 }
 0x1bc   :  { %v3794_v38 = vpop.eup %3793  ;;  %v2815_v53 = vsel %vm2399_vm4, %v4770_v57, %v2551_v61  ;;  %v2554_v39 = vmul.f32 0.6931472, %v3792_v32  ;;  %3813 = vpow2.f32 %v2255_v23  ;;  %v3249_v47 = vpack.c.bf16 %v2846_v33, %v2845_v11 }
 0x1bd   :  { %v3796_v55 = vpop.eup %3795  ;;  %v2847_v56 = vmul.f32 %v3790_v51, %v2815_v53  ;;  %3815 = vpow2.f32 %v2479_v59  ;;  %v4924_v52 = vpop.f32.mrb[20].mxu0  ;;  %v2257_v27 = vmul.f32 1.442695, %v2215_v58  ;;  %v2439_v54 = vmin.f32 %v4804_v41, 20.0 }
 0x1be   :  { %v3798_v60 = vpop.eup %3797  ;;  %v2560_v42 = vsel %vm4865_vm6, %v4863_v50, %v2554_v39  ;;  %v2563_v43 = vmul.f32 0.6931472, %v3796_v55  ;;  %2973 = vst [vmem:[%s5326_s6] sm:$0xff] %v3249_v47  ;;  %v4926_v50 = vpop.f32.mrb[20].mxu1  ;;  %3817 = vrcp.f32 %v2307_v40  ;;  %v2440_v40 = vmin.f32 %v4811_v46, 20.0 }
 0x1bf   :  { %v3800_v57 = vpop.eup %3799  ;;  %v2816_v62 = vsel %vm2400_vm7, %v4773_v3, %v2560_v42  ;;  %v4929_v44 = vpop.f32.mrb[21].mxu0  ;;  %v2481_v59 = vmul.f32 1.442695, %v2439_v54  ;;  %v2217_v54 = vsub.f32 0.0, %v4823_v7  ;;  %vm2405_vm0 = vcmp.gt.f32.partialorder %v4791_v31, 20.0 }
 0x1c0   :  { %v3802_v2 = vpop.eup %3801  ;;  %v2848_v36 = vmul.f32 %v3794_v38, %v2816_v62  ;;  %v2569_v4 = vsel %vm2568_vm10, %v2566_v1, %v2563_v43  ;;  %v2572_v5 = vmul.f32 0.6931472, %v3800_v57  ;;  %v4931_v11 = vpop.f32.mrb[21].mxu1  ;;  %v2483_v7 = vmul.f32 1.442695, %v2440_v40 }
 0x1c1   :  { %v3804_v12 = vpop.eup %3803  ;;  %v2817_v3 = vsel %vm2401_vm8, %v4776_v9, %v2569_v4  ;;  %v4937_v18 = vpop.f32.mrb[22].mxu0  ;;  %vm2406_vm3 = vcmp.gt.f32.partialorder %v4796_v35, 20.0  ;;  %vm2407_vm4 = vcmp.gt.f32.partialorder %v4804_v41, 20.0  ;;  %vm2408_vm6 = vcmp.gt.f32.partialorder %v4811_v46, 20.0 }
 0x1c2   :  { %v3806_v51 = vpop.eup %3805  ;;  %v3250_v34 = vpack.c.bf16 %v2848_v36, %v2847_v56  ;;  %v2849_v23 = vmul.f32 %v3798_v60, %v2817_v3  ;;  %v2578_v32 = vsel %vm2577_vm11, %v2575_v6, %v2572_v5  ;;  %v2579_v16 = vadd.f32 1.0, %v3804_v12  ;;  %v4939_v33 = vpop.f32.mrb[22].mxu1 }
 0x1c3   :  { %v4941_v61 = vpop.f32.mrb[23].mxu0  ;;  %v3808_v30 = vpop.eup %3807  ;;  %v2818_v9 = vsel %vm2402_vm9, %v4779_v13, %v2578_v32  ;;  %v2582_v20 = vmul.f32 -0.5, %v3804_v12  ;;  %v2308_v48 = vadd.f32 1.0, %v3806_v51  ;;  %v2216_v13 = vsub.f32 0.0, %v4809_v45 }
 0x1c4   :  { %v4946_v38 = vpop.f32.mrb[23].mxu1  ;;  %v3810_v53 = vpop.eup %3809  ;;  %2974 = vst [vmem:[%s5326_s6 + $0x8] sm:$0xff] %v3250_v34  ;;  %v2850_v39 = vmul.f32 %v3802_v2, %v2818_v9  ;;  %3819 = vlog2.f32 %v2579_v16  ;;  %v2588_v55 = vadd.f32 1.0, %v3808_v30  ;;  %v2591_v56 = vmul.f32 -0.5, %v3808_v30 }
 0x1c5   :  { %v4951_v47 = vpop.eup %3811  ;;  %3821 = vpow2.f32 %v2257_v27  ;;  %v2585_v42 = vand.u32 2147483647, %v3804_v12  ;;  %v2309_v43 = vadd.f32 1.0, %v3810_v53  ;;  %v2583_v1 = vadd.f32 1.0, %v2582_v20  ;;  %v4957_v2 = vpop.f32.mrb[24].mxu0 }
 0x1c6   :  { %v3814_v58 = vpop.eup %3813  ;;  %v3251_v60 = vpack.c.bf16 %v2850_v39, %v2849_v23  ;;  %3823 = vlog2.f32 %v2588_v55  ;;  %v2597_v57 = vadd.f32 1.0, %v4951_v47  ;;  %v2600_v62 = vmul.f32 -0.5, %v4951_v47  ;;  %v4959_v36 = vpop.f32.mrb[24].mxu1 }
 0x1c7   :  { %3825 = vrcp.f32 %v2308_v48  ;;  %v2594_v45 = vand.u32 2147483647, %v3808_v30  ;;  %v4964_v4 = vpop.f32.mrb[25].mxu0  ;;  %v4966_v5 = vpop.f32.mrb[25].mxu1  ;;  %v2592_v3 = vadd.f32 1.0, %v2591_v56  ;;  %v2310_v27 = vadd.f32 1.0, %v3814_v58 }
 0x1c8   :  { %2975 = vst [vmem:[%s5326_s6 + $0x10] sm:$0xff] %v3251_v60  ;;  %v4968_v6 = vpop.eup %3815  ;;  %3827 = vlog2.f32 %v2597_v57  ;;  %v4972_v51 = vpop.f32.mrb[26].mxu0  ;;  %v2601_v23 = vadd.f32 1.0, %v2600_v62  ;;  %v2259_v16 = vmul.f32 1.442695, %v2216_v13  ;;  %v2584_v53 = vmul.f32 %v3804_v12, %v2583_v1 }
 0x1c9   :  { %v4974_v34 = vpop.f32.mrb[26].mxu1  ;;  %3829 = vrcp.f32 %v2309_v43  ;;  %v2606_v32 = vadd.f32 1.0, %v4968_v6  ;;  %v4977_v9 = vpop.f32.mrb[27].mxu0  ;;  %vm4981_vm13 = vcmp.lt.f32.partialorder %v2585_v42, 0.0004427343  ;;  %v2609_v55 = vmul.f32 -0.5, %v4968_v6 }
 0x1ca   :  { %v4979_v20 = vpop.f32.mrb[27].mxu1  ;;  %3831 = vpow2.f32 %v2481_v59  ;;  %vm4986_vm15 = vcmp.lt.f32.partialorder %v2594_v45, 0.0004427343  ;;  %v2261_v56 = vmul.f32 1.442695, %v2217_v54  ;;  %v3818_v13 = vpop.eup %3817  ;;  %v2593_v58 = vmul.f32 %v3808_v30, %v2592_v3 }
 0x1cb   :  { %3833 = vlog2.f32 %v2606_v32  ;;  %v2441_v12 = vmin.f32 %v4826_v14, 20.0  ;;  %v2218_v60 = vsub.f32 0.0, %v4828_v15  ;;  %v2602_v43 = vmul.f32 %v4951_v47, %v2601_v23 }
 0x1cc   :  { %3835 = vrcp.f32 %v2310_v27  ;;  %v2603_v59 = vand.u32 2147483647, %v4951_v47  ;;  %v2442_v1 = vmin.f32 %v4834_v21, 20.0  ;;  %v2610_v30 = vadd.f32 1.0, %v2609_v55 }
 0x1cd   :  { %3837 = vpow2.f32 %v2259_v16  ;;  %v2485_v40 = vmul.f32 1.442695, %v2441_v12  ;;  %v2263_v45 = vmul.f32 1.442695, %v2218_v60  ;;  %v2219_v27 = vsub.f32 0.0, %v4836_v22  ;;  %v4997_v15 = vpop.f32.mrb[28].mxu0 }
 0x1ce   :  { %v3820_v42 = vpop.eup %3819  ;;  %3839 = vpow2.f32 %v2483_v7  ;;  %v2487_v3 = vmul.f32 1.442695, %v2442_v1  ;;  %v4999_v32 = vpop.f32.mrb[28].mxu1  ;;  %v2443_v16 = vmin.f32 %v4840_v28, 20.0  ;;  %v2220_v60 = vsub.f32 0.0, %v4842_v29 }
 0x1cf   :  { %v3822_v57 = vpop.eup %3821  ;;  %v2581_v62 = vmul.f32 0.6931472, %v3820_v42  ;;  %3841 = vpow2.f32 %v2261_v56  ;;  %v5004_v7 = vpop.f32.mrb[29].mxu0  ;;  %v2265_v56 = vmul.f32 1.442695, %v2219_v27  ;;  %vm2409_vm8 = vcmp.gt.f32.partialorder %v4826_v14, 20.0 }
 0x1d0   :  { %v3824_v54 = vpop.eup %3823  ;;  %3843 = vpow2.f32 %v2485_v40  ;;  %v5006_v12 = vpop.f32.mrb[29].mxu1  ;;  %v2489_v40 = vmul.f32 1.442695, %v2443_v16  ;;  %v2612_v27 = vand.u32 2147483647, %v4968_v6  ;;  %vm2410_vm11 = vcmp.gt.f32.partialorder %v4834_v21, 20.0 }
 0x1d1   :  { %v2587_v47 = vsel %vm4981_vm13, %v2584_v53, %v2581_v62  ;;  %v2590_v23 = vmul.f32 0.6931472, %v3824_v54  ;;  %5341 = vst [vmem:[#allocation2_spill] sm:$0xff] %v5006_v12  ;;  %v3826_v55 = vpop.eup %3825  ;;  %3845 = vpow2.f32 %v2263_v45  ;;  %v5012_v42 = vpop.f32.mrb[30].mxu0  ;;  %vm2604_vm1 = vcmp.lt.f32.partialorder %v2603_v59, 0.0004427343 }
 0x1d2   :  { %v2819_v22 = vsel %vm2403_vm12, %v4782_v17, %v2587_v47  ;;  %v5014_v53 = vpop.f32.mrb[30].mxu1  ;;  %v3828_v39 = vpop.eup %3827  ;;  %3847 = vpow2.f32 %v2487_v3  ;;  %v2611_v3 = vmul.f32 %v4968_v6, %v2610_v30  ;;  %vm2613_vm2 = vcmp.lt.f32.partialorder %v2612_v27, 0.0004427343 }
 0x1d3   :  { %v2851_v1 = vmul.f32 %v3818_v13, %v2819_v22  ;;  %v2596_v62 = vsel %vm4986_vm15, %v2593_v58, %v2590_v23  ;;  %v5018_v54 = vpop.f32.mrb[31].mxu0  ;;  %v5020_v12 = vpop.f32.mrb[31].mxu1  ;;  %v2599_v45 = vmul.f32 0.6931472, %v3828_v39  ;;  %3849 = vpow2.f32 %v2265_v56 }
 0x1d4   :  { %5342 = vst [vmem:[#allocation3_spill] sm:$0xff] %v5018_v54  ;;  %5343 = vst [vmem:[#allocation4_spill] sm:$0xff] %v5020_v12  ;;  %v3830_v17 = vpop.eup %3829  ;;  %v2820_v29 = vsel %vm2404_vm14, %v4784_v24, %v2596_v62  ;;  %3851 = vpow2.f32 %v2489_v40  ;;  %v2311_v23 = vadd.f32 1.0, %v3822_v57  ;;  %v2267_v62 = vmul.f32 1.442695, %v2220_v60 }
 0x1d5   :  { %v3832_v47 = vpop.eup %3831  ;;  %v2852_v13 = vmul.f32 %v3826_v55, %v2820_v29  ;;  %v2605_v58 = vsel %vm2604_vm1, %v2602_v43, %v2599_v45  ;;  %v2444_v29 = vmin.f32 %v4854_v37, 20.0  ;;  %vm2411_vm12 = vcmp.gt.f32.partialorder %v4840_v28, 20.0 }
 0x1d6   :  { %v3834_v48 = vpop.eup %3833  ;;  %v2615_v16 = vadd.f32 1.0, %v3832_v47  ;;  %v2821_v24 = vsel %vm2405_vm0, %v4791_v31, %v2605_v58  ;;  %v2618_v43 = vmul.f32 -0.5, %v3832_v47  ;;  %v2621_v59 = vand.u32 2147483647, %v3832_v47 }
 0x1d7   :  { %v3836_v22 = vpop.eup %3835  ;;  %v3252_v12 = vpack.c.bf16 %v2852_v13, %v2851_v1  ;;  %v2608_v39 = vmul.f32 0.6931472, %v3834_v48  ;;  %v2853_v56 = vmul.f32 %v3830_v17, %v2821_v24  ;;  %vm2412_vm14 = vcmp.gt.f32.partialorder %v4854_v37, 20.0 }
 0x1d8   :  { %v3838_v54 = vpop.eup %3837  ;;  %3853 = vlog2.f32 %v2615_v16  ;;  %vm5038_vm5 = vcmp.lt.f32.partialorder %v2621_v59, 0.0004427343  ;;  %vm2413_vm0 = vcmp.gt.f32.partialorder %v4878_v0, 20.0 }
 0x1d9   :  { %v3840_v55 = vpop.eup %3839  ;;  %2976 = vst [vmem:[%s5326_s6 + $0x18] sm:$0xff] %v3252_v12  ;;  %v2614_v6 = vsel %vm2613_vm2, %v2611_v3, %v2608_v39  ;;  %3855 = vrcp.f32 %v2311_v23  ;;  %v2312_v17 = vadd.f32 1.0, %v3838_v54  ;;  %v2221_v54 = vsub.f32 0.0, %v4876_v63 }
 0x1da   :  { %v3842_v57 = vpop.eup %3841  ;;  %v2822_v30 = vsel %vm2406_vm3, %v4796_v35, %v2614_v6  ;;  %v2624_v31 = vadd.f32 1.0, %v3840_v55  ;;  %v2627_v60 = vmul.f32 -0.5, %v3840_v55  ;;  %3857 = vpow2.f32 %v2267_v62 }
 0x1db   :  { %v3844_v1 = vpop.eup %3843  ;;  %v2854_v40 = vmul.f32 %v3836_v22, %v2822_v30  ;;  %v2313_v12 = vadd.f32 1.0, %v3842_v57  ;;  %v2619_v35 = vadd.f32 1.0, %v2618_v43  ;;  %v2630_v22 = vand.u32 2147483647, %v3840_v55 }
 0x1dc   :  { %v3846_v45 = vpop.eup %3845  ;;  %3859 = vlog2.f32 %v2624_v31  ;;  %v2633_v27 = vadd.f32 1.0, %v3844_v1  ;;  %v2636_v13 = vmul.f32 -0.5, %v3844_v1  ;;  %v2628_v16 = vadd.f32 1.0, %v2627_v60 }
 0x1dd   :  { %v5035_v48 = vpop.eup %3847  ;;  %v3253_v58 = vpack.c.bf16 %v2854_v40, %v2853_v56  ;;  %v2314_v24 = vadd.f32 1.0, %v3846_v45  ;;  %v2639_v56 = vand.u32 2147483647, %v3844_v1  ;;  %v2620_v57 = vmul.f32 %v3832_v47, %v2619_v35 }
 0x1de   :  { %v3850_v23 = vpop.eup %3849  ;;  %3861 = vlog2.f32 %v2633_v27  ;;  %v2637_v62 = vadd.f32 1.0, %v2636_v13  ;;  %v2642_v6 = vadd.f32 1.0, %v5035_v48  ;;  %v2645_v43 = vmul.f32 -0.5, %v5035_v48 }
 0x1df   :  { %v5043_v39 = vpop.eup %3851  ;;  %2977 = vst [vmem:[%s5326_s6 + $0x20] sm:$0xff] %v3253_v58  ;;  %3863 = vrcp.f32 %v2312_v17  ;;  %v2315_v63 = vadd.f32 1.0, %v3850_v23  ;;  %v2648_v30 = vand.u32 2147483647, %v5035_v48  ;;  %v2491_v31 = vmul.f32 1.442695, %v2444_v29 }
 0x1e0   :  { %3865 = vrcp.f32 %v2313_v12  ;;  %v2651_v59 = vadd.f32 1.0, %v5043_v39  ;;  %v2629_v40 = vmul.f32 %v3840_v55, %v2628_v16  ;;  %vm5053_vm7 = vcmp.lt.f32.partialorder %v2630_v22, 0.0004427343 }
 0x1e1   :  { %3867 = vlog2.f32 %v2642_v6  ;;  %v2269_v45 = vmul.f32 1.442695, %v2221_v54  ;;  %v2638_v27 = vmul.f32 %v3844_v1, %v2637_v62  ;;  %vm5058_vm9 = vcmp.lt.f32.partialorder %v2639_v56, 0.0004427343 }
 0x1e2   :  { %v3854_v60 = vpop.eup %3853  ;;  %3869 = vrcp.f32 %v2314_v24  ;;  %v2646_v58 = vadd.f32 1.0, %v2645_v43  ;;  %v2654_v55 = vmul.f32 -0.5, %v5043_v39  ;;  %v2445_v29 = vmin.f32 %v4878_v0, 20.0 }
 0x1e3   :  { %v2617_v12 = vmul.f32 0.6931472, %v3854_v60  ;;  %3871 = vlog2.f32 %v2651_v59  ;;  %v3856_v13 = vpop.eup %3855  ;;  %vm5066_vm10 = vcmp.lt.f32.partialorder %v2648_v30, 0.0004427343  ;;  %v2222_v1 = vsub.f32 0.0, %v4886_v8 }
 0x1e4   :  { %3873 = vrcp.f32 %v2315_v63  ;;  %v3858_v35 = vpop.eup %3857  ;;  %v2657_v24 = vand.u32 2147483647, %v5043_v39  ;;  %v2493_v62 = vmul.f32 1.442695, %v2445_v29  ;;  %v2446_v43 = vmin.f32 %v4888_v10, 20.0 }
 0x1e5   :  { %v2623_v54 = vsel %vm5038_vm5, %v2620_v57, %v2617_v12  ;;  %3875 = vpow2.f32 %v2491_v31  ;;  %v2271_v6 = vmul.f32 1.442695, %v2222_v1  ;;  %v2655_v59 = vadd.f32 1.0, %v2654_v55 }
 0x1e6   :  { %v3860_v16 = vpop.eup %3859  ;;  %v2823_v22 = vsel %vm2407_vm4, %v4804_v41, %v2623_v54  ;;  %3877 = vpow2.f32 %v2269_v45  ;;  %v2223_v8 = vsub.f32 0.0, %v4893_v49  ;;  %v2447_v57 = vmin.f32 %v4895_v19, 20.0 }
 0x1e7   :  { %v2855_v3 = vmul.f32 %v3856_v13, %v2823_v22  ;;  %v2626_v56 = vmul.f32 0.6931472, %v3860_v16  ;;  %3879 = vpow2.f32 %v2493_v62  ;;  %v2495_v60 = vmul.f32 1.442695, %v2446_v43 }
 0x1e8   :  { %v3862_v63 = vpop.eup %3861  ;;  %3881 = vpow2.f32 %v2271_v6  ;;  %v2273_v13 = vmul.f32 1.442695, %v2223_v8  ;;  %v2497_v29 = vmul.f32 1.442695, %v2447_v57  ;;  %v2224_v55 = vsub.f32 0.0, %v4901_v25 }
 0x1e9   :  { %v3864_v30 = vpop.eup %3863  ;;  %v2632_v41 = vsel %vm5053_vm7, %v2629_v40, %v2626_v56  ;;  %v2635_v31 = vmul.f32 0.6931472, %v3862_v63  ;;  %v2647_v17 = vmul.f32 %v5035_v48, %v2646_v58  ;;  %3883 = vpow2.f32 %v2495_v60 }
 0x1ea   :  { %v3866_v45 = vpop.eup %3865  ;;  %v2824_v12 = vsel %vm2408_vm6, %v4811_v46, %v2632_v41  ;;  %3885 = vpow2.f32 %v2273_v13  ;;  %v2275_v46 = vmul.f32 1.442695, %v2224_v55  ;;  %v2448_v25 = vmin.f32 %v4903_v26, 20.0 }
 0x1eb   :  { %v3868_v54 = vpop.eup %3867  ;;  %v2856_v49 = vmul.f32 %v3864_v30, %v2824_v12  ;;  %v2641_v1 = vsel %vm5058_vm9, %v2638_v27, %v2635_v31  ;;  %3887 = vpow2.f32 %v2497_v29  ;;  %v2656_v47 = vmul.f32 %v5043_v39, %v2655_v59 }
 0x1ec   :  { %v3870_v40 = vpop.eup %3869  ;;  %v2825_v16 = vsel %vm2409_vm8, %v4826_v14, %v2641_v1  ;;  %v2644_v22 = vmul.f32 0.6931472, %v3868_v54  ;;  %3889 = vpow2.f32 %v2275_v46  ;;  %vm2658_vm13 = vcmp.lt.f32.partialorder %v2657_v24, 0.0004427343 }
 0x1ed   :  { %v3872_v62 = vpop.eup %3871  ;;  %v3254_v56 = vpack.c.bf16 %v2856_v49, %v2855_v3  ;;  %v2857_v6 = vmul.f32 %v3866_v45, %v2825_v16  ;;  %v2499_v3 = vmul.f32 1.442695, %v2448_v25  ;;  %v2316_v57 = vadd.f32 1.0, %v3858_v35 }
 0x1ee   :  { %v3874_v43 = vpop.eup %3873  ;;  %v2650_v27 = vsel %vm5066_vm10, %v2647_v17, %v2644_v22  ;;  %v2653_v48 = vmul.f32 0.6931472, %v3872_v62  ;;  %v2225_v41 = vsub.f32 0.0, %v4924_v52  ;;  %v2449_v55 = vmin.f32 %v4926_v50, 20.0 }
 0x1ef   :  { %v3876_v58 = vpop.eup %3875  ;;  %2978 = vst [vmem:[%s5326_s6 + $0x28] sm:$0xff] %v3254_v56  ;;  %v2826_v14 = vsel %vm2410_vm11, %v4834_v21, %v2650_v27  ;;  %3891 = vpow2.f32 %v2499_v3  ;;  %v2226_v22 = vsub.f32 0.0, %v4929_v44  ;;  %vm2414_vm2 = vcmp.gt.f32.partialorder %v4888_v10, 20.0 }
 0x1f0   :  { %v3878_v63 = vpop.eup %3877  ;;  %v2858_v23 = vmul.f32 %v3870_v40, %v2826_v14  ;;  %v2659_v8 = vsel %vm2658_vm13, %v2656_v47, %v2653_v48  ;;  %v2660_v30 = vadd.f32 1.0, %v3876_v58  ;;  %v2663_v59 = vmul.f32 -0.5, %v3876_v58 }
 0x1f1   :  { %v2827_v39 = vsel %vm2411_vm12, %v4840_v28, %v2659_v8  ;;  %v3880_v31 = vpop.eup %3879  ;;  %v2317_v21 = vadd.f32 1.0, %v3878_v63  ;;  %v2666_v29 = vand.u32 2147483647, %v3876_v58  ;;  %v2277_v52 = vmul.f32 1.442695, %v2225_v41 }
 0x1f2   :  { %v3255_v60 = vpack.c.bf16 %v2858_v23, %v2857_v6  ;;  %v5104_v45 = vmul.f32 %v3874_v43, %v2827_v39  ;;  %3893 = vlog2.f32 %v2660_v30  ;;  %v3882_v12 = vpop.eup %3881  ;;  %v2669_v24 = vadd.f32 1.0, %v3880_v31 }
 0x1f3   :  { %3895 = vrcp.f32 %v2316_v57  ;;  %v2672_v35 = vmul.f32 -0.5, %v3880_v31  ;;  %v2318_v13 = vadd.f32 1.0, %v3882_v12  ;;  %v5109_v28 = vpop.eup %3883  ;;  %v2664_v49 = vadd.f32 1.0, %v2663_v59 }
 0x1f4   :  { %2979 = vst [vmem:[%s5326_s6 + $0x30] sm:$0xff] %v3255_v60  ;;  %3897 = vlog2.f32 %v2669_v24  ;;  %v3886_v54 = vpop.eup %3885  ;;  %v2678_v1 = vadd.f32 1.0, %v5109_v28  ;;  %v2675_v40 = vand.u32 2147483647, %v3880_v31  ;;  %vm5118_vm15 = vcmp.lt.f32.partialorder %v2666_v29, 0.0004427343 }
 0x1f5   :  { %3899 = vrcp.f32 %v2317_v21  ;;  %v5113_v17 = vpop.eup %3887  ;;  %v2319_v16 = vadd.f32 1.0, %v3886_v54  ;;  %v2673_v62 = vadd.f32 1.0, %v2672_v35  ;;  %v2501_v43 = vmul.f32 1.442695, %v2449_v55 }
 0x1f6   :  { %3901 = vrcp.f32 %v2318_v13  ;;  %v3890_v46 = vpop.eup %3889  ;;  %v2687_v56 = vadd.f32 1.0, %v5113_v17  ;;  %v2665_v27 = vmul.f32 %v3876_v58, %v2664_v49  ;;  %v2681_v48 = vmul.f32 -0.5, %v5109_v28 }
 0x1f7   :  { %3903 = vlog2.f32 %v2678_v1  ;;  %v2320_v25 = vadd.f32 1.0, %v3890_v46  ;;  %v2684_v44 = vand.u32 2147483647, %v5109_v28  ;;  %vm5127_vm1 = vcmp.lt.f32.partialorder %v2675_v40, 0.0004427343 }
 0x1f8   :  { %3905 = vpow2.f32 %v2277_v52  ;;  %v2279_v3 = vmul.f32 1.442695, %v2226_v22  ;;  %v2450_v63 = vmin.f32 %v4931_v11, 20.0  ;;  %v2674_v8 = vmul.f32 %v3880_v31, %v2673_v62 }
 0x1f9   :  { %3907 = vlog2.f32 %v2687_v56  ;;  %v5125_v47 = vpop.eup %3891  ;;  %v2690_v58 = vmul.f32 -0.5, %v5113_v17  ;;  %v2227_v59 = vsub.f32 0.0, %v4937_v18  ;;  %v2682_v60 = vadd.f32 1.0, %v2681_v48 }
 0x1fa   :  { %3909 = vrcp.f32 %v2319_v16  ;;  %v2696_v57 = vadd.f32 1.0, %v5125_v47  ;;  %v2503_v39 = vmul.f32 1.442695, %v2450_v63  ;;  %vm5136_vm3 = vcmp.lt.f32.partialorder %v2684_v44, 0.0004427343 }
 0x1fb   :  { %3911 = vrcp.f32 %v2320_v25  ;;  %v2693_v31 = vand.u32 2147483647, %v5113_v17  ;;  %v2281_v35 = vmul.f32 1.442695, %v2227_v59  ;;  %v2451_v13 = vmin.f32 %v4939_v33, 20.0 }
 0x1fc   :  { %v3894_v23 = vpop.eup %3893  ;;  %3913 = vpow2.f32 %v2501_v43  ;;  %v2691_v55 = vadd.f32 1.0, %v2690_v58  ;;  %v2699_v1 = vmul.f32 -0.5, %v5125_v47  ;;  %v2228_v16 = vsub.f32 0.0, %v4941_v61 }
 0x1fd   :  { %v2662_v30 = vmul.f32 0.6931472, %v3894_v23  ;;  %v3896_v41 = vpop.eup %3895  ;;  %3915 = vlog2.f32 %v2696_v57  ;;  %v2505_v40 = vmul.f32 1.442695, %v2451_v13  ;;  %v2683_v62 = vmul.f32 %v5109_v28, %v2682_v60 }
 0x1fe   :  { %v3898_v12 = vpop.eup %3897  ;;  %3917 = vpow2.f32 %v2279_v3  ;;  %v2452_v56 = vmin.f32 %v4946_v38, 20.0  ;;  %vm5157_vm4 = vcmp.lt.f32.partialorder %v2693_v31, 0.0004427343  ;;  %v2283_v44 = vmul.f32 1.442695, %v2228_v16 }
 0x1ff   :  { %v2668_v24 = vsel %vm5118_vm15, %v2665_v27, %v2662_v30  ;;  %v3900_v29 = vpop.eup %3899  ;;  %v2671_v52 = vmul.f32 0.6931472, %v3898_v12  ;;  %3919 = vpow2.f32 %v2503_v39  ;;  %v2700_v63 = vadd.f32 1.0, %v2699_v1 }
 0x200   :  { %v2828_v18 = vsel %vm2412_vm14, %v4854_v37, %v2668_v24  ;;  %v3902_v54 = vpop.eup %3901  ;;  %3921 = vpow2.f32 %v2281_v35  ;;  %v2507_v28 = vmul.f32 1.442695, %v2452_v56  ;;  %v2702_v58 = vand.u32 2147483647, %v5125_v47 }
 0x201   :  { %v2860_v49 = vmul.f32 %v3896_v41, %v2828_v18  ;;  %v3904_v22 = vpop.eup %3903  ;;  %v2677_v46 = vsel %vm5127_vm1, %v2674_v8, %v2671_v52  ;;  %3923 = vpow2.f32 %v2505_v40  ;;  %v2229_v57 = vsub.f32 0.0, %v4957_v2 }
 0x202   :  { %v3906_v37 = vpop.eup %3905  ;;  %v2829_v25 = vsel %vm2413_vm0, %v4878_v0, %v2677_v46  ;;  %v2680_v43 = vmul.f32 0.6931472, %v3904_v22  ;;  %v2692_v0 = vmul.f32 %v5113_v17, %v2691_v55  ;;  %3925 = vpow2.f32 %v2283_v44 }
 0x203   :  { %v3256_v6 = vpack.c.bf16 %v2860_v49, %v5104_v45  ;;  %v3908_v27 = vpop.eup %3907  ;;  %v2861_v61 = vmul.f32 %v3900_v29, %v2829_v25  ;;  %vm2415_vm5 = vcmp.gt.f32.partialorder %v4895_v19, 20.0  ;;  %3927 = vpow2.f32 %v2507_v28 }
 0x204   :  { %v3910_v14 = vpop.eup %3909  ;;  %v2686_v45 = vsel %vm5136_vm3, %v2683_v62, %v2680_v43  ;;  %v2689_v3 = vmul.f32 0.6931472, %v3908_v27  ;;  %vm2416_vm6 = vcmp.gt.f32.partialorder %v4903_v26, 20.0  ;;  %v2321_v60 = vadd.f32 1.0, %v3906_v37 }
 0x205   :  { %2980 = vst [vmem:[%s5326_s6 + $0x38] sm:$0xff] %v3256_v6  ;;  %v3912_v23 = vpop.eup %3911  ;;  %v2830_v8 = vsel %vm2414_vm2, %v4888_v10, %v2686_v45  ;;  %v2701_v2 = vmul.f32 %v5125_v47, %v2700_v63  ;;  %vm2703_vm7 = vcmp.lt.f32.partialorder %v2702_v58, 0.0004427343  ;;  %v2285_v29 = vmul.f32 1.442695, %v2229_v57 }
 0x206   :  { %v3914_v30 = vpop.eup %3913  ;;  %v2862_v39 = vmul.f32 %v3902_v54, %v2830_v8  ;;  %v2695_v59 = vsel %vm5157_vm4, %v2692_v0, %v2689_v3  ;;  %v2453_v55 = vmin.f32 %v4959_v36, 20.0  ;;  %v2230_v22 = vsub.f32 0.0, %v4964_v4 }
 0x207   :  { %v3916_v17 = vpop.eup %3915  ;;  %v2831_v41 = vsel %vm2415_vm5, %v4895_v19, %v2695_v59  ;;  %v2705_v10 = vadd.f32 1.0, %v3914_v30  ;;  %v2708_v13 = vmul.f32 -0.5, %v3914_v30  ;;  %v2711_v16 = vand.u32 2147483647, %v3914_v30 }
 0x208   :  { %v3918_v21 = vpop.eup %3917  ;;  %v3257_v31 = vpack.c.bf16 %v2862_v39, %v2861_v61  ;;  %v2863_v12 = vmul.f32 %v3910_v14, %v2831_v41  ;;  %v2698_v24 = vmul.f32 0.6931472, %v3916_v17  ;;  %v2509_v25 = vmul.f32 1.442695, %v2453_v55 }
 0x209   :  { %v3920_v35 = vpop.eup %3919  ;;  %3929 = vlog2.f32 %v2705_v10  ;;  %v2322_v18 = vadd.f32 1.0, %v3918_v21  ;;  %v2709_v46 = vadd.f32 1.0, %v2708_v13  ;;  %vm2417_vm8 = vcmp.gt.f32.partialorder %v4926_v50, 20.0 }
 0x20a   :  { %2981 = vst [vmem:[%s5326_s6 + $0x40] sm:$0xff] %v3257_v31  ;;  %v2704_v19 = vsel %vm2703_vm7, %v2701_v2, %v2698_v24  ;;  %v2714_v52 = vadd.f32 1.0, %v3920_v35  ;;  %v3922_v54 = vpop.eup %3921  ;;  %3931 = vrcp.f32 %v2321_v60  ;;  %v2717_v47 = vmul.f32 -0.5, %v3920_v35 }
 0x20b   :  { %v2832_v49 = vsel %vm2416_vm6, %v4903_v26, %v2704_v19  ;;  %v5185_v1 = vpop.eup %3923  ;;  %v2720_v62 = vand.u32 2147483647, %v3920_v35  ;;  %v2323_v6 = vadd.f32 1.0, %v3922_v54  ;;  %v2454_v61 = vmin.f32 %v4966_v5, 20.0 }
 0x20c   :  { %v2864_v40 = vmul.f32 %v3912_v23, %v2832_v49  ;;  %3933 = vlog2.f32 %v2714_v52  ;;  %v2723_v56 = vadd.f32 1.0, %v5185_v1  ;;  %v3926_v43 = vpop.eup %3925  ;;  %v2718_v26 = vadd.f32 1.0, %v2717_v47 }
 0x20d   :  { %3935 = vpow2.f32 %v2285_v29  ;;  %v5190_v27 = vpop.eup %3927  ;;  %v2324_v4 = vadd.f32 1.0, %v3926_v43  ;;  %v2231_v48 = vsub.f32 0.0, %v4972_v51  ;;  %vm5197_vm9 = vcmp.lt.f32.partialorder %v2711_v16, 0.0004427343 }
 0x20e   :  { %v3258_v37 = vpack.c.bf16 %v2864_v40, %v2863_v12  ;;  %3937 = vrcp.f32 %v2322_v18  ;;  %vm2418_vm10 = vcmp.gt.f32.partialorder %v4931_v11, 20.0  ;;  %v2726_v28 = vmul.f32 -0.5, %v5185_v1 }
 0x20f   :  { %3939 = vlog2.f32 %v2723_v56  ;;  %v2732_v14 = vadd.f32 1.0, %v5190_v27  ;;  %v2287_v45 = vmul.f32 1.442695, %v2230_v22  ;;  %v2710_v3 = vmul.f32 %v3914_v30, %v2709_v46 }
 0x210   :  { %2982 = vst [vmem:[%s5326_s6 + $0x48] sm:$0xff] %v3258_v37  ;;  %3941 = vpow2.f32 %v2509_v25  ;;  %vm5204_vm11 = vcmp.lt.f32.partialorder %v2720_v62, 0.0004427343  ;;  %v2511_v63 = vmul.f32 1.442695, %v2454_v61  ;;  %v2719_v51 = vmul.f32 %v3920_v35, %v2718_v26 }
 0x211   :  { %3943 = vrcp.f32 %v2323_v6  ;;  %v2729_v8 = vand.u32 2147483647, %v5185_v1  ;;  %v2289_v58 = vmul.f32 1.442695, %v2231_v48  ;;  %vm2419_vm12 = vcmp.gt.f32.partialorder %v4939_v33, 20.0 }
 0x212   :  { %3945 = vlog2.f32 %v2732_v14  ;;  %v2455_v39 = vmin.f32 %v4974_v34, 20.0  ;;  %v2232_v30 = vsub.f32 0.0, %v4977_v9  ;;  %v2727_v17 = vadd.f32 1.0, %v2726_v28 }
 0x213   :  { %v3930_v23 = vpop.eup %3929  ;;  %3947 = vrcp.f32 %v2324_v4  ;;  %v2735_v41 = vmul.f32 -0.5, %v5190_v27  ;;  %v2456_v60 = vmin.f32 %v4979_v20, 20.0  ;;  %vm5219_vm13 = vcmp.lt.f32.partialorder %v2729_v8, 0.0004427343 }
 0x214   :  { %v2707_v57 = vmul.f32 0.6931472, %v3930_v23  ;;  %v3932_v59 = vpop.eup %3931  ;;  %3949 = vpow2.f32 %v2287_v45  ;;  %v2513_v31 = vmul.f32 1.442695, %v2455_v39  ;;  %v2291_v12 = vmul.f32 1.442695, %v2232_v30 }
 0x215   :  { %3951 = vpow2.f32 %v2511_v63  ;;  %v2515_v35 = vmul.f32 1.442695, %v2456_v60  ;;  %v2233_v18 = vsub.f32 0.0, %v4997_v15  ;;  %v2728_v54 = vmul.f32 %v5185_v1, %v2727_v17 }
 0x216   :  { %v3934_v10 = vpop.eup %3933  ;;  %v2713_v21 = vsel %vm5197_vm9, %v2710_v3, %v2707_v57  ;;  %3953 = vpow2.f32 %v2289_v58  ;;  %v2736_v49 = vadd.f32 1.0, %v2735_v41  ;;  %v2738_v15 = vand.u32 2147483647, %v5190_v27 }
 0x217   :  { %v3936_v24 = vpop.eup %3935  ;;  %v2833_v2 = vsel %vm2417_vm8, %v4926_v50, %v2713_v21  ;;  %v2716_v9 = vmul.f32 0.6931472, %v3934_v10  ;;  %3955 = vpow2.f32 %v2513_v31  ;;  %v2457_v50 = vmin.f32 %v4999_v32, 20.0 }
 0x218   :  { %v3938_v13 = vpop.eup %3937  ;;  %v2865_v29 = vmul.f32 %v3932_v59, %v2833_v2  ;;  %3957 = vpow2.f32 %v2515_v35  ;;  %v2293_v22 = vmul.f32 1.442695, %v2233_v18  ;;  %v2325_v37 = vadd.f32 1.0, %v3936_v24 }
 0x219   :  { %v3940_v52 = vpop.eup %3939  ;;  %v2722_v55 = vsel %vm5204_vm11, %v2719_v51, %v2716_v9  ;;  %3959 = vpow2.f32 %v2291_v12  ;;  %v2517_v6 = vmul.f32 1.442695, %v2457_v50  ;;  %v2737_v26 = vmul.f32 %v5190_v27, %v2736_v49  ;;  %v5366_v51 = vld [vmem:[#allocation2_spill] sm:$0xff] }
 0x21a   :  { %v5228_v47 = vpop.eup %3941  ;;  %v2834_v40 = vsel %vm2418_vm10, %v4931_v11, %v2722_v55  ;;  %v2725_v16 = vmul.f32 0.6931472, %v3940_v52  ;;  %3961 = vpow2.f32 %v2293_v22  ;;  %v2234_v44 = vsub.f32 0.0, %v5004_v7 }
 0x21b   :  { %v2866_v46 = vmul.f32 %v3938_v13, %v2834_v40  ;;  %v2741_v62 = vadd.f32 1.0, %v5228_v47  ;;  %v3944_v56 = vpop.eup %3943  ;;  %vm2739_vm14 = vcmp.lt.f32.partialorder %v2738_v15, 0.0004427343  ;;  %vm2420_vm15 = vcmp.gt.f32.partialorder %v4946_v38, 20.0 }
 0x21c   :  { %v2731_v1 = vsel %vm5219_vm13, %v2728_v54, %v2725_v16  ;;  %v3946_v25 = vpop.eup %3945  ;;  %v2295_v23 = vmul.f32 1.442695, %v2234_v44  ;;  %v2458_v8 = vmin.f32 %v5366_v51, 20.0  ;;  %v2747_v58 = vand.u32 2147483647, %v5228_v47 }
 0x21d   :  { %v3259_v43 = vpack.c.bf16 %v2866_v46, %v2865_v29  ;;  %v2835_v11 = vsel %vm2419_vm12, %v4939_v33, %v2731_v1  ;;  %3963 = vlog2.f32 %v2741_v62  ;;  %v3948_v4 = vpop.eup %3947  ;;  %v2734_v48 = vmul.f32 0.6931472, %v3946_v25  ;;  %v5371_v62 = vld [vmem:[#allocation3_spill] sm:$0xff] }
 0x21e   :  { %v2867_v61 = vmul.f32 %v3944_v56, %v2835_v11  ;;  %3965 = vpow2.f32 %v2517_v6  ;;  %v3950_v28 = vpop.eup %3949  ;;  %v2744_v33 = vmul.f32 -0.5, %v5228_v47  ;;  %v2519_v24 = vmul.f32 1.442695, %v2458_v8 }
 0x21f   :  { %2983 = vst [vmem:[%s5326_s6 + $0x50] sm:$0xff] %v3259_v43  ;;  %v3952_v14 = vpop.eup %3951  ;;  %v2740_v45 = vsel %vm2739_vm14, %v2737_v26, %v2734_v48  ;;  %3967 = vrcp.f32 %v2325_v37  ;;  %v2326_v57 = vadd.f32 1.0, %v3950_v28  ;;  %vm2421_vm0 = vcmp.gt.f32.partialorder %v4959_v36, 20.0  ;;  %v5372_v43 = vld [vmem:[#allocation4_spill] sm:$0xff] }
 0x220   :  { %v3954_v27 = vpop.eup %3953  ;;  %v2836_v3 = vsel %vm2420_vm15, %v4946_v38, %v2740_v45  ;;  %v2750_v0 = vadd.f32 1.0, %v3952_v14  ;;  %v2745_v17 = vadd.f32 1.0, %v2744_v33  ;;  %v2753_v38 = vmul.f32 -0.5, %v3952_v14 }
 0x221   :  { %v5248_v63 = vpop.eup %3955  ;;  %v2868_v7 = vmul.f32 %v3948_v4, %v2836_v3  ;;  %v2756_v60 = vand.u32 2147483647, %v3952_v14  ;;  %v2327_v10 = vadd.f32 1.0, %v3954_v27  ;;  %vm5261_vm1 = vcmp.lt.f32.partialorder %v2747_v58, 0.0004427343 }
 0x222   :  { %3969 = vlog2.f32 %v2750_v0  ;;  %v2759_v39 = vadd.f32 1.0, %v5248_v63  ;;  %v5253_v30 = vpop.eup %3957  ;;  %v2762_v31 = vmul.f32 -0.5, %v5248_v63  ;;  %v2235_v35 = vsub.f32 0.0, %v5012_v42 }
 0x223   :  { %v3260_v59 = vpack.c.bf16 %v2868_v7, %v2867_v61  ;;  %v3960_v41 = vpop.eup %3959  ;;  %v2768_v12 = vadd.f32 1.0, %v5253_v30  ;;  %v2746_v19 = vmul.f32 %v5228_v47, %v2745_v17  ;;  %vm2422_vm2 = vcmp.gt.f32.partialorder %v4966_v5, 20.0 }
 0x224   :  { %3971 = vlog2.f32 %v2759_v39  ;;  %v3962_v21 = vpop.eup %3961  ;;  %v2328_v18 = vadd.f32 1.0, %v3960_v41  ;;  %v2754_v52 = vadd.f32 1.0, %v2753_v38  ;;  %vm5270_vm3 = vcmp.lt.f32.partialorder %v2756_v60, 0.0004427343 }
 0x225   :  { %2984 = vst [vmem:[%s5326_s6 + $0x58] sm:$0xff] %v3260_v59  ;;  %3973 = vpow2.f32 %v2295_v23  ;;  %v2763_v49 = vadd.f32 1.0, %v2762_v31  ;;  %v2329_v50 = vadd.f32 1.0, %v3962_v21  ;;  %v2771_v16 = vmul.f32 -0.5, %v5253_v30 }
 0x226   :  { %3975 = vrcp.f32 %v2326_v57  ;;  %v2297_v22 = vmul.f32 1.442695, %v2235_v35  ;;  %v2459_v15 = vmin.f32 %v5014_v53, 20.0  ;;  %v2236_v56 = vsub.f32 0.0, %v5371_v62 }
 0x227   :  { %v3964_v2 = vpop.eup %3963  ;;  %3977 = vlog2.f32 %v2768_v12  ;;  %v2755_v37 = vmul.f32 %v3952_v14, %v2754_v52  ;;  %v2765_v6 = vand.u32 2147483647, %v5248_v63  ;;  %v2460_v11 = vmin.f32 %v5372_v43, 20.0 }
 0x228   :  { %v5266_v13 = vpop.eup %3965  ;;  %v2743_v29 = vmul.f32 0.6931472, %v3964_v2  ;;  %3979 = vrcp.f32 %v2327_v10  ;;  %v2299_v4 = vmul.f32 1.442695, %v2236_v56  ;;  %v2772_v48 = vadd.f32 1.0, %v2771_v16 }
 0x229   :  { %v2777_v54 = vadd.f32 1.0, %v5266_v13  ;;  %3981 = vpow2.f32 %v2519_v24  ;;  %v3968_v40 = vpop.eup %3967  ;;  %v2780_v25 = vmul.f32 -0.5, %v5266_v13  ;;  %v2774_v44 = vand.u32 2147483647, %v5253_v30 }
 0x22a   :  { %v2749_v42 = vsel %vm5261_vm1, %v2746_v19, %v2743_v29  ;;  %v2523_v28 = vmul.f32 1.442695, %v2460_v11  ;;  %v2764_v27 = vmul.f32 %v5248_v63, %v2763_v49  ;;  %vm2423_vm4 = vcmp.gt.f32.partialorder %v4974_v34, 20.0 }
 0x22b   :  { %v2837_v47 = vsel %vm2421_vm0, %v4959_v36, %v2749_v42  ;;  %3983 = vlog2.f32 %v2777_v54  ;;  %v2521_v36 = vmul.f32 1.442695, %v2459_v15  ;;  %vm2766_vm5 = vcmp.lt.f32.partialorder %v2765_v6, 0.0004427343 }
 0x22c   :  { %v2869_v46 = vmul.f32 %v3968_v40, %v2837_v47  ;;  %3985 = vrcp.f32 %v2328_v18  ;;  %v3970_v1 = vpop.eup %3969  ;;  %v2781_v58 = vadd.f32 1.0, %v2780_v25  ;;  %v2773_v63 = vmul.f32 %v5253_v30, %v2772_v48 }
 0x22d   :  { %v2752_v26 = vmul.f32 0.6931472, %v3970_v1  ;;  %3987 = vrcp.f32 %v2329_v50  ;;  %v2783_v17 = vand.u32 2147483647, %v5266_v13  ;;  %vm2775_vm6 = vcmp.lt.f32.partialorder %v2774_v44, 0.0004427343 }
 0x22e   :  { %v3972_v61 = vpop.eup %3971  ;;  %3989 = vpow2.f32 %v2297_v22  ;;  %vm2424_vm7 = vcmp.gt.f32.partialorder %v4979_v20, 20.0  ;;  %v2782_v30 = vmul.f32 %v5266_v13, %v2781_v58  ;;  %vm2425_vm9 = vcmp.gt.f32.partialorder %v4999_v32, 20.0 }
 0x22f   :  { %v3974_v45 = vpop.eup %3973  ;;  %v2758_v14 = vsel %vm5270_vm3, %v2755_v37, %v2752_v26  ;;  %v2761_v33 = vmul.f32 0.6931472, %v3972_v61  ;;  %3991 = vpow2.f32 %v2521_v36  ;;  %vm2784_vm8 = vcmp.lt.f32.partialorder %v2783_v17, 0.0004427343 }
 0x230   :  { %v3976_v3 = vpop.eup %3975  ;;  %v2838_v0 = vsel %vm2422_vm2, %v4966_v5, %v2758_v14  ;;  %3993 = vpow2.f32 %v2299_v4  ;;  %v2330_v2 = vadd.f32 1.0, %v3974_v45  ;;  %vm2426_vm11 = vcmp.gt.f32.partialorder %v5366_v51, 20.0 }
 0x231   :  { %v3978_v7 = vpop.eup %3977  ;;  %v2870_v23 = vmul.f32 %v3976_v3, %v2838_v0  ;;  %v2767_v8 = vsel %vm2766_vm5, %v2764_v27, %v2761_v33  ;;  %3995 = vpow2.f32 %v2523_v28  ;;  %vm2427_vm13 = vcmp.gt.f32.partialorder %v5014_v53, 20.0 }
 0x232   :  { %v3980_v57 = vpop.eup %3979  ;;  %v2839_v39 = vsel %vm2423_vm4, %v4974_v34, %v2767_v8  ;;  %v2770_v59 = vmul.f32 0.6931472, %v3978_v7  ;;  %vm2428_vm15 = vcmp.gt.f32.partialorder %v5372_v43, 20.0 }
 0x233   :  { %v3982_v41 = vpop.eup %3981  ;;  %v3261_v38 = vpack.c.bf16 %v2870_v23, %v2869_v46  ;;  %v2871_v5 = vmul.f32 %v3980_v57, %v2839_v39 }
 0x234   :  { %v2776_v10 = vsel %vm2775_vm6, %v2773_v63, %v2770_v59  ;;  %v2786_v21 = vadd.f32 1.0, %v3982_v41  ;;  %v2789_v54 = vmul.f32 -0.5, %v3982_v41  ;;  %v2792_v47 = vand.u32 2147483647, %v3982_v41 }
 0x235   :  { %v3984_v60 = vpop.eup %3983  ;;  %2985 = vst [vmem:[%s5326_s6 + $0x60] sm:$0xff] %v3261_v38  ;;  %v2840_v34 = vsel %vm2424_vm7, %v4979_v20, %v2776_v10 }
 0x236   :  { %v3986_v31 = vpop.eup %3985  ;;  %v2779_v12 = vmul.f32 0.6931472, %v3984_v60  ;;  %3997 = vlog2.f32 %v2786_v21  ;;  %v2790_v40 = vadd.f32 1.0, %v2789_v54  ;;  %vm2793_vm10 = vcmp.lt.f32.partialorder %v2792_v47, 0.0004427343 }
 0x237   :  { %v2872_v24 = vmul.f32 %v3986_v31, %v2840_v34  ;;  %v3988_v9 = vpop.eup %3987  ;;  %3999 = vrcp.f32 %v2330_v2 }
 0x238   :  { %v2785_v35 = vsel %vm2784_vm8, %v2782_v30, %v2779_v12  ;;  %v3990_v29 = vpop.eup %3989  ;;  %v2791_v15 = vmul.f32 %v3982_v41, %v2790_v40 }
 0x239   :  { %v3262_v19 = vpack.c.bf16 %v2872_v24, %v2871_v5  ;;  %v2841_v18 = vsel %vm2425_vm9, %v4999_v32, %v2785_v35  ;;  %v3992_v52 = vpop.eup %3991  ;;  %v2331_v49 = vadd.f32 1.0, %v3990_v29 }
 0x23a   :  { %v2873_v55 = vmul.f32 %v3988_v9, %v2841_v18  ;;  %v3994_v42 = vpop.eup %3993  ;;  %v2795_v20 = vadd.f32 1.0, %v3992_v52  ;;  %v2798_v22 = vmul.f32 -0.5, %v3992_v52  ;;  %v2801_v25 = vand.u32 2147483647, %v3992_v52 }
 0x23b   :  { %2986 = vst [vmem:[%s5326_s6 + $0x68] sm:$0xff] %v3262_v19  ;;  %v3996_v13 = vpop.eup %3995  ;;  %v2332_v16 = vadd.f32 1.0, %v3994_v42 }
 0x23c   :  { %4001 = vlog2.f32 %v2795_v20  ;;  %v2804_v50 = vadd.f32 1.0, %v3996_v13  ;;  %v2807_v62 = vmul.f32 -0.5, %v3996_v13  ;;  %v2799_v1 = vadd.f32 1.0, %v2798_v22 }
 0x23d   :  { %v2810_v4 = vand.u32 2147483647, %v3996_v13  ;;  %vm2802_vm12 = vcmp.lt.f32.partialorder %v2801_v25, 0.0004427343 }
 0x23e   :  { %4003 = vlog2.f32 %v2804_v50  ;;  %v2808_v26 = vadd.f32 1.0, %v2807_v62  ;;  %v2800_v44 = vmul.f32 %v3992_v52, %v2799_v1 }
 0x23f   :  { %4005 = vrcp.f32 %v2331_v49  ;;  %vm2811_vm14 = vcmp.lt.f32.partialorder %v2810_v4, 0.0004427343 }
 0x240   :  { %v3998_v32 = vpop.eup %3997  ;;  %4007 = vrcp.f32 %v2332_v16  ;;  %v2809_v33 = vmul.f32 %v3996_v13, %v2808_v26 }
 0x241   :  { %v2788_v46 = vmul.f32 0.6931472, %v3998_v32  ;;  %v4000_v37 = vpop.eup %3999 }
 0x243   :  { %v2794_v56 = vsel %vm2793_vm10, %v2791_v15, %v2788_v46 }
 0x244   :  { %v2842_v6 = vsel %vm2426_vm11, %v5366_v51, %v2794_v56 }
 0x245   :  { %v2874_v11 = vmul.f32 %v4000_v37, %v2842_v6 }
 0x246   :  { %v4002_v36 = vpop.eup %4001 }
 0x247   :  { %v3263_v61 = vpack.c.bf16 %v2874_v11, %v2873_v55  ;;  %v2797_v48 = vmul.f32 0.6931472, %v4002_v36 }
 0x248   :  { %v4004_v28 = vpop.eup %4003 }
 0x249   :  { %2987 = vst [vmem:[%s5326_s6 + $0x70] sm:$0xff] %v3263_v61  ;;  %v2803_v45 = vsel %vm2802_vm12, %v2800_v44, %v2797_v48  ;;  %v2806_v14 = vmul.f32 0.6931472, %v4004_v28  ;;  %v4006_v51 = vpop.eup %4005 }
 0x24a   :  { %v2843_v27 = vsel %vm2427_vm13, %v5014_v53, %v2803_v45  ;;  %v4008_v7 = vpop.eup %4007 }
 0x24b   :  { %v2875_v3 = vmul.f32 %v4006_v51, %v2843_v27  ;;  %v2812_v0 = vsel %vm2811_vm14, %v2809_v33, %v2806_v14 }
 0x24c   :  { %v2844_v23 = vsel %vm2428_vm15, %v5372_v43, %v2812_v0 }
 0x24d   :  { %v2876_v8 = vmul.f32 %v4008_v7, %v2844_v23 }
 0x24f   :  { %v3264_v58 = vpack.c.bf16 %v2876_v8, %v2875_v3 }
 0x251   :  { %2988 = vst [vmem:[%s5326_s6 + $0x78] sm:$0xff] %v3264_v58 }

// kernel: cgcnn_forward.15
= control target key start
LH: loop header
LB: loop body
LE: loop exit
PB: predicated region body
PF: predicated region fallthrough
CT: control target
= control target key end

     0   :  { %v10803_v0 = vmov 0   ;;  %v94_v47 = vlaneseq  ;;  %s14895_s2 = inlined_call_operand.vmem [shape: s32[256,1], index: 2, kind: input, shape index: {}]   ;;  %s14896_s0 = inlined_call_operand.vmem [shape: bf16[256,256], index: 0, kind: input, shape index: {}]   ;;  %s14897_s4 = inlined_call_operand.vmem [shape: bf16[256,256], index: 4, kind: input, shape index: {}]   ;;  %s14898_s1 = inlined_call_operand.vmem [shape: s32[1,256], index: 1, kind: input, shape index: {}]   ;;  %s14899_s3 = inlined_call_operand.vmem [shape: bf16[8,256], index: 3, kind: input, shape index: {}]   ;;  %s14900_s9 = inlined_call_operand.vmem [shape: bf16[256,1024], index: 9, kind: input, shape index: {}]   ;;  %s14901_s6 = inlined_call_operand.vmem [shape: bf16[256,128], index: 6, kind: input, shape index: {}]   ;;  %s14902_s5 = inlined_call_operand.vmem [shape: f32[1,256], index: 5, kind: input, shape index: {}]   ;;  %s14903_s8 = inlined_call_operand.vmem [shape: bf16[256,1024], index: 8, kind: input, shape index: {}]   ;;  %s14904_s10 = inlined_call_operand.vmem [shape: bf16[256,1024], index: 10, kind: input, shape index: {}]   ;;  %s14905_s11 = inlined_call_operand.vmem [shape: bf16[128,1024], index: 11, kind: input, shape index: {}]   ;;  %s14906_s7 = inlined_call_operand.vmem [shape: f32[1,128], index: 7, kind: input, shape index: {}]   ;;  %s14907_s13 = inlined_call_operand.vmem [shape: bf16[1024,896], index: 13, kind: input, shape index: {}]   ;;  %s14908_s12 = inlined_call_operand.vmem [shape: f32[1,1024], index: 12, kind: input, shape index: {}]   ;;  %s14909_s14 = inlined_call_operand.vmem [shape: f32[1,896], index: 14, kind: input, shape index: {}]   ;;  %s14910_s15 = inlined_call_operand.vmem [shape: f32[8,896], index: 15, kind: output, shape index: {}]  }
   0x1   :  { %10029 = vset.pattern.permute.xlu1 %v10803_v0  ;;  %10028 = vset.pattern.permute.xlu0 %v10803_v0  ;;  %v10893_v1 = vld [vmem:[%s14895_s2 + $0x10] sm:$0xff]  ;;  %v10898_v2 = vld [vmem:[%s14895_s2] sm:$0xff]  ;;  %v10910_v4 = vld [vmem:[%s14896_s0 + $0x8] sm:$0xff] }
   0x2   :  { %v10903_v3 = vld [vmem:[%s14896_s0] sm:$0xff]  ;;  %vm361_vm0 = vcmp.eq.s32.totalorder %v10893_v1, 0  ;;  %vm359_vm1 = vcmp.eq.s32.totalorder %v10898_v2, 0  ;;  %v10915_v5 = vld [vmem:[%s14895_s2 + $0x18] sm:$0xff]  ;;  %v328_v6 = vld [vmem:[%s14895_s2 + $0x8] sm:$0xff]  ;;  %vm885_vm9 = vcmp.eq.s32.totalorder %v10898_v2, 1 }
   0x3   :  { %v393_v7 = vsel %vm361_vm0, 1, %v10803_v0  ;;  %v391_v8 = vsel %vm359_vm1, 1, %v10803_v0  ;;  %v8801_v9 = vcombine.high %v10903_v3, %v10910_v4  ;;  %v8800_v10 = vcombine.low %v10903_v3, %v10910_v4  ;;  %v10929_v11 = vld [vmem:[%s14896_s0 + $0x10] sm:$0xff]  ;;  %v10934_v12 = vld [vmem:[%s14896_s0 + $0x18] sm:$0xff]  ;;  %v10939_v13 = vld [vmem:[%s14895_s2 + $0x28] sm:$0xff] }
   0x4   :  { %430 = vperm.xlu1 %10029, %v393_v7   ;;  %424 = vperm.xlu0 %10028, %v391_v8   ;;  %vm362_vm2 = vcmp.eq.s32.totalorder %v10915_v5, 0  ;;  %vm360_vm3 = vcmp.eq.s32.totalorder %v328_v6, 0  ;;  %v8803_v14 = vcombine.high %v10929_v11, %v10934_v12  ;;  %v10947_v15 = vld [vmem:[%s14895_s2 + $0x20] sm:$0xff]  ;;  %v10957_v17 = vld [vmem:[%s14896_s0 + $0x28] sm:$0xff]  ;;  %v8802_v20 = vcombine.low %v10929_v11, %v10934_v12  ;;  %v10970_v22 = vld [vmem:[%s14895_s2 + $0x38] sm:$0xff] }
   0x5   :  { %v10952_v16 = vld [vmem:[%s14896_s0 + $0x20] sm:$0xff]  ;;  %275 = vmatprep.subr.bf16.mxu0 %v8801_v9  ;;  %v394_v18 = vsel %vm362_vm2, 1, %v10803_v0  ;;  %v392_v19 = vsel %vm360_vm3, 1, %v10803_v0  ;;  %vm364_vm4 = vcmp.eq.s32.totalorder %v10939_v13, 0  ;;  %vm363_vm5 = vcmp.eq.s32.totalorder %v10947_v15, 0  ;;  %v10975_v23 = vld [vmem:[%s14895_s2 + $0x30] sm:$0xff] }
   0x6   :  { %276 = vmatpush1.bf16.msra.mxu0 %v8800_v10  ;;  %v8805_v21 = vcombine.high %v10952_v16, %v10957_v17  ;;  %v10980_v24 = vld [vmem:[%s14896_s0 + $0x30] sm:$0xff]  ;;  %v10985_v25 = vld [vmem:[%s14896_s0 + $0x38] sm:$0xff]  ;;  %v396_v26 = vsel %vm364_vm4, 1, %v10803_v0  ;;  %v395_v27 = vsel %vm363_vm5, 1, %v10803_v0  ;;  %v8804_v28 = vcombine.low %v10952_v16, %v10957_v17  ;;  %v70_v30 = vld [vmem:[%s14896_s0 + $0x40] sm:$0xff] }
   0x7   :  { %277 = vmatprep.subr.bf16.mxu0 %v8803_v14  ;;  %vm366_vm6 = vcmp.eq.s32.totalorder %v10970_v22, 0  ;;  %vm365_vm7 = vcmp.eq.s32.totalorder %v10975_v23, 0  ;;  %v8807_v29 = vcombine.high %v10980_v24, %v10985_v25  ;;  %v71_v31 = vld [vmem:[%s14896_s0 + $0x48] sm:$0xff]  ;;  %v8806_v34 = vcombine.low %v10980_v24, %v10985_v25  ;;  %v72_v36 = vld [vmem:[%s14896_s0 + $0x50] sm:$0xff]  ;;  %v73_v37 = vld [vmem:[%s14896_s0 + $0x58] sm:$0xff] }
   0x8   :  { %433 = vperm.xlu1 %10029, %v394_v18   ;;  %427 = vperm.xlu0 %10028, %v392_v19   ;;  %v398_v32 = vsel %vm366_vm6, 1, %v10803_v0  ;;  %v397_v33 = vsel %vm365_vm7, 1, %v10803_v0  ;;  %vm886_vm8 = vcmp.eq.s32.totalorder %v328_v6, 1  ;;  %v8809_v35 = vcombine.high %v70_v30, %v71_v31  ;;  %v74_v42 = vld [vmem:[%s14896_s0 + $0x60] sm:$0xff]  ;;  %v75_v43 = vld [vmem:[%s14896_s0 + $0x68] sm:$0xff]  ;;  %v76_v49 = vld [vmem:[%s14896_s0 + $0x70] sm:$0xff] }
   0x9   :  { %v918_v38 = vsel %vm886_vm8, 1, %v10803_v0  ;;  %v917_v39 = vsel %vm885_vm9, 1, %v10803_v0  ;;  %v8808_v40 = vcombine.low %v70_v30, %v71_v31  ;;  %vm888_vm10 = vcmp.eq.s32.totalorder %v10915_v5, 1  ;;  %v77_v50 = vld [vmem:[%s14896_s0 + $0x78] sm:$0xff]  ;;  %v336_v54 = vld [vmem:[%s14895_s2 + $0x48] sm:$0xff]  ;;  %v335_v57 = vld [vmem:[%s14895_s2 + $0x40] sm:$0xff] }
   0xa   :  { %278 = vmatpush1.bf16.msra.mxu0 %v8802_v20  ;;  %vm887_vm11 = vcmp.eq.s32.totalorder %v10893_v1, 1  ;;  %v8811_v41 = vcombine.high %v72_v36, %v73_v37  ;;  %v920_v44 = vsel %vm888_vm10, 1, %v10803_v0  ;;  %v8810_v46 = vcombine.low %v72_v36, %v73_v37  ;;  %v78_v58 = vld [vmem:[%s14896_s0 + $0x80] sm:$0xff]  ;;  %v79_v60 = vld [vmem:[%s14896_s0 + $0x88] sm:$0xff]  ;;  %v338_v2 = vld [vmem:[%s14895_s2 + $0x58] sm:$0xff] }
   0xb   :  { %279 = vmatprep.subr.bf16.mxu0 %v8805_v21  ;;  %v919_v45 = vsel %vm887_vm11, 1, %v10803_v0  ;;  %vm890_vm12 = vcmp.eq.s32.totalorder %v10939_v13, 1  ;;  %vm889_vm13 = vcmp.eq.s32.totalorder %v10947_v15, 1  ;;  %v8813_v48 = vcombine.high %v74_v42, %v75_v43  ;;  %v11051_v59 = vld [vmem:[%s14898_s1] sm:$0x3]  ;;  %v337_v7 = vld [vmem:[%s14895_s2 + $0x50] sm:$0xff] }
   0xc   :  { %439 = vperm.xlu1 %10029, %v396_v26   ;;  %436 = vperm.xlu0 %10028, %v395_v27   ;;  %v922_v51 = vsel %vm890_vm12, 1, %v10803_v0  ;;  %v921_v52 = vsel %vm889_vm13, 1, %v10803_v0  ;;  %v8812_v53 = vcombine.low %v74_v42, %v75_v43  ;;  %vm892_vm14 = vcmp.eq.s32.totalorder %v10970_v22, 1  ;;  %v80_v8 = vld [vmem:[%s14896_s0 + $0x90] sm:$0xff]  ;;  %v81_v9 = vld [vmem:[%s14896_s0 + $0x98] sm:$0xff]  ;;  %v82_v20 = vld [vmem:[%s14896_s0 + $0xa0] sm:$0xff] }
   0xd   :  { %vm891_vm15 = vcmp.eq.s32.totalorder %v10975_v23, 1  ;;  %v11040_v55 = vshrl.u32 %v94_v47, 7  ;;  %v8815_v56 = vcombine.high %v76_v49, %v77_v50  ;;  %v924_v62 = vsel %vm892_vm14, 1, %v10803_v0  ;;  %v83_v21 = vld [vmem:[%s14896_s0 + $0xa8] sm:$0xff]  ;;  %v86_v37 = vld [vmem:[%s14896_s0 + $0xc0] sm:$0xff] }
   0xe   :  { %280 = vmatpush1.bf16.msra.mxu0 %v8804_v28  ;;  %v923_v63 = vsel %vm891_vm15, 1, %v10803_v0  ;;  %v8814_v1 = vcombine.low %v76_v49, %v77_v50  ;;  %vm368_vm0 = vcmp.eq.s32.totalorder %v336_v54, 0  ;;  %vm367_vm1 = vcmp.eq.s32.totalorder %v335_v57, 0  ;;  %v84_v28 = vld [vmem:[%s14896_s0 + $0xb0] sm:$0xff]  ;;  %v89_v49 = vld [vmem:[%s14896_s0 + $0xd8] sm:$0xff] }
   0xf   :  { %281 = vmatprep.subr.bf16.mxu0 %v8807_v29  ;;  %v11057_v61 = vsub.s32 1, %v11040_v55  ;;  %v8817_v6 = vcombine.high %v78_v58, %v79_v60  ;;  %v400_v13 = vsel %vm368_vm0, 1, %v10803_v0  ;;  %v399_v14 = vsel %vm367_vm1, 1, %v10803_v0  ;;  %v85_v29 = vld [vmem:[%s14896_s0 + $0xb8] sm:$0xff] }
  0x10   :  { %445 = vperm.xlu1 %10029, %v398_v32   ;;  %442 = vperm.xlu0 %10028, %v397_v33   ;;  %v8816_v15 = vcombine.low %v78_v58, %v79_v60  ;;  %vm370_vm4 = vcmp.eq.s32.totalorder %v338_v2, 0  ;;  %vm369_vm5 = vcmp.eq.s32.totalorder %v337_v7, 0  ;;  %v10804_v18 = vmov 1.0|1.0   ;;  %v340_v33 = vld [vmem:[%s14895_s2 + $0x68] sm:$0xff] }
  0x11   :  { %v104_v5 = vrot.slane %v11051_v59, %v11057_v61  ;;  %v8819_v19 = vcombine.high %v80_v8, %v81_v9  ;;  %v402_v22 = vsel %vm370_vm4, 1, %v10803_v0  ;;  %v401_v23 = vsel %vm369_vm5, 1, %v10803_v0 }
  0x12   :  { %282 = vmatpush1.bf16.msra.mxu0 %v8806_v34  ;;  %v8818_v26 = vcombine.low %v80_v8, %v81_v9  ;;  %vm894_vm6 = vcmp.eq.s32.totalorder %v336_v54, 1  ;;  %vm893_vm7 = vcmp.eq.s32.totalorder %v335_v57, 1  ;;  %v8821_v27 = vcombine.high %v82_v20, %v83_v21  ;;  %v91_v57 = vld [vmem:[%s14896_s0 + $0xe8] sm:$0xff] }
  0x13   :  { %283 = vmatprep.subr.bf16.mxu0 %v8809_v35  ;;  %vm11076_vm2 = vcmp.eq.s32.totalorder %v11040_v55, %v104_v5  ;;  %v926_v30 = vsel %vm894_vm6, 1, %v10803_v0  ;;  %v925_v31 = vsel %vm893_vm7, 1, %v10803_v0  ;;  %v8820_v32 = vcombine.low %v82_v20, %v83_v21  ;;  %v339_v35 = vld [vmem:[%s14895_s2 + $0x60] sm:$0xff]  ;;  %v92_v5 = vld [vmem:[%s14896_s0 + $0xf0] sm:$0xff] }
  0x14   :  { %953 = vperm.xlu1 %10029, %v918_v38   ;;  %950 = vperm.xlu0 %10028, %v917_v39   ;;  %vm8832_vm3 = vmpackc.low %vm11076_vm2, %vm11076_vm2  ;;  %vm896_vm8 = vcmp.eq.s32.totalorder %v338_v2, 1  ;;  %vm895_vm9 = vcmp.eq.s32.totalorder %v337_v7, 1  ;;  %v8823_v34 = vcombine.high %v84_v28, %v85_v29  ;;  %v11109_v36 = vsub.s32 0, %v11040_v55  ;;  %v87_v38 = vld [vmem:[%s14896_s0 + $0xc8] sm:$0xff] }
  0x15   :  { %8833 = vmatprep.mubr.msk.bf16.mxu0 %vm8832_vm3, %v10804_v18  ;;  %v928_v39 = vsel %vm896_vm8, 1, %v10803_v0  ;;  %vm58_vm10 = vcmask 7168   ;;  %vm372_vm11 = vcmp.eq.s32.totalorder %v340_v33, 0  ;;  %vm371_vm12 = vcmp.eq.s32.totalorder %v339_v35, 0  ;;  %v10064_v21 = vld [vmem:[%s14897_s4 + $0x4] ss:$8 sps:$4 sm:$0xff]  }
  0x16   :  { %284 = vmatpush1.bf16.msra.mxu0 %v8808_v40  ;;  %v927_v40 = vsel %vm895_vm9, 1, %v10803_v0  ;;  %v10805_v42 = vmov 0.0   ;;  %v8825_v43 = vcombine.high %v86_v37, %v87_v38  ;;  %v404_v50 = vsel %vm372_vm11, 1, %v10803_v0 }
  0x17   :  { %285 = vmatprep.subr.bf16.mxu0 %v8811_v41  ;;  %v8822_v41 = vcombine.low %v84_v28, %v85_v29  ;;  %59 = vst.msk [vmem:[#allocation4] sm:$0xff] %vm58_vm10, %v10805_v42  ;;  %vm898_vm0 = vcmp.eq.s32.totalorder %v340_v33, 1  ;;  %vm897_vm1 = vcmp.eq.s32.totalorder %v339_v35, 1  ;;  %v10062_v29 = vld [vmem:[%s14897_s4] ss:$8 sps:$4 sm:$0xff]  }
  0x18   :  { %959 = vperm.xlu1 %10029, %v920_v44   ;;  %956 = vperm.xlu0 %10028, %v919_v45   ;;  %v342_v44 = vld [vmem:[%s14895_s2 + $0x78] sm:$0xff]  ;;  %v341_v45 = vld [vmem:[%s14895_s2 + $0x70] sm:$0xff]  ;;  %v930_v7 = vsel %vm898_vm0, 1, %v10803_v0  ;;  %v929_v8 = vsel %vm897_vm1, 1, %v10803_v0  ;;  %v10070_v35 = vld [vmem:[%s14897_s4 + $0x24] ss:$8 sps:$4 sm:$0xff]  }
  0x19   :  { %vm374_vm13 = vcmp.eq.s32.totalorder %v342_v44, 0  ;;  %vm373_vm14 = vcmp.eq.s32.totalorder %v341_v45, 0  ;;  %vm899_vm3 = vcmp.eq.s32.totalorder %v341_v45, 1  ;;  %v10076_v45 = vld [vmem:[%s14897_s4 + $0x44] ss:$8 sps:$4 sm:$0xff]  }
  0x1a   :  { %286 = vmatpush1.bf16.msra.mxu0 %v8810_v46  ;;  %v100_v46 = vrot.slane %v11051_v59, %v11109_v36  ;;  %v8799_v59 = vsel %vm11076_vm2, 1.0, %v10805_v42  ;;  %v406_v60 = vsel %vm374_vm13, 1, %v10803_v0  ;;  %vm900_vm2 = vcmp.eq.s32.totalorder %v342_v44, 1  ;;  %v10071_v44 = vld [vmem:[%s14897_s4 + $0x30] ss:$8 sps:$4 sm:$0xff]  }
  0x1b   :  { %287 = vmatprep.subr.bf16.mxu0 %v8813_v48  ;;  %v88_v48 = vld [vmem:[%s14896_s0 + $0xd0] sm:$0xff] }
  0x1c   :  { %965 = vperm.xlu1 %10029, %v922_v51   ;;  %962 = vperm.xlu0 %10028, %v921_v52   ;;  %v403_v51 = vsel %vm371_vm12, 1, %v10803_v0  ;;  %v8824_v52 = vcombine.low %v86_v37, %v87_v38  ;;  %vm11137_vm15 = vcmp.eq.s32.totalorder %v11040_v55, %v100_v46  ;;  %v10068_v38 = vld [vmem:[%s14897_s4 + $0x20] ss:$8 sps:$4 sm:$0xff]   ;;  %v350_v46 = vld [vmem:[%s14895_s2 + $0xb8] sm:$0xff] }
  0x1d   :  { %v8798_v58 = vsel %vm11137_vm15, 1.0, %v10805_v42  ;;  %vm8834_vm6 = vmpackc.low %vm11137_vm15, %vm11137_vm15  ;;  %vm382_vm0 = vcmp.eq.s32.totalorder %v350_v46, 0 }
  0x1e   :  { %288 = vmatpush1.bf16.msra.mxu0 %v8812_v53  ;;  %v8827_v53 = vcombine.high %v88_v48, %v89_v49 }
  0x1f   :  { %289 = vmatprep.subr.bf16.mxu0 %v8815_v56  ;;  %v90_v56 = vld [vmem:[%s14896_s0 + $0xe0] sm:$0xff] }
  0x20   :  { %971 = vperm.xlu1 %10029, %v924_v62   ;;  %968 = vperm.xlu0 %10028, %v923_v63   ;;  %v405_v62 = vsel %vm373_vm14, 1, %v10803_v0  ;;  %v11153_v63 = vadd.f32 %v8799_v59, %v8798_v58  ;;  %v8829_v2 = vcombine.high %v90_v56, %v91_v57  ;;  %v8828_v9 = vcombine.low %v90_v56, %v91_v57  ;;  %v10077_v56 = vld [vmem:[%s14897_s4 + $0x50] ss:$8 sps:$4 sm:$0xff]   ;;  %v10082_v57 = vld [vmem:[%s14897_s4 + $0x64] ss:$8 sps:$4 sm:$0xff]  }
  0x22   :  { %290 = vmatpush1.bf16.msra.mxu0 %v8814_v1  ;;  %v8826_v1 = vcombine.low %v88_v48, %v89_v49  ;;  %v349_v48 = vld [vmem:[%s14895_s2 + $0xb0] sm:$0xff] }
  0x23   :  { %291 = vmatprep.subr.bf16.mxu0 %v8817_v6  ;;  %v93_v6 = vld [vmem:[%s14896_s0 + $0xf8] sm:$0xff]  ;;  %vm381_vm1 = vcmp.eq.s32.totalorder %v349_v48, 0 }
  0x24   :  { %451 = vperm.xlu1 %10029, %v400_v13   ;;  %448 = vperm.xlu0 %10028, %v399_v14   ;;  %v8831_v10 = vcombine.high %v92_v5, %v93_v6  ;;  %v344_v13 = vld [vmem:[%s14895_s2 + $0x88] sm:$0xff]  ;;  %v343_v14 = vld [vmem:[%s14895_s2 + $0x80] sm:$0xff]  ;;  %v8830_v20 = vcombine.low %v92_v5, %v93_v6  ;;  %v413_v54 = vsel %vm381_vm1, 1, %v10803_v0 }
  0x25   :  { %vm376_vm4 = vcmp.eq.s32.totalorder %v344_v13, 0  ;;  %vm375_vm5 = vcmp.eq.s32.totalorder %v343_v14, 0  ;;  %vm902_vm9 = vcmp.eq.s32.totalorder %v344_v13, 1  ;;  %vm901_vm11 = vcmp.eq.s32.totalorder %v343_v14, 1 }
  0x26   :  { %292 = vmatpush1.bf16.msra.mxu0 %v8816_v15  ;;  %v932_v15 = vsel %vm900_vm2, 1, %v10803_v0  ;;  %v407_v28 = vsel %vm375_vm5, 1, %v10803_v0  ;;  %v933_v37 = vsel %vm901_vm11, 1, %v10803_v0  ;;  %vm907_vm5 = vcmp.eq.s32.totalorder %v349_v48, 1  ;;  %v10098_v48 = vld [vmem:[%s14897_s4 + $0xc0] ss:$8 sps:$4 sm:$0xff]  }
  0x27   :  { %293 = vmatprep.subr.bf16.mxu0 %v8819_v19  ;;  %v931_v19 = vsel %vm899_vm3, 1, %v10803_v0  ;;  %v939_v6 = vsel %vm907_vm5, 1, %v10803_v0 }
  0x28   :  { %457 = vperm.xlu1 %10029, %v402_v22   ;;  %454 = vperm.xlu0 %10028, %v401_v23   ;;  %v346_v22 = vld [vmem:[%s14895_s2 + $0x98] sm:$0xff]  ;;  %v345_v23 = vld [vmem:[%s14895_s2 + $0x90] sm:$0xff] }
  0x29   :  { %vm378_vm7 = vcmp.eq.s32.totalorder %v346_v22, 0  ;;  %vm377_vm8 = vcmp.eq.s32.totalorder %v345_v23, 0  ;;  %vm904_vm12 = vcmp.eq.s32.totalorder %v346_v22, 1  ;;  %vm903_vm13 = vcmp.eq.s32.totalorder %v345_v23, 1  ;;  %v10089_v22 = vld [vmem:[%s14897_s4 + $0x90] ss:$8 sps:$4 sm:$0xff]  }
  0x2a   :  { %294 = vmatpush1.bf16.msra.mxu0 %v8818_v26  ;;  %v11183_v26 = vld [vmem:[%s14899_s3] sm:$0xff]  ;;  %v409_v33 = vsel %vm377_vm8, 1, %v10803_v0  ;;  %v936_v42 = vsel %vm904_vm12, 1, %v10803_v0 }
  0x2b   :  { %295 = vmatprep.subr.bf16.mxu0 %v8821_v27  ;;  %v408_v27 = vsel %vm376_vm4, 1, %v10803_v0  ;;  %vm908_vm4 = vcmp.eq.s32.totalorder %v350_v46, 1  ;;  %v10094_v23 = vld [vmem:[%s14897_s4 + $0xa4] ss:$8 sps:$4 sm:$0xff]  }
  0x2c   :  { %977 = vperm.xlu1 %10029, %v926_v30   ;;  %974 = vperm.xlu0 %10028, %v925_v31   ;;  %v8901_v30 = vcombine.high %v11183_v26, %v11183_v26  ;;  %v10067_v31 = vld [vmem:[%s14897_s4 + $0x14] ss:$8 sps:$4 sm:$0xff]   ;;  %v940_v5 = vsel %vm908_vm4, 1, %v10803_v0  ;;  %v1977_v46 = vld [vmem:[%s14900_s9 + $0x60] sm:$0xff] }
  0x2e   :  { %296 = vmatpush1.bf16.msra.mxu0 %v8820_v32  ;;  %v410_v32 = vsel %vm378_vm7, 1, %v10803_v0 }
  0x2f   :  { %297 = vmatprep.subr.bf16.mxu0 %v8823_v34  ;;  %v10065_v34 = vld [vmem:[%s14897_s4 + $0x10] ss:$8 sps:$4 sm:$0xff]  }
  0x30   :  { %983 = vperm.xlu1 %10029, %v928_v39   ;;  %980 = vperm.xlu0 %10028, %v927_v40   ;;  %v10073_v39 = vld [vmem:[%s14897_s4 + $0x34] ss:$8 sps:$4 sm:$0xff]   ;;  %v348_v40 = vld [vmem:[%s14895_s2 + $0xa8] sm:$0xff] }
  0x31   :  { %vm380_vm14 = vcmp.eq.s32.totalorder %v348_v40, 0  ;;  %vm906_vm2 = vcmp.eq.s32.totalorder %v348_v40, 1  ;;  %v358_v40 = vld [vmem:[%s14895_s2 + $0xf8] sm:$0xff] }
  0x32   :  { %298 = vmatpush1.bf16.msra.mxu0 %v8822_v41  ;;  %v347_v41 = vld [vmem:[%s14895_s2 + $0xa0] sm:$0xff]  ;;  %v412_v49 = vsel %vm380_vm14, 1, %v10803_v0  ;;  %v938_v58 = vsel %vm906_vm2, 1, %v10803_v0  ;;  %vm390_vm1 = vcmp.eq.s32.totalorder %v358_v40, 0  ;;  %vm916_vm5 = vcmp.eq.s32.totalorder %v358_v40, 1 }
  0x33   :  { %299 = vmatprep.subr.bf16.mxu0 %v8825_v43  ;;  %v935_v43 = vsel %vm903_vm13, 1, %v10803_v0  ;;  %vm379_vm15 = vcmp.eq.s32.totalorder %v347_v41, 0  ;;  %vm905_vm3 = vcmp.eq.s32.totalorder %v347_v41, 1  ;;  %v357_v41 = vld [vmem:[%s14895_s2 + $0xf0] sm:$0xff] }
  0x34   :  { %463 = vperm.xlu1 %10029, %v404_v50   ;;  %460 = vperm.xlu0 %10028, %v403_v51   ;;  %v411_v50 = vsel %vm379_vm15, 1, %v10803_v0  ;;  %v10074_v51 = vld [vmem:[%s14897_s4 + $0x40] ss:$8 sps:$4 sm:$0xff]   ;;  %v937_v59 = vsel %vm905_vm3, 1, %v10803_v0  ;;  %vm389_vm2 = vcmp.eq.s32.totalorder %v357_v41, 0 }
  0x36   :  { %300 = vmatpush1.bf16.msra.mxu0 %v8824_v52  ;;  %v10079_v52 = vld [vmem:[%s14897_s4 + $0x54] ss:$8 sps:$4 sm:$0xff]  }
  0x37   :  { %301 = vmatprep.subr.bf16.mxu0 %v8827_v53  ;;  %v414_v53 = vsel %vm382_vm0, 1, %v10803_v0 }
  0x38   :  { %469 = vperm.xlu1 %10029, %v406_v60   ;;  %466 = vperm.xlu0 %10028, %v405_v62   ;;  %v10080_v60 = vld [vmem:[%s14897_s4 + $0x60] ss:$8 sps:$4 sm:$0xff]   ;;  %v10085_v62 = vld [vmem:[%s14897_s4 + $0x74] ss:$8 sps:$4 sm:$0xff]  }
  0x3a   :  { %302 = vmatpush1.bf16.msra.mxu0 %v8826_v1  ;;  %v352_v1 = vld [vmem:[%s14895_s2 + $0xc8] sm:$0xff] }
  0x3b   :  { %303 = vmatprep.subr.bf16.mxu0 %v8829_v2  ;;  %v351_v2 = vld [vmem:[%s14895_s2 + $0xc0] sm:$0xff]  ;;  %vm910_vm11 = vcmp.eq.s32.totalorder %v352_v1, 1 }
  0x3c   :  { %989 = vperm.xlu1 %10029, %v930_v7   ;;  %986 = vperm.xlu0 %10028, %v929_v8   ;;  %v10083_v7 = vld [vmem:[%s14897_s4 + $0x70] ss:$8 sps:$4 sm:$0xff]   ;;  %vm383_vm7 = vcmp.eq.s32.totalorder %v351_v2, 0  ;;  %v10088_v8 = vld [vmem:[%s14897_s4 + $0x84] ss:$8 sps:$4 sm:$0xff]   ;;  %vm909_vm12 = vcmp.eq.s32.totalorder %v351_v2, 1 }
  0x3d   :  { %v415_v14 = vsel %vm383_vm7, 1, %v10803_v0  ;;  %v1989_v2 = vld [vmem:[%s14900_s9 + $0xc0] sm:$0xff] }
  0x3e   :  { %304 = vmatpush1.bf16.msra.mxu0 %v8828_v9  ;;  %v354_v9 = vld [vmem:[%s14895_s2 + $0xd8] sm:$0xff] }
  0x3f   :  { %305 = vmatprep.subr.bf16.mxu0 %v8831_v10  ;;  %v353_v10 = vld [vmem:[%s14895_s2 + $0xd0] sm:$0xff]  ;;  %vm386_vm8 = vcmp.eq.s32.totalorder %v354_v9, 0  ;;  %vm912_vm13 = vcmp.eq.s32.totalorder %v354_v9, 1  ;;  %v10806_v9 = vmov -1e+30  }
  0x40   :  { %995 = vperm.xlu1 %10029, %v932_v15   ;;  %992 = vperm.xlu0 %10028, %v931_v19   ;;  %v10086_v15 = vld [vmem:[%s14897_s4 + $0x80] ss:$8 sps:$4 sm:$0xff]   ;;  %v10091_v19 = vld [vmem:[%s14897_s4 + $0x94] ss:$8 sps:$4 sm:$0xff]   ;;  %vm911_vm14 = vcmp.eq.s32.totalorder %v353_v10, 1  ;;  %60 = vst [vmem:[#allocation3] sm:$0xff] %v10806_v9 }
  0x41   :  { %61 = vst [vmem:[#allocation3 + $0x8] sm:$0xff] %v10806_v9 }
  0x42   :  { %306 = vmatpush1.bf16.msra.mxu0 %v8830_v20  ;;  %v418_v20 = vsel %vm386_vm8, 1, %v10803_v0 }
  0x43   :  { %1609 = vmatprep.subr.bf16.mxu0 %v10064_v21 }
  0x44   :  { %475 = vperm.xlu1 %10029, %v408_v27   ;;  %472 = vperm.xlu0 %10028, %v407_v28   ;;  %v942_v27 = vsel %vm910_vm11, 1, %v10803_v0  ;;  %v941_v28 = vsel %vm909_vm12, 1, %v10803_v0 }
  0x45   :  { %8835 = vmatmul.mubr.msk.bf16.vlgmr.msra.gmra.mrb[0].mxu0 %vm8834_vm6, %v10804_v18  ;;  %v934_v18 = vsel %vm902_vm9, 1, %v10803_v0  ;;  %vm384_vm6 = vcmp.eq.s32.totalorder %v352_v1, 0  ;;  %vm385_vm9 = vcmp.eq.s32.totalorder %v353_v10, 0 }
  0x46   :  { %1610 = vmatpush1.bf16.msra.mxu0 %v10062_v29  ;;  %1641 = vmatprep.mubr.bf16.mxu0 %v8901_v30  ;;  %v416_v13 = vsel %vm384_vm6, 1, %v10803_v0  ;;  %v417_v21 = vsel %vm385_vm9, 1, %v10803_v0  ;;  %v10092_v29 = vld [vmem:[%s14897_s4 + $0xa0] ss:$8 sps:$4 sm:$0xff]   ;;  %v10097_v30 = vld [vmem:[%s14897_s4 + $0xb4] ss:$8 sps:$4 sm:$0xff]  }
  0x47   :  { %1611 = vmatprep.subr.bf16.mxu0 %v10067_v31  ;;  %v356_v31 = vld [vmem:[%s14895_s2 + $0xe8] sm:$0xff]  ;;  %vm915_vm6 = vcmp.eq.s32.totalorder %v357_v41, 1  ;;  %v2021_v41 = vld [vmem:[%s14900_s9 + $0x1c0] sm:$0xff] }
  0x48   :  { %481 = vperm.xlu1 %10029, %v410_v32   ;;  %478 = vperm.xlu0 %10028, %v409_v33   ;;  %v355_v32 = vld [vmem:[%s14895_s2 + $0xe0] sm:$0xff]  ;;  %v944_v33 = vsel %vm912_vm13, 1, %v10803_v0  ;;  %vm388_vm15 = vcmp.eq.s32.totalorder %v356_v31, 0  ;;  %vm914_vm3 = vcmp.eq.s32.totalorder %v356_v31, 1 }
  0x49   :  { %vm387_vm0 = vcmp.eq.s32.totalorder %v355_v32, 0  ;;  %vm913_vm4 = vcmp.eq.s32.totalorder %v355_v32, 1 }
  0x4a   :  { %1612 = vmatpush1.bf16.msra.mxu0 %v10065_v34  ;;  %v943_v34 = vsel %vm911_vm14, 1, %v10803_v0  ;;  %v945_v1 = vsel %vm913_vm4, 1, %v10803_v0 }
  0x4b   :  { %1613 = vmatprep.subr.bf16.mxu0 %v10070_v35  ;;  %v1965_v35 = vld [vmem:[%s14900_s9] sm:$0xff] }
  0x4c   :  { %1001 = vperm.xlu1 %10029, %v934_v18   ;;  %998 = vperm.xlu0 %10028, %v933_v37   ;;  %v1969_v18 = vld [vmem:[%s14900_s9 + $0x20] sm:$0xff]  ;;  %v10095_v37 = vld [vmem:[%s14897_s4 + $0xb0] ss:$8 sps:$4 sm:$0xff]  }
  0x4e   :  { %1614 = vmatpush1.bf16.msra.mxu0 %v10068_v38  ;;  %v8952_v38 = vcombine.high %v1965_v35, %v1969_v18 }
  0x4f   :  { %1615 = vmatprep.subr.bf16.mxu0 %v10073_v39  ;;  %v10100_v39 = vld [vmem:[%s14897_s4 + $0xc4] ss:$8 sps:$4 sm:$0xff]  }
  0x50   :  { %1007 = vperm.xlu1 %10029, %v936_v42   ;;  %1004 = vperm.xlu0 %10028, %v935_v43   ;;  %v8951_v42 = vcombine.low %v1965_v35, %v1969_v18  ;;  %v420_v43 = vsel %vm388_vm15, 1, %v10803_v0 }
  0x51   :  { %2733 = vmatprep.subr.bf16.mxu1 %v8952_v38 }
  0x52   :  { %1616 = vmatpush1.bf16.msra.mxu0 %v10071_v44  ;;  %v419_v44 = vsel %vm387_vm0, 1, %v10803_v0  ;;  %2734 = vmatpush1.bf16.msra.mxu1 %v8951_v42  ;;  %v2025_v42 = vld [vmem:[%s14900_s9 + $0x1e0] sm:$0xff] }
  0x53   :  { %1617 = vmatprep.subr.bf16.mxu0 %v10076_v45  ;;  %v1973_v45 = vld [vmem:[%s14900_s9 + $0x40] sm:$0xff] }
  0x54   :  { %487 = vperm.xlu1 %10029, %v412_v49   ;;  %484 = vperm.xlu0 %10028, %v411_v50   ;;  %v8960_v49 = vcombine.high %v1973_v45, %v1977_v46  ;;  %v10103_v50 = vld [vmem:[%s14897_s4 + $0xd4] ss:$8 sps:$4 sm:$0xff]  }
  0x56   :  { %1618 = vmatpush1.bf16.msra.mxu0 %v10074_v51  ;;  %v8959_v51 = vcombine.low %v1973_v45, %v1977_v46  ;;  %2735 = vmatprep.subr.bf16.mxu1 %v8960_v49  ;;  %v9008_v46 = vcombine.high %v2021_v41, %v2025_v42 }
  0x57   :  { %1619 = vmatprep.subr.bf16.mxu0 %v10079_v52  ;;  %v422_v52 = vsel %vm390_vm1, 1, %v10803_v0 }
  0x58   :  { %493 = vperm.xlu1 %10029, %v414_v53   ;;  %490 = vperm.xlu0 %10028, %v413_v54   ;;  %v421_v53 = vsel %vm389_vm2, 1, %v10803_v0  ;;  %v1981_v54 = vld [vmem:[%s14900_s9 + $0x80] sm:$0xff] }
  0x59   :  { %2736 = vmatpush1.bf16.msra.mxu1 %v8959_v51  ;;  %v2029_v51 = vld [vmem:[%s14900_s9 + $0x200] sm:$0xff] }
  0x5a   :  { %1620 = vmatpush1.bf16.msra.mxu0 %v10077_v56  ;;  %v1985_v56 = vld [vmem:[%s14900_s9 + $0xa0] sm:$0xff] }
  0x5b   :  { %1621 = vmatprep.subr.bf16.mxu0 %v10082_v57  ;;  %v10101_v57 = vld [vmem:[%s14897_s4 + $0xd0] ss:$8 sps:$4 sm:$0xff]  }
  0x5c   :  { %1013 = vperm.xlu1 %10029, %v938_v58   ;;  %1010 = vperm.xlu0 %10028, %v937_v59   ;;  %v8968_v58 = vcombine.high %v1981_v54, %v1985_v56  ;;  %v10106_v59 = vld [vmem:[%s14897_s4 + $0xe4] ss:$8 sps:$4 sm:$0xff]  }
  0x5e   :  { %1622 = vmatpush1.bf16.msra.mxu0 %v10080_v60  ;;  %v8967_v60 = vcombine.low %v1981_v54, %v1985_v56  ;;  %2737 = vmatprep.subr.bf16.mxu1 %v8968_v58 }
  0x5f   :  { %1623 = vmatprep.subr.bf16.mxu0 %v10085_v62  ;;  %v946_v62 = vsel %vm914_vm3, 1, %v10803_v0 }
  0x60   :  { %1019 = vperm.xlu1 %10029, %v940_v5   ;;  %1016 = vperm.xlu0 %10028, %v939_v6   ;;  %v1993_v5 = vld [vmem:[%s14900_s9 + $0xe0] sm:$0xff] }
  0x61   :  { %v10104_v6 = vld [vmem:[%s14897_s4 + $0xe0] ss:$8 sps:$4 sm:$0xff]   ;;  %2738 = vmatpush1.bf16.msra.mxu1 %v8967_v60  ;;  %v8975_v10 = vcombine.low %v1989_v2, %v1993_v5 }
  0x62   :  { %1624 = vmatpush1.bf16.msra.mxu0 %v10083_v7  ;;  %v8976_v7 = vcombine.high %v1989_v2, %v1993_v5 }
  0x63   :  { %1625 = vmatprep.subr.bf16.mxu0 %v10088_v8  ;;  %v10109_v8 = vld [vmem:[%s14897_s4 + $0xf4] ss:$8 sps:$4 sm:$0xff]  }
  0x64   :  { %499 = vperm.xlu1 %10029, %v416_v13   ;;  %496 = vperm.xlu0 %10028, %v415_v14   ;;  %v948_v13 = vsel %vm916_vm5, 1, %v10803_v0  ;;  %v947_v14 = vsel %vm915_vm6, 1, %v10803_v0 }
  0x65   :  { %2739 = vmatprep.subr.bf16.mxu1 %v8976_v7 }
  0x66   :  { %1626 = vmatpush1.bf16.msra.mxu0 %v10086_v15  ;;  %v10107_v15 = vld [vmem:[%s14897_s4 + $0xf0] ss:$8 sps:$4 sm:$0xff]   ;;  %2740 = vmatpush1.bf16.msra.mxu1 %v8975_v10 }
  0x67   :  { %1627 = vmatprep.subr.bf16.mxu0 %v10091_v19  ;;  %v1997_v19 = vld [vmem:[%s14900_s9 + $0x100] sm:$0xff] }
  0x68   :  { %505 = vperm.xlu1 %10029, %v418_v20   ;;  %502 = vperm.xlu0 %10028, %v417_v21   ;;  %v2001_v20 = vld [vmem:[%s14900_s9 + $0x120] sm:$0xff] }
  0x69   :  { %v8984_v21 = vcombine.high %v1997_v19, %v2001_v20 }
  0x6a   :  { %1628 = vmatpush1.bf16.msra.mxu0 %v10089_v22  ;;  %v8983_v22 = vcombine.low %v1997_v19, %v2001_v20  ;;  %v2049_v19 = vld [vmem:[%s14900_s9 + $0x2a0] sm:$0xff] }
  0x6b   :  { %1629 = vmatprep.subr.bf16.mxu0 %v10094_v23  ;;  %v8900_v23 = vcombine.low %v11183_v26, %v11183_v26  ;;  %2741 = vmatprep.subr.bf16.mxu1 %v8984_v21  ;;  %v2013_v26 = vld [vmem:[%s14900_s9 + $0x180] sm:$0xff] }
  0x6c   :  { %1025 = vperm.xlu1 %10029, %v942_v27   ;;  %1022 = vperm.xlu0 %10028, %v941_v28   ;;  %v2005_v27 = vld [vmem:[%s14900_s9 + $0x140] sm:$0xff] }
  0x6d   :  { %2742 = vmatpush1.bf16.msra.mxu1 %v8983_v22  ;;  %v2009_v28 = vld [vmem:[%s14900_s9 + $0x160] sm:$0xff] }
  0x6e   :  { %1630 = vmatpush1.bf16.msra.mxu0 %v10092_v29  ;;  %v8992_v31 = vcombine.high %v2005_v27, %v2009_v28  ;;  %v8991_v32 = vcombine.low %v2005_v27, %v2009_v28  ;;  %v10771_v20 = vld [vmem:[%s14896_s0] sm:$0xff] }
  0x6f   :  { %1631 = vmatprep.subr.bf16.mxu0 %v10097_v30 }
  0x70   :  { %1031 = vperm.xlu1 %10029, %v944_v33   ;;  %1028 = vperm.xlu0 %10028, %v943_v34   ;;  %v2017_v33 = vld [vmem:[%s14900_s9 + $0x1a0] sm:$0xff] }
  0x71   :  { %2743 = vmatprep.subr.bf16.mxu1 %v8992_v31  ;;  %v9000_v18 = vcombine.high %v2013_v26, %v2017_v33  ;;  %v8999_v38 = vcombine.low %v2013_v26, %v2017_v33  ;;  %v10772_v31 = vld [vmem:[%s14896_s0 + $0x18] sm:$0xff]  ;;  %v2053_v26 = vld [vmem:[%s14900_s9 + $0x2c0] sm:$0xff] }
  0x72   :  { %1632 = vmatpush1.bf16.msra.mxu0 %v10095_v37  ;;  %2744 = vmatpush1.bf16.msra.mxu1 %v8991_v32  ;;  %v2057_v33 = vld [vmem:[%s14900_s9 + $0x2e0] sm:$0xff] }
  0x73   :  { %1633 = vmatprep.subr.bf16.mxu0 %v10100_v39  ;;  %2745 = vmatprep.subr.bf16.mxu1 %v9000_v18 }
  0x74   :  { %511 = vperm.xlu1 %10029, %v420_v43   ;;  %508 = vperm.xlu0 %10028, %v419_v44  }
  0x76   :  { %1634 = vmatpush1.bf16.msra.mxu0 %v10098_v48  ;;  %2746 = vmatpush1.bf16.msra.mxu1 %v8999_v38  ;;  %v9040_v38 = vcombine.high %v2053_v26, %v2057_v33 }
  0x77   :  { %1635 = vmatprep.subr.bf16.mxu0 %v10103_v50  ;;  %2747 = vmatprep.subr.bf16.mxu1 %v9008_v46 }
  0x78   :  { %517 = vperm.xlu1 %10029, %v422_v52   ;;  %514 = vperm.xlu0 %10028, %v421_v53  }
  0x7a   :  { %1636 = vmatpush1.bf16.msra.mxu0 %v10101_v57 }
  0x7b   :  { %1637 = vmatprep.subr.bf16.mxu0 %v10106_v59 }
  0x7c   :  { %1037 = vperm.xlu1 %10029, %v946_v62   ;;  %1034 = vperm.xlu0 %10028, %v945_v1   ;;  %v2041_v1 = vld [vmem:[%s14900_s9 + $0x260] sm:$0xff] }
  0x7e   :  { %1638 = vmatpush1.bf16.msra.mxu0 %v10104_v6 }
  0x7f   :  { %1639 = vmatprep.subr.bf16.mxu0 %v10109_v8 }
  0x80   :  { %1043 = vperm.xlu1 %10029, %v948_v13   ;;  %1040 = vperm.xlu0 %10028, %v947_v14   ;;  %v10770_v14 = vld [vmem:[%s14896_s0 + $0x8] sm:$0xff] }
  0x82   :  { %1640 = vmatpush1.bf16.msra.mxu0 %v10107_v15  ;;  %v2045_v15 = vld [vmem:[%s14900_s9 + $0x280] sm:$0xff] }
  0x83   :  { %v431_v29 = vpop.permute.xlu1 %430  ;;  %v425_v30 = vpop.permute.xlu0 %424  ;;  %v9032_v27 = vcombine.high %v2045_v15, %v2049_v19 }
  0x84   :  { %vm521_vm7 = vcmp.eq.s32.totalorder %v431_v29, 1  ;;  %vm519_vm8 = vcmp.eq.s32.totalorder %v425_v30, 1  ;;  %v9031_v30 = vcombine.low %v2045_v15, %v2049_v19 }
  0x85   :  { %vm553_vm9 = vmpackc.low %vm521_vm7, %vm521_vm7  ;;  %1642 = vmatmul.mubr.bf16.vlgmr.msra.gmra.mrb[4].mxu0 %v8900_v23 }
  0x86   :  { %vm551_vm11 = vmpackc.low %vm519_vm8, %vm519_vm8  ;;  %v585_v37 = vsel %vm553_vm9, %v10929_v11, 4048220490 }
  0x87   :  { %v434_v34 = vpop.permute.xlu1 %433  ;;  %v428_v35 = vpop.permute.xlu0 %427  ;;  %v583_v39 = vsel %vm551_vm11, %v10903_v3, 4048220490 }
  0x88   :  { %vm522_vm12 = vcmp.eq.s32.totalorder %v434_v34, 1  ;;  %vm520_vm13 = vcmp.eq.s32.totalorder %v428_v35, 1  ;;  %v10773_v34 = vld [vmem:[%s14896_s0 + $0x10] sm:$0xff] }
  0x89   :  { %vm554_vm14 = vmpackc.low %vm522_vm12, %vm522_vm12 }
  0x8a   :  { %v586_v40 = vsel %vm554_vm14, %v10934_v12, 4048220490  ;;  %vm552_vm15 = vmpackc.low %vm520_vm13, %vm520_vm13  ;;  %v9007_v12 = vcombine.low %v2021_v41, %v2025_v42  ;;  %v9039_v41 = vcombine.low %v2053_v26, %v2057_v33  ;;  %v10774_v42 = vld [vmem:[%s14896_s0 + $0x28] sm:$0xff]  ;;  %v10780_v26 = vld [vmem:[%s14896_s0 + $0x58] sm:$0xff] }
  0x8b   :  { %v8838_v11 = vcombine.low %v585_v37, %v586_v40  ;;  %v8839_v43 = vcombine.high %v585_v37, %v586_v40  ;;  %v584_v44 = vsel %vm552_vm15, %v10910_v4, 4048220490  ;;  %v440_v45 = vpop.permute.xlu1 %439  ;;  %v437_v3 = vpop.permute.xlu0 %436  ;;  %v2033_v4 = vld [vmem:[%s14900_s9 + $0x220] sm:$0xff] }
  0x8c   :  { %v8836_v48 = vcombine.low %v583_v39, %v584_v44  ;;  %v8837_v49 = vcombine.high %v583_v39, %v584_v44  ;;  %vm524_vm0 = vcmp.eq.s32.totalorder %v440_v45, 1  ;;  %vm523_vm1 = vcmp.eq.s32.totalorder %v437_v3, 1  ;;  %2748 = vmatpush1.bf16.msra.mxu1 %v9007_v12  ;;  %v10775_v44 = vld [vmem:[%s14896_s0 + $0x20] sm:$0xff] }
  0x8d   :  { %vm556_vm2 = vmpackc.low %vm524_vm0, %vm524_vm0  ;;  %v9016_v56 = vcombine.high %v2029_v51, %v2033_v4 }
  0x8e   :  { %v588_v50 = vsel %vm556_vm2, %v10957_v17, 4048220490  ;;  %vm555_vm3 = vmpackc.low %vm523_vm1, %vm523_vm1  ;;  %v9015_v17 = vcombine.low %v2029_v51, %v2033_v4 }
  0x8f   :  { %v587_v52 = vsel %vm555_vm3, %v10952_v16, 4048220490  ;;  %v446_v53 = vpop.permute.xlu1 %445  ;;  %v443_v54 = vpop.permute.xlu0 %442  ;;  %2749 = vmatprep.subr.bf16.mxu1 %v9016_v56  ;;  %v2037_v16 = vld [vmem:[%s14900_s9 + $0x240] sm:$0xff] }
  0x90   :  { %v8840_v57 = vcombine.low %v587_v52, %v588_v50  ;;  %v8841_v58 = vcombine.high %v587_v52, %v588_v50  ;;  %vm526_vm4 = vcmp.eq.s32.totalorder %v446_v53, 1  ;;  %vm525_vm5 = vcmp.eq.s32.totalorder %v443_v54, 1  ;;  %2750 = vmatpush1.bf16.msra.mxu1 %v9015_v17  ;;  %v2069_v54 = vld [vmem:[%s14900_s9 + $0x340] sm:$0xff] }
  0x91   :  { %vm558_vm6 = vmpackc.low %vm526_vm4, %vm526_vm4  ;;  %v9024_v7 = vcombine.high %v2037_v16, %v2041_v1  ;;  %v2073_v56 = vld [vmem:[%s14900_s9 + $0x360] sm:$0xff] }
  0x92   :  { %v11414_v59 = vmax.bf16 %v8840_v57, %v8836_v48  ;;  %v11416_v60 = vmax.bf16 %v8841_v58, %v8837_v49  ;;  %v590_v62 = vsel %vm558_vm6, %v10985_v25, 4048220490  ;;  %vm557_vm7 = vmpackc.low %vm525_vm5, %vm525_vm5  ;;  %v9023_v25 = vcombine.low %v2037_v16, %v2041_v1  ;;  %v2065_v48 = vld [vmem:[%s14900_s9 + $0x320] sm:$0xff]  ;;  %v10777_v57 = vld [vmem:[%s14896_s0 + $0x30] sm:$0xff] }
  0x93   :  { %v589_v2 = vsel %vm557_vm7, %v10980_v24, 4048220490  ;;  %v954_v5 = vpop.permute.xlu1 %953  ;;  %v951_v6 = vpop.permute.xlu0 %950  ;;  %2751 = vmatprep.subr.bf16.mxu1 %v9024_v7  ;;  %v9056_v16 = vcombine.high %v2069_v54, %v2073_v56 }
  0x94   :  { %v8842_v8 = vcombine.low %v589_v2, %v590_v62  ;;  %v8843_v9 = vcombine.high %v589_v2, %v590_v62  ;;  %vm1046_vm8 = vcmp.eq.s32.totalorder %v954_v5, 1  ;;  %vm1045_vm9 = vcmp.eq.s32.totalorder %v951_v6, 1  ;;  %2752 = vmatpush1.bf16.msra.mxu1 %v9023_v25  ;;  %v2077_v25 = vld [vmem:[%s14900_s9 + $0x380] sm:$0xff] }
  0x95   :  { %vm1078_vm11 = vmpackc.low %vm1046_vm8, %vm1046_vm8  ;;  %2753 = vmatprep.subr.bf16.mxu1 %v9032_v27  ;;  %v9055_v5 = vcombine.low %v2069_v54, %v2073_v56  ;;  %v2089_v27 = vld [vmem:[%s14900_s9 + $0x3e0] sm:$0xff] }
  0x96   :  { %v11426_v10 = vmax.bf16 %v8842_v8, %v8838_v11  ;;  %v11428_v13 = vmax.bf16 %v8843_v9, %v8839_v43  ;;  %v1110_v24 = vsel %vm1078_vm11, %v10770_v14, 4048220490  ;;  %vm1077_vm12 = vmpackc.low %vm1045_vm9, %vm1045_vm9  ;;  %v2061_v43 = vld [vmem:[%s14900_s9 + $0x300] sm:$0xff]  ;;  %v10778_v8 = vld [vmem:[%s14896_s0 + $0x48] sm:$0xff] }
  0x97   :  { %v1109_v21 = vsel %vm1077_vm12, %v10771_v20, 4048220490  ;;  %v960_v22 = vpop.permute.xlu1 %959  ;;  %v957_v23 = vpop.permute.xlu0 %956  ;;  %v9048_v50 = vcombine.high %v2061_v43, %v2065_v48  ;;  %v9047_v51 = vcombine.low %v2061_v43, %v2065_v48  ;;  %v2081_v14 = vld [vmem:[%s14900_s9 + $0x3a0] sm:$0xff] }
  0x98   :  { %v8868_v28 = vcombine.low %v1109_v21, %v1110_v24  ;;  %v8869_v29 = vcombine.high %v1109_v21, %v1110_v24  ;;  %vm1048_vm13 = vcmp.eq.s32.totalorder %v960_v22, 1  ;;  %vm1047_vm14 = vcmp.eq.s32.totalorder %v957_v23, 1  ;;  %2754 = vmatpush1.bf16.msra.mxu1 %v9031_v30  ;;  %v10779_v24 = vld [vmem:[%s14896_s0 + $0x40] sm:$0xff] }
  0x99   :  { %vm1080_vm15 = vmpackc.low %vm1048_vm13, %vm1048_vm13  ;;  %2755 = vmatprep.subr.bf16.mxu1 %v9040_v38  ;;  %v9064_v21 = vcombine.high %v2077_v25, %v2081_v14  ;;  %v9063_v22 = vcombine.low %v2077_v25, %v2081_v14  ;;  %v2085_v23 = vld [vmem:[%s14900_s9 + $0x3c0] sm:$0xff]  ;;  %v10116_v14 = vld [vmem:[%s14901_s6 + $0x50] sm:$0xff]  }
  0x9a   :  { %v1112_v32 = vsel %vm1080_vm15, %v10772_v31, 4048220490  ;;  %vm1079_vm0 = vmpackc.low %vm1047_vm14, %vm1047_vm14  ;;  %v9072_v30 = vcombine.high %v2085_v23, %v2089_v27  ;;  %v9071_v38 = vcombine.low %v2085_v23, %v2089_v27  ;;  %v10120_v27 = vld [vmem:[%s14901_s6 + $0x60] sm:$0xff]  }
  0x9b   :  { %v1111_v35 = vsel %vm1079_vm0, %v10773_v34, 4048220490  ;;  %v966_v18 = vpop.permute.xlu1 %965  ;;  %v963_v37 = vpop.permute.xlu0 %962  ;;  %v10781_v34 = vld [vmem:[%s14896_s0 + $0x50] sm:$0xff] }
  0x9c   :  { %v8870_v39 = vcombine.low %v1111_v35, %v1112_v32  ;;  %v8871_v40 = vcombine.high %v1111_v35, %v1112_v32  ;;  %vm1050_vm1 = vcmp.eq.s32.totalorder %v966_v18, 1  ;;  %vm1049_vm2 = vcmp.eq.s32.totalorder %v963_v37, 1  ;;  %2756 = vmatpush1.bf16.msra.mxu1 %v9039_v41 }
  0x9d   :  { %vm1082_vm3 = vmpackc.low %vm1050_vm1, %vm1050_vm1  ;;  %2757 = vmatprep.subr.bf16.mxu1 %v9048_v50 }
  0x9e   :  { %v1114_v11 = vsel %vm1082_vm3, %v10774_v42, 4048220490  ;;  %vm1081_vm4 = vmpackc.low %vm1049_vm2, %vm1049_vm2  ;;  %v11526_v42 = vld [vmem:[%s14900_s9 + $0x10] sm:$0xff] }
  0x9f   :  { %v1113_v45 = vsel %vm1081_vm4, %v10775_v44, 4048220490  ;;  %v972_v3 = vpop.permute.xlu1 %971  ;;  %v969_v46 = vpop.permute.xlu0 %968  ;;  %322 = vadd.xlane.f32.xlu0 %v11153_v63  ;;  %v10776_v63 = vld [vmem:[%s14896_s0 + $0x38] sm:$0xff] }
  0xa0   :  { %v8872_v49 = vcombine.low %v1113_v45, %v1114_v11  ;;  %v8873_v12 = vcombine.high %v1113_v45, %v1114_v11  ;;  %vm1052_vm5 = vcmp.eq.s32.totalorder %v972_v3, 1  ;;  %vm1051_vm6 = vcmp.eq.s32.totalorder %v969_v46, 1  ;;  %2758 = vmatpush1.bf16.msra.mxu1 %v9047_v51  ;;  %v11531_v11 = vld [vmem:[%s14900_s9 + $0x30] sm:$0xff] }
  0xa1   :  { %vm1084_vm7 = vmpackc.low %vm1052_vm5, %vm1052_vm5  ;;  %2759 = vmatprep.subr.bf16.mxu1 %v9056_v16  ;;  %v8955_v46 = vcombine.low %v11526_v42, %v11531_v11 }
  0xa2   :  { %v11467_v4 = vmax.bf16 %v8872_v49, %v8868_v28  ;;  %v11469_v52 = vmax.bf16 %v8873_v12, %v8869_v29  ;;  %v1116_v53 = vsel %vm1084_vm7, %v10776_v63, 4048220490  ;;  %vm1083_vm8 = vmpackc.low %vm1051_vm6, %vm1051_vm6 }
  0xa3   :  { %v1115_v58 = vsel %vm1083_vm8, %v10777_v57, 4048220490  ;;  %v452_v17 = vpop.permute.xlu1 %451  ;;  %v449_v62 = vpop.permute.xlu0 %448 }
  0xa4   :  { %v8874_v1 = vcombine.low %v1115_v58, %v1116_v53  ;;  %v8875_v2 = vcombine.high %v1115_v58, %v1116_v53  ;;  %vm528_vm9 = vcmp.eq.s32.totalorder %v452_v17, 1  ;;  %vm527_vm11 = vcmp.eq.s32.totalorder %v449_v62, 1  ;;  %2760 = vmatpush1.bf16.msra.mxu1 %v9055_v5 }
  0xa5   :  { %vm560_vm12 = vmpackc.low %vm528_vm9, %vm528_vm9  ;;  %2761 = vmatprep.subr.bf16.mxu1 %v9064_v21  ;;  %v10119_v21 = vld [vmem:[%s14901_s6 + $0x18] sm:$0xff]  }
  0xa6   :  { %v11483_v6 = vmax.bf16 %v8874_v1, %v8870_v39  ;;  %v11485_v7 = vmax.bf16 %v8875_v2, %v8871_v40  ;;  %v592_v9 = vsel %vm560_vm12, %v10778_v8, 4048220490  ;;  %vm559_vm13 = vmpackc.low %vm527_vm11, %vm527_vm11  ;;  %v10112_v1 = vld [vmem:[%s14901_s6 + $0x40] sm:$0xff]  }
  0xa7   :  { %v591_v15 = vsel %vm559_vm13, %v10779_v24, 4048220490  ;;  %v458_v19 = vpop.permute.xlu1 %457  ;;  %v455_v20 = vpop.permute.xlu0 %454  ;;  %9871 = vmatprep.subr.bf16.mxu0 %v10112_v1 }
  0xa8   :  { %v8844_v28 = vcombine.low %v591_v15, %v592_v9  ;;  %v8845_v29 = vcombine.high %v591_v15, %v592_v9  ;;  %vm530_vm14 = vcmp.eq.s32.totalorder %v458_v19, 1  ;;  %vm529_vm15 = vcmp.eq.s32.totalorder %v455_v20, 1  ;;  %2762 = vmatpush1.bf16.msra.mxu1 %v9063_v22  ;;  %v10118_v20 = vld [vmem:[%s14901_s6 + $0x58] sm:$0xff]  }
  0xa9   :  { %vm562_vm0 = vmpackc.low %vm530_vm14, %vm530_vm14  ;;  %2763 = vmatprep.subr.bf16.mxu1 %v9072_v30 }
  0xaa   :  { %v11506_v31 = vmax.bf16 %v8844_v28, %v11414_v59  ;;  %v11509_v32 = vmax.bf16 %v8845_v29, %v11416_v60  ;;  %v594_v33 = vsel %vm562_vm0, %v10780_v26, 4048220490  ;;  %vm561_vm1 = vmpackc.low %vm529_vm15, %vm529_vm15  ;;  %v10121_v28 = vld [vmem:[%s14901_s6 + $0x20] sm:$0xff]  }
  0xab   :  { %v593_v35 = vsel %vm561_vm1, %v10781_v34, 4048220490  ;;  %v978_v18 = vpop.permute.xlu1 %977  ;;  %v975_v37 = vpop.permute.xlu0 %974 }
  0xac   :  { %v8846_v39 = vcombine.low %v593_v35, %v594_v33  ;;  %v8847_v59 = vcombine.high %v593_v35, %v594_v33  ;;  %vm1054_vm2 = vcmp.eq.s32.totalorder %v978_v18, 1  ;;  %vm1053_vm3 = vcmp.eq.s32.totalorder %v975_v37, 1  ;;  %2764 = vmatpush1.bf16.msra.mxu1 %v9071_v38  ;;  %v10123_v33 = vld [vmem:[%s14901_s6 + $0x28] sm:$0xff]  }
  0xad   :  { %vm1086_vm4 = vmpackc.low %vm1054_vm2, %vm1054_vm2 }
  0xae   :  { %v11518_v60 = vmax.bf16 %v8846_v39, %v11426_v10  ;;  %v11521_v40 = vmax.bf16 %v8847_v59, %v11428_v13  ;;  %v1118_v41 = vsel %vm1086_vm4, %v10778_v8, 4048220490  ;;  %vm1085_vm5 = vmpackc.low %vm1053_vm3, %vm1053_vm3  ;;  %v8956_v10 = vcombine.high %v11526_v42, %v11531_v11  ;;  %v10115_v8 = vld [vmem:[%s14901_s6 + $0x8] sm:$0xff]   ;;  %v10124_v39 = vld [vmem:[%s14901_s6 + $0x70] sm:$0xff]  }
  0xaf   :  { %v1117_v43 = vsel %vm1085_vm5, %v10779_v24, 4048220490  ;;  %v984_v44 = vpop.permute.xlu1 %983  ;;  %v981_v45 = vpop.permute.xlu0 %980  ;;  %v10117_v24 = vld [vmem:[%s14901_s6 + $0x10] sm:$0xff]  }
  0xb0   :  { %v8876_v13 = vcombine.low %v1117_v43, %v1118_v41  ;;  %v8877_v3 = vcombine.high %v1117_v43, %v1118_v41  ;;  %vm1056_vm6 = vcmp.eq.s32.totalorder %v984_v44, 1  ;;  %vm1055_vm7 = vcmp.eq.s32.totalorder %v981_v45, 1  ;;  %2815 = vmatprep.subr.bf16.mxu1 %v8956_v10  ;;  %v10125_v41 = vld [vmem:[%s14901_s6 + $0x30] sm:$0xff]   ;;  %v10782_v10 = vld [vmem:[%s14896_s0 + $0x68] sm:$0xff] }
  0xb1   :  { %vm1088_vm8 = vmpackc.low %vm1056_vm6, %vm1056_vm6 }
  0xb2   :  { %v11538_v48 = vmax.bf16 %v8876_v13, %v11467_v4  ;;  %v11541_v49 = vmax.bf16 %v8877_v3, %v11469_v52  ;;  %v1120_v12 = vsel %vm1088_vm8, %v10780_v26, 4048220490  ;;  %vm1087_vm9 = vmpackc.low %vm1055_vm7, %vm1055_vm7  ;;  %v10122_v26 = vld [vmem:[%s14901_s6 + $0x68] sm:$0xff]   ;;  %v10783_v3 = vld [vmem:[%s14896_s0 + $0x60] sm:$0xff] }
  0xb3   :  { %v1119_v50 = vsel %vm1087_vm9, %v10781_v34, 4048220490  ;;  %v464_v51 = vpop.permute.xlu1 %463  ;;  %v461_v63 = vpop.permute.xlu0 %460 }
  0xb4   :  { %v8878_v53 = vcombine.low %v1119_v50, %v1120_v12  ;;  %v8879_v54 = vcombine.high %v1119_v50, %v1120_v12  ;;  %vm532_vm11 = vcmp.eq.s32.totalorder %v464_v51, 1  ;;  %vm531_vm12 = vcmp.eq.s32.totalorder %v461_v63, 1  ;;  %v10784_v50 = vld [vmem:[%s14896_s0 + $0x78] sm:$0xff]  ;;  %v10785_v63 = vld [vmem:[%s14896_s0 + $0x70] sm:$0xff] }
  0xb5   :  { %vm11609_vm14 = vmpackc.low %vm532_vm11, %vm532_vm11 }
  0xb6   :  { %v11544_v56 = vmax.bf16 %v8878_v53, %v11483_v6  ;;  %v11547_v57 = vmax.bf16 %v8879_v54, %v11485_v7  ;;  %v10113_v6 = vld [vmem:[%s14901_s6] sm:$0xff]   ;;  %v10114_v7 = vld [vmem:[%s14901_s6 + $0x48] sm:$0xff]   ;;  %vm11617_vm0 = vmpackc.low %vm531_vm12, %vm531_vm12  ;;  %v596_v13 = vsel %vm11609_vm14, %v10782_v10, 4048220490 }
  0xb7   :  { %v470_v58 = vpop.permute.xlu1 %469  ;;  %v467_v17 = vpop.permute.xlu0 %466  ;;  %9872 = vmatpush3.bf16.msra.mxu0 %v10113_v6  ;;  %v595_v12 = vsel %vm11617_vm0, %v10783_v3, 4048220490 }
  0xb8   :  { %9873 = vmatprep.subr.bf16.mxu0 %v10114_v7  ;;  %vm534_vm13 = vcmp.eq.s32.totalorder %v470_v58, 1  ;;  %vm533_vm15 = vcmp.eq.s32.totalorder %v467_v17, 1  ;;  %v10126_v58 = vld [vmem:[%s14901_s6 + $0x78] sm:$0xff]   ;;  %v8849_v7 = vcombine.high %v595_v12, %v596_v13 }
  0xb9   :  { %vm11621_vm2 = vmpackc.low %vm534_vm13, %vm534_vm13 }
  0xba   :  { %vm11628_vm4 = vmpackc.low %vm533_vm15, %vm533_vm15  ;;  %v598_v51 = vsel %vm11621_vm2, %v10784_v50, 4048220490  ;;  %v804_v59 = vmax.bf16 %v8849_v7, %v11509_v32  ;;  %v10787_v32 = vld [vmem:[%s14896_s0 + $0x80] sm:$0xff]  ;;  %v10790_v7 = vld [vmem:[%s14896_s0 + $0xa8] sm:$0xff] }
  0xbb   :  { %v990_v4 = vpop.permute.xlu1 %989  ;;  %v987_v62 = vpop.permute.xlu0 %986  ;;  %9874 = vmatpush3.bf16.msra.mxu0 %v10115_v8  ;;  %v597_v53 = vsel %vm11628_vm4, %v10785_v63, 4048220490 }
  0xbc   :  { %9875 = vmatprep.subr.bf16.mxu0 %v10116_v14  ;;  %vm1058_vm1 = vcmp.eq.s32.totalorder %v990_v4, 1  ;;  %vm1057_vm3 = vcmp.eq.s32.totalorder %v987_v62, 1  ;;  %v10127_v4 = vld [vmem:[%s14901_s6 + $0x38] sm:$0xff]   ;;  %v8848_v62 = vcombine.low %v595_v12, %v596_v13  ;;  %v8850_v8 = vcombine.low %v597_v53, %v598_v51  ;;  %v10786_v13 = vld [vmem:[%s14896_s0 + $0x88] sm:$0xff] }
  0xbd   :  { %vm11636_vm6 = vmpackc.low %vm1058_vm1, %vm1058_vm1 }
  0xbe   :  { %vm1089_vm8 = vmpackc.low %vm1057_vm3, %vm1057_vm3 }
  0xbf   :  { %v11549_v16 = vpop.permute.xlu1 %995  ;;  %v11551_v52 = vpop.permute.xlu0 %992  ;;  %9876 = vmatpush3.bf16.msra.mxu0 %v10117_v24  ;;  %v1121_v1 = vsel %vm1089_vm8, %v10783_v3, 4048220490 }
  0xc0   :  { %9877 = vmatprep.subr.bf16.mxu0 %v10118_v20  ;;  %vm1060_vm5 = vcmp.eq.s32.totalorder %v11549_v16, 1  ;;  %vm1059_vm7 = vcmp.eq.s32.totalorder %v11551_v52, 1  ;;  %v1122_v16 = vsel %vm11636_vm6, %v10782_v10, 4048220490  ;;  %v11712_v20 = vld [vmem:[%s14900_s9 + $0x8] sm:$0xff] }
  0xc1   :  { %vm11669_vm11 = vmpackc.low %vm1060_vm5, %vm1060_vm5  ;;  %v8881_v34 = vcombine.high %v1121_v1, %v1122_v16 }
  0xc2   :  { %vm11680_vm13 = vmpackc.low %vm1059_vm7, %vm1059_vm7  ;;  %v1124_v14 = vsel %vm11669_vm11, %v10784_v50, 4048220490 }
  0xc3   :  { %v11556_v2 = vpop.permute.xlu1 %475  ;;  %v11558_v5 = vpop.permute.xlu0 %472  ;;  %9878 = vmatpush3.bf16.msra.mxu0 %v10119_v21  ;;  %v11717_v21 = vld [vmem:[%s14900_s9 + $0x28] sm:$0xff]  ;;  %v1330_v12 = vmax.bf16 %v8881_v34, %v11541_v49 }
  0xc4   :  { %9879 = vmatprep.subr.bf16.mxu0 %v10120_v27  ;;  %vm536_vm9 = vcmp.eq.s32.totalorder %v11556_v2, 1  ;;  %vm535_vm12 = vcmp.eq.s32.totalorder %v11558_v5, 1  ;;  %v1123_v5 = vsel %vm11680_vm13, %v10785_v63, 4048220490 }
  0xc5   :  { %vm11690_vm15 = vmpackc.low %vm536_vm9, %vm536_vm9  ;;  %v8883_v50 = vcombine.high %v1123_v5, %v1124_v14 }
  0xc6   :  { %vm11704_vm1 = vmpackc.low %vm535_vm12, %vm535_vm12 }
  0xc7   :  { %v11569_v9 = vpop.permute.xlu1 %481  ;;  %v11571_v25 = vpop.permute.xlu0 %478  ;;  %9880 = vmatpush3.bf16.msra.mxu0 %v10121_v28  ;;  %v8954_v28 = vcombine.high %v11712_v20, %v11717_v21 }
  0xc8   :  { %9881 = vmatprep.subr.bf16.mxu0 %v10122_v26  ;;  %vm538_vm14 = vcmp.eq.s32.totalorder %v11569_v9, 1  ;;  %vm537_vm0 = vcmp.eq.s32.totalorder %v11571_v25, 1  ;;  %v8851_v26 = vcombine.high %v597_v53, %v598_v51  ;;  %v8882_v25 = vcombine.low %v1123_v5, %v1124_v14  ;;  %v10791_v14 = vld [vmem:[%s14896_s0 + $0xa0] sm:$0xff] }
  0xc9   :  { %vm11724_vm3 = vmpackc.low %vm538_vm14, %vm538_vm14 }
  0xca   :  { %vm11736_vm5 = vmpackc.low %vm537_vm0, %vm537_vm0  ;;  %v11764_v10 = vmax.bf16 %v8851_v26, %v11521_v40  ;;  %v1306_v53 = vmax.bf16 %v8882_v25, %v11544_v56 }
  0xcb   :  { %v11579_v15 = vpop.permute.xlu1 %1001  ;;  %v11581_v19 = vpop.permute.xlu0 %998  ;;  %9882 = vmatpush3.bf16.msra.mxu0 %v10123_v33  ;;  %v8880_v33 = vcombine.low %v1121_v1, %v1122_v16 }
  0xcc   :  { %9883 = vmatprep.subr.bf16.mxu0 %v10124_v39  ;;  %vm1062_vm2 = vcmp.eq.s32.totalorder %v11579_v15, 1  ;;  %vm1061_vm4 = vcmp.eq.s32.totalorder %v11581_v19, 1  ;;  %v8953_v15 = vcombine.low %v11712_v20, %v11717_v21  ;;  %v1990_v20 = vld [vmem:[%s14900_s9 + $0xc8] sm:$0xff] }
  0xcd   :  { %vm11741_vm7 = vmpackc.low %vm1062_vm2, %vm1062_vm2  ;;  %v1305_v3 = vmax.bf16 %v8880_v33, %v11538_v48  ;;  %v10788_v48 = vld [vmem:[%s14896_s0 + $0x98] sm:$0xff]  ;;  %v1994_v21 = vld [vmem:[%s14900_s9 + $0xe8] sm:$0xff] }
  0xce   :  { %vm11748_vm9 = vmpackc.low %vm1061_vm4, %vm1061_vm4  ;;  %v602_v49 = vsel %vm11724_vm3, %v10788_v48, 4048220490  ;;  %v1126_v17 = vsel %vm11741_vm7, %v10786_v13, 4048220490 }
  0xcf   :  { %v11589_v22 = vpop.permute.xlu1 %1007  ;;  %v11591_v23 = vpop.permute.xlu0 %1004  ;;  %9884 = vmatpush3.bf16.msra.mxu0 %v10125_v41  ;;  %v11756_v41 = vmax.bf16 %v8850_v8, %v11518_v60  ;;  %v599_v60 = vsel %vm11704_vm1, %v10787_v32, 4048220490 }
  0xd0   :  { %9885 = vmatprep.subr.bf16.mxu0 %v10126_v58  ;;  %vm1064_vm6 = vcmp.eq.s32.totalorder %v11589_v22, 1  ;;  %vm1063_vm8 = vcmp.eq.s32.totalorder %v11591_v23, 1  ;;  %v779_v22 = vmax.bf16 %v8848_v62, %v11506_v31  ;;  %v600_v31 = vsel %vm11690_vm15, %v10786_v13, 4048220490 }
  0xd1   :  { %vm11758_vm12 = vmpackc.low %vm1064_vm6, %vm1064_vm6  ;;  %v8852_v56 = vcombine.low %v599_v60, %v600_v31 }
  0xd2   :  { %vm11779_vm14 = vmpackc.low %vm1063_vm8, %vm1063_vm8  ;;  %v1128_v16 = vsel %vm11758_vm12, %v10788_v48, 4048220490 }
  0xd3   :  { %v11599_v29 = vpop.permute.xlu1 %487  ;;  %v11601_v30 = vpop.permute.xlu0 %484  ;;  %9886 = vmatpush3.bf16.msra.mxu0 %v10127_v4  ;;  %v1125_v4 = vsel %vm11748_vm9, %v10787_v32, 4048220490  ;;  %v781_v25 = vmax.bf16 %v8852_v56, %v779_v22  ;;  %v10793_v22 = vld [vmem:[%s14896_s0 + $0xb0] sm:$0xff]  ;;  %v10796_v56 = vld [vmem:[%s14896_s0 + $0xd8] sm:$0xff] }
  0xd4   :  { %2774 = vmatprep.subr.bf16.mxu0 %v8954_v28  ;;  %vm540_vm11 = vcmp.eq.s32.totalorder %v11599_v29, 1  ;;  %vm539_vm13 = vcmp.eq.s32.totalorder %v11601_v30, 1  ;;  %v10789_v29 = vld [vmem:[%s14896_s0 + $0x90] sm:$0xff]  ;;  %v8853_v30 = vcombine.high %v599_v60, %v600_v31  ;;  %v8884_v26 = vcombine.low %v1125_v4, %v1126_v17 }
  0xd5   :  { %vm11789_vm15 = vmpackc.low %vm540_vm11, %vm540_vm11  ;;  %v601_v54 = vsel %vm11736_vm5, %v10789_v29, 4048220490  ;;  %v1127_v1 = vsel %vm11779_vm14, %v10789_v29, 4048220490 }
  0xd6   :  { %vm11808_vm2 = vmpackc.low %vm539_vm13, %vm539_vm13  ;;  %v604_v8 = vsel %vm11789_vm15, %v10790_v7, 4048220490  ;;  %v8854_v27 = vcombine.low %v601_v54, %v602_v49  ;;  %v8855_v28 = vcombine.high %v601_v54, %v602_v49  ;;  %v8886_v33 = vcombine.low %v1127_v1, %v1128_v16 }
  0xd7   :  { %v11613_v35 = vpop.permute.xlu1 %493  ;;  %v11615_v18 = vpop.permute.xlu0 %490  ;;  %v8887_v34 = vcombine.high %v1127_v1, %v1128_v16  ;;  %v806_v39 = vmax.bf16 %v8853_v30, %v804_v59  ;;  %v11895_v51 = vmax.bf16 %v8884_v26, %v1305_v3 }
  0xd8   :  { %vm542_vm0 = vcmp.eq.s32.totalorder %v11613_v35, 1  ;;  %vm541_vm1 = vcmp.eq.s32.totalorder %v11615_v18, 1  ;;  %v1331_v35 = vmax.bf16 %v8883_v50, %v11547_v57  ;;  %v603_v18 = vsel %vm11808_vm2, %v10791_v14, 4048220490 }
  0xd9   :  { %vm11820_vm3 = vmpackc.low %vm542_vm0, %vm542_vm0  ;;  %v8856_v43 = vcombine.low %v603_v18, %v604_v8  ;;  %v8857_v13 = vcombine.high %v603_v18, %v604_v8  ;;  %v782_v40 = vmax.bf16 %v8854_v27, %v11756_v41  ;;  %v807_v50 = vmax.bf16 %v8855_v28, %v11764_v10 }
  0xda   :  { %vm11832_vm6 = vmpackc.low %vm541_vm1, %vm541_vm1  ;;  %v11905_v49 = vmax.bf16 %v8886_v33, %v1306_v53  ;;  %v11907_v29 = vmax.bf16 %v8887_v34, %v1331_v35  ;;  %v10795_v53 = vld [vmem:[%s14896_s0 + $0xc0] sm:$0xff] }
  0xdb   :  { %v11641_v44 = vpop.permute.xlu1 %1013  ;;  %v11643_v45 = vpop.permute.xlu0 %1010  ;;  %v783_v10 = vmax.bf16 %v8856_v43, %v781_v25  ;;  %v10799_v33 = vld [vmem:[%s14896_s0 + $0xe0] sm:$0xff] }
  0xdc   :  { %vm1066_vm4 = vcmp.eq.s32.totalorder %v11641_v44, 1  ;;  %vm1065_vm5 = vcmp.eq.s32.totalorder %v11643_v45, 1  ;;  %v8885_v44 = vcombine.high %v1125_v4, %v1126_v17  ;;  %v10797_v4 = vld [vmem:[%s14896_s0 + $0xd0] sm:$0xff] }
  0xdd   :  { %vm11850_vm8 = vmpackc.low %vm1066_vm4, %vm1066_vm4 }
  0xde   :  { %vm11858_vm11 = vmpackc.low %vm1065_vm5, %vm1065_vm5  ;;  %v1130_v2 = vsel %vm11850_vm8, %v10790_v7, 4048220490 }
  0xdf   :  { %v11695_v52 = vpop.permute.xlu1 %1019  ;;  %v11697_v6 = vpop.permute.xlu0 %1016  ;;  %v1129_v8 = vsel %vm11858_vm11, %v10791_v14, 4048220490  ;;  %v10798_v14 = vld [vmem:[%s14896_s0 + $0xe8] sm:$0xff] }
  0xe0   :  { %vm1068_vm0 = vcmp.eq.s32.totalorder %v11695_v52, 1  ;;  %vm1067_vm1 = vcmp.eq.s32.totalorder %v11697_v6, 1  ;;  %v808_v6 = vmax.bf16 %v8857_v13, %v806_v39  ;;  %v8888_v39 = vcombine.low %v1129_v8, %v1130_v2 }
  0xe1   :  { %vm11912_vm5 = vmpackc.low %vm1068_vm0, %vm1068_vm0  ;;  %v8889_v43 = vcombine.high %v1129_v8, %v1130_v2 }
  0xe3   :  { %v500_v37 = vpop.permute.xlu1 %499  ;;  %v11746_v38 = vpop.permute.xlu0 %496 }
  0xe4   :  { %vm544_vm7 = vcmp.eq.s32.totalorder %v500_v37, 1  ;;  %vm543_vm9 = vcmp.eq.s32.totalorder %v11746_v38, 1  ;;  %v10792_v37 = vld [vmem:[%s14896_s0 + $0xb8] sm:$0xff]  ;;  %v605_v38 = vsel %vm11832_vm6, %v10793_v22, 4048220490 }
  0xe5   :  { %vm11864_vm13 = vmpackc.low %vm544_vm7, %vm544_vm7  ;;  %v606_v31 = vsel %vm11820_vm3, %v10792_v37, 4048220490  ;;  %v1132_v7 = vsel %vm11912_vm5, %v10792_v37, 4048220490 }
  0xe6   :  { %vm11872_vm15 = vmpackc.low %vm543_vm9, %vm543_vm9  ;;  %v8858_v3 = vcombine.low %v605_v38, %v606_v31  ;;  %v8859_v58 = vcombine.high %v605_v38, %v606_v31 }
  0xe7   :  { %v506_v23 = vpop.permute.xlu1 %505  ;;  %v503_v63 = vpop.permute.xlu0 %502  ;;  %vm11919_vm7 = vmpackc.low %vm1067_vm1, %vm1067_vm1  ;;  %v607_v54 = vsel %vm11872_vm15, %v10795_v53, 4048220490 }
  0xe8   :  { %vm546_vm12 = vcmp.eq.s32.totalorder %v506_v23, 1  ;;  %vm545_vm14 = vcmp.eq.s32.totalorder %v503_v63, 1  ;;  %v11903_v23 = vmax.bf16 %v8885_v44, %v1330_v12  ;;  %v10794_v63 = vld [vmem:[%s14896_s0 + $0xc8] sm:$0xff]  ;;  %v784_v27 = vmax.bf16 %v8858_v3, %v782_v40  ;;  %v10800_v40 = vld [vmem:[%s14896_s0 + $0xf8] sm:$0xff] }
  0xe9   :  { %vm11889_vm2 = vmpackc.low %vm546_vm12, %vm546_vm12  ;;  %v608_v52 = vsel %vm11864_vm13, %v10794_v63, 4048220490  ;;  %v1131_v24 = vsel %vm11919_vm7, %v10793_v22, 4048220490  ;;  %v809_v28 = vmax.bf16 %v8859_v58, %v807_v50  ;;  %v1309_v58 = vmax.bf16 %v8888_v39, %v11895_v51 }
  0xea   :  { %vm11899_vm4 = vmpackc.low %vm545_vm14, %vm545_vm14  ;;  %v610_v17 = vsel %vm11889_vm2, %v10796_v56, 4048220490  ;;  %v8860_v18 = vcombine.low %v607_v54, %v608_v52  ;;  %v8890_v13 = vcombine.low %v1131_v24, %v1132_v7  ;;  %v8891_v37 = vcombine.high %v1131_v24, %v1132_v7 }
  0xeb   :  { %v1026_v57 = vpop.permute.xlu1 %1025  ;;  %v1023_v5 = vpop.permute.xlu0 %1022  ;;  %v609_v62 = vsel %vm11899_vm4, %v10797_v4, 4048220490 }
  0xec   :  { %vm1070_vm3 = vcmp.eq.s32.totalorder %v1026_v57, 1  ;;  %vm1069_vm6 = vcmp.eq.s32.totalorder %v1023_v5, 1  ;;  %v8861_v57 = vcombine.high %v607_v54, %v608_v52  ;;  %v8862_v5 = vcombine.low %v609_v62, %v610_v17 }
  0xed   :  { %vm11945_vm9 = vmpackc.low %vm1070_vm3, %vm1070_vm3  ;;  %v8863_v26 = vcombine.high %v609_v62, %v610_v17  ;;  %v785_v31 = vmax.bf16 %v8860_v18, %v783_v10  ;;  %v10801_v10 = vld [vmem:[%s14896_s0 + $0xf0] sm:$0xff]  ;;  %v1334_v17 = vmax.bf16 %v8889_v43, %v11903_v23  ;;  %v1310_v2 = vmax.bf16 %v8890_v13, %v11905_v49 }
  0xee   :  { %vm11953_vm12 = vmpackc.low %vm1069_vm6, %vm1069_vm6  ;;  %v810_v22 = vmax.bf16 %v8861_v57, %v808_v6  ;;  %v786_v38 = vmax.bf16 %v8862_v5, %v784_v27  ;;  %v1134_v48 = vsel %vm11945_vm9, %v10794_v63, 4048220490  ;;  %v1335_v35 = vmax.bf16 %v8891_v37, %v11907_v29 }
  0xef   :  { %v1032_v32 = vpop.permute.xlu1 %1031  ;;  %v1029_v60 = vpop.permute.xlu0 %1028  ;;  %v811_v50 = vmax.bf16 %v8863_v26, %v809_v28  ;;  %v1133_v41 = vsel %vm11953_vm12, %v10795_v53, 4048220490 }
  0xf0   :  { %vm1072_vm13 = vcmp.eq.s32.totalorder %v1032_v32, 1  ;;  %vm1071_vm15 = vcmp.eq.s32.totalorder %v1029_v60, 1  ;;  %v8892_v8 = vcombine.low %v1133_v41, %v1134_v48  ;;  %v8893_v51 = vcombine.high %v1133_v41, %v1134_v48 }
  0xf1   :  { %vm11963_vm2 = vmpackc.low %vm1072_vm13, %vm1072_vm13 }
  0xf2   :  { %vm11975_vm11 = vmpackc.low %vm1071_vm15, %vm1071_vm15  ;;  %v1136_v63 = vsel %vm11963_vm2, %v10796_v56, 4048220490  ;;  %v1311_v49 = vmax.bf16 %v8892_v8, %v1309_v58 }
  0xf3   :  { %v512_v16 = vpop.permute.xlu1 %511  ;;  %v509_v1 = vpop.permute.xlu0 %508  ;;  %v1135_v53 = vsel %vm11975_vm11, %v10797_v4, 4048220490 }
  0xf4   :  { %vm548_vm14 = vcmp.eq.s32.totalorder %v512_v16, 1  ;;  %vm547_vm0 = vcmp.eq.s32.totalorder %v509_v1, 1  ;;  %v8894_v24 = vcombine.low %v1135_v53, %v1136_v63  ;;  %v8895_v4 = vcombine.high %v1135_v53, %v1136_v63 }
  0xf5   :  { %vm580_vm1 = vmpackc.low %vm548_vm14, %vm548_vm14 }
  0xf6   :  { %vm579_vm8 = vmpackc.low %vm547_vm0, %vm547_vm0  ;;  %v612_v9 = vsel %vm580_vm1, %v10798_v14, 4048220490 }
  0xf7   :  { %v611_v34 = vsel %vm579_vm8, %v10799_v33, 4048220490  ;;  %v518_v19 = vpop.permute.xlu1 %517  ;;  %v515_v25 = vpop.permute.xlu0 %514  ;;  %vm849_vm8 = vcmp.lt.s32.totalorder %v94_v47, 256  ;;  %v1975_v47 = vld [vmem:[%s14900_s9 + $0x50] sm:$0xff] }
  0xf8   :  { %vm550_vm4 = vcmp.eq.s32.totalorder %v518_v19, 1  ;;  %vm549_vm3 = vcmp.eq.s32.totalorder %v515_v25, 1  ;;  %v8864_v59 = vcombine.low %v611_v34, %v612_v9  ;;  %v8865_v32 = vcombine.high %v611_v34, %v612_v9 }
  0xf9   :  { %vm582_vm5 = vmpackc.low %vm550_vm4, %vm550_vm4  ;;  %v1336_v19 = vmax.bf16 %v8893_v51, %v1334_v17 }
  0xfa   :  { %v614_v60 = vsel %vm582_vm5, %v10800_v40, 4048220490  ;;  %vm581_vm6 = vmpackc.low %vm549_vm3, %vm549_vm3  ;;  %v787_v62 = vmax.bf16 %v8864_v59, %v785_v31  ;;  %v812_v30 = vmax.bf16 %v8865_v32, %v810_v22 }
  0xfb   :  { %v613_v3 = vsel %vm581_vm6, %v10801_v10, 4048220490  ;;  %v1038_v12 = vpop.permute.xlu1 %1037  ;;  %v1035_v52 = vpop.permute.xlu0 %1034 }
  0xfc   :  { %v8866_v54 = vcombine.low %v613_v3, %v614_v60  ;;  %v8867_v6 = vcombine.high %v613_v3, %v614_v60  ;;  %vm1074_vm7 = vcmp.eq.s32.totalorder %v1038_v12, 1  ;;  %vm1073_vm13 = vcmp.eq.s32.totalorder %v1035_v52, 1 }
  0xfd   :  { %vm1106_vm9 = vmpackc.low %vm1074_vm7, %vm1074_vm7 }
  0xfe   :  { %v788_v16 = vmax.bf16 %v8866_v54, %v786_v38  ;;  %v813_v1 = vmax.bf16 %v8867_v6, %v811_v50  ;;  %vm1105_vm12 = vmpackc.low %vm1073_vm13, %vm1073_vm13  ;;  %v1138_v56 = vsel %vm1106_vm9, %v10798_v14, 4048220490  ;;  %v1312_v14 = vmax.bf16 %v8894_v24, %v1310_v2 }
  0xff   :  { %v1044_v18 = vpop.permute.xlu1 %1043  ;;  %v1041_v23 = vpop.permute.xlu0 %1040  ;;  %v1137_v7 = vsel %vm1105_vm12, %v10799_v33, 4048220490  ;;  %v1337_v33 = vmax.bf16 %v8895_v4, %v1335_v35  ;;  %v10807_v6 = vmov 1966171168  }
 0x100   :  { %v789_v57 = vmax.bf16 %v788_v16, %v787_v62  ;;  %v814_v27 = vmax.bf16 %v813_v1, %v812_v30  ;;  %vm1076_vm14 = vcmp.eq.s32.totalorder %v1044_v18, 1  ;;  %vm1075_vm0 = vcmp.eq.s32.totalorder %v1041_v23, 1 }
 0x101   :  { %vm1108_vm15 = vmpackc.low %vm1076_vm14, %vm1076_vm14  ;;  %v8896_v9 = vcombine.low %v1137_v7, %v1138_v56  ;;  %v8897_v29 = vcombine.high %v1137_v7, %v1138_v56  ;;  %v832_v58 = vunpack.c.l.s4 %v10807_v6 }
 0x102   :  { %v790_v5 = vunpack.i.l.bf16 %v789_v57  ;;  %v791_v28 = vunpack.i.h.bf16 %v789_v57  ;;  %v815_v26 = vunpack.i.l.bf16 %v814_v27  ;;  %v816_v44 = vunpack.i.h.bf16 %v814_v27  ;;  %vm1107_vm1 = vmpackc.low %vm1075_vm0, %vm1075_vm0 }
 0x103   :  { %v1140_v34 = vsel %vm1108_vm15, %v10800_v40, 4048220490  ;;  %v1139_v43 = vsel %vm1107_vm1, %v10801_v10, 4048220490  ;;  %v1313_v22 = vmax.bf16 %v8896_v9, %v1311_v49  ;;  %v1338_v38 = vmax.bf16 %v8897_v29, %v1336_v19 }
 0x104   :  { %v792_v25 = vmax.f32 %v790_v5, %v791_v28  ;;  %v817_v39 = vmax.f32 %v815_v26, %v816_v44  ;;  %v8898_v45 = vcombine.low %v1139_v43, %v1140_v34  ;;  %v8899_v13 = vcombine.high %v1139_v43, %v1140_v34  ;;  %v827_v19 = vld [vmem:[#allocation3] ss:$8 sm:$0x3] }
 0x105   :  { %v833_v35 = vunpack.c.0.s8 %v832_v58  ;;  %v1955_v58 = vld [vmem:[%s14903_s8 + $0x3c0] sm:$0xff] }
 0x106   :  { %v793_v37 = vrot.slane %v792_v25, 4  ;;  %v818_v31 = vrot.slane %v817_v39, 4  ;;  %v1314_v59 = vmax.bf16 %v8898_v45, %v1312_v14  ;;  %v1339_v32 = vmax.bf16 %v8899_v13, %v1337_v33 }
 0x107   :  { %v836_v24 = vsub.s32 %v833_v35, %v11040_v55 }
 0x108   :  { %v794_v60 = vmax.f32 %v792_v25, %v793_v37  ;;  %v819_v50 = vmax.f32 %v817_v39, %v818_v31  ;;  %v1315_v48 = vmax.bf16 %v1314_v59, %v1313_v22  ;;  %v1340_v41 = vmax.bf16 %v1339_v32, %v1338_v38 }
 0x10a   :  { %v795_v40 = vrot.slane %v794_v60, 2  ;;  %v820_v3 = vrot.slane %v819_v50, 2  ;;  %v1316_v12 = vunpack.i.l.bf16 %v1315_v48  ;;  %v1317_v52 = vunpack.i.h.bf16 %v1315_v48 }
 0x10b   :  { %v1341_v54 = vunpack.i.l.bf16 %v1340_v41  ;;  %v1342_v10 = vunpack.i.h.bf16 %v1340_v41  ;;  %v320_v41 = vld [vmem:[#allocation4] sm:$0xff] }
 0x10c   :  { %v796_v17 = vmax.f32 %v794_v60, %v795_v40  ;;  %v821_v63 = vmax.f32 %v819_v50, %v820_v3  ;;  %v1318_v53 = vmax.f32 %v1316_v12, %v1317_v52  ;;  %v1354_v60 = vld [vmem:[#allocation3 + $0x1] ss:$8 sm:$0x3]  ;;  %v1979_v12 = vld [vmem:[%s14900_s9 + $0x70] sm:$0xff] }
 0x10d   :  { %v1343_v62 = vmax.f32 %v1341_v54, %v1342_v10 }
 0x10e   :  { %v797_v30 = vrot.slane %v796_v17, 1  ;;  %v822_v16 = vrot.slane %v821_v63, 1  ;;  %v1319_v1 = vrot.slane %v1318_v53, 4 }
 0x10f   :  { %v1344_v2 = vrot.slane %v1343_v62, 4 }
 0x110   :  { %v798_v8 = vmax.f32 %v796_v17, %v797_v30  ;;  %v823_v51 = vmax.f32 %v821_v63, %v822_v16  ;;  %v1320_v18 = vmax.f32 %v1318_v53, %v1319_v1  ;;  %v8964_v17 = vcombine.high %v1975_v47, %v1979_v12  ;;  %v1983_v53 = vld [vmem:[%s14900_s9 + $0x90] sm:$0xff]  ;;  %v1864_v63 = vld [vmem:[%s14903_s8 + $0xe8] sm:$0xff] }
 0x111   :  { %v1345_v23 = vmax.f32 %v1343_v62, %v1344_v2  ;;  %v1987_v62 = vld [vmem:[%s14900_s9 + $0xb0] sm:$0xff]  ;;  %v8963_v30 = vcombine.low %v1975_v47, %v1979_v12 }
 0x112   :  { %v799_v57 = vpack.i.bf16 %v798_v8, %v798_v8  ;;  %v824_v27 = vpack.i.bf16 %v823_v51, %v823_v51  ;;  %v1321_v56 = vrot.slane %v1320_v18, 2  ;;  %v8972_v16 = vcombine.high %v1983_v53, %v1987_v62  ;;  %v1991_v1 = vld [vmem:[%s14900_s9 + $0xd0] sm:$0xff] }
 0x113   :  { %v1346_v7 = vrot.slane %v1345_v23, 2  ;;  %v1995_v2 = vld [vmem:[%s14900_s9 + $0xf0] sm:$0xff]  ;;  %v8971_v8 = vcombine.low %v1983_v53, %v1987_v62 }
 0x114   :  { %v825_v4 = vunpack.c.l.bf16 %v799_v57  ;;  %v826_v5 = vunpack.c.l.bf16 %v824_v27  ;;  %v1322_v28 = vmax.f32 %v1320_v18, %v1321_v56  ;;  %v8980_v11 = vcombine.high %v1991_v1, %v1995_v2  ;;  %v2003_v51 = vld [vmem:[%s14900_s9 + $0x130] sm:$0xff] }
 0x115   :  { %v1347_v26 = vmax.f32 %v1345_v23, %v1346_v7  ;;  %v8979_v18 = vcombine.low %v1991_v1, %v1995_v2  ;;  %v2007_v57 = vld [vmem:[%s14900_s9 + $0x150] sm:$0xff] }
 0x116   :  { %v830_v44 = vcombine.low %v825_v4, %v826_v5  ;;  %v1323_v49 = vrot.slane %v1322_v28, 1  ;;  %v2011_v27 = vld [vmem:[%s14900_s9 + $0x170] sm:$0xff] }
 0x117   :  { %v1348_v9 = vrot.slane %v1347_v26, 1  ;;  %v8996_v7 = vcombine.high %v2007_v57, %v2011_v27  ;;  %v2019_v4 = vld [vmem:[%s14900_s9 + $0x1b0] sm:$0xff]  ;;  %v8995_v5 = vcombine.low %v2007_v57, %v2011_v27 }
 0x118   :  { %v837_v29 = vrot.slane %v830_v44, %v836_v24  ;;  %v11998_v34 = vpop.f32.mrb[0].mxu0  ;;  %v1324_v25 = vmax.f32 %v1322_v28, %v1323_v49  ;;  %v2027_v44 = vld [vmem:[%s14900_s9 + $0x1f0] sm:$0xff] }
 0x119   :  { %v1349_v39 = vmax.f32 %v1347_v26, %v1348_v9  ;;  %v12000_v43 = vpop.f32.mrb[1].mxu0  ;;  %v2023_v26 = vld [vmem:[%s14900_s9 + $0x1d0] sm:$0xff] }
 0x11a   :  { %v844_v14 = vrot.slane %v837_v29, %v836_v24  ;;  %v313_v33 = vpop.f32.mrb[2].mxu0  ;;  %v1325_v45 = vpack.i.bf16 %v1324_v25, %v1324_v25  ;;  %v9012_v9 = vcombine.high %v2023_v26, %v2027_v44  ;;  %v2031_v29 = vld [vmem:[%s14900_s9 + $0x210] sm:$0xff]  ;;  %v9011_v25 = vcombine.low %v2023_v26, %v2027_v44 }
 0x11b   :  { %v1350_v13 = vpack.i.bf16 %v1349_v39, %v1349_v39  ;;  %v314_v37 = vpop.f32.mrb[3].mxu0  ;;  %v2043_v33 = vld [vmem:[%s14900_s9 + $0x270] sm:$0xff] }
 0x11c   :  { %v846_v31 = vmax.f32 %v827_v19, %v844_v14  ;;  %v1351_v22 = vunpack.c.l.bf16 %v1325_v45  ;;  %v2035_v19 = vld [vmem:[%s14900_s9 + $0x230] sm:$0xff] }
 0x11d   :  { %v1352_v38 = vunpack.c.l.bf16 %v1350_v13  ;;  %v9020_v39 = vcombine.high %v2031_v29, %v2035_v19  ;;  %v2039_v14 = vld [vmem:[%s14900_s9 + $0x250] sm:$0xff]  ;;  %v9019_v45 = vcombine.low %v2031_v29, %v2035_v19 }
 0x11e   :  { %851 = vst.msk [vmem:[#allocation3] ss:$8 sm:$0x3] %vm849_vm8, %v846_v31  ;;  %v9028_v13 = vcombine.high %v2039_v14, %v2043_v33  ;;  %v2047_v37 = vld [vmem:[%s14900_s9 + $0x290] sm:$0xff] }
 0x11f   :  { %v1357_v59 = vcombine.low %v1351_v22, %v1352_v38  ;;  %v2051_v31 = vld [vmem:[%s14900_s9 + $0x2b0] sm:$0xff]  ;;  %v1430_v22 = vld [vmem:[%s14902_s5] sm:$0x3]  ;;  %v9027_v38 = vcombine.low %v2039_v14, %v2043_v33  ;;  %v1998_v14 = vld [vmem:[%s14900_s9 + $0x108] sm:$0xff] }
 0x120   :  { %v2091_v29 = vld [vmem:[%s14900_s9 + $0x3f0] sm:$0xff]  ;;  %v2002_v33 = vld [vmem:[%s14900_s9 + $0x128] sm:$0xff] }
 0x121   :  { %v1364_v32 = vrot.slane %v1357_v59, %v836_v24  ;;  %v9036_v59 = vcombine.high %v2047_v37, %v2051_v31 }
 0x123   :  { %v1371_v50 = vrot.slane %v1364_v32, %v836_v24  ;;  %v2015_v24 = vld [vmem:[%s14900_s9 + $0x190] sm:$0xff]  ;;  %v1435_v32 = vrot.slane %v1430_v22, %v11109_v36 }
 0x124   :  { %v9004_v28 = vcombine.high %v2015_v24, %v2019_v4  ;;  %v9003_v49 = vcombine.low %v2015_v24, %v2019_v4  ;;  %v2083_v24 = vld [vmem:[%s14900_s9 + $0x3b0] sm:$0xff]  ;;  %v1982_v4 = vld [vmem:[%s14900_s9 + $0x88] sm:$0xff] }
 0x125   :  { %v1373_v48 = vmax.f32 %v1354_v60, %v1371_v50  ;;  %v2055_v60 = vld [vmem:[%s14900_s9 + $0x2d0] sm:$0xff] }
 0x126   :  { %v2059_v50 = vld [vmem:[%s14900_s9 + $0x2f0] sm:$0xff] }
 0x127   :  { %1374 = vst.msk [vmem:[#allocation3 + $0x1] ss:$8 sm:$0x3] %vm849_vm8, %v1373_v48  ;;  %v1439_v48 = vrot.slane %v1430_v22, %v11057_v61  ;;  %v8986_v22 = vcombine.high %v1998_v14, %v2002_v33 }
 0x12c   :  { %v323_v40 = vpop.xlane.xlu0 %322 }
 0x12d   :  { %v324_v3 = vadd.f32 %v323_v40, %v320_v41  ;;  %v9035_v41 = vcombine.low %v2047_v37, %v2051_v31  ;;  %v8977_v31 = vcombine.low %v1990_v20, %v1994_v21 }
 0x12e   :  { %v1392_v52 = vld [vmem:[#allocation3 + $0x8] sm:$0xff]  ;;  %v1391_v54 = vld [vmem:[#allocation3] sm:$0xff] }
 0x12f   :  { %326 = vst.msk [vmem:[#allocation4] sm:$0xff] %vm58_vm10, %v324_v3  ;;  %vm1394_vm2 = vcmp.gt.f32.partialorder %v1392_v52, -1e+29  ;;  %v12010_v10 = vpack.c.bf16 %v1392_v52, %v1392_v52  ;;  %vm1393_vm11 = vcmp.gt.f32.partialorder %v1391_v54, -1e+29  ;;  %v12012_v6 = vpack.c.bf16 %v1391_v54, %v1391_v54  ;;  %v2063_v52 = vld [vmem:[%s14900_s9 + $0x310] sm:$0xff] }
 0x130   :  { %vm12014_vm4 = vmpackc.low %vm1394_vm2, %vm1394_vm2  ;;  %v9044_v3 = vcombine.high %v2055_v60, %v2059_v50  ;;  %v2067_v54 = vld [vmem:[%s14900_s9 + $0x330] sm:$0xff] }
 0x131   :  { %9081 = vmatprep.mubr.msk.bf16.mxu1 %vm12014_vm4, %v12010_v10  ;;  %vm12021_vm3 = vmpackc.low %vm1393_vm11, %vm1393_vm11  ;;  %v9052_v2 = vcombine.high %v2063_v52, %v2067_v54 }
 0x132   :  { %9084 = vmatmul.mubr.msk.bf16.vlgmr.msra.gmra.mrb[0].mxu1 %vm12021_vm3, %v12012_v6 }
 0x133   :  { %2816 = vmatpush1.bf16.msra.mxu1 %v8955_v46  ;;  %9093 = vmatprep.mubr.msk.bf16.mxu1 %vm12014_vm4, %v12010_v10  ;;  %v1999_v46 = vld [vmem:[%s14900_s9 + $0x110] sm:$0xff] }
 0x134   :  { %2817 = vmatprep.subr.bf16.mxu1 %v8964_v17  ;;  %v8988_v23 = vcombine.high %v1999_v46, %v2003_v51  ;;  %v8987_v56 = vcombine.low %v1999_v46, %v2003_v51  ;;  %v1974_v46 = vld [vmem:[%s14900_s9 + $0x48] sm:$0xff] }
 0x135   :  { %v1978_v51 = vld [vmem:[%s14900_s9 + $0x68] sm:$0xff] }
 0x136   :  { %v1381_v35 = vld [vmem:[#allocation4] sm:$0xff]  ;;  %v8961_v26 = vcombine.low %v1974_v46, %v1978_v51 }
 0x137   :  { %2818 = vmatpush1.bf16.msra.mxu1 %v8963_v30  ;;  %v1382_v42 = vmax.f32 %v1381_v35, 1.0 }
 0x138   :  { %2819 = vmatprep.subr.bf16.mxu1 %v8972_v16  ;;  %v9043_v16 = vcombine.low %v2055_v60, %v2059_v50  ;;  %v1843_v60 = vld [vmem:[%s14903_s8 + $0x40] sm:$0xff] }
 0x139   :  { %1385 = vperm.xlu1 %10029, %v1382_v42   ;;  %v2075_v42 = vld [vmem:[%s14900_s9 + $0x370] sm:$0xff]  ;;  %v1847_v50 = vld [vmem:[%s14903_s8 + $0x60] sm:$0xff] }
 0x13b   :  { %2820 = vmatpush1.bf16.msra.mxu1 %v8971_v8  ;;  %v2071_v8 = vld [vmem:[%s14900_s9 + $0x350] sm:$0xff] }
 0x13c   :  { %2821 = vmatprep.subr.bf16.mxu1 %v8980_v11  ;;  %v9060_v27 = vcombine.high %v2071_v8, %v2075_v42 }
 0x13f   :  { %2822 = vmatpush1.bf16.msra.mxu1 %v8979_v18  ;;  %v9051_v18 = vcombine.low %v2063_v52, %v2067_v54  ;;  %v1851_v52 = vld [vmem:[%s14903_s8 + $0x80] sm:$0xff] }
 0x140   :  { %2823 = vmatprep.subr.bf16.mxu1 %v8988_v23  ;;  %v1855_v54 = vld [vmem:[%s14903_s8 + $0xa0] sm:$0xff] }
 0x143   :  { %2824 = vmatpush1.bf16.msra.mxu1 %v8987_v56  ;;  %v2079_v56 = vld [vmem:[%s14900_s9 + $0x390] sm:$0xff] }
 0x144   :  { %2825 = vmatprep.subr.bf16.mxu1 %v8996_v7  ;;  %v8962_v7 = vcombine.high %v1974_v46, %v1978_v51  ;;  %v9068_v44 = vcombine.high %v2079_v56, %v2083_v24  ;;  %v2030_v46 = vld [vmem:[%s14900_s9 + $0x208] sm:$0xff] }
 0x147   :  { %2826 = vmatpush1.bf16.msra.mxu1 %v8995_v5  ;;  %v1986_v5 = vld [vmem:[%s14900_s9 + $0xa8] sm:$0xff] }
 0x148   :  { %2827 = vmatprep.subr.bf16.mxu1 %v9004_v28  ;;  %v9059_v28 = vcombine.low %v2071_v8, %v2075_v42  ;;  %v8969_v19 = vcombine.low %v1982_v4, %v1986_v5  ;;  %v9119_v42 = vcombine.low %v1851_v52, %v1855_v54 }
 0x14b   :  { %2828 = vmatpush1.bf16.msra.mxu1 %v9003_v49  ;;  %v8970_v49 = vcombine.high %v1982_v4, %v1986_v5  ;;  %v2042_v5 = vld [vmem:[%s14900_s9 + $0x268] sm:$0xff] }
 0x14c   :  { %2829 = vmatprep.subr.bf16.mxu1 %v9012_v9  ;;  %v2087_v9 = vld [vmem:[%s14900_s9 + $0x3d0] sm:$0xff] }
 0x14d   :  { %v9075_v37 = vcombine.low %v2087_v9, %v2091_v29 }
 0x14f   :  { %2830 = vmatpush1.bf16.msra.mxu1 %v9011_v25  ;;  %v9076_v25 = vcombine.high %v2087_v9, %v2091_v29  ;;  %v2046_v29 = vld [vmem:[%s14900_s9 + $0x288] sm:$0xff] }
 0x150   :  { %2831 = vmatprep.subr.bf16.mxu1 %v9020_v39  ;;  %v8978_v39 = vcombine.high %v1990_v20, %v1994_v21  ;;  %v2050_v21 = vld [vmem:[%s14900_s9 + $0x2a8] sm:$0xff] }
 0x153   :  { %2832 = vmatpush1.bf16.msra.mxu1 %v9019_v45  ;;  %v1835_v45 = vld [vmem:[%s14903_s8] sm:$0xff] }
 0x154   :  { %2833 = vmatprep.subr.bf16.mxu1 %v9028_v13  ;;  %v1839_v13 = vld [vmem:[%s14903_s8 + $0x20] sm:$0xff] }
 0x157   :  { %2834 = vmatpush1.bf16.msra.mxu1 %v9027_v38  ;;  %v2006_v38 = vld [vmem:[%s14900_s9 + $0x148] sm:$0xff] }
 0x158   :  { %v1643_v40 = vpop.f32.mrb[4].mxu0  ;;  %2835 = vmatprep.subr.bf16.mxu1 %v9036_v59  ;;  %v9104_v59 = vcombine.high %v1835_v45, %v1839_v13 }
 0x159   :  { %v1644_v47 = vadd.f32 %v1643_v40, %v1435_v32  ;;  %v1645_v12 = vpop.f32.mrb[5].mxu0  ;;  %v2010_v32 = vld [vmem:[%s14900_s9 + $0x168] sm:$0xff] }
 0x15a   :  { %v1646_v17 = vadd.f32 %v1645_v12, %v1439_v48  ;;  %v1647_v53 = vpop.f32.mrb[6].mxu0  ;;  %v8985_v48 = vcombine.low %v1998_v14, %v2002_v33  ;;  %v8994_v40 = vcombine.high %v2006_v38, %v2010_v32  ;;  %v2018_v12 = vld [vmem:[%s14900_s9 + $0x1a8] sm:$0xff]  ;;  %v9034_v14 = vcombine.high %v2046_v29, %v2050_v21 }
 0x15b   :  { %vm1650_vm10 = vcmp.ge.f32.partialorder %v1644_v47, 0.0  ;;  %v1652_v62 = vmul.f32 0.01, %v1644_v47  ;;  %2836 = vmatpush1.bf16.msra.mxu1 %v9035_v41  ;;  %v1648_v30 = vpop.f32.mrb[7].mxu0  ;;  %v9103_v41 = vcombine.low %v1835_v45, %v1839_v13  ;;  %v9111_v53 = vcombine.low %v1843_v60, %v1847_v50  ;;  %v2054_v33 = vld [vmem:[%s14900_s9 + $0x2c8] sm:$0xff] }
 0x15c   :  { %vm1651_vm5 = vcmp.ge.f32.partialorder %v1646_v17, 0.0  ;;  %v1653_v1 = vmul.f32 0.01, %v1646_v17  ;;  %2837 = vmatprep.subr.bf16.mxu1 %v9044_v3  ;;  %v2014_v3 = vld [vmem:[%s14900_s9 + $0x188] sm:$0xff] }
 0x15d   :  { %v1654_v35 = vsel %vm1650_vm10, %v1644_v47, %v1652_v62  ;;  %v9112_v47 = vcombine.high %v1843_v60, %v1847_v50  ;;  %v9002_v62 = vcombine.high %v2014_v3, %v2018_v12  ;;  %v2022_v30 = vld [vmem:[%s14900_s9 + $0x1c8] sm:$0xff]  ;;  %v9001_v8 = vcombine.low %v2014_v3, %v2018_v12 }
 0x15e   :  { %v1655_v11 = vsel %vm1651_vm5, %v1646_v17, %v1653_v1  ;;  %v1656_v57 = vpack.c.bf16 %v1654_v35, %v1654_v35  ;;  %v8993_v17 = vcombine.low %v2006_v38, %v2010_v32  ;;  %v2026_v1 = vld [vmem:[%s14900_s9 + $0x1e8] sm:$0xff]  ;;  %v1863_v35 = vld [vmem:[%s14903_s8 + $0xe0] sm:$0xff] }
 0x15f   :  { %2838 = vmatpush1.bf16.msra.mxu1 %v9043_v16  ;;  %v1657_v23 = vpack.c.bf16 %v1655_v11, %v1655_v11  ;;  %v9120_v16 = vcombine.high %v1851_v52, %v1855_v54  ;;  %v9010_v11 = vcombine.high %v2022_v30, %v2026_v1  ;;  %v2058_v13 = vld [vmem:[%s14900_s9 + $0x2e8] sm:$0xff] }
 0x160   :  { %2839 = vmatprep.subr.bf16.mxu1 %v9052_v2  ;;  %v1859_v2 = vld [vmem:[%s14903_s8 + $0xc0] sm:$0xff]  ;;  %v2062_v32 = vld [vmem:[%s14900_s9 + $0x308] sm:$0xff] }
 0x161   :  { %1825 = vmatprep.mubr.bf16.mxu0 %v1657_v23  ;;  %v9128_v51 = vcombine.high %v1859_v2, %v1863_v35  ;;  %v1867_v23 = vld [vmem:[%s14903_s8 + $0x100] sm:$0xff]  ;;  %v2066_v50 = vld [vmem:[%s14900_s9 + $0x328] sm:$0xff] }
 0x162   :  { %1826 = vmatmul.mubr.bf16.vlgmr.msra.gmra.mrb[8].mxu0 %v1656_v57  ;;  %v1871_v57 = vld [vmem:[%s14903_s8 + $0x120] sm:$0xff]  ;;  %v2070_v12 = vld [vmem:[%s14900_s9 + $0x348] sm:$0xff] }
 0x163   :  { %2840 = vmatpush1.bf16.msra.mxu1 %v9051_v18  ;;  %2775 = vmatpush1.bf16.msra.mxu0 %v8953_v15  ;;  %v9067_v15 = vcombine.low %v2079_v56, %v2083_v24  ;;  %v2034_v18 = vld [vmem:[%s14900_s9 + $0x228] sm:$0xff]  ;;  %v9127_v56 = vcombine.low %v1859_v2, %v1863_v35  ;;  %v9136_v4 = vcombine.high %v1867_v23, %v1871_v57 }
 0x164   :  { %9087 = vmatprep.mubr.msk.bf16.mxu0 %vm12014_vm4, %v12010_v10  ;;  %2841 = vmatprep.subr.bf16.mxu1 %v9060_v27  ;;  %v9009_v27 = vcombine.low %v2022_v30, %v2026_v1  ;;  %v2038_v24 = vld [vmem:[%s14900_s9 + $0x248] sm:$0xff] }
 0x165   :  { %2776 = vmatprep.subr.bf16.mxu0 %v8962_v7  ;;  %v9018_v7 = vcombine.high %v2030_v46, %v2034_v18  ;;  %v9026_v9 = vcombine.high %v2038_v24, %v2042_v5  ;;  %v2074_v54 = vld [vmem:[%s14900_s9 + $0x368] sm:$0xff] }
 0x166   :  { %v2078_v1 = vld [vmem:[%s14900_s9 + $0x388] sm:$0xff] }
 0x167   :  { %2842 = vmatpush1.bf16.msra.mxu1 %v9059_v28  ;;  %2777 = vmatpush1.bf16.msra.mxu0 %v8961_v26  ;;  %v1875_v28 = vld [vmem:[%s14903_s8 + $0x140] sm:$0xff]  ;;  %v2082_v35 = vld [vmem:[%s14900_s9 + $0x3a8] sm:$0xff] }
 0x168   :  { %2843 = vmatprep.subr.bf16.mxu1 %v9068_v44  ;;  %2778 = vmatprep.subr.bf16.mxu0 %v8970_v49  ;;  %v1879_v26 = vld [vmem:[%s14903_s8 + $0x160] sm:$0xff]  ;;  %v9017_v44 = vcombine.low %v2030_v46, %v2034_v18  ;;  %v9135_v49 = vcombine.low %v1867_v23, %v1871_v57  ;;  %v2086_v18 = vld [vmem:[%s14900_s9 + $0x3c8] sm:$0xff] }
 0x169   :  { %v9144_v20 = vcombine.high %v1875_v28, %v1879_v26  ;;  %v2090_v57 = vld [vmem:[%s14900_s9 + $0x3e8] sm:$0xff] }
 0x16b   :  { %2844 = vmatpush1.bf16.msra.mxu1 %v9067_v15  ;;  %2779 = vmatpush1.bf16.msra.mxu0 %v8969_v19  ;;  %v1883_v15 = vld [vmem:[%s14903_s8 + $0x180] sm:$0xff] }
 0x16c   :  { %2845 = vmatprep.subr.bf16.mxu1 %v9076_v25  ;;  %2780 = vmatprep.subr.bf16.mxu0 %v8978_v39  ;;  %v1887_v19 = vld [vmem:[%s14903_s8 + $0x1a0] sm:$0xff]  ;;  %v9025_v25 = vcombine.low %v2038_v24, %v2042_v5  ;;  %v9143_v39 = vcombine.low %v1875_v28, %v1879_v26  ;;  %v1968_v5 = vld [vmem:[%s14900_s9 + $0x18] sm:$0xff] }
 0x16d   :  { %v9152_v45 = vcombine.high %v1883_v15, %v1887_v19  ;;  %v9151_v38 = vcombine.low %v1883_v15, %v1887_v19  ;;  %v1972_v26 = vld [vmem:[%s14900_s9 + $0x38] sm:$0xff] }
 0x16e   :  { %v1976_v15 = vld [vmem:[%s14900_s9 + $0x58] sm:$0xff] }
 0x16f   :  { %2846 = vmatpush1.bf16.msra.mxu1 %v9075_v37  ;;  %2781 = vmatpush1.bf16.msra.mxu0 %v8977_v31  ;;  %v1891_v37 = vld [vmem:[%s14903_s8 + $0x1c0] sm:$0xff]  ;;  %v1980_v19 = vld [vmem:[%s14900_s9 + $0x78] sm:$0xff] }
 0x170   :  { %2782 = vmatprep.subr.bf16.mxu0 %v8986_v22  ;;  %3537 = vmatprep.subr.bf16.mxu1 %v9104_v59  ;;  %v1895_v31 = vld [vmem:[%s14903_s8 + $0x1e0] sm:$0xff]  ;;  %v9033_v22 = vcombine.low %v2046_v29, %v2050_v21  ;;  %v9042_v59 = vcombine.high %v2054_v33, %v2058_v13 }
 0x171   :  { %v9160_v60 = vcombine.high %v1891_v37, %v1895_v31  ;;  %v9159_v3 = vcombine.low %v1891_v37, %v1895_v31  ;;  %v1988_v37 = vld [vmem:[%s14900_s9 + $0xb8] sm:$0xff] }
 0x172   :  { %9096 = vmatmul.mubr.msk.bf16.vlgmr.msra.gmra.mrb[4].mxu1 %vm12021_vm3, %v12012_v6 }
 0x173   :  { %2783 = vmatpush1.bf16.msra.mxu0 %v8985_v48  ;;  %3538 = vmatpush1.bf16.msra.mxu1 %v9103_v41  ;;  %v1899_v48 = vld [vmem:[%s14903_s8 + $0x200] sm:$0xff] }
 0x174   :  { %2784 = vmatprep.subr.bf16.mxu0 %v8994_v40  ;;  %3539 = vmatprep.subr.bf16.mxu1 %v9112_v47  ;;  %v1903_v41 = vld [vmem:[%s14903_s8 + $0x220] sm:$0xff]  ;;  %v9041_v40 = vcombine.low %v2054_v33, %v2058_v13  ;;  %v9050_v47 = vcombine.high %v2062_v32, %v2066_v50  ;;  %v8966_v33 = vcombine.high %v1976_v15, %v1980_v19  ;;  %v1984_v13 = vld [vmem:[%s14900_s9 + $0x98] sm:$0xff] }
 0x175   :  { %v9168_v52 = vcombine.high %v1899_v48, %v1903_v41  ;;  %v9167_v30 = vcombine.low %v1899_v48, %v1903_v41  ;;  %v1996_v48 = vld [vmem:[%s14900_s9 + $0xf8] sm:$0xff] }
 0x177   :  { %2785 = vmatpush1.bf16.msra.mxu0 %v8993_v17  ;;  %3540 = vmatpush1.bf16.msra.mxu1 %v9111_v53  ;;  %v1907_v17 = vld [vmem:[%s14903_s8 + $0x240] sm:$0xff] }
 0x178   :  { %2786 = vmatprep.subr.bf16.mxu0 %v9002_v62  ;;  %3541 = vmatprep.subr.bf16.mxu1 %v9120_v16  ;;  %v1911_v53 = vld [vmem:[%s14903_s8 + $0x260] sm:$0xff]  ;;  %v9049_v62 = vcombine.low %v2062_v32, %v2066_v50  ;;  %v9058_v16 = vcombine.high %v2070_v12, %v2074_v54  ;;  %v8974_v32 = vcombine.high %v1984_v13, %v1988_v37  ;;  %v1992_v50 = vld [vmem:[%s14900_s9 + $0xd8] sm:$0xff] }
 0x179   :  { %v9176_v2 = vcombine.high %v1907_v17, %v1911_v53  ;;  %v9175_v46 = vcombine.low %v1907_v17, %v1911_v53  ;;  %v12357_v17 = vld [vmem:[%s14903_s8 + $0x10] sm:$0xff] }
 0x17a   :  { %v12362_v53 = vld [vmem:[%s14903_s8 + $0x30] sm:$0xff] }
 0x17b   :  { %2787 = vmatpush1.bf16.msra.mxu0 %v9001_v8  ;;  %3542 = vmatpush1.bf16.msra.mxu1 %v9119_v42  ;;  %v1915_v8 = vld [vmem:[%s14903_s8 + $0x280] sm:$0xff] }
 0x17c   :  { %2788 = vmatprep.subr.bf16.mxu0 %v9010_v11  ;;  %3543 = vmatprep.subr.bf16.mxu1 %v9128_v51  ;;  %v1919_v42 = vld [vmem:[%s14903_s8 + $0x2a0] sm:$0xff]  ;;  %v9057_v11 = vcombine.low %v2070_v12, %v2074_v54  ;;  %v9066_v51 = vcombine.high %v2078_v1, %v2082_v35  ;;  %v2000_v12 = vld [vmem:[%s14900_s9 + $0x118] sm:$0xff] }
 0x17d   :  { %v9184_v23 = vcombine.high %v1915_v8, %v1919_v42  ;;  %v9183_v24 = vcombine.low %v1915_v8, %v1919_v42 }
 0x17f   :  { %2789 = vmatpush1.bf16.msra.mxu0 %v9009_v27  ;;  %3544 = vmatpush1.bf16.msra.mxu1 %v9127_v56  ;;  %v1923_v27 = vld [vmem:[%s14903_s8 + $0x2c0] sm:$0xff] }
 0x180   :  { %2790 = vmatprep.subr.bf16.mxu0 %v9018_v7  ;;  %3545 = vmatprep.subr.bf16.mxu1 %v9136_v4  ;;  %v1927_v56 = vld [vmem:[%s14903_s8 + $0x2e0] sm:$0xff]  ;;  %v9065_v7 = vcombine.low %v2078_v1, %v2082_v35  ;;  %v9074_v4 = vcombine.high %v2086_v18, %v2090_v57  ;;  %v2008_v1 = vld [vmem:[%s14900_s9 + $0x158] sm:$0xff]  ;;  %v9108_v35 = vcombine.high %v12357_v17, %v12362_v53 }
 0x181   :  { %v9192_v28 = vcombine.high %v1923_v27, %v1927_v56  ;;  %v9191_v29 = vcombine.low %v1923_v27, %v1927_v56 }
 0x183   :  { %2791 = vmatpush1.bf16.msra.mxu0 %v9017_v44  ;;  %3546 = vmatpush1.bf16.msra.mxu1 %v9135_v49  ;;  %v1931_v44 = vld [vmem:[%s14903_s8 + $0x300] sm:$0xff] }
 0x184   :  { %2792 = vmatprep.subr.bf16.mxu0 %v9026_v9  ;;  %3547 = vmatprep.subr.bf16.mxu1 %v9144_v20  ;;  %v1935_v49 = vld [vmem:[%s14903_s8 + $0x320] sm:$0xff]  ;;  %v9073_v9 = vcombine.low %v2086_v18, %v2090_v57  ;;  %v8958_v20 = vcombine.high %v1968_v5, %v1972_v26  ;;  %v2028_v57 = vld [vmem:[%s14900_s9 + $0x1f8] sm:$0xff] }
 0x185   :  { %v9200_v21 = vcombine.high %v1931_v44, %v1935_v49 }
 0x187   :  { %2793 = vmatpush1.bf16.msra.mxu0 %v9025_v25  ;;  %3548 = vmatpush1.bf16.msra.mxu1 %v9143_v39  ;;  %v1939_v25 = vld [vmem:[%s14903_s8 + $0x340] sm:$0xff] }
 0x188   :  { %2794 = vmatprep.subr.bf16.mxu0 %v9034_v14  ;;  %3549 = vmatprep.subr.bf16.mxu1 %v9152_v45  ;;  %v1943_v39 = vld [vmem:[%s14903_s8 + $0x360] sm:$0xff]  ;;  %v8957_v14 = vcombine.low %v1968_v5, %v1972_v26  ;;  %v9199_v45 = vcombine.low %v1931_v44, %v1935_v49  ;;  %v2040_v26 = vld [vmem:[%s14900_s9 + $0x258] sm:$0xff] }
 0x189   :  { %v9208_v31 = vcombine.high %v1939_v25, %v1943_v39  ;;  %v2044_v44 = vld [vmem:[%s14900_s9 + $0x278] sm:$0xff] }
 0x18b   :  { %2795 = vmatpush1.bf16.msra.mxu0 %v9033_v22  ;;  %3550 = vmatpush1.bf16.msra.mxu1 %v9151_v38  ;;  %v1947_v22 = vld [vmem:[%s14903_s8 + $0x380] sm:$0xff] }
 0x18c   :  { %2796 = vmatprep.subr.bf16.mxu0 %v9042_v59  ;;  %3551 = vmatprep.subr.bf16.mxu1 %v9160_v60  ;;  %v1951_v38 = vld [vmem:[%s14903_s8 + $0x3a0] sm:$0xff]  ;;  %v8965_v59 = vcombine.low %v1976_v15, %v1980_v19  ;;  %v9207_v60 = vcombine.low %v1939_v25, %v1943_v39  ;;  %v9029_v15 = vcombine.low %v2040_v26, %v2044_v44 }
 0x18d   :  { %v9216_v41 = vcombine.high %v1947_v22, %v1951_v38 }
 0x18f   :  { %2797 = vmatpush1.bf16.msra.mxu0 %v9041_v40  ;;  %3552 = vmatpush1.bf16.msra.mxu1 %v9159_v3  ;;  %v8973_v40 = vcombine.low %v1984_v13, %v1988_v37  ;;  %v8982_v3 = vcombine.high %v1992_v50, %v1996_v48  ;;  %v2060_v13 = vld [vmem:[%s14900_s9 + $0x2f8] sm:$0xff] }
 0x190   :  { %2798 = vmatprep.subr.bf16.mxu0 %v9050_v47  ;;  %3553 = vmatprep.subr.bf16.mxu1 %v9168_v52  ;;  %v9215_v47 = vcombine.low %v1947_v22, %v1951_v38  ;;  %v2004_v52 = vld [vmem:[%s14900_s9 + $0x138] sm:$0xff] }
 0x191   :  { %v8989_v8 = vcombine.low %v2000_v12, %v2004_v52 }
 0x193   :  { %2799 = vmatpush1.bf16.msra.mxu0 %v9049_v62  ;;  %3554 = vmatpush1.bf16.msra.mxu1 %v9167_v30  ;;  %v8981_v62 = vcombine.low %v1992_v50, %v1996_v48  ;;  %v8990_v30 = vcombine.high %v2000_v12, %v2004_v52  ;;  %v1857_v50 = vld [vmem:[%s14903_s8 + $0xb0] sm:$0xff]  ;;  %v2064_v48 = vld [vmem:[%s14900_s9 + $0x318] sm:$0xff] }
 0x194   :  { %2800 = vmatprep.subr.bf16.mxu0 %v9058_v16  ;;  %3555 = vmatprep.subr.bf16.mxu1 %v9176_v2  ;;  %v2012_v2 = vld [vmem:[%s14900_s9 + $0x178] sm:$0xff]  ;;  %v1865_v12 = vld [vmem:[%s14903_s8 + $0xf0] sm:$0xff] }
 0x195   :  { %v8998_v42 = vcombine.high %v2008_v1, %v2012_v2  ;;  %v2072_v52 = vld [vmem:[%s14900_s9 + $0x358] sm:$0xff] }
 0x197   :  { %2801 = vmatpush1.bf16.msra.mxu0 %v9057_v11  ;;  %3556 = vmatpush1.bf16.msra.mxu1 %v9175_v46  ;;  %v2016_v11 = vld [vmem:[%s14900_s9 + $0x198] sm:$0xff] }
 0x198   :  { %2802 = vmatprep.subr.bf16.mxu0 %v9066_v51  ;;  %3557 = vmatprep.subr.bf16.mxu1 %v9184_v23  ;;  %v2020_v46 = vld [vmem:[%s14900_s9 + $0x1b8] sm:$0xff]  ;;  %v8997_v51 = vcombine.low %v2008_v1, %v2012_v2  ;;  %v1873_v1 = vld [vmem:[%s14903_s8 + $0x130] sm:$0xff] }
 0x199   :  { %v9006_v18 = vcombine.high %v2016_v11, %v2020_v46  ;;  %v2024_v23 = vld [vmem:[%s14900_s9 + $0x1d8] sm:$0xff]  ;;  %v9005_v27 = vcombine.low %v2016_v11, %v2020_v46 }
 0x19a   :  { %v9013_v5 = vcombine.low %v2024_v23, %v2028_v57  ;;  %v2080_v2 = vld [vmem:[%s14900_s9 + $0x398] sm:$0xff] }
 0x19b   :  { %2803 = vmatpush1.bf16.msra.mxu0 %v9065_v7  ;;  %3558 = vmatpush1.bf16.msra.mxu1 %v9183_v24  ;;  %v9014_v7 = vcombine.high %v2024_v23, %v2028_v57  ;;  %v2032_v24 = vld [vmem:[%s14900_s9 + $0x218] sm:$0xff] }
 0x19c   :  { %2804 = vmatprep.subr.bf16.mxu0 %v9074_v4  ;;  %3559 = vmatprep.subr.bf16.mxu1 %v9192_v28  ;;  %v2036_v4 = vld [vmem:[%s14900_s9 + $0x238] sm:$0xff] }
 0x19d   :  { %v9022_v28 = vcombine.high %v2032_v24, %v2036_v4  ;;  %v9021_v49 = vcombine.low %v2032_v24, %v2036_v4  ;;  %v2088_v23 = vld [vmem:[%s14900_s9 + $0x3d8] sm:$0xff]  ;;  %v1885_v4 = vld [vmem:[%s14903_s8 + $0x190] sm:$0xff] }
 0x19e   :  { %v2092_v57 = vld [vmem:[%s14900_s9 + $0x3f8] sm:$0xff] }
 0x19f   :  { %2805 = vmatpush1.bf16.msra.mxu0 %v9073_v9  ;;  %3560 = vmatpush1.bf16.msra.mxu1 %v9191_v29  ;;  %v9030_v9 = vcombine.high %v2040_v26, %v2044_v44  ;;  %v2048_v29 = vld [vmem:[%s14900_s9 + $0x298] sm:$0xff]  ;;  %v9078_v24 = vcombine.high %v2088_v23, %v2092_v57  ;;  %v1840_v26 = vld [vmem:[%s14903_s8 + $0x28] sm:$0xff] }
 0x1a0   :  { %2856 = vmatprep.subr.bf16.mxu0 %v8958_v20  ;;  %3561 = vmatprep.subr.bf16.mxu1 %v9200_v21  ;;  %v2052_v20 = vld [vmem:[%s14900_s9 + $0x2b8] sm:$0xff] }
 0x1a1   :  { %v9038_v19 = vcombine.high %v2048_v29, %v2052_v20  ;;  %v9037_v38 = vcombine.low %v2048_v29, %v2052_v20  ;;  %v1844_v20 = vld [vmem:[%s14903_s8 + $0x48] sm:$0xff] }
 0x1a2   :  { %9090 = vmatmul.mubr.msk.bf16.vlgmr.msra.gmra.mrb[12].mxu0 %vm12021_vm3, %v12012_v6 }
 0x1a3   :  { %2857 = vmatpush1.bf16.msra.mxu0 %v8957_v14  ;;  %9099 = vmatprep.mubr.msk.bf16.mxu0 %vm12014_vm4, %v12010_v10  ;;  %v1959_v10 = vld [vmem:[%s14903_s8 + $0x3e0] sm:$0xff]  ;;  %v1845_v14 = vld [vmem:[%s14903_s8 + $0x50] sm:$0xff] }
 0x1a4   :  { %2858 = vmatprep.subr.bf16.mxu0 %v8966_v33  ;;  %3562 = vmatpush1.bf16.msra.mxu1 %v9199_v45  ;;  %v9224_v54 = vcombine.high %v1955_v58, %v1959_v10  ;;  %v9223_v16 = vcombine.low %v1955_v58, %v1959_v10  ;;  %v1849_v33 = vld [vmem:[%s14903_s8 + $0x70] sm:$0xff]  ;;  %v2056_v45 = vld [vmem:[%s14900_s9 + $0x2d8] sm:$0xff] }
 0x1a5   :  { %3563 = vmatprep.subr.bf16.mxu1 %v9208_v31  ;;  %v9107_v31 = vcombine.low %v12357_v17, %v12362_v53  ;;  %v9115_v58 = vcombine.low %v1845_v14, %v1849_v33  ;;  %v9045_v10 = vcombine.low %v2056_v45, %v2060_v13 }
 0x1a7   :  { %2859 = vmatpush1.bf16.msra.mxu0 %v8965_v59  ;;  %v9116_v59 = vcombine.high %v1845_v14, %v1849_v33 }
 0x1a8   :  { %2860 = vmatprep.subr.bf16.mxu0 %v8974_v32  ;;  %3564 = vmatpush1.bf16.msra.mxu1 %v9207_v60  ;;  %v9046_v32 = vcombine.high %v2056_v45, %v2060_v13  ;;  %v1853_v60 = vld [vmem:[%s14903_s8 + $0x90] sm:$0xff] }
 0x1a9   :  { %3565 = vmatprep.subr.bf16.mxu1 %v9216_v41  ;;  %v2068_v41 = vld [vmem:[%s14900_s9 + $0x338] sm:$0xff]  ;;  %v9123_v17 = vcombine.low %v1853_v60, %v1857_v50  ;;  %v1901_v45 = vld [vmem:[%s14903_s8 + $0x210] sm:$0xff] }
 0x1aa   :  { %v9053_v53 = vcombine.low %v2064_v48, %v2068_v41  ;;  %v1905_v13 = vld [vmem:[%s14903_s8 + $0x230] sm:$0xff] }
 0x1ab   :  { %2861 = vmatpush1.bf16.msra.mxu0 %v8973_v40  ;;  %v9124_v40 = vcombine.high %v1853_v60, %v1857_v50  ;;  %v9172_v60 = vcombine.high %v1901_v45, %v1905_v13 }
 0x1ac   :  { %2862 = vmatprep.subr.bf16.mxu0 %v8982_v3  ;;  %3566 = vmatpush1.bf16.msra.mxu1 %v9215_v47  ;;  %v9054_v3 = vcombine.high %v2064_v48, %v2068_v41  ;;  %v1861_v47 = vld [vmem:[%s14903_s8 + $0xd0] sm:$0xff] }
 0x1ad   :  { %3567 = vmatprep.subr.bf16.mxu1 %v9224_v54  ;;  %v2076_v54 = vld [vmem:[%s14900_s9 + $0x378] sm:$0xff]  ;;  %v1909_v48 = vld [vmem:[%s14903_s8 + $0x250] sm:$0xff] }
 0x1ae   :  { %v1913_v41 = vld [vmem:[%s14903_s8 + $0x270] sm:$0xff] }
 0x1af   :  { %2863 = vmatpush1.bf16.msra.mxu0 %v8981_v62  ;;  %v9132_v62 = vcombine.high %v1861_v47, %v1865_v12 }
 0x1b0   :  { %2864 = vmatprep.subr.bf16.mxu0 %v8990_v30  ;;  %3568 = vmatpush1.bf16.msra.mxu1 %v9223_v16  ;;  %v9062_v30 = vcombine.high %v2072_v52, %v2076_v54  ;;  %v1869_v16 = vld [vmem:[%s14903_s8 + $0x110] sm:$0xff] }
 0x1b1   :  { %3619 = vmatprep.subr.bf16.mxu1 %v9108_v35  ;;  %v2084_v35 = vld [vmem:[%s14900_s9 + $0x3b8] sm:$0xff]  ;;  %v9140_v11 = vcombine.high %v1869_v16, %v1873_v1 }
 0x1b2   :  { %v9070_v46 = vcombine.high %v2080_v2, %v2084_v35 }
 0x1b3   :  { %2865 = vmatpush1.bf16.msra.mxu0 %v8989_v8  ;;  %v9131_v8 = vcombine.low %v1861_v47, %v1865_v12  ;;  %v1917_v47 = vld [vmem:[%s14903_s8 + $0x290] sm:$0xff] }
 0x1b4   :  { %2866 = vmatprep.subr.bf16.mxu0 %v8998_v42  ;;  %v9061_v42 = vcombine.low %v2072_v52, %v2076_v54  ;;  %v1921_v12 = vld [vmem:[%s14903_s8 + $0x2b0] sm:$0xff]  ;;  %v1868_v52 = vld [vmem:[%s14903_s8 + $0x108] sm:$0xff] }
 0x1b5   :  { %v1872_v54 = vld [vmem:[%s14903_s8 + $0x128] sm:$0xff] }
 0x1b7   :  { %2867 = vmatpush1.bf16.msra.mxu0 %v8997_v51  ;;  %v1877_v51 = vld [vmem:[%s14903_s8 + $0x150] sm:$0xff] }
 0x1b8   :  { %v1386_v56 = vpop.permute.xlu1 %1385  ;;  %2868 = vmatprep.subr.bf16.mxu0 %v9006_v18  ;;  %v1881_v18 = vld [vmem:[%s14903_s8 + $0x170] sm:$0xff] }
 0x1b9   :  { %10768 = vrcp.f32 %v1386_v56  ;;  %v9069_v56 = vcombine.low %v2080_v2, %v2084_v35  ;;  %v9147_v44 = vcombine.low %v1877_v51, %v1881_v18  ;;  %v1876_v2 = vld [vmem:[%s14903_s8 + $0x148] sm:$0xff] }
 0x1ba   :  { %v1880_v35 = vld [vmem:[%s14903_s8 + $0x168] sm:$0xff] }
 0x1bb   :  { %2869 = vmatpush1.bf16.msra.mxu0 %v9005_v27  ;;  %v9139_v27 = vcombine.low %v1869_v16, %v1873_v1  ;;  %v1925_v16 = vld [vmem:[%s14903_s8 + $0x2d0] sm:$0xff] }
 0x1bc   :  { %2870 = vmatprep.subr.bf16.mxu0 %v9014_v7  ;;  %v9148_v7 = vcombine.high %v1877_v51, %v1881_v18  ;;  %v1929_v1 = vld [vmem:[%s14903_s8 + $0x2f0] sm:$0xff] }
 0x1bd   :  { %v1933_v51 = vld [vmem:[%s14903_s8 + $0x310] sm:$0xff] }
 0x1be   :  { %v1937_v18 = vld [vmem:[%s14903_s8 + $0x330] sm:$0xff] }
 0x1bf   :  { %2871 = vmatpush1.bf16.msra.mxu0 %v9013_v5  ;;  %v1889_v5 = vld [vmem:[%s14903_s8 + $0x1b0] sm:$0xff] }
 0x1c0   :  { %2872 = vmatprep.subr.bf16.mxu0 %v9022_v28  ;;  %v1836_v28 = vld [vmem:[%s14903_s8 + $0x8] sm:$0xff] }
 0x1c1   :  { %v9106_v29 = vcombine.high %v1836_v28, %v1840_v26 }
 0x1c3   :  { %v10769_v21 = vpop.eup %10768  ;;  %2873 = vmatpush1.bf16.msra.mxu0 %v9021_v49  ;;  %v9077_v49 = vcombine.low %v2088_v23, %v2092_v57  ;;  %v1884_v23 = vld [vmem:[%s14903_s8 + $0x188] sm:$0xff] }
 0x1c4   :  { %2874 = vmatprep.subr.bf16.mxu0 %v9030_v9  ;;  %v1390_v25 = vmul.f32 %v10769_v21, %v12000_v43  ;;  %v1389_v39 = vmul.f32 %v10769_v21, %v11998_v34  ;;  %v9156_v9 = vcombine.high %v1885_v4, %v1889_v5  ;;  %v1848_v21 = vld [vmem:[%s14903_s8 + $0x68] sm:$0xff] }
 0x1c5   :  { %v9114_v14 = vcombine.high %v1844_v20, %v1848_v21  ;;  %v1888_v57 = vld [vmem:[%s14903_s8 + $0x1a8] sm:$0xff] }
 0x1c6   :  { %v12416_v37 = vpack.c.bf16 %v1390_v25, %v1390_v25  ;;  %v12420_v22 = vpack.c.bf16 %v1389_v39, %v1389_v39  ;;  %v9155_v25 = vcombine.low %v1885_v4, %v1889_v5  ;;  %v9105_v39 = vcombine.low %v1836_v28, %v1840_v26  ;;  %v1941_v4 = vld [vmem:[%s14903_s8 + $0x350] sm:$0xff]  ;;  %v1892_v28 = vld [vmem:[%s14903_s8 + $0x1c8] sm:$0xff] }
 0x1c7   :  { %2875 = vmatpush1.bf16.msra.mxu0 %v9029_v15  ;;  %v1893_v15 = vld [vmem:[%s14903_s8 + $0x1d0] sm:$0xff]  ;;  %v1896_v26 = vld [vmem:[%s14903_s8 + $0x1e8] sm:$0xff] }
 0x1c8   :  { %2876 = vmatprep.subr.bf16.mxu0 %v9038_v19  ;;  %3569 = vmatprep.mubr.bf16.mxu1 %v12416_v37  ;;  %v1897_v19 = vld [vmem:[%s14903_s8 + $0x1f0] sm:$0xff] }
 0x1c9   :  { %3570 = vmatmul.mubr.bf16.vlgmr.msra.gmra.mrb[8].mxu1 %v12420_v22  ;;  %v9164_v33 = vcombine.high %v1893_v15, %v1897_v19  ;;  %v1945_v5 = vld [vmem:[%s14903_s8 + $0x370] sm:$0xff] }
 0x1ca   :  { %3620 = vmatpush1.bf16.msra.mxu1 %v9107_v31  ;;  %3651 = vmatprep.mubr.bf16.mxu1 %v12416_v37  ;;  %v1852_v31 = vld [vmem:[%s14903_s8 + $0x88] sm:$0xff] }
 0x1cb   :  { %2877 = vmatpush1.bf16.msra.mxu0 %v9037_v38  ;;  %3621 = vmatprep.subr.bf16.mxu1 %v9116_v59  ;;  %v1856_v38 = vld [vmem:[%s14903_s8 + $0xa8] sm:$0xff]  ;;  %v9163_v59 = vcombine.low %v1893_v15, %v1897_v19 }
 0x1cc   :  { %2878 = vmatprep.subr.bf16.mxu0 %v9046_v32  ;;  %v9113_v32 = vcombine.low %v1844_v20, %v1848_v21  ;;  %v9122_v50 = vcombine.high %v1852_v31, %v1856_v38  ;;  %v1949_v20 = vld [vmem:[%s14903_s8 + $0x390] sm:$0xff]  ;;  %v1900_v15 = vld [vmem:[%s14903_s8 + $0x208] sm:$0xff] }
 0x1cd   :  { %v1953_v21 = vld [vmem:[%s14903_s8 + $0x3b0] sm:$0xff]  ;;  %v1904_v19 = vld [vmem:[%s14903_s8 + $0x228] sm:$0xff] }
 0x1ce   :  { %3622 = vmatpush1.bf16.msra.mxu1 %v9115_v58  ;;  %v9171_v58 = vcombine.low %v1901_v45, %v1905_v13  ;;  %v1957_v45 = vld [vmem:[%s14903_s8 + $0x3d0] sm:$0xff] }
 0x1cf   :  { %2879 = vmatpush1.bf16.msra.mxu0 %v9045_v10  ;;  %3623 = vmatprep.subr.bf16.mxu1 %v9124_v40  ;;  %v9121_v10 = vcombine.low %v1852_v31, %v1856_v38  ;;  %v9180_v40 = vcombine.high %v1909_v48, %v1913_v41  ;;  %v1961_v13 = vld [vmem:[%s14903_s8 + $0x3f0] sm:$0xff]  ;;  %v1908_v31 = vld [vmem:[%s14903_s8 + $0x248] sm:$0xff] }
 0x1d0   :  { %2880 = vmatprep.subr.bf16.mxu0 %v9054_v3  ;;  %v1912_v38 = vld [vmem:[%s14903_s8 + $0x268] sm:$0xff] }
 0x1d2   :  { %3624 = vmatpush1.bf16.msra.mxu1 %v9123_v17  ;;  %v9179_v17 = vcombine.low %v1909_v48, %v1913_v41  ;;  %v3703_v48 = vld [vmem:[%s14904_s10] sm:$0xff] }
 0x1d3   :  { %2881 = vmatpush1.bf16.msra.mxu0 %v9053_v53  ;;  %3625 = vmatprep.subr.bf16.mxu1 %v9132_v62  ;;  %v9188_v62 = vcombine.high %v1917_v47, %v1921_v12  ;;  %v3707_v41 = vld [vmem:[%s14904_s10 + $0x20] sm:$0xff] }
 0x1d4   :  { %2882 = vmatprep.subr.bf16.mxu0 %v9062_v30  ;;  %v9138_v30 = vcombine.high %v1868_v52, %v1872_v54 }
 0x1d6   :  { %3626 = vmatpush1.bf16.msra.mxu1 %v9131_v8  ;;  %v9187_v8 = vcombine.low %v1917_v47, %v1921_v12  ;;  %v3711_v47 = vld [vmem:[%s14904_s10 + $0x40] sm:$0xff] }
 0x1d7   :  { %2883 = vmatpush1.bf16.msra.mxu0 %v9061_v42  ;;  %3627 = vmatprep.subr.bf16.mxu1 %v9140_v11  ;;  %v9137_v42 = vcombine.low %v1868_v52, %v1872_v54  ;;  %v9196_v11 = vcombine.high %v1925_v16, %v1929_v1  ;;  %v3715_v12 = vld [vmem:[%s14904_s10 + $0x60] sm:$0xff]  ;;  %v1924_v54 = vld [vmem:[%s14903_s8 + $0x2c8] sm:$0xff] }
 0x1d8   :  { %2884 = vmatprep.subr.bf16.mxu0 %v9070_v46  ;;  %v9146_v46 = vcombine.high %v1876_v2, %v1880_v35 }
 0x1da   :  { %3628 = vmatpush1.bf16.msra.mxu1 %v9139_v27  ;;  %v9195_v27 = vcombine.low %v1925_v16, %v1929_v1  ;;  %v9240_v1 = vcombine.high %v3711_v47, %v3715_v12 }
 0x1db   :  { %2885 = vmatpush1.bf16.msra.mxu0 %v9069_v56  ;;  %3629 = vmatprep.subr.bf16.mxu1 %v9148_v7  ;;  %v9145_v56 = vcombine.low %v1876_v2, %v1880_v35  ;;  %v9204_v7 = vcombine.high %v1933_v51, %v1937_v18  ;;  %v12627_v2 = vpack.c.bf16 %v12000_v43, %v12000_v43  ;;  %v1936_v43 = vld [vmem:[%s14903_s8 + $0x328] sm:$0xff] }
 0x1dc   :  { %2886 = vmatprep.subr.bf16.mxu0 %v9078_v24  ;;  %v9154_v24 = vcombine.high %v1884_v23, %v1888_v57 }
 0x1de   :  { %3630 = vmatpush1.bf16.msra.mxu1 %v9147_v44  ;;  %v9203_v44 = vcombine.low %v1933_v51, %v1937_v18  ;;  %v9239_v51 = vcombine.low %v3711_v47, %v3715_v12 }
 0x1df   :  { %2887 = vmatpush1.bf16.msra.mxu0 %v9077_v49  ;;  %3631 = vmatprep.subr.bf16.mxu1 %v9156_v9  ;;  %v9153_v49 = vcombine.low %v1884_v23, %v1888_v57  ;;  %v9212_v9 = vcombine.high %v1941_v4, %v1945_v5 }
 0x1e0   :  { %3578 = vmatprep.subr.bf16.mxu0 %v9106_v29  ;;  %v9162_v29 = vcombine.high %v1892_v28, %v1896_v26 }
 0x1e2   :  { %9102 = vmatmul.mubr.msk.bf16.vlgmr.msra.gmra.mrb[16].mxu0 %vm12021_vm3, %v12012_v6  ;;  %3632 = vmatpush1.bf16.msra.mxu1 %v9155_v25  ;;  %v1860_v6 = vld [vmem:[%s14903_s8 + $0xc8] sm:$0xff]  ;;  %v9211_v25 = vcombine.low %v1941_v4, %v1945_v5 }
 0x1e3   :  { %3579 = vmatpush1.bf16.msra.mxu0 %v9105_v39  ;;  %3610 = vmatprep.mubr.bf16.mxu0 %v12416_v37  ;;  %v9130_v3 = vcombine.high %v1860_v6, %v1864_v63  ;;  %v9129_v53 = vcombine.low %v1860_v6, %v1864_v63  ;;  %v9161_v39 = vcombine.low %v1892_v28, %v1896_v26  ;;  %v1916_v6 = vld [vmem:[%s14903_s8 + $0x288] sm:$0xff] }
 0x1e4   :  { %3580 = vmatprep.subr.bf16.mxu0 %v9114_v14  ;;  %3633 = vmatprep.subr.bf16.mxu1 %v9164_v33  ;;  %v9220_v14 = vcombine.high %v1949_v20, %v1953_v21  ;;  %v9170_v33 = vcombine.high %v1900_v15, %v1904_v19  ;;  %v1920_v63 = vld [vmem:[%s14903_s8 + $0x2a8] sm:$0xff] }
 0x1e5   :  { %v9185_v16 = vcombine.low %v1916_v6, %v1920_v63 }
 0x1e6   :  { %3634 = vmatpush1.bf16.msra.mxu1 %v9163_v59  ;;  %v9219_v59 = vcombine.low %v1949_v20, %v1953_v21 }
 0x1e7   :  { %3581 = vmatpush1.bf16.msra.mxu0 %v9113_v32  ;;  %3635 = vmatprep.subr.bf16.mxu1 %v9172_v60  ;;  %v9169_v32 = vcombine.low %v1900_v15, %v1904_v19  ;;  %v9228_v60 = vcombine.high %v1957_v45, %v1961_v13 }
 0x1e8   :  { %3582 = vmatprep.subr.bf16.mxu0 %v9122_v50  ;;  %v9178_v50 = vcombine.high %v1908_v31, %v1912_v38 }
 0x1ea   :  { %3636 = vmatpush1.bf16.msra.mxu1 %v9171_v58  ;;  %v9227_v58 = vcombine.low %v1957_v45, %v1961_v13 }
 0x1eb   :  { %3583 = vmatpush1.bf16.msra.mxu0 %v9121_v10  ;;  %3637 = vmatprep.subr.bf16.mxu1 %v9180_v40  ;;  %v9177_v10 = vcombine.low %v1908_v31, %v1912_v38  ;;  %v9232_v40 = vcombine.high %v3703_v48, %v3707_v41 }
 0x1ec   :  { %3584 = vmatprep.subr.bf16.mxu0 %v9130_v3  ;;  %v9186_v3 = vcombine.high %v1916_v6, %v1920_v63 }
 0x1ee   :  { %3638 = vmatpush1.bf16.msra.mxu1 %v9179_v17  ;;  %v1928_v17 = vld [vmem:[%s14903_s8 + $0x2e8] sm:$0xff] }
 0x1ef   :  { %3585 = vmatpush1.bf16.msra.mxu0 %v9129_v53  ;;  %3639 = vmatprep.subr.bf16.mxu1 %v9188_v62  ;;  %v9231_v62 = vcombine.low %v3703_v48, %v3707_v41  ;;  %v9193_v18 = vcombine.low %v1924_v54, %v1928_v17 }
 0x1f0   :  { %3586 = vmatprep.subr.bf16.mxu0 %v9138_v30 }
 0x1f2   :  { %3640 = vmatpush1.bf16.msra.mxu1 %v9187_v8  ;;  %v9194_v8 = vcombine.high %v1924_v54, %v1928_v17 }
 0x1f3   :  { %3587 = vmatpush1.bf16.msra.mxu0 %v9137_v42  ;;  %3641 = vmatprep.subr.bf16.mxu1 %v9196_v11  ;;  %v3719_v42 = vld [vmem:[%s14904_s10 + $0x80] sm:$0xff] }
 0x1f4   :  { %3588 = vmatprep.subr.bf16.mxu0 %v9146_v46  ;;  %v3723_v11 = vld [vmem:[%s14904_s10 + $0xa0] sm:$0xff]  ;;  %v1932_v46 = vld [vmem:[%s14903_s8 + $0x308] sm:$0xff] }
 0x1f5   :  { %v9248_v23 = vcombine.high %v3719_v42, %v3723_v11  ;;  %v9202_v57 = vcombine.high %v1932_v46, %v1936_v43  ;;  %v9247_v4 = vcombine.low %v3719_v42, %v3723_v11  ;;  %v9201_v5 = vcombine.low %v1932_v46, %v1936_v43  ;;  %v3775_v46 = vld [vmem:[%s14904_s10 + $0x240] sm:$0xff] }
 0x1f6   :  { %3642 = vmatpush1.bf16.msra.mxu1 %v9195_v27  ;;  %v3727_v27 = vld [vmem:[%s14904_s10 + $0xc0] sm:$0xff] }
 0x1f7   :  { %3589 = vmatpush1.bf16.msra.mxu0 %v9145_v56  ;;  %3643 = vmatprep.subr.bf16.mxu1 %v9204_v7  ;;  %v3731_v56 = vld [vmem:[%s14904_s10 + $0xe0] sm:$0xff]  ;;  %v1940_v7 = vld [vmem:[%s14903_s8 + $0x348] sm:$0xff] }
 0x1f8   :  { %3590 = vmatprep.subr.bf16.mxu0 %v9154_v24  ;;  %v1944_v24 = vld [vmem:[%s14903_s8 + $0x368] sm:$0xff]  ;;  %v9256_v28 = vcombine.high %v3727_v27, %v3731_v56  ;;  %v9255_v20 = vcombine.low %v3727_v27, %v3731_v56  ;;  %v3779_v43 = vld [vmem:[%s14904_s10 + $0x260] sm:$0xff] }
 0x1f9   :  { %v9210_v26 = vcombine.high %v1940_v7, %v1944_v24  ;;  %v9209_v21 = vcombine.low %v1940_v7, %v1944_v24  ;;  %v3783_v56 = vld [vmem:[%s14904_s10 + $0x280] sm:$0xff]  ;;  %v1870_v24 = vld [vmem:[%s14903_s8 + $0x118] sm:$0xff] }
 0x1fa   :  { %3644 = vmatpush1.bf16.msra.mxu1 %v9203_v44  ;;  %v3735_v44 = vld [vmem:[%s14904_s10 + $0x100] sm:$0xff] }
 0x1fb   :  { %3591 = vmatpush1.bf16.msra.mxu0 %v9153_v49  ;;  %3645 = vmatprep.subr.bf16.mxu1 %v9212_v9  ;;  %v3739_v49 = vld [vmem:[%s14904_s10 + $0x120] sm:$0xff]  ;;  %v1948_v9 = vld [vmem:[%s14903_s8 + $0x388] sm:$0xff] }
 0x1fc   :  { %3592 = vmatprep.subr.bf16.mxu0 %v9162_v29  ;;  %v1952_v29 = vld [vmem:[%s14903_s8 + $0x3a8] sm:$0xff]  ;;  %v9264_v15 = vcombine.high %v3735_v44, %v3739_v49  ;;  %v9263_v45 = vcombine.low %v3735_v44, %v3739_v49  ;;  %v3787_v7 = vld [vmem:[%s14904_s10 + $0x2a0] sm:$0xff] }
 0x1fd   :  { %v9218_v19 = vcombine.high %v1948_v9, %v1952_v29  ;;  %v9217_v13 = vcombine.low %v1948_v9, %v1952_v29  ;;  %v3791_v49 = vld [vmem:[%s14904_s10 + $0x2c0] sm:$0xff]  ;;  %v1878_v29 = vld [vmem:[%s14903_s8 + $0x158] sm:$0xff] }
 0x1fe   :  { %3646 = vmatpush1.bf16.msra.mxu1 %v9211_v25  ;;  %v3743_v25 = vld [vmem:[%s14904_s10 + $0x140] sm:$0xff] }
 0x1ff   :  { %3593 = vmatpush1.bf16.msra.mxu0 %v9161_v39  ;;  %3647 = vmatprep.subr.bf16.mxu1 %v9220_v14  ;;  %v3747_v39 = vld [vmem:[%s14904_s10 + $0x160] sm:$0xff]  ;;  %v1956_v14 = vld [vmem:[%s14903_s8 + $0x3c8] sm:$0xff] }
 0x200   :  { %3594 = vmatprep.subr.bf16.mxu0 %v9170_v33  ;;  %v1960_v33 = vld [vmem:[%s14903_s8 + $0x3e8] sm:$0xff]  ;;  %v9272_v31 = vcombine.high %v3743_v25, %v3747_v39  ;;  %v9271_v48 = vcombine.low %v3743_v25, %v3747_v39  ;;  %v3795_v9 = vld [vmem:[%s14904_s10 + $0x2e0] sm:$0xff] }
 0x201   :  { %v9226_v38 = vcombine.high %v1956_v14, %v1960_v33  ;;  %v9225_v41 = vcombine.low %v1956_v14, %v1960_v33  ;;  %v3799_v39 = vld [vmem:[%s14904_s10 + $0x300] sm:$0xff]  ;;  %v1886_v33 = vld [vmem:[%s14903_s8 + $0x198] sm:$0xff] }
 0x202   :  { %3648 = vmatpush1.bf16.msra.mxu1 %v9219_v59  ;;  %v3751_v59 = vld [vmem:[%s14904_s10 + $0x180] sm:$0xff] }
 0x203   :  { %3595 = vmatpush1.bf16.msra.mxu0 %v9169_v32  ;;  %3649 = vmatprep.subr.bf16.mxu1 %v9228_v60  ;;  %v3755_v32 = vld [vmem:[%s14904_s10 + $0x1a0] sm:$0xff]  ;;  %v1838_v60 = vld [vmem:[%s14903_s8 + $0x18] sm:$0xff] }
 0x204   :  { %3596 = vmatprep.subr.bf16.mxu0 %v9178_v50  ;;  %v1842_v50 = vld [vmem:[%s14903_s8 + $0x38] sm:$0xff]  ;;  %v9280_v6 = vcombine.high %v3751_v59, %v3755_v32  ;;  %v9279_v47 = vcombine.low %v3751_v59, %v3755_v32  ;;  %v3803_v14 = vld [vmem:[%s14904_s10 + $0x320] sm:$0xff] }
 0x205   :  { %v12615_v52 = vpop.f32.mrb[0].mxu1  ;;  %v9110_v63 = vcombine.high %v1838_v60, %v1842_v50  ;;  %v9109_v12 = vcombine.low %v1838_v60, %v1842_v50  ;;  %v3807_v32 = vld [vmem:[%s14904_s10 + $0x340] sm:$0xff] }
 0x206   :  { %v12623_v53 = vpop.f32.mrb[1].mxu1  ;;  %3650 = vmatpush1.bf16.msra.mxu1 %v9227_v58  ;;  %v1846_v58 = vld [vmem:[%s14903_s8 + $0x58] sm:$0xff]  ;;  %v3811_v60 = vld [vmem:[%s14904_s10 + $0x360] sm:$0xff] }
 0x207   :  { %v2771_v30 = vpop.f32.mrb[2].mxu1  ;;  %3597 = vmatpush1.bf16.msra.mxu0 %v9177_v10  ;;  %4471 = vmatprep.subr.bf16.mxu1 %v9232_v40  ;;  %v1850_v10 = vld [vmem:[%s14903_s8 + $0x78] sm:$0xff]  ;;  %v3759_v40 = vld [vmem:[%s14904_s10 + $0x1c0] sm:$0xff] }
 0x208   :  { %v2772_v35 = vpop.f32.mrb[3].mxu1  ;;  %3598 = vmatprep.subr.bf16.mxu0 %v9186_v3  ;;  %v3763_v3 = vld [vmem:[%s14904_s10 + $0x1e0] sm:$0xff]  ;;  %v9118_v54 = vcombine.high %v1846_v58, %v1850_v10 }
 0x209   :  { %3652 = vmatmul.mubr.bf16.vlgmr.msra.gmra.mrb[12].mxu1 %v12420_v22  ;;  %v9288_v17 = vcombine.high %v3759_v40, %v3763_v3  ;;  %v3771_v30 = vld [vmem:[%s14904_s10 + $0x220] sm:$0xff]  ;;  %v9287_v35 = vcombine.low %v3759_v40, %v3763_v3  ;;  %v9336_v3 = vcombine.high %v3807_v32, %v3811_v60 }
 0x20a   :  { %4472 = vmatpush1.bf16.msra.mxu1 %v9231_v62  ;;  %4503 = vmatprep.mubr.bf16.mxu1 %v12627_v2  ;;  %v3767_v62 = vld [vmem:[%s14904_s10 + $0x200] sm:$0xff] }
 0x20b   :  { %3599 = vmatpush1.bf16.msra.mxu0 %v9185_v16  ;;  %4473 = vmatprep.subr.bf16.mxu1 %v9240_v1  ;;  %v1854_v16 = vld [vmem:[%s14903_s8 + $0x98] sm:$0xff]  ;;  %v9296_v42 = vcombine.high %v3767_v62, %v3771_v30 }
 0x20c   :  { %3600 = vmatprep.subr.bf16.mxu0 %v9194_v8  ;;  %v1858_v1 = vld [vmem:[%s14903_s8 + $0xb8] sm:$0xff]  ;;  %v9117_v8 = vcombine.low %v1846_v58, %v1850_v10 }
 0x20d   :  { %v9126_v11 = vcombine.high %v1854_v16, %v1858_v1 }
 0x20e   :  { %4474 = vmatpush1.bf16.msra.mxu1 %v9239_v51  ;;  %v1862_v51 = vld [vmem:[%s14903_s8 + $0xd8] sm:$0xff] }
 0x20f   :  { %3601 = vmatpush1.bf16.msra.mxu0 %v9193_v18  ;;  %4475 = vmatprep.subr.bf16.mxu1 %v9248_v23  ;;  %v9295_v18 = vcombine.low %v3767_v62, %v3771_v30  ;;  %v9125_v23 = vcombine.low %v1854_v16, %v1858_v1  ;;  %v1902_v62 = vld [vmem:[%s14903_s8 + $0x218] sm:$0xff]  ;;  %v9335_v16 = vcombine.low %v3807_v32, %v3811_v60 }
 0x210   :  { %3602 = vmatprep.subr.bf16.mxu0 %v9202_v57  ;;  %v9304_v57 = vcombine.high %v3775_v46, %v3779_v43  ;;  %v1906_v30 = vld [vmem:[%s14903_s8 + $0x238] sm:$0xff] }
 0x212   :  { %4476 = vmatpush1.bf16.msra.mxu1 %v9247_v4  ;;  %v1874_v4 = vld [vmem:[%s14903_s8 + $0x138] sm:$0xff] }
 0x213   :  { %3603 = vmatpush1.bf16.msra.mxu0 %v9201_v5  ;;  %4477 = vmatprep.subr.bf16.mxu1 %v9256_v28  ;;  %v9303_v5 = vcombine.low %v3775_v46, %v3779_v43  ;;  %v9142_v44 = vcombine.high %v1870_v24, %v1874_v4  ;;  %v1910_v46 = vld [vmem:[%s14903_s8 + $0x258] sm:$0xff] }
 0x214   :  { %3604 = vmatprep.subr.bf16.mxu0 %v9210_v26  ;;  %v9312_v26 = vcombine.high %v3783_v56, %v3787_v7  ;;  %v1914_v43 = vld [vmem:[%s14903_s8 + $0x278] sm:$0xff] }
 0x216   :  { %4478 = vmatpush1.bf16.msra.mxu1 %v9255_v20  ;;  %v1882_v20 = vld [vmem:[%s14903_s8 + $0x178] sm:$0xff] }
 0x217   :  { %3605 = vmatpush1.bf16.msra.mxu0 %v9209_v21  ;;  %4479 = vmatprep.subr.bf16.mxu1 %v9264_v15  ;;  %v9311_v21 = vcombine.low %v3783_v56, %v3787_v7  ;;  %v9141_v15 = vcombine.low %v1870_v24, %v1874_v4  ;;  %v9150_v25 = vcombine.high %v1878_v29, %v1882_v20  ;;  %v1918_v56 = vld [vmem:[%s14903_s8 + $0x298] sm:$0xff] }
 0x218   :  { %3606 = vmatprep.subr.bf16.mxu0 %v9218_v19  ;;  %v9320_v19 = vcombine.high %v3791_v49, %v3795_v9  ;;  %v1922_v7 = vld [vmem:[%s14903_s8 + $0x2b8] sm:$0xff]  ;;  %v9181_v4 = vcombine.low %v1910_v46, %v1914_v43 }
 0x21a   :  { %4480 = vmatpush1.bf16.msra.mxu1 %v9263_v45  ;;  %v1890_v45 = vld [vmem:[%s14903_s8 + $0x1b8] sm:$0xff] }
 0x21b   :  { %3607 = vmatpush1.bf16.msra.mxu0 %v9217_v13  ;;  %4481 = vmatprep.subr.bf16.mxu1 %v9272_v31  ;;  %v9319_v13 = vcombine.low %v3791_v49, %v3795_v9  ;;  %v9149_v31 = vcombine.low %v1878_v29, %v1882_v20  ;;  %v9158_v59 = vcombine.high %v1886_v33, %v1890_v45  ;;  %v1926_v9 = vld [vmem:[%s14903_s8 + $0x2d8] sm:$0xff] }
 0x21c   :  { %3608 = vmatprep.subr.bf16.mxu0 %v9226_v38  ;;  %v9328_v38 = vcombine.high %v3799_v39, %v3803_v14  ;;  %v9157_v40 = vcombine.low %v1886_v33, %v1890_v45  ;;  %v1930_v29 = vld [vmem:[%s14903_s8 + $0x2f8] sm:$0xff]  ;;  %v3721_v45 = vld [vmem:[%s14904_s10 + $0x90] sm:$0xff] }
 0x21d   :  { %v9198_v33 = vcombine.high %v1926_v9, %v1930_v29 }
 0x21e   :  { %4482 = vmatpush1.bf16.msra.mxu1 %v9271_v48  ;;  %v1894_v48 = vld [vmem:[%s14903_s8 + $0x1d8] sm:$0xff] }
 0x21f   :  { %3609 = vmatpush1.bf16.msra.mxu0 %v9225_v41  ;;  %4483 = vmatprep.subr.bf16.mxu1 %v9280_v6  ;;  %v1898_v41 = vld [vmem:[%s14903_s8 + $0x1f8] sm:$0xff] }
 0x220   :  { %3660 = vmatprep.subr.bf16.mxu0 %v9110_v63  ;;  %v9327_v63 = vcombine.low %v3799_v39, %v3803_v14  ;;  %v9165_v1 = vcombine.low %v1894_v48, %v1898_v41 }
 0x222   :  { %3611 = vmatmul.mubr.bf16.vlgmr.msra.gmra.mrb[20].mxu0 %v12420_v22  ;;  %4484 = vmatpush1.bf16.msra.mxu1 %v9279_v47 }
 0x223   :  { %3661 = vmatpush1.bf16.msra.mxu0 %v9109_v12  ;;  %3692 = vmatprep.mubr.bf16.mxu0 %v12416_v37  ;;  %v1866_v37 = vld [vmem:[%s14903_s8 + $0xf8] sm:$0xff]  ;;  %v9166_v12 = vcombine.high %v1894_v48, %v1898_v41  ;;  %v3733_v48 = vld [vmem:[%s14904_s10 + $0xf0] sm:$0xff] }
 0x224   :  { %3662 = vmatprep.subr.bf16.mxu0 %v9118_v54  ;;  %4485 = vmatprep.subr.bf16.mxu1 %v9288_v17  ;;  %v9134_v27 = vcombine.high %v1862_v51, %v1866_v37  ;;  %v9133_v28 = vcombine.low %v1862_v51, %v1866_v37  ;;  %v3815_v54 = vld [vmem:[%s14904_s10 + $0x380] sm:$0xff]  ;;  %v9173_v37 = vcombine.low %v1902_v62, %v1906_v30  ;;  %v1942_v41 = vld [vmem:[%s14903_s8 + $0x358] sm:$0xff] }
 0x225   :  { %v3819_v17 = vld [vmem:[%s14904_s10 + $0x3a0] sm:$0xff] }
 0x226   :  { %4486 = vmatpush1.bf16.msra.mxu1 %v9287_v35  ;;  %v9344_v35 = vcombine.high %v3815_v54, %v3819_v17  ;;  %v9343_v51 = vcombine.low %v3815_v54, %v3819_v17  ;;  %v1950_v54 = vld [vmem:[%s14903_s8 + $0x398] sm:$0xff] }
 0x227   :  { %3663 = vmatpush1.bf16.msra.mxu0 %v9117_v8  ;;  %4487 = vmatprep.subr.bf16.mxu1 %v9296_v42  ;;  %v9174_v8 = vcombine.high %v1902_v62, %v1906_v30  ;;  %v3823_v42 = vld [vmem:[%s14904_s10 + $0x3c0] sm:$0xff]  ;;  %v1954_v17 = vld [vmem:[%s14903_s8 + $0x3b8] sm:$0xff] }
 0x228   :  { %3664 = vmatprep.subr.bf16.mxu0 %v9126_v11  ;;  %v3827_v11 = vld [vmem:[%s14904_s10 + $0x3e0] sm:$0xff] }
 0x229   :  { %v9351_v24 = vcombine.low %v3823_v42, %v3827_v11 }
 0x22a   :  { %4488 = vmatpush1.bf16.msra.mxu1 %v9295_v18  ;;  %v9352_v18 = vcombine.high %v3823_v42, %v3827_v11  ;;  %v1958_v42 = vld [vmem:[%s14903_s8 + $0x3d8] sm:$0xff] }
 0x22b   :  { %3665 = vmatpush1.bf16.msra.mxu0 %v9125_v23  ;;  %4489 = vmatprep.subr.bf16.mxu1 %v9304_v57  ;;  %v9182_v23 = vcombine.high %v1910_v46, %v1914_v43  ;;  %v3705_v57 = vld [vmem:[%s14904_s10 + $0x10] sm:$0xff]  ;;  %v1962_v11 = vld [vmem:[%s14903_s8 + $0x3f8] sm:$0xff]  ;;  %v9221_v43 = vcombine.low %v1950_v54, %v1954_v17 }
 0x22c   :  { %3666 = vmatprep.subr.bf16.mxu0 %v9134_v27  ;;  %v3709_v27 = vld [vmem:[%s14904_s10 + $0x30] sm:$0xff] }
 0x22e   :  { %4490 = vmatpush1.bf16.msra.mxu1 %v9303_v5  ;;  %v9236_v5 = vcombine.high %v3705_v57, %v3709_v27 }
 0x22f   :  { %3667 = vmatpush1.bf16.msra.mxu0 %v9133_v28  ;;  %4491 = vmatprep.subr.bf16.mxu1 %v9312_v26  ;;  %v9190_v28 = vcombine.high %v1918_v56, %v1922_v7  ;;  %v3713_v26 = vld [vmem:[%s14904_s10 + $0x50] sm:$0xff] }
 0x230   :  { %3668 = vmatprep.subr.bf16.mxu0 %v9142_v44  ;;  %v3717_v44 = vld [vmem:[%s14904_s10 + $0x70] sm:$0xff] }
 0x231   :  { %v9244_v39 = vcombine.high %v3713_v26, %v3717_v44 }
 0x232   :  { %4492 = vmatpush1.bf16.msra.mxu1 %v9311_v21  ;;  %v9235_v21 = vcombine.low %v3705_v57, %v3709_v27  ;;  %v3704_v57 = vld [vmem:[%s14904_s10 + $0x8] sm:$0xff] }
 0x233   :  { %3669 = vmatpush1.bf16.msra.mxu0 %v9141_v15  ;;  %4493 = vmatprep.subr.bf16.mxu1 %v9320_v19  ;;  %v12833_v15 = vpack.c.bf16 %v11998_v34, %v11998_v34  ;;  %v1934_v34 = vld [vmem:[%s14903_s8 + $0x318] sm:$0xff]  ;;  %v3708_v27 = vld [vmem:[%s14904_s10 + $0x28] sm:$0xff] }
 0x234   :  { %3670 = vmatprep.subr.bf16.mxu0 %v9150_v25  ;;  %v9189_v25 = vcombine.low %v1918_v56, %v1922_v7  ;;  %v9229_v7 = vcombine.low %v1958_v42, %v1962_v11 }
 0x235   :  { %v9887_v50 = vpop.f32.mrb[8].mxu0 }
 0x236   :  { %v9888_v6 = vpop.f32.mrb[9].mxu0  ;;  %4494 = vmatpush1.bf16.msra.mxu1 %v9319_v13  ;;  %v3725_v13 = vld [vmem:[%s14904_s10 + $0xb0] sm:$0xff] }
 0x237   :  { %v12777_v58 = vadd.f32 %v9888_v6, %v9887_v50  ;;  %3671 = vmatpush1.bf16.msra.mxu0 %v9149_v31  ;;  %v9890_v10 = vpop.f32.mrb[10].mxu0  ;;  %4495 = vmatprep.subr.bf16.mxu1 %v9328_v38  ;;  %v1938_v31 = vld [vmem:[%s14903_s8 + $0x338] sm:$0xff]  ;;  %v9243_v38 = vcombine.low %v3713_v26, %v3717_v44  ;;  %v9252_v32 = vcombine.high %v3721_v45, %v3725_v13  ;;  %v3729_v50 = vld [vmem:[%s14904_s10 + $0xd0] sm:$0xff] }
 0x238   :  { %v9891_v47 = vpop.f32.mrb[11].mxu0  ;;  %3672 = vmatprep.subr.bf16.mxu0 %v9158_v59  ;;  %v9197_v59 = vcombine.low %v1926_v9, %v1930_v29  ;;  %v9206_v60 = vcombine.high %v1934_v34, %v1938_v31  ;;  %v1946_v6 = vld [vmem:[%s14903_s8 + $0x378] sm:$0xff]  ;;  %v9205_v10 = vcombine.low %v1934_v34, %v1938_v31  ;;  %v9259_v62 = vcombine.low %v3729_v50, %v3733_v48  ;;  %v3761_v26 = vld [vmem:[%s14904_s10 + $0x1d0] sm:$0xff] }
 0x239   :  { %v3737_v47 = vld [vmem:[%s14904_s10 + $0x110] sm:$0xff]  ;;  %v9213_v30 = vcombine.low %v1942_v41, %v1946_v6  ;;  %v9233_v29 = vcombine.low %v3704_v57, %v3708_v27 }
 0x23a   :  { %4496 = vmatpush1.bf16.msra.mxu1 %v9327_v63  ;;  %v9251_v63 = vcombine.low %v3721_v45, %v3725_v13  ;;  %v3765_v44 = vld [vmem:[%s14904_s10 + $0x1f0] sm:$0xff] }
 0x23b   :  { %3673 = vmatpush1.bf16.msra.mxu0 %v9157_v40  ;;  %4497 = vmatprep.subr.bf16.mxu1 %v9336_v3  ;;  %v9260_v40 = vcombine.high %v3729_v50, %v3733_v48  ;;  %v9214_v3 = vcombine.high %v1942_v41, %v1946_v6  ;;  %v9291_v45 = vcombine.low %v3761_v26, %v3765_v44  ;;  %v3785_v6 = vld [vmem:[%s14904_s10 + $0x290] sm:$0xff] }
 0x23c   :  { %3674 = vmatprep.subr.bf16.mxu0 %v9166_v12  ;;  %v3741_v12 = vld [vmem:[%s14904_s10 + $0x130] sm:$0xff] }
 0x23d   :  { %v9267_v46 = vcombine.low %v3737_v47, %v3741_v12 }
 0x23e   :  { %4498 = vmatpush1.bf16.msra.mxu1 %v9335_v16  ;;  %v9268_v16 = vcombine.high %v3737_v47, %v3741_v12 }
 0x23f   :  { %3675 = vmatpush1.bf16.msra.mxu0 %v9165_v1  ;;  %4499 = vmatprep.subr.bf16.mxu1 %v9344_v35  ;;  %v9222_v1 = vcombine.high %v1950_v54, %v1954_v17  ;;  %v3745_v35 = vld [vmem:[%s14904_s10 + $0x150] sm:$0xff] }
 0x240   :  { %3676 = vmatprep.subr.bf16.mxu0 %v9174_v8  ;;  %v3749_v8 = vld [vmem:[%s14904_s10 + $0x170] sm:$0xff] }
 0x241   :  { %v9275_v56 = vcombine.low %v3745_v35, %v3749_v8  ;;  %v3793_v17 = vld [vmem:[%s14904_s10 + $0x2d0] sm:$0xff] }
 0x242   :  { %4500 = vmatpush1.bf16.msra.mxu1 %v9343_v51  ;;  %v9276_v51 = vcombine.high %v3745_v35, %v3749_v8 }
 0x243   :  { %3677 = vmatpush1.bf16.msra.mxu0 %v9173_v37  ;;  %4501 = vmatprep.subr.bf16.mxu1 %v9352_v18  ;;  %v9230_v37 = vcombine.high %v1958_v42, %v1962_v11  ;;  %v3753_v18 = vld [vmem:[%s14904_s10 + $0x190] sm:$0xff] }
 0x244   :  { %3678 = vmatprep.subr.bf16.mxu0 %v9182_v23  ;;  %v3757_v23 = vld [vmem:[%s14904_s10 + $0x1b0] sm:$0xff] }
 0x245   :  { %v12821_v49 = vpop.f32.mrb[4].mxu1  ;;  %v9283_v9 = vcombine.low %v3753_v18, %v3757_v23  ;;  %v3801_v11 = vld [vmem:[%s14904_s10 + $0x310] sm:$0xff] }
 0x246   :  { %v12829_v20 = vpop.f32.mrb[5].mxu1  ;;  %4502 = vmatpush1.bf16.msra.mxu1 %v9351_v24  ;;  %v9284_v24 = vcombine.high %v3753_v18, %v3757_v23 }
 0x247   :  { %v2853_v19 = vpop.f32.mrb[6].mxu1  ;;  %3679 = vmatpush1.bf16.msra.mxu0 %v9181_v4  ;;  %4553 = vmatprep.subr.bf16.mxu1 %v9236_v5  ;;  %v9234_v4 = vcombine.high %v3704_v57, %v3708_v27  ;;  %v3712_v5 = vld [vmem:[%s14904_s10 + $0x48] sm:$0xff]  ;;  %v3809_v27 = vld [vmem:[%s14904_s10 + $0x350] sm:$0xff] }
 0x248   :  { %v2854_v14 = vpop.f32.mrb[7].mxu1  ;;  %3680 = vmatprep.subr.bf16.mxu0 %v9190_v28  ;;  %v3716_v28 = vld [vmem:[%s14904_s10 + $0x68] sm:$0xff]  ;;  %v9292_v19 = vcombine.high %v3761_v26, %v3765_v44 }
 0x249   :  { %4504 = vmatmul.mubr.bf16.vlgmr.msra.gmra.mrb[16].mxu1 %v12833_v15  ;;  %v3720_v14 = vld [vmem:[%s14904_s10 + $0x88] sm:$0xff]  ;;  %v9241_v13 = vcombine.low %v3712_v5, %v3716_v28 }
 0x24a   :  { %4554 = vmatpush1.bf16.msra.mxu1 %v9235_v21  ;;  %4585 = vmatprep.mubr.bf16.mxu1 %v12627_v2  ;;  %v9242_v21 = vcombine.high %v3712_v5, %v3716_v28 }
 0x24b   :  { %3681 = vmatpush1.bf16.msra.mxu0 %v9189_v25  ;;  %4555 = vmatprep.subr.bf16.mxu1 %v9244_v39  ;;  %v3769_v25 = vld [vmem:[%s14904_s10 + $0x210] sm:$0xff] }
 0x24c   :  { %3682 = vmatprep.subr.bf16.mxu0 %v9198_v33  ;;  %v3773_v39 = vld [vmem:[%s14904_s10 + $0x230] sm:$0xff]  ;;  %v3724_v33 = vld [vmem:[%s14904_s10 + $0xa8] sm:$0xff] }
 0x24d   :  { %v9300_v34 = vcombine.high %v3769_v25, %v3773_v39  ;;  %v9250_v31 = vcombine.high %v3720_v14, %v3724_v33  ;;  %v9249_v50 = vcombine.low %v3720_v14, %v3724_v33  ;;  %v3772_v14 = vld [vmem:[%s14904_s10 + $0x228] sm:$0xff] }
 0x24e   :  { %4556 = vmatpush1.bf16.msra.mxu1 %v9243_v38  ;;  %v3777_v38 = vld [vmem:[%s14904_s10 + $0x250] sm:$0xff] }
 0x24f   :  { %3683 = vmatpush1.bf16.msra.mxu0 %v9197_v59  ;;  %4557 = vmatprep.subr.bf16.mxu1 %v9252_v32  ;;  %v3781_v59 = vld [vmem:[%s14904_s10 + $0x270] sm:$0xff]  ;;  %v3732_v32 = vld [vmem:[%s14904_s10 + $0xe8] sm:$0xff] }
 0x250   :  { %3684 = vmatprep.subr.bf16.mxu0 %v9206_v60  ;;  %v9299_v60 = vcombine.low %v3769_v25, %v3773_v39  ;;  %v9308_v48 = vcombine.high %v3777_v38, %v3781_v59  ;;  %v3821_v25 = vld [vmem:[%s14904_s10 + $0x3b0] sm:$0xff]  ;;  %v3768_v39 = vld [vmem:[%s14904_s10 + $0x208] sm:$0xff] }
 0x252   :  { %4558 = vmatpush1.bf16.msra.mxu1 %v9251_v63  ;;  %v3789_v63 = vld [vmem:[%s14904_s10 + $0x2b0] sm:$0xff] }
 0x253   :  { %3685 = vmatpush1.bf16.msra.mxu0 %v9205_v10  ;;  %4559 = vmatprep.subr.bf16.mxu1 %v9260_v40  ;;  %v3736_v10 = vld [vmem:[%s14904_s10 + $0x108] sm:$0xff]  ;;  %v9316_v12 = vcombine.high %v3785_v6, %v3789_v63 }
 0x254   :  { %3686 = vmatprep.subr.bf16.mxu0 %v9214_v3  ;;  %v3740_v40 = vld [vmem:[%s14904_s10 + $0x128] sm:$0xff]  ;;  %v9307_v3 = vcombine.low %v3777_v38, %v3781_v59  ;;  %v3829_v38 = vld [vmem:[%s14904_s10 + $0x3f0] sm:$0xff] }
 0x255   :  { %v9266_v54 = vcombine.high %v3736_v10, %v3740_v40  ;;  %v9265_v35 = vcombine.low %v3736_v10, %v3740_v40  ;;  %v3776_v59 = vld [vmem:[%s14904_s10 + $0x248] sm:$0xff] }
 0x256   :  { %4560 = vmatpush1.bf16.msra.mxu1 %v9259_v62  ;;  %v3797_v62 = vld [vmem:[%s14904_s10 + $0x2f0] sm:$0xff]  ;;  %v3788_v10 = vld [vmem:[%s14904_s10 + $0x2a8] sm:$0xff] }
 0x257   :  { %3687 = vmatpush1.bf16.msra.mxu0 %v9213_v30  ;;  %4561 = vmatprep.subr.bf16.mxu1 %v9268_v16  ;;  %v3744_v30 = vld [vmem:[%s14904_s10 + $0x148] sm:$0xff]  ;;  %v9324_v8 = vcombine.high %v3793_v17, %v3797_v62 }
 0x258   :  { %3688 = vmatprep.subr.bf16.mxu0 %v9222_v1  ;;  %v3748_v16 = vld [vmem:[%s14904_s10 + $0x168] sm:$0xff]  ;;  %v9315_v1 = vcombine.low %v3785_v6, %v3789_v63  ;;  %v4648_v6 = vld [vmem:[%s14905_s11 + $0x20] sm:$0xff] }
 0x259   :  { %v9274_v42 = vcombine.high %v3744_v30, %v3748_v16  ;;  %v9273_v18 = vcombine.low %v3744_v30, %v3748_v16  ;;  %v3784_v63 = vld [vmem:[%s14904_s10 + $0x288] sm:$0xff] }
 0x25a   :  { %4562 = vmatpush1.bf16.msra.mxu1 %v9267_v46  ;;  %v3805_v46 = vld [vmem:[%s14904_s10 + $0x330] sm:$0xff]  ;;  %v3796_v30 = vld [vmem:[%s14904_s10 + $0x2e8] sm:$0xff] }
 0x25b   :  { %3689 = vmatpush1.bf16.msra.mxu0 %v9221_v43  ;;  %4563 = vmatprep.subr.bf16.mxu1 %v9276_v51  ;;  %v3752_v43 = vld [vmem:[%s14904_s10 + $0x188] sm:$0xff]  ;;  %v9332_v23 = vcombine.high %v3801_v11, %v3805_v46  ;;  %v9331_v28 = vcombine.low %v3801_v11, %v3805_v46  ;;  %v4664_v11 = vld [vmem:[%s14905_s11 + $0xa0] sm:$0xff] }
 0x25c   :  { %3690 = vmatprep.subr.bf16.mxu0 %v9230_v37  ;;  %v3756_v51 = vld [vmem:[%s14904_s10 + $0x1a8] sm:$0xff]  ;;  %v9323_v37 = vcombine.low %v3793_v17, %v3797_v62  ;;  %v4656_v17 = vld [vmem:[%s14905_s11 + $0x60] sm:$0xff] }
 0x25d   :  { %v9282_v57 = vcombine.high %v3752_v43, %v3756_v51  ;;  %v9281_v44 = vcombine.low %v3752_v43, %v3756_v51  ;;  %v3792_v62 = vld [vmem:[%s14904_s10 + $0x2c8] sm:$0xff] }
 0x25e   :  { %4564 = vmatpush1.bf16.msra.mxu1 %v9275_v56  ;;  %v3813_v56 = vld [vmem:[%s14904_s10 + $0x370] sm:$0xff]  ;;  %v3800_v46 = vld [vmem:[%s14904_s10 + $0x308] sm:$0xff] }
 0x25f   :  { %3691 = vmatpush1.bf16.msra.mxu0 %v9229_v7  ;;  %4565 = vmatprep.subr.bf16.mxu1 %v9284_v24  ;;  %v3760_v24 = vld [vmem:[%s14904_s10 + $0x1c8] sm:$0xff]  ;;  %v9339_v33 = vcombine.low %v3809_v27, %v3813_v56 }
 0x260   :  { %4512 = vmatprep.subr.bf16.mxu0 %v9234_v4  ;;  %v3764_v4 = vld [vmem:[%s14904_s10 + $0x1e8] sm:$0xff] }
 0x261   :  { %v3804_v43 = vld [vmem:[%s14904_s10 + $0x328] sm:$0xff] }
 0x262   :  { %3693 = vmatmul.mubr.bf16.vlgmr.msra.gmra.mrb[24].mxu0 %v12420_v22  ;;  %4566 = vmatpush1.bf16.msra.mxu1 %v9283_v9  ;;  %v3728_v22 = vld [vmem:[%s14904_s10 + $0xc8] sm:$0xff]  ;;  %v9340_v9 = vcombine.high %v3809_v27, %v3813_v56  ;;  %v4672_v27 = vld [vmem:[%s14905_s11 + $0xe0] sm:$0xff] }
 0x263   :  { %4513 = vmatpush1.bf16.msra.mxu0 %v9233_v29  ;;  %4544 = vmatprep.mubr.bf16.mxu0 %v12627_v2  ;;  %v9258_v41 = vcombine.high %v3728_v22, %v3732_v32  ;;  %v9257_v47 = vcombine.low %v3728_v22, %v3732_v32  ;;  %v3780_v22 = vld [vmem:[%s14904_s10 + $0x268] sm:$0xff] }
 0x264   :  { %4514 = vmatprep.subr.bf16.mxu0 %v9242_v21  ;;  %4567 = vmatprep.subr.bf16.mxu1 %v9292_v19  ;;  %v9290_v21 = vcombine.high %v3760_v24, %v3764_v4  ;;  %v3817_v19 = vld [vmem:[%s14904_s10 + $0x390] sm:$0xff]  ;;  %v3808_v56 = vld [vmem:[%s14904_s10 + $0x348] sm:$0xff] }
 0x265   :  { %v9347_v32 = vcombine.low %v3817_v19, %v3821_v25 }
 0x266   :  { %4568 = vmatpush1.bf16.msra.mxu1 %v9291_v45  ;;  %v9289_v45 = vcombine.low %v3760_v24, %v3764_v4  ;;  %v3812_v24 = vld [vmem:[%s14904_s10 + $0x368] sm:$0xff] }
 0x267   :  { %4515 = vmatpush1.bf16.msra.mxu0 %v9241_v13  ;;  %4569 = vmatprep.subr.bf16.mxu1 %v9300_v34  ;;  %v9348_v13 = vcombine.high %v3817_v19, %v3821_v25  ;;  %v9298_v34 = vcombine.high %v3768_v39, %v3772_v14  ;;  %v3820_v19 = vld [vmem:[%s14904_s10 + $0x3a8] sm:$0xff] }
 0x268   :  { %4516 = vmatprep.subr.bf16.mxu0 %v9250_v31  ;;  %v3825_v31 = vld [vmem:[%s14904_s10 + $0x3d0] sm:$0xff] }
 0x269   :  { %v9355_v40 = vcombine.low %v3825_v31, %v3829_v38 }
 0x26a   :  { %4570 = vmatpush1.bf16.msra.mxu1 %v9299_v60  ;;  %v9297_v60 = vcombine.low %v3768_v39, %v3772_v14  ;;  %v9337_v39 = vcombine.low %v3808_v56, %v3812_v24 }
 0x26b   :  { %4517 = vmatpush1.bf16.msra.mxu0 %v9249_v50  ;;  %4571 = vmatprep.subr.bf16.mxu1 %v9308_v48  ;;  %v9356_v50 = vcombine.high %v3825_v31, %v3829_v38  ;;  %v9306_v48 = vcombine.high %v3776_v59, %v3780_v22  ;;  %v3828_v31 = vld [vmem:[%s14904_s10 + $0x3e8] sm:$0xff] }
 0x26c   :  { %4518 = vmatprep.subr.bf16.mxu0 %v9258_v41  ;;  %v4644_v41 = vld [vmem:[%s14905_s11] sm:$0xff] }
 0x26d   :  { %v9359_v16 = vcombine.low %v4644_v41, %v4648_v6 }
 0x26e   :  { %4572 = vmatpush1.bf16.msra.mxu1 %v9307_v3  ;;  %v9305_v3 = vcombine.low %v3776_v59, %v3780_v22 }
 0x26f   :  { %4519 = vmatpush1.bf16.msra.mxu0 %v9257_v47  ;;  %4573 = vmatprep.subr.bf16.mxu1 %v9316_v12  ;;  %v9360_v47 = vcombine.high %v4644_v41, %v4648_v6  ;;  %v9314_v12 = vcombine.high %v3784_v63, %v3788_v10  ;;  %v3710_v41 = vld [vmem:[%s14904_s10 + $0x38] sm:$0xff] }
 0x270   :  { %4520 = vmatprep.subr.bf16.mxu0 %v9266_v54  ;;  %v4652_v54 = vld [vmem:[%s14905_s11 + $0x40] sm:$0xff] }
 0x271   :  { %v9367_v51 = vcombine.low %v4652_v54, %v4656_v17 }
 0x272   :  { %4574 = vmatpush1.bf16.msra.mxu1 %v9315_v1  ;;  %v9313_v1 = vcombine.low %v3784_v63, %v3788_v10 }
 0x273   :  { %4521 = vmatpush1.bf16.msra.mxu0 %v9265_v35  ;;  %4575 = vmatprep.subr.bf16.mxu1 %v9324_v8  ;;  %v9368_v35 = vcombine.high %v4652_v54, %v4656_v17  ;;  %v9322_v8 = vcombine.high %v3792_v62, %v3796_v30  ;;  %v3718_v17 = vld [vmem:[%s14904_s10 + $0x78] sm:$0xff] }
 0x274   :  { %4522 = vmatprep.subr.bf16.mxu0 %v9274_v42  ;;  %v4660_v42 = vld [vmem:[%s14905_s11 + $0x80] sm:$0xff] }
 0x275   :  { %v12977_v7 = vpop.f32.mrb[12].mxu0  ;;  %v9375_v4 = vcombine.low %v4660_v42, %v4664_v11 }
 0x276   :  { %v12985_v5 = vpop.f32.mrb[13].mxu0  ;;  %4576 = vmatpush1.bf16.msra.mxu1 %v9323_v37  ;;  %v9321_v37 = vcombine.low %v3792_v62, %v3796_v30  ;;  %v4700_v62 = vld [vmem:[%s14905_s11 + $0x1c0] sm:$0xff] }
 0x277   :  { %v2812_v26 = vpop.f32.mrb[14].mxu0  ;;  %4523 = vmatpush1.bf16.msra.mxu0 %v9273_v18  ;;  %4577 = vmatprep.subr.bf16.mxu1 %v9332_v23  ;;  %v9376_v18 = vcombine.high %v4660_v42, %v4664_v11  ;;  %v9330_v23 = vcombine.high %v3800_v46, %v3804_v43  ;;  %v4704_v30 = vld [vmem:[%s14905_s11 + $0x1e0] sm:$0xff] }
 0x278   :  { %v2813_v29 = vpop.f32.mrb[15].mxu0  ;;  %4524 = vmatprep.subr.bf16.mxu0 %v9282_v57  ;;  %v4668_v57 = vld [vmem:[%s14905_s11 + $0xc0] sm:$0xff] }
 0x279   :  { %v9384_v26 = vcombine.high %v4668_v57, %v4672_v27  ;;  %v4680_v29 = vld [vmem:[%s14905_s11 + $0x120] sm:$0xff]  ;;  %v9383_v25 = vcombine.low %v4668_v57, %v4672_v27 }
 0x27a   :  { %4578 = vmatpush1.bf16.msra.mxu1 %v9331_v28  ;;  %v9329_v28 = vcombine.low %v3800_v46, %v3804_v43  ;;  %v8934_v42 = vld [vmem:[%s14906_s7] ss:$0 sm:$0xff]  ;;  %v9416_v46 = vcombine.high %v4700_v62, %v4704_v30  ;;  %v4646_v43 = vld [vmem:[%s14905_s11 + $0x10] sm:$0xff] }
 0x27b   :  { %4525 = vmatpush1.bf16.msra.mxu0 %v9281_v44  ;;  %4579 = vmatprep.subr.bf16.mxu1 %v9340_v9  ;;  %v9338_v44 = vcombine.high %v3808_v56, %v3812_v24  ;;  %v4676_v9 = vld [vmem:[%s14905_s11 + $0x100] sm:$0xff]  ;;  %v4654_v24 = vld [vmem:[%s14905_s11 + $0x50] sm:$0xff] }
 0x27c   :  { %4526 = vmatprep.subr.bf16.mxu0 %v9290_v21  ;;  %v3816_v21 = vld [vmem:[%s14904_s10 + $0x388] sm:$0xff]  ;;  %v9392_v14 = vcombine.high %v4676_v9, %v4680_v29  ;;  %v9391_v38 = vcombine.low %v4676_v9, %v4680_v29 }
 0x27d   :  { %v9345_v59 = vcombine.low %v3816_v21, %v3820_v19 }
 0x27e   :  { %4580 = vmatpush1.bf16.msra.mxu1 %v9339_v33  ;;  %v9346_v33 = vcombine.high %v3816_v21, %v3820_v19  ;;  %v4662_v21 = vld [vmem:[%s14905_s11 + $0x90] sm:$0xff] }
 0x27f   :  { %4527 = vmatpush1.bf16.msra.mxu0 %v9289_v45  ;;  %4581 = vmatprep.subr.bf16.mxu1 %v9348_v13  ;;  %v4684_v45 = vld [vmem:[%s14905_s11 + $0x140] sm:$0xff]  ;;  %v4666_v19 = vld [vmem:[%s14905_s11 + $0xb0] sm:$0xff] }
 0x280   :  { %4528 = vmatprep.subr.bf16.mxu0 %v9298_v34  ;;  %v4688_v13 = vld [vmem:[%s14905_s11 + $0x160] sm:$0xff]  ;;  %v3824_v34 = vld [vmem:[%s14904_s10 + $0x3c8] sm:$0xff] }
 0x281   :  { %v9400_v22 = vcombine.high %v4684_v45, %v4688_v13  ;;  %v9399_v6 = vcombine.low %v4684_v45, %v4688_v13  ;;  %v9353_v63 = vcombine.low %v3824_v34, %v3828_v31  ;;  %v9380_v45 = vcombine.high %v4662_v21, %v4666_v19 }
 0x282   :  { %4582 = vmatpush1.bf16.msra.mxu1 %v9347_v32  ;;  %v9354_v32 = vcombine.high %v3824_v34, %v3828_v31  ;;  %v4670_v34 = vld [vmem:[%s14905_s11 + $0xd0] sm:$0xff] }
 0x283   :  { %4529 = vmatpush1.bf16.msra.mxu0 %v9297_v60  ;;  %4583 = vmatprep.subr.bf16.mxu1 %v9356_v50  ;;  %v4692_v60 = vld [vmem:[%s14905_s11 + $0x180] sm:$0xff]  ;;  %v4674_v31 = vld [vmem:[%s14905_s11 + $0xf0] sm:$0xff] }
 0x284   :  { %4530 = vmatprep.subr.bf16.mxu0 %v9306_v48  ;;  %v4696_v50 = vld [vmem:[%s14905_s11 + $0x1a0] sm:$0xff]  ;;  %v3706_v48 = vld [vmem:[%s14904_s10 + $0x18] sm:$0xff] }
 0x285   :  { %v9408_v10 = vcombine.high %v4692_v60, %v4696_v50 }
 0x286   :  { %4584 = vmatpush1.bf16.msra.mxu1 %v9355_v40 }
 0x287   :  { %4531 = vmatpush1.bf16.msra.mxu0 %v9305_v3  ;;  %5028 = vmatprep.subr.bf16.mxu1 %v9360_v47  ;;  %v9238_v3 = vcombine.high %v3706_v48, %v3710_v41  ;;  %v3714_v47 = vld [vmem:[%s14904_s10 + $0x58] sm:$0xff] }
 0x288   :  { %4532 = vmatprep.subr.bf16.mxu0 %v9314_v12  ;;  %v9246_v11 = vcombine.high %v3714_v47, %v3718_v17  ;;  %v9245_v57 = vcombine.low %v3714_v47, %v3718_v17  ;;  %v4690_v17 = vld [vmem:[%s14905_s11 + $0x170] sm:$0xff] }
 0x289   :  { %4586 = vmatmul.mubr.bf16.vlgmr.msra.gmra.mrb[20].mxu1 %v12833_v15 }
 0x28a   :  { %5029 = vmatpush1.bf16.msra.mxu1 %v9359_v16  ;;  %5060 = vmatprep.mubr.bf16.mxu1 %v10803_v0 }
 0x28b   :  { %4533 = vmatpush1.bf16.msra.mxu0 %v9313_v1  ;;  %5030 = vmatprep.subr.bf16.mxu1 %v9368_v35 }
 0x28c   :  { %4534 = vmatprep.subr.bf16.mxu0 %v9322_v8  ;;  %v9237_v8 = vcombine.low %v3706_v48, %v3710_v41  ;;  %v4678_v48 = vld [vmem:[%s14905_s11 + $0x110] sm:$0xff] }
 0x28d   :  { %v4682_v41 = vld [vmem:[%s14905_s11 + $0x130] sm:$0xff] }
 0x28e   :  { %5031 = vmatpush1.bf16.msra.mxu1 %v9367_v51  ;;  %v3722_v51 = vld [vmem:[%s14904_s10 + $0x98] sm:$0xff] }
 0x28f   :  { %4535 = vmatpush1.bf16.msra.mxu0 %v9321_v37  ;;  %5032 = vmatprep.subr.bf16.mxu1 %v9376_v18  ;;  %v3726_v37 = vld [vmem:[%s14904_s10 + $0xb8] sm:$0xff]  ;;  %v9415_v18 = vcombine.low %v4700_v62, %v4704_v30 }
 0x290   :  { %4536 = vmatprep.subr.bf16.mxu0 %v9330_v23  ;;  %v1828_v23 = vadd.f32 %v12777_v58, %v8934_v42  ;;  %v9254_v56 = vcombine.high %v3722_v51, %v3726_v37  ;;  %v3730_v58 = vld [vmem:[%s14904_s10 + $0xd8] sm:$0xff] }
 0x291   :  { %v3762_v30 = vld [vmem:[%s14904_s10 + $0x1d8] sm:$0xff] }
 0x292   :  { %5033 = vmatpush1.bf16.msra.mxu1 %v9375_v4  ;;  %v4658_v4 = vld [vmem:[%s14905_s11 + $0x70] sm:$0xff] }
 0x293   :  { %4537 = vmatpush1.bf16.msra.mxu0 %v9329_v28  ;;  %5034 = vmatprep.subr.bf16.mxu1 %v9384_v26  ;;  %v13145_v26 = vpack.c.bf16 %v1828_v23, %v1828_v23  ;;  %v9372_v9 = vcombine.high %v4654_v24, %v4658_v4 }
 0x294   :  { %4538 = vmatprep.subr.bf16.mxu0 %v9338_v44  ;;  %v9253_v44 = vcombine.low %v3722_v51, %v3726_v37  ;;  %v4694_v51 = vld [vmem:[%s14905_s11 + $0x190] sm:$0xff] }
 0x295   :  { %v4698_v37 = vld [vmem:[%s14905_s11 + $0x1b0] sm:$0xff] }
 0x296   :  { %5035 = vmatpush1.bf16.msra.mxu1 %v9383_v25  ;;  %v3738_v25 = vld [vmem:[%s14904_s10 + $0x118] sm:$0xff] }
 0x297   :  { %4539 = vmatpush1.bf16.msra.mxu0 %v9337_v39  ;;  %5036 = vmatprep.subr.bf16.mxu1 %v9392_v14  ;;  %v3742_v39 = vld [vmem:[%s14904_s10 + $0x138] sm:$0xff]  ;;  %v9371_v14 = vcombine.low %v4654_v24, %v4658_v4  ;;  %v4702_v4 = vld [vmem:[%s14905_s11 + $0x1d0] sm:$0xff] }
 0x298   :  { %4540 = vmatprep.subr.bf16.mxu0 %v9346_v33  ;;  %v9270_v13 = vcombine.high %v3738_v25, %v3742_v39 }
 0x29a   :  { %5037 = vmatpush1.bf16.msra.mxu1 %v9391_v38  ;;  %v3746_v38 = vld [vmem:[%s14904_s10 + $0x158] sm:$0xff] }
 0x29b   :  { %4541 = vmatpush1.bf16.msra.mxu0 %v9345_v59  ;;  %5038 = vmatprep.subr.bf16.mxu1 %v9400_v22  ;;  %v3750_v59 = vld [vmem:[%s14904_s10 + $0x178] sm:$0xff]  ;;  %v9379_v22 = vcombine.low %v4662_v21, %v4666_v19 }
 0x29c   :  { %v3571_v40 = vpop.f32.mrb[8].mxu1  ;;  %4542 = vmatprep.subr.bf16.mxu0 %v9354_v32  ;;  %v9269_v32 = vcombine.low %v3738_v25, %v3742_v39  ;;  %v3786_v21 = vld [vmem:[%s14904_s10 + $0x298] sm:$0xff] }
 0x29d   :  { %v13101_v12 = vadd.f32 %v3571_v40, %v12615_v52  ;;  %v3573_v54 = vpop.f32.mrb[9].mxu1  ;;  %v9407_v52 = vcombine.low %v4692_v60, %v4696_v50  ;;  %v9388_v60 = vcombine.high %v4670_v34, %v4674_v31  ;;  %v9278_v50 = vcombine.high %v3746_v38, %v3750_v59  ;;  %v3790_v19 = vld [vmem:[%s14904_s10 + $0x2b8] sm:$0xff] }
 0x29e   :  { %v13113_v16 = vadd.f32 %v3573_v54, %v12623_v53  ;;  %5039 = vmatpush1.bf16.msra.mxu1 %v9399_v6  ;;  %v3575_v1 = vpop.f32.mrb[10].mxu1  ;;  %v4650_v53 = vld [vmem:[%s14905_s11 + $0x30] sm:$0xff]  ;;  %v3754_v6 = vld [vmem:[%s14904_s10 + $0x198] sm:$0xff]  ;;  %v9277_v40 = vcombine.low %v3746_v38, %v3750_v59  ;;  %v9317_v38 = vcombine.low %v3786_v21, %v3790_v19 }
 0x29f   :  { %4543 = vmatpush1.bf16.msra.mxu0 %v9353_v63  ;;  %v3576_v35 = vpop.f32.mrb[11].mxu1  ;;  %5040 = vmatprep.subr.bf16.mxu1 %v9408_v10  ;;  %v9364_v27 = vcombine.high %v4646_v43, %v4650_v53  ;;  %v9363_v28 = vcombine.low %v4646_v43, %v4650_v53  ;;  %v3758_v63 = vld [vmem:[%s14904_s10 + $0x1b8] sm:$0xff]  ;;  %v9387_v10 = vcombine.low %v4670_v34, %v4674_v31  ;;  %v4686_v54 = vld [vmem:[%s14905_s11 + $0x150] sm:$0xff] }
 0x2a0   :  { %4594 = vmatprep.subr.bf16.mxu0 %v9238_v3  ;;  %v9396_v3 = vcombine.high %v4678_v48, %v4682_v41  ;;  %v9286_v47 = vcombine.high %v3754_v6, %v3758_v63  ;;  %v3766_v1 = vld [vmem:[%s14904_s10 + $0x1f8] sm:$0xff]  ;;  %v9395_v35 = vcombine.low %v4678_v48, %v4682_v41  ;;  %v9285_v42 = vcombine.low %v3754_v6, %v3758_v63 }
 0x2a1   :  { %v9294_v43 = vcombine.high %v3762_v30, %v3766_v1  ;;  %v3770_v53 = vld [vmem:[%s14904_s10 + $0x218] sm:$0xff]  ;;  %v9403_v23 = vcombine.low %v4686_v54, %v4690_v17 }
 0x2a2   :  { %4545 = vmatmul.mubr.bf16.vlgmr.msra.gmra.mrb[28].mxu0 %v12833_v15  ;;  %5041 = vmatpush1.bf16.msra.mxu1 %v9407_v52  ;;  %v10128_v34 = vld [vmem:[%s14907_s13] ss:$28 sps:$4 sm:$0xff]  }
 0x2a3   :  { %4595 = vmatpush1.bf16.msra.mxu0 %v9237_v8  ;;  %4626 = vmatprep.mubr.bf16.mxu0 %v12627_v2  ;;  %v3734_v2 = vld [vmem:[%s14904_s10 + $0xf8] sm:$0xff] }
 0x2a4   :  { %4596 = vmatprep.subr.bf16.mxu0 %v9246_v11  ;;  %5042 = vmatprep.subr.bf16.mxu1 %v9416_v46  ;;  %v9262_v29 = vcombine.high %v3730_v58, %v3734_v2  ;;  %v9261_v33 = vcombine.low %v3730_v58, %v3734_v2  ;;  %v9404_v11 = vcombine.high %v4686_v54, %v4690_v17  ;;  %v4706_v58 = vld [vmem:[%s14905_s11 + $0x1f0] sm:$0xff]  ;;  %v3782_v2 = vld [vmem:[%s14904_s10 + $0x278] sm:$0xff] }
 0x2a5   :  { %v9419_v25 = vcombine.low %v4702_v4, %v4706_v58  ;;  %v10136_v31 = vld [vmem:[%s14907_s13 + $0x3c] ss:$28 sps:$4 sm:$0xff]  }
 0x2a6   :  { %5043 = vmatpush1.bf16.msra.mxu1 %v9415_v18  ;;  %v3774_v18 = vld [vmem:[%s14904_s10 + $0x238] sm:$0xff] }
 0x2a7   :  { %4597 = vmatpush1.bf16.msra.mxu0 %v9245_v57  ;;  %5110 = vmatprep.subr.bf16.mxu1 %v9364_v27  ;;  %v9293_v57 = vcombine.low %v3762_v30, %v3766_v1  ;;  %v9412_v27 = vcombine.high %v4694_v51, %v4698_v37  ;;  %v9302_v24 = vcombine.high %v3770_v53, %v3774_v18  ;;  %v3802_v59 = vld [vmem:[%s14904_s10 + $0x318] sm:$0xff]  ;;  %v10146_v30 = vld [vmem:[%s14907_s13 + $0xa8] ss:$28 sps:$4 sm:$0xff]  }
 0x2a8   :  { %4598 = vmatprep.subr.bf16.mxu0 %v9254_v56  ;;  %v3778_v56 = vld [vmem:[%s14904_s10 + $0x258] sm:$0xff]  ;;  %v10154_v1 = vld [vmem:[%s14907_s13 + $0xe4] ss:$28 sps:$4 sm:$0xff]  }
 0x2a9   :  { %5061 = vmatmul.mubr.bf16.vlgmr.msra.gmra.mrb[24].mxu1 %v13145_v26  ;;  %v9309_v39 = vcombine.low %v3778_v56, %v3782_v2  ;;  %v3810_v41 = vld [vmem:[%s14904_s10 + $0x358] sm:$0xff] }
 0x2aa   :  { %5111 = vmatpush1.bf16.msra.mxu1 %v9363_v28  ;;  %5142 = vmatprep.mubr.bf16.mxu1 %v10803_v0  ;;  %v9411_v28 = vcombine.low %v4694_v51, %v4698_v37  ;;  %v3814_v6 = vld [vmem:[%s14904_s10 + $0x378] sm:$0xff]  ;;  %v4649_v51 = vld [vmem:[%s14905_s11 + $0x28] sm:$0xff] }
 0x2ab   :  { %4599 = vmatpush1.bf16.msra.mxu0 %v9253_v44  ;;  %5112 = vmatprep.subr.bf16.mxu1 %v9372_v9  ;;  %v9301_v44 = vcombine.low %v3770_v53, %v3774_v18  ;;  %v9420_v9 = vcombine.high %v4702_v4, %v4706_v58  ;;  %v3822_v54 = vld [vmem:[%s14904_s10 + $0x3b8] sm:$0xff]  ;;  %v9342_v17 = vcombine.high %v3810_v41, %v3814_v6  ;;  %v4645_v53 = vld [vmem:[%s14905_s11 + $0x8] sm:$0xff] }
 0x2ac   :  { %4600 = vmatprep.subr.bf16.mxu0 %v9262_v29  ;;  %v9310_v29 = vcombine.high %v3778_v56, %v3782_v2  ;;  %v10160_v56 = vld [vmem:[%s14907_s13 + $0x11c] ss:$28 sps:$4 sm:$0xff]   ;;  %v4657_v58 = vld [vmem:[%s14905_s11 + $0x68] sm:$0xff] }
 0x2ad   :  { %v10158_v2 = vld [vmem:[%s14907_s13 + $0x118] ss:$28 sps:$4 sm:$0xff]  }
 0x2ae   :  { %5113 = vmatpush1.bf16.msra.mxu1 %v9371_v14  ;;  %v10130_v14 = vld [vmem:[%s14907_s13 + $0x4] ss:$28 sps:$4 sm:$0xff]  }
 0x2af   :  { %4601 = vmatpush1.bf16.msra.mxu0 %v9261_v33  ;;  %5114 = vmatprep.subr.bf16.mxu1 %v9380_v45  ;;  %v9318_v33 = vcombine.high %v3786_v21, %v3790_v19  ;;  %v3794_v45 = vld [vmem:[%s14904_s10 + $0x2d8] sm:$0xff]  ;;  %v10164_v19 = vld [vmem:[%s14907_s13 + $0x150] ss:$28 sps:$4 sm:$0xff]  }
 0x2b0   :  { %4602 = vmatprep.subr.bf16.mxu0 %v9270_v13  ;;  %v3798_v13 = vld [vmem:[%s14904_s10 + $0x2f8] sm:$0xff] }
 0x2b1   :  { %v9325_v48 = vcombine.low %v3794_v45, %v3798_v13 }
 0x2b2   :  { %5115 = vmatpush1.bf16.msra.mxu1 %v9379_v22  ;;  %v3806_v22 = vld [vmem:[%s14904_s10 + $0x338] sm:$0xff] }
 0x2b3   :  { %4603 = vmatpush1.bf16.msra.mxu0 %v9269_v32  ;;  %5116 = vmatprep.subr.bf16.mxu1 %v9388_v60  ;;  %v9326_v32 = vcombine.high %v3794_v45, %v3798_v13  ;;  %v10134_v60 = vld [vmem:[%s14907_s13 + $0x38] ss:$28 sps:$4 sm:$0xff]   ;;  %v9334_v63 = vcombine.high %v3802_v59, %v3806_v22  ;;  %v10170_v45 = vld [vmem:[%s14907_s13 + $0x188] ss:$28 sps:$4 sm:$0xff]  }
 0x2b4   :  { %4604 = vmatprep.subr.bf16.mxu0 %v9278_v50  ;;  %v10142_v50 = vld [vmem:[%s14907_s13 + $0x74] ss:$28 sps:$4 sm:$0xff]   ;;  %v4669_v13 = vld [vmem:[%s14905_s11 + $0xc8] sm:$0xff] }
 0x2b5   :  { %v13191_v62 = vpop.f32.mrb[16].mxu0 }
 0x2b6   :  { %v13199_v52 = vpop.f32.mrb[17].mxu0  ;;  %5117 = vmatpush1.bf16.msra.mxu1 %v9387_v10  ;;  %v10140_v10 = vld [vmem:[%s14907_s13 + $0x70] ss:$28 sps:$4 sm:$0xff]  }
 0x2b7   :  { %v2894_v8 = vpop.f32.mrb[18].mxu0  ;;  %4605 = vmatpush1.bf16.msra.mxu0 %v9277_v40  ;;  %5118 = vmatprep.subr.bf16.mxu1 %v9396_v3  ;;  %v10148_v40 = vld [vmem:[%s14907_s13 + $0xac] ss:$28 sps:$4 sm:$0xff]   ;;  %v9333_v3 = vcombine.low %v3802_v59, %v3806_v22 }
 0x2b8   :  { %v2895_v46 = vpop.f32.mrb[19].mxu0  ;;  %4606 = vmatprep.subr.bf16.mxu0 %v9286_v47  ;;  %v3818_v47 = vld [vmem:[%s14904_s10 + $0x398] sm:$0xff]  ;;  %v4677_v59 = vld [vmem:[%s14905_s11 + $0x108] sm:$0xff] }
 0x2b9   :  { %v3826_v8 = vld [vmem:[%s14904_s10 + $0x3d8] sm:$0xff]  ;;  %v4681_v22 = vld [vmem:[%s14905_s11 + $0x128] sm:$0xff] }
 0x2ba   :  { %5119 = vmatpush1.bf16.msra.mxu1 %v9395_v35  ;;  %v9341_v35 = vcombine.low %v3810_v41, %v3814_v6  ;;  %v10152_v46 = vld [vmem:[%s14907_s13 + $0xe0] ss:$28 sps:$4 sm:$0xff]   ;;  %v4685_v41 = vld [vmem:[%s14905_s11 + $0x148] sm:$0xff] }
 0x2bb   :  { %4607 = vmatpush1.bf16.msra.mxu0 %v9285_v42  ;;  %5120 = vmatprep.subr.bf16.mxu1 %v9404_v11  ;;  %v3830_v42 = vld [vmem:[%s14904_s10 + $0x3f8] sm:$0xff]  ;;  %v9350_v11 = vcombine.high %v3818_v47, %v3822_v54  ;;  %v4689_v6 = vld [vmem:[%s14905_s11 + $0x168] sm:$0xff] }
 0x2bc   :  { %4608 = vmatprep.subr.bf16.mxu0 %v9294_v43  ;;  %v9349_v43 = vcombine.low %v3818_v47, %v3822_v54  ;;  %v9358_v37 = vcombine.high %v3826_v8, %v3830_v42  ;;  %v9357_v18 = vcombine.low %v3826_v8, %v3830_v42  ;;  %v4693_v47 = vld [vmem:[%s14905_s11 + $0x188] sm:$0xff] }
 0x2bd   :  { %v4697_v54 = vld [vmem:[%s14905_s11 + $0x1a8] sm:$0xff] }
 0x2be   :  { %5121 = vmatpush1.bf16.msra.mxu1 %v9403_v23  ;;  %v10196_v8 = vld [vmem:[%s14907_s13 + $0x26c] ss:$28 sps:$4 sm:$0xff]  }
 0x2bf   :  { %4609 = vmatpush1.bf16.msra.mxu0 %v9293_v57  ;;  %5122 = vmatprep.subr.bf16.mxu1 %v9412_v27  ;;  %v9362_v57 = vcombine.high %v4645_v53, %v4649_v51  ;;  %v4653_v27 = vld [vmem:[%s14905_s11 + $0x48] sm:$0xff] }
 0x2c0   :  { %4610 = vmatprep.subr.bf16.mxu0 %v9302_v24  ;;  %v9370_v21 = vcombine.high %v4653_v27, %v4657_v58 }
 0x2c2   :  { %5123 = vmatpush1.bf16.msra.mxu1 %v9411_v28 }
 0x2c3   :  { %4611 = vmatpush1.bf16.msra.mxu0 %v9301_v44  ;;  %5124 = vmatprep.subr.bf16.mxu1 %v9420_v9 }
 0x2c4   :  { %4612 = vmatprep.subr.bf16.mxu0 %v9310_v29  ;;  %v9361_v29 = vcombine.low %v4645_v53, %v4649_v51 }
 0x2c6   :  { %5125 = vmatpush1.bf16.msra.mxu1 %v9419_v25  ;;  %v4665_v25 = vld [vmem:[%s14905_s11 + $0xa8] sm:$0xff] }
 0x2c7   :  { %4613 = vmatpush1.bf16.msra.mxu0 %v9309_v39  ;;  %8135 = vmatprep.subr.bf16.mxu1 %v10130_v14  ;;  %v10172_v39 = vld [vmem:[%s14907_s13 + $0x18c] ss:$28 sps:$4 sm:$0xff]   ;;  %v9369_v14 = vcombine.low %v4653_v27, %v4657_v58  ;;  %v10200_v27 = vld [vmem:[%s14907_s13 + $0x2a0] ss:$28 sps:$4 sm:$0xff]  }
 0x2c8   :  { %4614 = vmatprep.subr.bf16.mxu0 %v9318_v33 }
 0x2c9   :  { %5143 = vmatmul.mubr.bf16.vlgmr.msra.gmra.mrb[28].mxu1 %v13145_v26 }
 0x2ca   :  { %8136 = vmatpush1.bf16.msra.mxu1 %v10128_v34  ;;  %v4673_v34 = vld [vmem:[%s14905_s11 + $0xe8] sm:$0xff] }
 0x2cb   :  { %4615 = vmatpush1.bf16.msra.mxu0 %v9317_v38  ;;  %8137 = vmatprep.subr.bf16.mxu1 %v10136_v31  ;;  %v10176_v31 = vld [vmem:[%s14907_s13 + $0x1c0] ss:$28 sps:$4 sm:$0xff]  }
 0x2cc   :  { %4616 = vmatprep.subr.bf16.mxu0 %v9326_v32  ;;  %v10184_v32 = vld [vmem:[%s14907_s13 + $0x1fc] ss:$28 sps:$4 sm:$0xff]  }
 0x2ce   :  { %8138 = vmatpush1.bf16.msra.mxu1 %v10134_v60  ;;  %v9386_v60 = vcombine.high %v4669_v13, %v4673_v34 }
 0x2cf   :  { %4617 = vmatpush1.bf16.msra.mxu0 %v9325_v48  ;;  %8139 = vmatprep.subr.bf16.mxu1 %v10142_v50  ;;  %v10182_v50 = vld [vmem:[%s14907_s13 + $0x1f8] ss:$28 sps:$4 sm:$0xff]   ;;  %v9385_v48 = vcombine.low %v4669_v13, %v4673_v34  ;;  %v10220_v13 = vld [vmem:[%s14907_s13 + $0x34c] ss:$28 sps:$4 sm:$0xff]  }
 0x2d0   :  { %4618 = vmatprep.subr.bf16.mxu0 %v9334_v63  ;;  %v10190_v63 = vld [vmem:[%s14907_s13 + $0x234] ss:$28 sps:$4 sm:$0xff]   ;;  %v4675_v34 = vld [vmem:[%s14905_s11 + $0xf8] sm:$0xff] }
 0x2d2   :  { %8140 = vmatpush1.bf16.msra.mxu1 %v10140_v10  ;;  %v9394_v10 = vcombine.high %v4677_v59, %v4681_v22 }
 0x2d3   :  { %4619 = vmatpush1.bf16.msra.mxu0 %v9333_v3  ;;  %8141 = vmatprep.subr.bf16.mxu1 %v10148_v40  ;;  %v10188_v40 = vld [vmem:[%s14907_s13 + $0x230] ss:$28 sps:$4 sm:$0xff]   ;;  %v9393_v3 = vcombine.low %v4677_v59, %v4681_v22 }
 0x2d4   :  { %4620 = vmatprep.subr.bf16.mxu0 %v9342_v17  ;;  %v9402_v17 = vcombine.high %v4685_v41, %v4689_v6 }
 0x2d6   :  { %8142 = vmatpush1.bf16.msra.mxu1 %v10146_v30  ;;  %v9401_v30 = vcombine.low %v4685_v41, %v4689_v6  ;;  %v4695_v41 = vld [vmem:[%s14905_s11 + $0x198] sm:$0xff] }
 0x2d7   :  { %4621 = vmatpush1.bf16.msra.mxu0 %v9341_v35  ;;  %8143 = vmatprep.subr.bf16.mxu1 %v10154_v1  ;;  %v9410_v1 = vcombine.high %v4693_v47, %v4697_v54  ;;  %v4701_v35 = vld [vmem:[%s14905_s11 + $0x1c8] sm:$0xff]  ;;  %v4699_v6 = vld [vmem:[%s14905_s11 + $0x1b8] sm:$0xff] }
 0x2d8   :  { %4622 = vmatprep.subr.bf16.mxu0 %v9350_v11  ;;  %v4705_v11 = vld [vmem:[%s14905_s11 + $0x1e8] sm:$0xff] }
 0x2da   :  { %8144 = vmatpush1.bf16.msra.mxu1 %v10152_v46  ;;  %v10194_v46 = vld [vmem:[%s14907_s13 + $0x268] ss:$28 sps:$4 sm:$0xff]  }
 0x2db   :  { %4623 = vmatpush1.bf16.msra.mxu0 %v9349_v43  ;;  %8145 = vmatprep.subr.bf16.mxu1 %v10160_v56  ;;  %v4651_v56 = vld [vmem:[%s14905_s11 + $0x38] sm:$0xff] }
 0x2dc   :  { %v3653_v23 = vpop.f32.mrb[12].mxu1  ;;  %4624 = vmatprep.subr.bf16.mxu0 %v9358_v37 }
 0x2dd   :  { %v13305_v24 = vadd.f32 %v3653_v23, %v12821_v49  ;;  %v3655_v4 = vpop.f32.mrb[13].mxu1  ;;  %v10166_v49 = vld [vmem:[%s14907_s13 + $0x154] ss:$28 sps:$4 sm:$0xff]  }
 0x2de   :  { %v13314_v28 = vadd.f32 %v3655_v4, %v12829_v20  ;;  %v3657_v44 = vpop.f32.mrb[14].mxu1  ;;  %8146 = vmatpush1.bf16.msra.mxu1 %v10158_v2  ;;  %v4661_v20 = vld [vmem:[%s14905_s11 + $0x88] sm:$0xff]  ;;  %v9417_v4 = vcombine.low %v4701_v35, %v4705_v11  ;;  %v10208_v2 = vld [vmem:[%s14907_s13 + $0x2dc] ss:$28 sps:$4 sm:$0xff]  }
 0x2df   :  { %4625 = vmatpush1.bf16.msra.mxu0 %v9357_v18  ;;  %v3658_v9 = vpop.f32.mrb[15].mxu1  ;;  %8147 = vmatprep.subr.bf16.mxu1 %v10166_v49  ;;  %v9378_v33 = vcombine.high %v4661_v20, %v4665_v25  ;;  %v9377_v38 = vcombine.low %v4661_v20, %v4665_v25  ;;  %v9409_v18 = vcombine.low %v4693_v47, %v4697_v54  ;;  %v4655_v44 = vld [vmem:[%s14905_s11 + $0x58] sm:$0xff]  ;;  %v10214_v20 = vld [vmem:[%s14907_s13 + $0x314] ss:$28 sps:$4 sm:$0xff]  }
 0x2e0   :  { %5069 = vmatprep.subr.bf16.mxu0 %v9362_v57  ;;  %v9418_v57 = vcombine.high %v4701_v35, %v4705_v11  ;;  %v4659_v9 = vld [vmem:[%s14905_s11 + $0x78] sm:$0xff]  ;;  %v9414_v47 = vcombine.high %v4695_v41, %v4699_v6  ;;  %v9413_v54 = vcombine.low %v4695_v41, %v4699_v6 }
 0x2e1   :  { %v4667_v25 = vld [vmem:[%s14905_s11 + $0xb8] sm:$0xff] }
 0x2e2   :  { %4627 = vmatmul.mubr.bf16.vlgmr.msra.gmra.mrb[32].mxu0 %v12833_v15  ;;  %8148 = vmatpush1.bf16.msra.mxu1 %v10164_v19  ;;  %v10178_v15 = vld [vmem:[%s14907_s13 + $0x1c4] ss:$28 sps:$4 sm:$0xff]   ;;  %v4663_v19 = vld [vmem:[%s14905_s11 + $0x98] sm:$0xff] }
 0x2e3   :  { %5070 = vmatpush1.bf16.msra.mxu0 %v9361_v29  ;;  %5101 = vmatprep.mubr.bf16.mxu0 %v10803_v0  ;;  %v10206_v29 = vld [vmem:[%s14907_s13 + $0x2d8] ss:$28 sps:$4 sm:$0xff]  }
 0x2e4   :  { %5071 = vmatprep.subr.bf16.mxu0 %v9370_v21  ;;  %8149 = vmatprep.subr.bf16.mxu1 %v10172_v39  ;;  %v9374_v21 = vcombine.high %v4655_v44, %v4659_v9  ;;  %v10212_v39 = vld [vmem:[%s14907_s13 + $0x310] ss:$28 sps:$4 sm:$0xff]  }
 0x2e6   :  { %8150 = vmatpush1.bf16.msra.mxu1 %v10170_v45  ;;  %v4671_v45 = vld [vmem:[%s14905_s11 + $0xd8] sm:$0xff] }
 0x2e7   :  { %5072 = vmatpush1.bf16.msra.mxu0 %v9369_v14  ;;  %8151 = vmatprep.subr.bf16.mxu1 %v10178_v15  ;;  %v9373_v14 = vcombine.low %v4655_v44, %v4659_v9  ;;  %v10218_v15 = vld [vmem:[%s14907_s13 + $0x348] ss:$28 sps:$4 sm:$0xff]   ;;  %v9390_v59 = vcombine.high %v4671_v45, %v4675_v34  ;;  %v9389_v22 = vcombine.low %v4671_v45, %v4675_v34  ;;  %v10191_v45 = vld [vmem:[%s14907_s13 + $0x238] ss:$28 sps:$4 sm:$0xff]   ;;  %v10197_v34 = vld [vmem:[%s14907_s13 + $0x270] ss:$28 sps:$4 sm:$0xff]  }
 0x2e8   :  { %5073 = vmatprep.subr.bf16.mxu0 %v9378_v33  ;;  %v9382_v33 = vcombine.high %v4663_v19, %v4667_v25 }
 0x2ea   :  { %8152 = vmatpush1.bf16.msra.mxu1 %v10176_v31  ;;  %v4679_v31 = vld [vmem:[%s14905_s11 + $0x118] sm:$0xff] }
 0x2eb   :  { %5074 = vmatpush1.bf16.msra.mxu0 %v9377_v38  ;;  %8153 = vmatprep.subr.bf16.mxu1 %v10184_v32  ;;  %v4683_v38 = vld [vmem:[%s14905_s11 + $0x138] sm:$0xff] }
 0x2ec   :  { %5075 = vmatprep.subr.bf16.mxu0 %v9386_v60  ;;  %v4687_v32 = vld [vmem:[%s14905_s11 + $0x158] sm:$0xff] }
 0x2ed   :  { %v4691_v60 = vld [vmem:[%s14905_s11 + $0x178] sm:$0xff] }
 0x2ee   :  { %8154 = vmatpush1.bf16.msra.mxu1 %v10182_v50  ;;  %v9398_v50 = vcombine.high %v4679_v31, %v4683_v38 }
 0x2ef   :  { %5076 = vmatpush1.bf16.msra.mxu0 %v9385_v48  ;;  %8155 = vmatprep.subr.bf16.mxu1 %v10190_v63  ;;  %v9397_v48 = vcombine.low %v4679_v31, %v4683_v38  ;;  %v9406_v63 = vcombine.high %v4687_v32, %v4691_v60  ;;  %v10211_v31 = vld [vmem:[%s14907_s13 + $0x2e4] ss:$28 sps:$4 sm:$0xff]  }
 0x2f0   :  { %5077 = vmatprep.subr.bf16.mxu0 %v9394_v10  ;;  %v9405_v10 = vcombine.low %v4687_v32, %v4691_v60  ;;  %v10209_v38 = vld [vmem:[%s14907_s13 + $0x2e0] ss:$28 sps:$4 sm:$0xff]   ;;  %v10223_v32 = vld [vmem:[%s14907_s13 + $0x354] ss:$28 sps:$4 sm:$0xff]  }
 0x2f1   :  { %v10221_v60 = vld [vmem:[%s14907_s13 + $0x350] ss:$28 sps:$4 sm:$0xff]  }
 0x2f2   :  { %8156 = vmatpush1.bf16.msra.mxu1 %v10188_v40  ;;  %v4703_v40 = vld [vmem:[%s14905_s11 + $0x1d8] sm:$0xff] }
 0x2f3   :  { %5078 = vmatpush1.bf16.msra.mxu0 %v9393_v3  ;;  %8157 = vmatprep.subr.bf16.mxu1 %v10196_v8  ;;  %v4707_v3 = vld [vmem:[%s14905_s11 + $0x1f8] sm:$0xff] }
 0x2f4   :  { %5079 = vmatprep.subr.bf16.mxu0 %v9402_v17  ;;  %v9422_v17 = vcombine.high %v4703_v40, %v4707_v3 }
 0x2f5   :  { %v3612_v42 = vpop.f32.mrb[20].mxu0 }
 0x2f6   :  { %v13391_v43 = vadd.f32 %v3612_v42, %v12977_v7  ;;  %v3614_v53 = vpop.f32.mrb[21].mxu0  ;;  %8158 = vmatpush1.bf16.msra.mxu1 %v10194_v46  ;;  %v10202_v7 = vld [vmem:[%s14907_s13 + $0x2a4] ss:$28 sps:$4 sm:$0xff]  }
 0x2f7   :  { %v13394_v51 = vadd.f32 %v3614_v53, %v12985_v5  ;;  %v3616_v37 = vpop.f32.mrb[22].mxu0  ;;  %5080 = vmatpush1.bf16.msra.mxu0 %v9401_v30  ;;  %v4647_v5 = vld [vmem:[%s14905_s11 + $0x18] sm:$0xff]  ;;  %8159 = vmatprep.subr.bf16.mxu1 %v10202_v7  ;;  %v10133_v30 = vld [vmem:[%s14907_s13 + $0xc] ss:$28 sps:$4 sm:$0xff]  }
 0x2f8   :  { %v3617_v23 = vpop.f32.mrb[23].mxu0  ;;  %5081 = vmatprep.subr.bf16.mxu0 %v9410_v1  ;;  %v9366_v58 = vcombine.high %v4647_v5, %v4651_v56  ;;  %v9365_v49 = vcombine.low %v4647_v5, %v4651_v56  ;;  %v9421_v1 = vcombine.low %v4703_v40, %v4707_v3  ;;  %v10131_v37 = vld [vmem:[%s14907_s13 + $0x8] ss:$28 sps:$4 sm:$0xff]  }
 0x2f9   :  { %v10145_v23 = vld [vmem:[%s14907_s13 + $0x7c] ss:$28 sps:$4 sm:$0xff]   ;;  %v10157_v7 = vld [vmem:[%s14907_s13 + $0xec] ss:$28 sps:$4 sm:$0xff]   ;;  %v10163_v56 = vld [vmem:[%s14907_s13 + $0x124] ss:$28 sps:$4 sm:$0xff]  }
 0x2fa   :  { %8160 = vmatpush1.bf16.msra.mxu1 %v10200_v27  ;;  %v10149_v27 = vld [vmem:[%s14907_s13 + $0xb0] ss:$28 sps:$4 sm:$0xff]   ;;  %v10155_v5 = vld [vmem:[%s14907_s13 + $0xe8] ss:$28 sps:$4 sm:$0xff]  }
 0x2fb   :  { %5082 = vmatpush1.bf16.msra.mxu0 %v9409_v18  ;;  %8161 = vmatprep.subr.bf16.mxu1 %v10208_v2  ;;  %v10226_v18 = vld [vmem:[%s14907_s13 + $0x384] ss:$28 sps:$4 sm:$0xff]  }
 0x2fc   :  { %5083 = vmatprep.subr.bf16.mxu0 %v9418_v57  ;;  %v10143_v57 = vld [vmem:[%s14907_s13 + $0x78] ss:$28 sps:$4 sm:$0xff]  }
 0x2fe   :  { %8162 = vmatpush1.bf16.msra.mxu1 %v10206_v29 }
 0x2ff   :  { %5084 = vmatpush1.bf16.msra.mxu0 %v9417_v4  ;;  %8163 = vmatprep.subr.bf16.mxu1 %v10214_v20  ;;  %v10161_v4 = vld [vmem:[%s14907_s13 + $0x120] ss:$28 sps:$4 sm:$0xff]   ;;  %v10175_v20 = vld [vmem:[%s14907_s13 + $0x194] ss:$28 sps:$4 sm:$0xff]  }
 0x300   :  { %5151 = vmatprep.subr.bf16.mxu0 %v9366_v58  ;;  %v10169_v58 = vld [vmem:[%s14907_s13 + $0x15c] ss:$28 sps:$4 sm:$0xff]  }
 0x302   :  { %5102 = vmatmul.mubr.bf16.vlgmr.msra.gmra.mrb[36].mxu0 %v13145_v26  ;;  %8164 = vmatpush1.bf16.msra.mxu1 %v10212_v39  ;;  %v10187_v39 = vld [vmem:[%s14907_s13 + $0x204] ss:$28 sps:$4 sm:$0xff]  }
 0x303   :  { %5152 = vmatpush1.bf16.msra.mxu0 %v9365_v49  ;;  %5183 = vmatprep.mubr.bf16.mxu0 %v10803_v0  ;;  %v9381_v0 = vcombine.low %v4663_v19, %v4667_v25  ;;  %v10179_v25 = vld [vmem:[%s14907_s13 + $0x1c8] ss:$28 sps:$4 sm:$0xff]  }
 0x304   :  { %5153 = vmatprep.subr.bf16.mxu0 %v9374_v21  ;;  %8165 = vmatprep.subr.bf16.mxu1 %v10220_v13  ;;  %v10167_v21 = vld [vmem:[%s14907_s13 + $0x158] ss:$28 sps:$4 sm:$0xff]  }
 0x305   :  { %v10199_v13 = vld [vmem:[%s14907_s13 + $0x274] ss:$28 sps:$4 sm:$0xff]  }
 0x306   :  { %8166 = vmatpush1.bf16.msra.mxu1 %v10218_v15  ;;  %v10205_v15 = vld [vmem:[%s14907_s13 + $0x2ac] ss:$28 sps:$4 sm:$0xff]  }
 0x307   :  { %5154 = vmatpush1.bf16.msra.mxu0 %v9373_v14  ;;  %8176 = vmatprep.subr.bf16.mxu1 %v10226_v18  ;;  %v10185_v14 = vld [vmem:[%s14907_s13 + $0x200] ss:$28 sps:$4 sm:$0xff]  }
 0x308   :  { %5155 = vmatprep.subr.bf16.mxu0 %v9382_v33  ;;  %v10193_v33 = vld [vmem:[%s14907_s13 + $0x23c] ss:$28 sps:$4 sm:$0xff]  }
 0x30b   :  { %5156 = vmatpush1.bf16.msra.mxu0 %v9381_v0  ;;  %v10203_v0 = vld [vmem:[%s14907_s13 + $0x2a8] ss:$28 sps:$4 sm:$0xff]  }
 0x30c   :  { %5157 = vmatprep.subr.bf16.mxu0 %v9390_v59  ;;  %v10217_v59 = vld [vmem:[%s14907_s13 + $0x31c] ss:$28 sps:$4 sm:$0xff]  }
 0x30f   :  { %5158 = vmatpush1.bf16.msra.mxu0 %v9389_v22  ;;  %v10215_v22 = vld [vmem:[%s14907_s13 + $0x318] ss:$28 sps:$4 sm:$0xff]  }
 0x310   :  { %5159 = vmatprep.subr.bf16.mxu0 %v9398_v50 }
 0x313   :  { %5160 = vmatpush1.bf16.msra.mxu0 %v9397_v48  ;;  %v10229_v48 = vld [vmem:[%s14907_s13 + $0x38c] ss:$28 sps:$4 sm:$0xff]  }
 0x314   :  { %5161 = vmatprep.subr.bf16.mxu0 %v9406_v63 }
 0x317   :  { %5162 = vmatpush1.bf16.msra.mxu0 %v9405_v10 }
 0x318   :  { %5163 = vmatprep.subr.bf16.mxu0 %v9414_v47 }
 0x31b   :  { %5164 = vmatpush1.bf16.msra.mxu0 %v9413_v54 }
 0x31c   :  { %v4505_v35 = vpop.f32.mrb[16].mxu1  ;;  %5165 = vmatprep.subr.bf16.mxu0 %v9422_v17 }
 0x31d   :  { %v13474_v8 = vadd.f32 %v4505_v35, %v13101_v12  ;;  %v4507_v42 = vpop.f32.mrb[17].mxu1  ;;  %v10139_v12 = vld [vmem:[%s14907_s13 + $0x44] ss:$28 sps:$4 sm:$0xff]  }
 0x31e   :  { %v13477_v11 = vadd.f32 %v4507_v42, %v13113_v16  ;;  %v4509_v46 = vpop.f32.mrb[18].mxu1  ;;  %v10137_v16 = vld [vmem:[%s14907_s13 + $0x40] ss:$28 sps:$4 sm:$0xff]  }
 0x31f   :  { %5166 = vmatpush1.bf16.msra.mxu0 %v9421_v1  ;;  %v4510_v53 = vpop.f32.mrb[19].mxu1 }
 0x320   :  { %8299 = vmatprep.subr.bf16.mxu0 %v10133_v30 }
 0x322   :  { %5184 = vmatmul.mubr.bf16.vlgmr.msra.gmra.mrb[40].mxu0 %v13145_v26  ;;  %v10151_v26 = vld [vmem:[%s14907_s13 + $0xb4] ss:$28 sps:$4 sm:$0xff]  }
 0x323   :  { %8300 = vmatpush1.bf16.msra.mxu0 %v10131_v37 }
 0x324   :  { %8301 = vmatprep.subr.bf16.mxu0 %v10139_v12 }
 0x327   :  { %8302 = vmatpush1.bf16.msra.mxu0 %v10137_v16 }
 0x328   :  { %8303 = vmatprep.subr.bf16.mxu0 %v10145_v23 }
 0x32b   :  { %8304 = vmatpush1.bf16.msra.mxu0 %v10143_v57 }
 0x32c   :  { %8305 = vmatprep.subr.bf16.mxu0 %v10151_v26  ;;  %v10224_v26 = vld [vmem:[%s14907_s13 + $0x380] ss:$28 sps:$4 sm:$0xff]  }
 0x32f   :  { %8306 = vmatpush1.bf16.msra.mxu0 %v10149_v27 }
 0x330   :  { %8307 = vmatprep.subr.bf16.mxu0 %v10157_v7 }
 0x333   :  { %8308 = vmatpush1.bf16.msra.mxu0 %v10155_v5  ;;  %v10232_v5 = vld [vmem:[%s14907_s13 + $0x3bc] ss:$28 sps:$4 sm:$0xff]  }
 0x334   :  { %8309 = vmatprep.subr.bf16.mxu0 %v10163_v56  ;;  %v10235_v56 = vld [vmem:[%s14907_s13 + $0x3c4] ss:$28 sps:$4 sm:$0xff]  }
 0x335   :  { %v3694_v2 = vpop.f32.mrb[24].mxu0 }
 0x336   :  { %v13520_v44 = vadd.f32 %v3694_v2, %v13191_v62  ;;  %v3696_v9 = vpop.f32.mrb[25].mxu0  ;;  %v10173_v62 = vld [vmem:[%s14907_s13 + $0x190] ss:$28 sps:$4 sm:$0xff]  }
 0x337   :  { %v13523_v29 = vadd.f32 %v3696_v9, %v13199_v52  ;;  %v3698_v49 = vpop.f32.mrb[26].mxu0  ;;  %8310 = vmatpush1.bf16.msra.mxu0 %v10161_v4  ;;  %v10181_v52 = vld [vmem:[%s14907_s13 + $0x1cc] ss:$28 sps:$4 sm:$0xff]   ;;  %v10230_v4 = vld [vmem:[%s14907_s13 + $0x3b8] ss:$28 sps:$4 sm:$0xff]  }
 0x338   :  { %v3699_v19 = vpop.f32.mrb[27].mxu0  ;;  %8311 = vmatprep.subr.bf16.mxu0 %v10169_v58  ;;  %v10233_v58 = vld [vmem:[%s14907_s13 + $0x3c0] ss:$28 sps:$4 sm:$0xff]   ;;  %v10238_v2 = vld [vmem:[%s14907_s13 + $0x3f4] ss:$28 sps:$4 sm:$0xff]  }
 0x339   :  { %v10241_v9 = vld [vmem:[%s14907_s13 + $0x3fc] ss:$28 sps:$4 sm:$0xff]   ;;  %v10236_v49 = vld [vmem:[%s14907_s13 + $0x3f0] ss:$28 sps:$4 sm:$0xff]  }
 0x33a   :  { %v10244_v19 = vld [vmem:[%s14907_s13 + $0x42c] ss:$28 sps:$4 sm:$0xff]  }
 0x33b   :  { %8312 = vmatpush1.bf16.msra.mxu0 %v10167_v21  ;;  %v10239_v21 = vld [vmem:[%s14907_s13 + $0x3f8] ss:$28 sps:$4 sm:$0xff]  }
 0x33c   :  { %8313 = vmatprep.subr.bf16.mxu0 %v10175_v20  ;;  %v10247_v20 = vld [vmem:[%s14907_s13 + $0x434] ss:$28 sps:$4 sm:$0xff]  }
 0x33f   :  { %8314 = vmatpush1.bf16.msra.mxu0 %v10173_v62  ;;  %v10242_v62 = vld [vmem:[%s14907_s13 + $0x428] ss:$28 sps:$4 sm:$0xff]  }
 0x340   :  { %8315 = vmatprep.subr.bf16.mxu0 %v10181_v52  ;;  %v10245_v52 = vld [vmem:[%s14907_s13 + $0x430] ss:$28 sps:$4 sm:$0xff]  }
 0x343   :  { %8316 = vmatpush1.bf16.msra.mxu0 %v10179_v25  ;;  %v10250_v25 = vld [vmem:[%s14907_s13 + $0x464] ss:$28 sps:$4 sm:$0xff]  }
 0x344   :  { %8317 = vmatprep.subr.bf16.mxu0 %v10187_v39  ;;  %v10253_v39 = vld [vmem:[%s14907_s13 + $0x46c] ss:$28 sps:$4 sm:$0xff]  }
 0x347   :  { %8318 = vmatpush1.bf16.msra.mxu0 %v10185_v14  ;;  %v10248_v14 = vld [vmem:[%s14907_s13 + $0x460] ss:$28 sps:$4 sm:$0xff]  }
 0x348   :  { %8319 = vmatprep.subr.bf16.mxu0 %v10193_v33  ;;  %v10251_v33 = vld [vmem:[%s14907_s13 + $0x468] ss:$28 sps:$4 sm:$0xff]  }
 0x34b   :  { %8320 = vmatpush1.bf16.msra.mxu0 %v10191_v45  ;;  %v10256_v45 = vld [vmem:[%s14907_s13 + $0x49c] ss:$28 sps:$4 sm:$0xff]  }
 0x34c   :  { %8321 = vmatprep.subr.bf16.mxu0 %v10199_v13  ;;  %v10259_v13 = vld [vmem:[%s14907_s13 + $0x4a4] ss:$28 sps:$4 sm:$0xff]  }
 0x34f   :  { %8322 = vmatpush1.bf16.msra.mxu0 %v10197_v34  ;;  %v10254_v34 = vld [vmem:[%s14907_s13 + $0x498] ss:$28 sps:$4 sm:$0xff]  }
 0x350   :  { %8323 = vmatprep.subr.bf16.mxu0 %v10205_v15  ;;  %v10257_v15 = vld [vmem:[%s14907_s13 + $0x4a0] ss:$28 sps:$4 sm:$0xff]  }
 0x353   :  { %8324 = vmatpush1.bf16.msra.mxu0 %v10203_v0  ;;  %v10262_v0 = vld [vmem:[%s14907_s13 + $0x4d4] ss:$28 sps:$4 sm:$0xff]  }
 0x354   :  { %8325 = vmatprep.subr.bf16.mxu0 %v10211_v31  ;;  %v10265_v31 = vld [vmem:[%s14907_s13 + $0x4dc] ss:$28 sps:$4 sm:$0xff]  }
 0x357   :  { %8326 = vmatpush1.bf16.msra.mxu0 %v10209_v38  ;;  %v10260_v38 = vld [vmem:[%s14907_s13 + $0x4d0] ss:$28 sps:$4 sm:$0xff]  }
 0x358   :  { %8327 = vmatprep.subr.bf16.mxu0 %v10217_v59  ;;  %v10263_v59 = vld [vmem:[%s14907_s13 + $0x4d8] ss:$28 sps:$4 sm:$0xff]  }
 0x35b   :  { %8328 = vmatpush1.bf16.msra.mxu0 %v10215_v22 }
 0x35c   :  { %v4587_v50 = vpop.f32.mrb[20].mxu1  ;;  %8329 = vmatprep.subr.bf16.mxu0 %v10223_v32  ;;  %v10268_v32 = vld [vmem:[%s14907_s13 + $0x50c] ss:$28 sps:$4 sm:$0xff]  }
 0x35d   :  { %v13586_v41 = vadd.f32 %v4587_v50, %v13305_v24  ;;  %v4589_v6 = vpop.f32.mrb[21].mxu1  ;;  %v13600_v24 = vld [vmem:[%s14908_s12] sm:$0xff] }
 0x35e   :  { %v13589_v63 = vadd.f32 %v4589_v6, %v13314_v28  ;;  %v4591_v10 = vpop.f32.mrb[22].mxu1  ;;  %v5205_v28 = vrot.slane %v13600_v24, %v11109_v36  ;;  %v5209_v42 = vrot.slane %v13600_v24, %v11057_v61 }
 0x35f   :  { %v4592_v40 = vpop.f32.mrb[23].mxu1  ;;  %8330 = vmatpush1.bf16.msra.mxu0 %v10221_v60  ;;  %v10271_v60 = vld [vmem:[%s14907_s13 + $0x514] ss:$28 sps:$4 sm:$0xff]  }
 0x360   :  { %8340 = vmatprep.subr.bf16.mxu0 %v10229_v48 }
 0x375   :  { %v4546_v3 = vpop.f32.mrb[28].mxu0 }
 0x376   :  { %v13592_v47 = vadd.f32 %v4546_v3, %v13391_v43  ;;  %v4548_v54 = vpop.f32.mrb[29].mxu0  ;;  %v10266_v3 = vld [vmem:[%s14907_s13 + $0x508] ss:$28 sps:$4 sm:$0xff]  }
 0x377   :  { %v13595_v17 = vadd.f32 %v4548_v54, %v13394_v51  ;;  %v4550_v30 = vpop.f32.mrb[30].mxu0  ;;  %v10269_v54 = vld [vmem:[%s14907_s13 + $0x510] ss:$28 sps:$4 sm:$0xff]  }
 0x378   :  { %v4551_v1 = vpop.f32.mrb[31].mxu0  ;;  %v10272_v30 = vld [vmem:[%s14907_s13 + $0x540] ss:$28 sps:$4 sm:$0xff]  }
 0x379   :  { %v10275_v1 = vld [vmem:[%s14907_s13 + $0x548] ss:$28 sps:$4 sm:$0xff]  }
 0x37c   :  { %v5062_v35 = vpop.f32.mrb[24].mxu1 }
 0x37d   :  { %v5192_v43 = vadd.f32 %v5062_v35, %v13474_v8  ;;  %v5064_v46 = vpop.f32.mrb[25].mxu1  ;;  %v10227_v8 = vld [vmem:[%s14907_s13 + $0x388] ss:$28 sps:$4 sm:$0xff]  }
 0x37e   :  { %v5193_v51 = vadd.f32 %v5064_v46, %v13477_v11  ;;  %v5066_v53 = vpop.f32.mrb[26].mxu1  ;;  %v10283_v35 = vld [vmem:[%s14907_s13 + $0x584] ss:$28 sps:$4 sm:$0xff]   ;;  %v10286_v46 = vld [vmem:[%s14907_s13 + $0x5b4] ss:$28 sps:$4 sm:$0xff]  }
 0x37f   :  { %v5242_v37 = vadd.f32 %v5205_v28, %v5192_v43  ;;  %v5067_v18 = vpop.f32.mrb[27].mxu1  ;;  %v10280_v28 = vld [vmem:[%s14907_s13 + $0x57c] ss:$28 sps:$4 sm:$0xff]   ;;  %v10284_v53 = vld [vmem:[%s14907_s13 + $0x5b0] ss:$28 sps:$4 sm:$0xff]  }
 0x380   :  { %v5243_v12 = vadd.f32 %v5209_v42, %v5193_v51  ;;  %v10278_v42 = vld [vmem:[%s14907_s13 + $0x578] ss:$28 sps:$4 sm:$0xff]   ;;  %v10281_v43 = vld [vmem:[%s14907_s13 + $0x580] ss:$28 sps:$4 sm:$0xff]   ;;  %v10292_v18 = vld [vmem:[%s14907_s13 + $0x5ec] ss:$28 sps:$4 sm:$0xff]  }
 0x381   :  { %vm5250_vm6 = vcmp.ge.f32.partialorder %v5242_v37, 0.0  ;;  %v5258_v16 = vmul.f32 0.01, %v5242_v37  ;;  %v10289_v51 = vld [vmem:[%s14907_s13 + $0x5bc] ss:$28 sps:$4 sm:$0xff]  }
 0x382   :  { %vm5251_vm7 = vcmp.ge.f32.partialorder %v5243_v12, 0.0  ;;  %v5259_v23 = vmul.f32 0.01, %v5243_v12 }
 0x383   :  { %v5266_v57 = vsel %vm5250_vm6, %v5242_v37, %v5258_v16  ;;  %v10287_v37 = vld [vmem:[%s14907_s13 + $0x5b8] ss:$28 sps:$4 sm:$0xff]   ;;  %v10290_v16 = vld [vmem:[%s14907_s13 + $0x5e8] ss:$28 sps:$4 sm:$0xff]  }
 0x384   :  { %v5267_v27 = vsel %vm5251_vm7, %v5243_v12, %v5259_v23  ;;  %v13616_v11 = vpack.c.bf16 %v5266_v57, %v5266_v57  ;;  %v10295_v12 = vld [vmem:[%s14907_s13 + $0x5f4] ss:$28 sps:$4 sm:$0xff]   ;;  %v10298_v57 = vld [vmem:[%s14907_s13 + $0x624] ss:$28 sps:$4 sm:$0xff]  }
 0x385   :  { %v13614_v7 = vpack.c.bf16 %v5267_v27, %v5267_v27  ;;  %v10293_v23 = vld [vmem:[%s14907_s13 + $0x5f0] ss:$28 sps:$4 sm:$0xff]   ;;  %v10296_v27 = vld [vmem:[%s14907_s13 + $0x620] ss:$28 sps:$4 sm:$0xff]  }
 0x387   :  { %8167 = vmatprep.mubr.bf16.mxu1 %v13614_v7  ;;  %8331 = vmatprep.mubr.bf16.mxu0 %v13614_v7 }
 0x388   :  { %8168 = vmatmul.mubr.bf16.vlgmr.msra.gmra.mrb[32].mxu1 %v13616_v11  ;;  %8332 = vmatmul.mubr.bf16.vlgmr.msra.gmra.mrb[44].mxu0 %v13616_v11 }
 0x389   :  { %8177 = vmatpush1.bf16.msra.mxu1 %v10224_v26  ;;  %8341 = vmatpush1.bf16.msra.mxu0 %v10227_v8  ;;  %v10301_v26 = vld [vmem:[%s14907_s13 + $0x62c] ss:$28 sps:$4 sm:$0xff]  }
 0x38a   :  { %8178 = vmatprep.subr.bf16.mxu1 %v10232_v5  ;;  %8342 = vmatprep.subr.bf16.mxu0 %v10235_v56  ;;  %v10299_v5 = vld [vmem:[%s14907_s13 + $0x628] ss:$28 sps:$4 sm:$0xff]  }
 0x38d   :  { %8179 = vmatpush1.bf16.msra.mxu1 %v10230_v4  ;;  %8343 = vmatpush1.bf16.msra.mxu0 %v10233_v58  ;;  %v10304_v58 = vld [vmem:[%s14907_s13 + $0x65c] ss:$28 sps:$4 sm:$0xff]  }
 0x38e   :  { %8180 = vmatprep.subr.bf16.mxu1 %v10238_v2  ;;  %8344 = vmatprep.subr.bf16.mxu0 %v10241_v9  ;;  %v10307_v2 = vld [vmem:[%s14907_s13 + $0x664] ss:$28 sps:$4 sm:$0xff]  }
 0x391   :  { %8181 = vmatpush1.bf16.msra.mxu1 %v10236_v49  ;;  %8345 = vmatpush1.bf16.msra.mxu0 %v10239_v21 }
 0x392   :  { %8182 = vmatprep.subr.bf16.mxu1 %v10244_v19  ;;  %8346 = vmatprep.subr.bf16.mxu0 %v10247_v20  ;;  %v10305_v19 = vld [vmem:[%s14907_s13 + $0x660] ss:$28 sps:$4 sm:$0xff]   ;;  %v10310_v20 = vld [vmem:[%s14907_s13 + $0x694] ss:$28 sps:$4 sm:$0xff]  }
 0x395   :  { %8183 = vmatpush1.bf16.msra.mxu1 %v10242_v62  ;;  %8347 = vmatpush1.bf16.msra.mxu0 %v10245_v52  ;;  %v10308_v62 = vld [vmem:[%s14907_s13 + $0x690] ss:$28 sps:$4 sm:$0xff]   ;;  %v10311_v52 = vld [vmem:[%s14907_s13 + $0x698] ss:$28 sps:$4 sm:$0xff]  }
 0x396   :  { %8184 = vmatprep.subr.bf16.mxu1 %v10250_v25  ;;  %8348 = vmatprep.subr.bf16.mxu0 %v10253_v39  ;;  %v10316_v25 = vld [vmem:[%s14907_s13 + $0x6cc] ss:$28 sps:$4 sm:$0xff]   ;;  %v10319_v39 = vld [vmem:[%s14907_s13 + $0x6d4] ss:$28 sps:$4 sm:$0xff]  }
 0x399   :  { %8185 = vmatpush1.bf16.msra.mxu1 %v10248_v14  ;;  %8349 = vmatpush1.bf16.msra.mxu0 %v10251_v33  ;;  %v10314_v14 = vld [vmem:[%s14907_s13 + $0x6c8] ss:$28 sps:$4 sm:$0xff]   ;;  %v10317_v33 = vld [vmem:[%s14907_s13 + $0x6d0] ss:$28 sps:$4 sm:$0xff]  }
 0x39a   :  { %8186 = vmatprep.subr.bf16.mxu1 %v10256_v45  ;;  %8350 = vmatprep.subr.bf16.mxu0 %v10259_v13  ;;  %v10322_v45 = vld [vmem:[%s14907_s13 + $0x704] ss:$28 sps:$4 sm:$0xff]   ;;  %v10325_v13 = vld [vmem:[%s14907_s13 + $0x70c] ss:$28 sps:$4 sm:$0xff]  }
 0x39c   :  { %v5144_v22 = vpop.f32.mrb[28].mxu1 }
 0x39d   :  { %v13701_v50 = vadd.f32 %v5144_v22, %v13586_v41  ;;  %v5146_v48 = vpop.f32.mrb[29].mxu1  ;;  %8187 = vmatpush1.bf16.msra.mxu1 %v10254_v34  ;;  %8351 = vmatpush1.bf16.msra.mxu0 %v10257_v15  ;;  %v10274_v41 = vld [vmem:[%s14907_s13 + $0x544] ss:$28 sps:$4 sm:$0xff]   ;;  %v5224_v34 = vsub.s32 5, %v11040_v55  ;;  %v5212_v15 = vsub.s32 2, %v11040_v55 }
 0x39e   :  { %v13704_v6 = vadd.f32 %v5146_v48, %v13589_v63  ;;  %v5148_v10 = vpop.f32.mrb[30].mxu1  ;;  %8188 = vmatprep.subr.bf16.mxu1 %v10262_v0  ;;  %8352 = vmatprep.subr.bf16.mxu0 %v10265_v31  ;;  %v10277_v63 = vld [vmem:[%s14907_s13 + $0x54c] ss:$28 sps:$4 sm:$0xff]   ;;  %v5216_v0 = vsub.s32 3, %v11040_v55 }
 0x39f   :  { %v5149_v40 = vpop.f32.mrb[31].mxu1  ;;  %v5225_v31 = vrot.slane %v13600_v24, %v5224_v34 }
 0x3a0   :  { %v5217_v22 = vrot.slane %v13600_v24, %v5216_v0 }
 0x3a1   :  { %8189 = vmatpush1.bf16.msra.mxu1 %v10260_v38  ;;  %8353 = vmatpush1.bf16.msra.mxu0 %v10263_v59  ;;  %v5213_v38 = vrot.slane %v13600_v24, %v5212_v15 }
 0x3a2   :  { %8190 = vmatprep.subr.bf16.mxu1 %v10268_v32  ;;  %8354 = vmatprep.subr.bf16.mxu0 %v10271_v60  ;;  %v5247_v32 = vadd.f32 %v5225_v31, %v13704_v6  ;;  %v10367_v31 = vld [vmem:[%s14907_s13 + $0x894] ss:$28 sps:$4 sm:$0xff]  }
 0x3a4   :  { %vm5255_vm9 = vcmp.ge.f32.partialorder %v5247_v32, 0.0 }
 0x3a5   :  { %8191 = vmatpush1.bf16.msra.mxu1 %v10266_v3  ;;  %8355 = vmatpush1.bf16.msra.mxu0 %v10269_v54 }
 0x3a6   :  { %8192 = vmatprep.subr.bf16.mxu1 %v10274_v41  ;;  %8356 = vmatprep.subr.bf16.mxu0 %v10277_v63  ;;  %v5263_v63 = vmul.f32 0.01, %v5247_v32 }
 0x3a9   :  { %8193 = vmatpush1.bf16.msra.mxu1 %v10272_v30  ;;  %8357 = vmatpush1.bf16.msra.mxu0 %v10275_v1 }
 0x3aa   :  { %8194 = vmatprep.subr.bf16.mxu1 %v10280_v28  ;;  %8358 = vmatprep.subr.bf16.mxu0 %v10283_v35 }
 0x3ad   :  { %8195 = vmatpush1.bf16.msra.mxu1 %v10278_v42  ;;  %8359 = vmatpush1.bf16.msra.mxu0 %v10281_v43  ;;  %v5271_v42 = vsel %vm5255_vm9, %v5247_v32, %v5263_v63  ;;  %v10373_v32 = vld [vmem:[%s14907_s13 + $0x8cc] ss:$28 sps:$4 sm:$0xff]   ;;  %v10385_v63 = vld [vmem:[%s14907_s13 + $0x93c] ss:$28 sps:$4 sm:$0xff]  }
 0x3ae   :  { %8196 = vmatprep.subr.bf16.mxu1 %v10286_v46  ;;  %8360 = vmatprep.subr.bf16.mxu0 %v10289_v51  ;;  %v10328_v46 = vld [vmem:[%s14907_s13 + $0x73c] ss:$28 sps:$4 sm:$0xff]   ;;  %v10331_v51 = vld [vmem:[%s14907_s13 + $0x744] ss:$28 sps:$4 sm:$0xff]  }
 0x3b1   :  { %8197 = vmatpush1.bf16.msra.mxu1 %v10284_v53  ;;  %8361 = vmatpush1.bf16.msra.mxu0 %v10287_v37  ;;  %v13853_v53 = vpack.c.bf16 %v5271_v42, %v5271_v42  ;;  %v10326_v37 = vld [vmem:[%s14907_s13 + $0x738] ss:$28 sps:$4 sm:$0xff]   ;;  %v10386_v42 = vld [vmem:[%s14907_s13 + $0x968] ss:$28 sps:$4 sm:$0xff]  }
 0x3b2   :  { %8198 = vmatprep.subr.bf16.mxu1 %v10292_v18  ;;  %8362 = vmatprep.subr.bf16.mxu0 %v10295_v12  ;;  %v10329_v18 = vld [vmem:[%s14907_s13 + $0x740] ss:$28 sps:$4 sm:$0xff]   ;;  %v10334_v12 = vld [vmem:[%s14907_s13 + $0x774] ss:$28 sps:$4 sm:$0xff]  }
 0x3b5   :  { %v4628_v8 = vpop.f32.mrb[32].mxu0  ;;  %8199 = vmatpush1.bf16.msra.mxu1 %v10290_v16  ;;  %8363 = vmatpush1.bf16.msra.mxu0 %v10293_v23  ;;  %v10337_v16 = vld [vmem:[%s14907_s13 + $0x77c] ss:$28 sps:$4 sm:$0xff]   ;;  %v10332_v23 = vld [vmem:[%s14907_s13 + $0x770] ss:$28 sps:$4 sm:$0xff]  }
 0x3b6   :  { %v13773_v56 = vadd.f32 %v4628_v8, %v13520_v44  ;;  %v4630_v4 = vpop.f32.mrb[33].mxu0  ;;  %8200 = vmatprep.subr.bf16.mxu1 %v10298_v57  ;;  %8364 = vmatprep.subr.bf16.mxu0 %v10301_v26  ;;  %v10302_v44 = vld [vmem:[%s14907_s13 + $0x658] ss:$28 sps:$4 sm:$0xff]   ;;  %v10340_v26 = vld [vmem:[%s14907_s13 + $0x7ac] ss:$28 sps:$4 sm:$0xff]  }
 0x3b7   :  { %v13782_v9 = vadd.f32 %v4630_v4, %v13523_v29  ;;  %v4632_v49 = vpop.f32.mrb[34].mxu0  ;;  %v10313_v29 = vld [vmem:[%s14907_s13 + $0x69c] ss:$28 sps:$4 sm:$0xff]   ;;  %v10343_v8 = vld [vmem:[%s14907_s13 + $0x7b4] ss:$28 sps:$4 sm:$0xff]  }
 0x3b8   :  { %v4633_v21 = vpop.f32.mrb[35].mxu0  ;;  %v10335_v57 = vld [vmem:[%s14907_s13 + $0x778] ss:$28 sps:$4 sm:$0xff]   ;;  %v10346_v4 = vld [vmem:[%s14907_s13 + $0x7e4] ss:$28 sps:$4 sm:$0xff]  }
 0x3b9   :  { %8201 = vmatpush1.bf16.msra.mxu1 %v10296_v27  ;;  %8365 = vmatpush1.bf16.msra.mxu0 %v10299_v5  ;;  %v10338_v27 = vld [vmem:[%s14907_s13 + $0x7a8] ss:$28 sps:$4 sm:$0xff]   ;;  %v10341_v5 = vld [vmem:[%s14907_s13 + $0x7b0] ss:$28 sps:$4 sm:$0xff]   ;;  %v10352_v21 = vld [vmem:[%s14907_s13 + $0x81c] ss:$28 sps:$4 sm:$0xff]  }
 0x3ba   :  { %8202 = vmatprep.subr.bf16.mxu1 %v10304_v58  ;;  %8366 = vmatprep.subr.bf16.mxu0 %v10307_v2  ;;  %v10349_v58 = vld [vmem:[%s14907_s13 + $0x7ec] ss:$28 sps:$4 sm:$0xff]   ;;  %v10344_v2 = vld [vmem:[%s14907_s13 + $0x7e0] ss:$28 sps:$4 sm:$0xff]  }
 0x3bb   :  { %v10347_v49 = vld [vmem:[%s14907_s13 + $0x7e8] ss:$28 sps:$4 sm:$0xff]  }
 0x3bd   :  { %8203 = vmatpush1.bf16.msra.mxu1 %v10302_v44  ;;  %8367 = vmatpush1.bf16.msra.mxu0 %v10305_v19  ;;  %v10355_v44 = vld [vmem:[%s14907_s13 + $0x824] ss:$28 sps:$4 sm:$0xff]   ;;  %v10350_v19 = vld [vmem:[%s14907_s13 + $0x818] ss:$28 sps:$4 sm:$0xff]  }
 0x3be   :  { %8204 = vmatprep.subr.bf16.mxu1 %v10310_v20  ;;  %8368 = vmatprep.subr.bf16.mxu0 %v10313_v29  ;;  %v10353_v20 = vld [vmem:[%s14907_s13 + $0x820] ss:$28 sps:$4 sm:$0xff]   ;;  %v10358_v29 = vld [vmem:[%s14907_s13 + $0x854] ss:$28 sps:$4 sm:$0xff]  }
 0x3c1   :  { %8205 = vmatpush1.bf16.msra.mxu1 %v10308_v62  ;;  %8369 = vmatpush1.bf16.msra.mxu0 %v10311_v52  ;;  %v10361_v62 = vld [vmem:[%s14907_s13 + $0x85c] ss:$28 sps:$4 sm:$0xff]  }
 0x3c2   :  { %8206 = vmatprep.subr.bf16.mxu1 %v10316_v25  ;;  %8370 = vmatprep.subr.bf16.mxu0 %v10319_v39 }
 0x3c5   :  { %8207 = vmatpush1.bf16.msra.mxu1 %v10314_v14  ;;  %8371 = vmatpush1.bf16.msra.mxu0 %v10317_v33  ;;  %v10356_v14 = vld [vmem:[%s14907_s13 + $0x850] ss:$28 sps:$4 sm:$0xff]   ;;  %v10359_v33 = vld [vmem:[%s14907_s13 + $0x858] ss:$28 sps:$4 sm:$0xff]  }
 0x3c6   :  { %8217 = vmatprep.subr.bf16.mxu1 %v10322_v45  ;;  %8381 = vmatprep.subr.bf16.mxu0 %v10325_v13 }
 0x3d5   :  { %v5103_v59 = vpop.f32.mrb[36].mxu0 }
 0x3d6   :  { %v5194_v60 = vadd.f32 %v5103_v59, %v13592_v47  ;;  %v5105_v48 = vpop.f32.mrb[37].mxu0  ;;  %v10320_v47 = vld [vmem:[%s14907_s13 + $0x700] ss:$28 sps:$4 sm:$0xff]   ;;  %v10362_v59 = vld [vmem:[%s14907_s13 + $0x888] ss:$28 sps:$4 sm:$0xff]  }
 0x3d7   :  { %v5195_v10 = vadd.f32 %v5105_v48, %v13595_v17  ;;  %v5107_v40 = vpop.f32.mrb[38].mxu0  ;;  %v10323_v17 = vld [vmem:[%s14907_s13 + $0x708] ss:$28 sps:$4 sm:$0xff]  }
 0x3d8   :  { %v5244_v3 = vadd.f32 %v5213_v38, %v5194_v60  ;;  %v5108_v54 = vpop.f32.mrb[39].mxu0  ;;  %v10368_v60 = vld [vmem:[%s14907_s13 + $0x8c0] ss:$28 sps:$4 sm:$0xff]   ;;  %v10371_v48 = vld [vmem:[%s14907_s13 + $0x8c8] ss:$28 sps:$4 sm:$0xff]  }
 0x3d9   :  { %v5245_v41 = vadd.f32 %v5217_v22, %v5195_v10  ;;  %v10370_v22 = vld [vmem:[%s14907_s13 + $0x8c4] ss:$28 sps:$4 sm:$0xff]   ;;  %v10376_v10 = vld [vmem:[%s14907_s13 + $0x8fc] ss:$28 sps:$4 sm:$0xff]  }
 0x3da   :  { %vm5252_vm13 = vcmp.ge.f32.partialorder %v5244_v3, 0.0  ;;  %v5260_v30 = vmul.f32 0.01, %v5244_v3  ;;  %v10379_v40 = vld [vmem:[%s14907_s13 + $0x904] ss:$28 sps:$4 sm:$0xff]  }
 0x3db   :  { %vm5253_vm12 = vcmp.ge.f32.partialorder %v5245_v41, 0.0  ;;  %v5261_v1 = vmul.f32 0.01, %v5245_v41  ;;  %v10377_v54 = vld [vmem:[%s14907_s13 + $0x900] ss:$28 sps:$4 sm:$0xff]  }
 0x3dc   :  { %v5268_v28 = vsel %vm5252_vm13, %v5244_v3, %v5260_v30  ;;  %v10374_v3 = vld [vmem:[%s14907_s13 + $0x8f8] ss:$28 sps:$4 sm:$0xff]   ;;  %v10380_v30 = vld [vmem:[%s14907_s13 + $0x930] ss:$28 sps:$4 sm:$0xff]  }
 0x3dd   :  { %v5269_v35 = vsel %vm5253_vm12, %v5245_v41, %v5261_v1  ;;  %v13843_v6 = vpack.c.bf16 %v5268_v28, %v5268_v28  ;;  %v10382_v41 = vld [vmem:[%s14907_s13 + $0x934] ss:$28 sps:$4 sm:$0xff]   ;;  %v10388_v28 = vld [vmem:[%s14907_s13 + $0x96c] ss:$28 sps:$4 sm:$0xff]  }
 0x3de   :  { %v13835_v43 = vpack.c.bf16 %v5269_v35, %v5269_v35  ;;  %v10383_v1 = vld [vmem:[%s14907_s13 + $0x938] ss:$28 sps:$4 sm:$0xff]  }
 0x3df   :  { %v10391_v35 = vld [vmem:[%s14907_s13 + $0x974] ss:$28 sps:$4 sm:$0xff]  }
 0x3e0   :  { %8208 = vmatprep.mubr.bf16.mxu1 %v13835_v43  ;;  %8372 = vmatprep.mubr.bf16.mxu0 %v13835_v43 }
 0x3e1   :  { %8209 = vmatmul.mubr.bf16.vlgmr.msra.gmra.mrb[32].mxu1 %v13843_v6  ;;  %8373 = vmatmul.mubr.bf16.vlgmr.msra.gmra.mrb[44].mxu0 %v13843_v6 }
 0x3e2   :  { %8218 = vmatpush1.bf16.msra.mxu1 %v10320_v47  ;;  %8382 = vmatpush1.bf16.msra.mxu0 %v10323_v17  ;;  %v10389_v47 = vld [vmem:[%s14907_s13 + $0x970] ss:$28 sps:$4 sm:$0xff]   ;;  %v10394_v17 = vld [vmem:[%s14907_s13 + $0x9a4] ss:$28 sps:$4 sm:$0xff]  }
 0x3e3   :  { %8249 = vmatprep.mubr.bf16.mxu1 %v13853_v53  ;;  %8413 = vmatprep.mubr.bf16.mxu0 %v13853_v53 }
 0x3e4   :  { %8219 = vmatprep.subr.bf16.mxu1 %v10328_v46  ;;  %8383 = vmatprep.subr.bf16.mxu0 %v10331_v51  ;;  %v10397_v46 = vld [vmem:[%s14907_s13 + $0x9ac] ss:$28 sps:$4 sm:$0xff]   ;;  %v5220_v51 = vsub.s32 4, %v11040_v55 }
 0x3e6   :  { %8220 = vmatpush1.bf16.msra.mxu1 %v10326_v37  ;;  %8384 = vmatpush1.bf16.msra.mxu0 %v10329_v18  ;;  %v5232_v37 = vsub.s32 7, %v11040_v55  ;;  %v10392_v18 = vld [vmem:[%s14907_s13 + $0x9a0] ss:$28 sps:$4 sm:$0xff]  }
 0x3e7   :  { %8221 = vmatprep.subr.bf16.mxu1 %v10334_v12  ;;  %8385 = vmatprep.subr.bf16.mxu0 %v10337_v16  ;;  %v10395_v12 = vld [vmem:[%s14907_s13 + $0x9a8] ss:$28 sps:$4 sm:$0xff]   ;;  %v10400_v16 = vld [vmem:[%s14907_s13 + $0x9dc] ss:$28 sps:$4 sm:$0xff]  }
 0x3ea   :  { %8222 = vmatpush1.bf16.msra.mxu1 %v10332_v23  ;;  %8386 = vmatpush1.bf16.msra.mxu0 %v10335_v57  ;;  %v10403_v23 = vld [vmem:[%s14907_s13 + $0x9e4] ss:$28 sps:$4 sm:$0xff]   ;;  %v5221_v57 = vrot.slane %v13600_v24, %v5220_v51 }
 0x3eb   :  { %8223 = vmatprep.subr.bf16.mxu1 %v10340_v26  ;;  %8387 = vmatprep.subr.bf16.mxu0 %v10343_v8  ;;  %v5233_v26 = vrot.slane %v13600_v24, %v5232_v37  ;;  %v10398_v8 = vld [vmem:[%s14907_s13 + $0x9d8] ss:$28 sps:$4 sm:$0xff]   ;;  %v10452_v37 = vld [vmem:[%s14907_s13 + $0xbd0] ss:$28 sps:$4 sm:$0xff]  }
 0x3ec   :  { %v10409_v24 = vld [vmem:[%s14907_s13 + $0xa1c] ss:$28 sps:$4 sm:$0xff]  }
 0x3ee   :  { %8224 = vmatpush1.bf16.msra.mxu1 %v10338_v27  ;;  %8388 = vmatpush1.bf16.msra.mxu0 %v10341_v5  ;;  %v10401_v27 = vld [vmem:[%s14907_s13 + $0x9e0] ss:$28 sps:$4 sm:$0xff]   ;;  %v10406_v5 = vld [vmem:[%s14907_s13 + $0xa14] ss:$28 sps:$4 sm:$0xff]  }
 0x3ef   :  { %8225 = vmatprep.subr.bf16.mxu1 %v10346_v4  ;;  %8389 = vmatprep.subr.bf16.mxu0 %v10349_v58  ;;  %v5246_v4 = vadd.f32 %v5221_v57, %v13701_v50  ;;  %v10415_v50 = vld [vmem:[%s14907_s13 + $0xa54] ss:$28 sps:$4 sm:$0xff]  }
 0x3f0   :  { %v10461_v57 = vld [vmem:[%s14907_s13 + $0xc10] ss:$28 sps:$4 sm:$0xff]  }
 0x3f1   :  { %vm5254_vm14 = vcmp.ge.f32.partialorder %v5246_v4, 0.0 }
 0x3f2   :  { %8226 = vmatpush1.bf16.msra.mxu1 %v10344_v2  ;;  %8390 = vmatpush1.bf16.msra.mxu0 %v10347_v49  ;;  %v10404_v2 = vld [vmem:[%s14907_s13 + $0xa10] ss:$28 sps:$4 sm:$0xff]   ;;  %v10407_v49 = vld [vmem:[%s14907_s13 + $0xa18] ss:$28 sps:$4 sm:$0xff]  }
 0x3f3   :  { %8227 = vmatprep.subr.bf16.mxu1 %v10352_v21  ;;  %8391 = vmatprep.subr.bf16.mxu0 %v10355_v44  ;;  %v10412_v21 = vld [vmem:[%s14907_s13 + $0xa4c] ss:$28 sps:$4 sm:$0xff]   ;;  %v5262_v44 = vmul.f32 0.01, %v5246_v4 }
 0x3f5   :  { %v5185_v52 = vpop.f32.mrb[40].mxu0 }
 0x3f6   :  { %v13920_v25 = vadd.f32 %v5185_v52, %v13773_v56  ;;  %8228 = vmatpush1.bf16.msra.mxu1 %v10350_v19  ;;  %8392 = vmatpush1.bf16.msra.mxu0 %v10353_v20  ;;  %v5187_v39 = vpop.f32.mrb[41].mxu0  ;;  %v10364_v56 = vld [vmem:[%s14907_s13 + $0x88c] ss:$28 sps:$4 sm:$0xff]  }
 0x3f7   :  { %v13929_v45 = vadd.f32 %v5187_v39, %v13782_v9  ;;  %v5189_v13 = vpop.f32.mrb[42].mxu0  ;;  %8229 = vmatprep.subr.bf16.mxu1 %v10358_v29  ;;  %8393 = vmatprep.subr.bf16.mxu0 %v10361_v62  ;;  %v10365_v9 = vld [vmem:[%s14907_s13 + $0x890] ss:$28 sps:$4 sm:$0xff]   ;;  %v10410_v20 = vld [vmem:[%s14907_s13 + $0xa48] ss:$28 sps:$4 sm:$0xff]   ;;  %v5270_v39 = vsel %vm5254_vm14, %v5246_v4, %v5262_v44 }
 0x3f8   :  { %v5190_v38 = vpop.f32.mrb[43].mxu0  ;;  %v10413_v29 = vld [vmem:[%s14907_s13 + $0xa50] ss:$28 sps:$4 sm:$0xff]   ;;  %v10418_v62 = vld [vmem:[%s14907_s13 + $0xa84] ss:$28 sps:$4 sm:$0xff]  }
 0x3f9   :  { %v5249_v58 = vadd.f32 %v5233_v26, %v13929_v45  ;;  %v10421_v52 = vld [vmem:[%s14907_s13 + $0xa8c] ss:$28 sps:$4 sm:$0xff]   ;;  %v14056_v45 = vpack.c.bf16 %v5270_v39, %v5270_v39  ;;  %v10427_v38 = vld [vmem:[%s14907_s13 + $0xac4] ss:$28 sps:$4 sm:$0xff]   ;;  %v10479_v44 = vld [vmem:[%s14907_s13 + $0xcb8] ss:$28 sps:$4 sm:$0xff]  }
 0x3fa   :  { %8230 = vmatpush1.bf16.msra.mxu1 %v10356_v14  ;;  %8394 = vmatpush1.bf16.msra.mxu0 %v10359_v33  ;;  %v10416_v33 = vld [vmem:[%s14907_s13 + $0xa80] ss:$28 sps:$4 sm:$0xff]   ;;  %v10419_v13 = vld [vmem:[%s14907_s13 + $0xa88] ss:$28 sps:$4 sm:$0xff]   ;;  %v5228_v39 = vsub.s32 6, %v11040_v55 }
 0x3fb   :  { %8231 = vmatprep.subr.bf16.mxu1 %v10364_v56  ;;  %8395 = vmatprep.subr.bf16.mxu0 %v10367_v31  ;;  %v5265_v19 = vmul.f32 0.01, %v5249_v58  ;;  %vm5257_vm0 = vcmp.ge.f32.partialorder %v5249_v58, 0.0  ;;  %v10424_v31 = vld [vmem:[%s14907_s13 + $0xabc] ss:$28 sps:$4 sm:$0xff]  }
 0x3fc   :  { %v10466_v26 = vld [vmem:[%s14907_s13 + $0xc44] ss:$28 sps:$4 sm:$0xff]  }
 0x3fd   :  { %v5273_v14 = vsel %vm5257_vm0, %v5249_v58, %v5265_v19  ;;  %v10475_v4 = vld [vmem:[%s14907_s13 + $0xc84] ss:$28 sps:$4 sm:$0xff]   ;;  %v10470_v58 = vld [vmem:[%s14907_s13 + $0xc78] ss:$28 sps:$4 sm:$0xff]   ;;  %v10484_v19 = vld [vmem:[%s14907_s13 + $0xcec] ss:$28 sps:$4 sm:$0xff]  }
 0x3fe   :  { %8232 = vmatpush1.bf16.msra.mxu1 %v10362_v59  ;;  %8396 = vmatpush1.bf16.msra.mxu0 %v10365_v9  ;;  %v14061_v56 = vpack.c.bf16 %v5273_v14, %v5273_v14  ;;  %v10422_v59 = vld [vmem:[%s14907_s13 + $0xab8] ss:$28 sps:$4 sm:$0xff]   ;;  %v10425_v9 = vld [vmem:[%s14907_s13 + $0xac0] ss:$28 sps:$4 sm:$0xff]   ;;  %v10493_v14 = vld [vmem:[%s14907_s13 + $0xd2c] ss:$28 sps:$4 sm:$0xff]  }
 0x3ff   :  { %8233 = vmatprep.subr.bf16.mxu1 %v10370_v22  ;;  %8397 = vmatprep.subr.bf16.mxu0 %v10373_v32  ;;  %v10430_v22 = vld [vmem:[%s14907_s13 + $0xaf4] ss:$28 sps:$4 sm:$0xff]   ;;  %v10433_v32 = vld [vmem:[%s14907_s13 + $0xafc] ss:$28 sps:$4 sm:$0xff]  }
 0x402   :  { %8234 = vmatpush1.bf16.msra.mxu1 %v10368_v60  ;;  %8398 = vmatpush1.bf16.msra.mxu0 %v10371_v48  ;;  %v10428_v60 = vld [vmem:[%s14907_s13 + $0xaf0] ss:$28 sps:$4 sm:$0xff]   ;;  %v10431_v48 = vld [vmem:[%s14907_s13 + $0xaf8] ss:$28 sps:$4 sm:$0xff]  }
 0x403   :  { %8235 = vmatprep.subr.bf16.mxu1 %v10376_v10  ;;  %8399 = vmatprep.subr.bf16.mxu0 %v10379_v40  ;;  %v10436_v10 = vld [vmem:[%s14907_s13 + $0xb2c] ss:$28 sps:$4 sm:$0xff]   ;;  %v10439_v40 = vld [vmem:[%s14907_s13 + $0xb34] ss:$28 sps:$4 sm:$0xff]  }
 0x406   :  { %8236 = vmatpush1.bf16.msra.mxu1 %v10374_v3  ;;  %8400 = vmatpush1.bf16.msra.mxu0 %v10377_v54  ;;  %v10434_v3 = vld [vmem:[%s14907_s13 + $0xb28] ss:$28 sps:$4 sm:$0xff]   ;;  %v10437_v54 = vld [vmem:[%s14907_s13 + $0xb30] ss:$28 sps:$4 sm:$0xff]  }
 0x407   :  { %8237 = vmatprep.subr.bf16.mxu1 %v10382_v41  ;;  %8401 = vmatprep.subr.bf16.mxu0 %v10385_v63  ;;  %v10442_v41 = vld [vmem:[%s14907_s13 + $0xb64] ss:$28 sps:$4 sm:$0xff]   ;;  %v10445_v63 = vld [vmem:[%s14907_s13 + $0xb6c] ss:$28 sps:$4 sm:$0xff]  }
 0x40a   :  { %8238 = vmatpush1.bf16.msra.mxu1 %v10380_v30  ;;  %8402 = vmatpush1.bf16.msra.mxu0 %v10383_v1  ;;  %v10440_v30 = vld [vmem:[%s14907_s13 + $0xb60] ss:$28 sps:$4 sm:$0xff]   ;;  %v10443_v1 = vld [vmem:[%s14907_s13 + $0xb68] ss:$28 sps:$4 sm:$0xff]  }
 0x40b   :  { %8239 = vmatprep.subr.bf16.mxu1 %v10388_v28  ;;  %8403 = vmatprep.subr.bf16.mxu0 %v10391_v35  ;;  %v10448_v28 = vld [vmem:[%s14907_s13 + $0xb9c] ss:$28 sps:$4 sm:$0xff]   ;;  %v10451_v35 = vld [vmem:[%s14907_s13 + $0xba4] ss:$28 sps:$4 sm:$0xff]  }
 0x40e   :  { %8240 = vmatpush1.bf16.msra.mxu1 %v10386_v42  ;;  %8404 = vmatpush1.bf16.msra.mxu0 %v10389_v47  ;;  %v10446_v42 = vld [vmem:[%s14907_s13 + $0xb98] ss:$28 sps:$4 sm:$0xff]   ;;  %v10449_v47 = vld [vmem:[%s14907_s13 + $0xba0] ss:$28 sps:$4 sm:$0xff]  }
 0x40f   :  { %8241 = vmatprep.subr.bf16.mxu1 %v10394_v17  ;;  %8405 = vmatprep.subr.bf16.mxu0 %v10397_v46  ;;  %v10454_v17 = vld [vmem:[%s14907_s13 + $0xbd4] ss:$28 sps:$4 sm:$0xff]   ;;  %v10457_v46 = vld [vmem:[%s14907_s13 + $0xbdc] ss:$28 sps:$4 sm:$0xff]  }
 0x412   :  { %8242 = vmatpush1.bf16.msra.mxu1 %v10392_v18  ;;  %8406 = vmatpush1.bf16.msra.mxu0 %v10395_v12  ;;  %v10455_v18 = vld [vmem:[%s14907_s13 + $0xbd8] ss:$28 sps:$4 sm:$0xff]   ;;  %v10460_v12 = vld [vmem:[%s14907_s13 + $0xc0c] ss:$28 sps:$4 sm:$0xff]  }
 0x413   :  { %8243 = vmatprep.subr.bf16.mxu1 %v10400_v16  ;;  %8407 = vmatprep.subr.bf16.mxu0 %v10403_v23  ;;  %v10463_v16 = vld [vmem:[%s14907_s13 + $0xc14] ss:$28 sps:$4 sm:$0xff]   ;;  %v10458_v23 = vld [vmem:[%s14907_s13 + $0xc08] ss:$28 sps:$4 sm:$0xff]  }
 0x416   :  { %8244 = vmatpush1.bf16.msra.mxu1 %v10398_v8  ;;  %8408 = vmatpush1.bf16.msra.mxu0 %v10401_v27  ;;  %v10469_v8 = vld [vmem:[%s14907_s13 + $0xc4c] ss:$28 sps:$4 sm:$0xff]   ;;  %v10464_v27 = vld [vmem:[%s14907_s13 + $0xc40] ss:$28 sps:$4 sm:$0xff]  }
 0x417   :  { %8245 = vmatprep.subr.bf16.mxu1 %v10406_v5  ;;  %8409 = vmatprep.subr.bf16.mxu0 %v10409_v24  ;;  %v10467_v5 = vld [vmem:[%s14907_s13 + $0xc48] ss:$28 sps:$4 sm:$0xff]   ;;  %v10472_v24 = vld [vmem:[%s14907_s13 + $0xc7c] ss:$28 sps:$4 sm:$0xff]  }
 0x41a   :  { %8246 = vmatpush1.bf16.msra.mxu1 %v10404_v2  ;;  %8410 = vmatpush1.bf16.msra.mxu0 %v10407_v49  ;;  %v10473_v2 = vld [vmem:[%s14907_s13 + $0xc80] ss:$28 sps:$4 sm:$0xff]   ;;  %v10478_v49 = vld [vmem:[%s14907_s13 + $0xcb4] ss:$28 sps:$4 sm:$0xff]  }
 0x41b   :  { %8247 = vmatprep.subr.bf16.mxu1 %v10412_v21  ;;  %8411 = vmatprep.subr.bf16.mxu0 %v10415_v50  ;;  %v10481_v21 = vld [vmem:[%s14907_s13 + $0xcbc] ss:$28 sps:$4 sm:$0xff]   ;;  %v10476_v50 = vld [vmem:[%s14907_s13 + $0xcb0] ss:$28 sps:$4 sm:$0xff]  }
 0x41e   :  { %8248 = vmatpush1.bf16.msra.mxu1 %v10410_v20  ;;  %8412 = vmatpush1.bf16.msra.mxu0 %v10413_v29  ;;  %v10487_v20 = vld [vmem:[%s14907_s13 + $0xcf4] ss:$28 sps:$4 sm:$0xff]   ;;  %v10482_v29 = vld [vmem:[%s14907_s13 + $0xce8] ss:$28 sps:$4 sm:$0xff]  }
 0x41f   :  { %8258 = vmatprep.subr.bf16.mxu1 %v10418_v62  ;;  %8422 = vmatprep.subr.bf16.mxu0 %v10421_v52  ;;  %v10485_v62 = vld [vmem:[%s14907_s13 + $0xcf0] ss:$28 sps:$4 sm:$0xff]   ;;  %v10490_v52 = vld [vmem:[%s14907_s13 + $0xd24] ss:$28 sps:$4 sm:$0xff]  }
 0x421   :  { %8250 = vmatmul.mubr.bf16.vlgmr.msra.gmra.mrb[32].mxu1 %v14056_v45  ;;  %8414 = vmatmul.mubr.bf16.vlgmr.msra.gmra.mrb[44].mxu0 %v14056_v45 }
 0x422   :  { %8259 = vmatpush1.bf16.msra.mxu1 %v10416_v33  ;;  %8290 = vmatprep.mubr.bf16.mxu1 %v14061_v56  ;;  %v10488_v33 = vld [vmem:[%s14907_s13 + $0xd20] ss:$28 sps:$4 sm:$0xff]  }
 0x423   :  { %8423 = vmatpush1.bf16.msra.mxu0 %v10419_v13  ;;  %8454 = vmatprep.mubr.bf16.mxu0 %v14061_v56  ;;  %v10491_v13 = vld [vmem:[%s14907_s13 + $0xd28] ss:$28 sps:$4 sm:$0xff]  }
 0x424   :  { %8260 = vmatprep.subr.bf16.mxu1 %v10424_v31  ;;  %8424 = vmatprep.subr.bf16.mxu0 %v10427_v38  ;;  %v10496_v31 = vld [vmem:[%s14907_s13 + $0xd5c] ss:$28 sps:$4 sm:$0xff]   ;;  %v10802_v38 = vld [vmem:[%s14908_s12] sm:$0xff] }
 0x426   :  { %8261 = vmatpush1.bf16.msra.mxu1 %v10422_v59  ;;  %v5229_v59 = vrot.slane %v10802_v38, %v5228_v39  ;;  %v10555_v38 = vld [vmem:[%s14907_s13 + $0x558] ss:$28 sps:$4 sm:$0xff]  }
 0x427   :  { %8425 = vmatpush1.bf16.msra.mxu0 %v10425_v9  ;;  %8262 = vmatprep.subr.bf16.mxu1 %v10430_v22  ;;  %v10499_v9 = vld [vmem:[%s14907_s13 + $0xd64] ss:$28 sps:$4 sm:$0xff]   ;;  %v10494_v22 = vld [vmem:[%s14907_s13 + $0xd58] ss:$28 sps:$4 sm:$0xff]  }
 0x428   :  { %8426 = vmatprep.subr.bf16.mxu0 %v10433_v32  ;;  %v10497_v32 = vld [vmem:[%s14907_s13 + $0xd60] ss:$28 sps:$4 sm:$0xff]  }
 0x42a   :  { %8263 = vmatpush1.bf16.msra.mxu1 %v10428_v60  ;;  %v10502_v60 = vld [vmem:[%s14907_s13 + $0xd94] ss:$28 sps:$4 sm:$0xff]  }
 0x42b   :  { %8427 = vmatpush1.bf16.msra.mxu0 %v10431_v48  ;;  %8264 = vmatprep.subr.bf16.mxu1 %v10436_v10  ;;  %v5248_v48 = vadd.f32 %v5229_v59, %v13920_v25  ;;  %v10505_v10 = vld [vmem:[%s14907_s13 + $0xd9c] ss:$28 sps:$4 sm:$0xff]   ;;  %v10508_v25 = vld [vmem:[%s14907_s13 + $0xdcc] ss:$28 sps:$4 sm:$0xff]  }
 0x42c   :  { %8428 = vmatprep.subr.bf16.mxu0 %v10439_v40  ;;  %v10500_v40 = vld [vmem:[%s14907_s13 + $0xd90] ss:$28 sps:$4 sm:$0xff]  }
 0x42d   :  { %vm5256_vm15 = vcmp.ge.f32.partialorder %v5248_v48, 0.0  ;;  %v10552_v59 = vld [vmem:[%s14907_s13 + $0x1d0] ss:$28 sps:$4 sm:$0xff]  }
 0x42e   :  { %8265 = vmatpush1.bf16.msra.mxu1 %v10434_v3  ;;  %v10503_v3 = vld [vmem:[%s14907_s13 + $0xd98] ss:$28 sps:$4 sm:$0xff]  }
 0x42f   :  { %8429 = vmatpush1.bf16.msra.mxu0 %v10437_v54  ;;  %8266 = vmatprep.subr.bf16.mxu1 %v10442_v41  ;;  %v5264_v54 = vmul.f32 0.01, %v5248_v48  ;;  %v10511_v41 = vld [vmem:[%s14907_s13 + $0xdd4] ss:$28 sps:$4 sm:$0xff]  }
 0x430   :  { %8430 = vmatprep.subr.bf16.mxu0 %v10445_v63  ;;  %v10506_v63 = vld [vmem:[%s14907_s13 + $0xdc8] ss:$28 sps:$4 sm:$0xff]  }
 0x432   :  { %8267 = vmatpush1.bf16.msra.mxu1 %v10440_v30  ;;  %v10509_v30 = vld [vmem:[%s14907_s13 + $0xdd0] ss:$28 sps:$4 sm:$0xff]  }
 0x433   :  { %8431 = vmatpush1.bf16.msra.mxu0 %v10443_v1  ;;  %8268 = vmatprep.subr.bf16.mxu1 %v10448_v28  ;;  %v10514_v1 = vld [vmem:[%s14907_s13 + $0x14] ss:$28 sps:$4 sm:$0xff]   ;;  %v5272_v28 = vsel %vm5256_vm15, %v5248_v48, %v5264_v54  ;;  %v10569_v54 = vld [vmem:[%s14907_s13 + $0x27c] ss:$28 sps:$4 sm:$0xff]  }
 0x434   :  { %8432 = vmatprep.subr.bf16.mxu0 %v10451_v35  ;;  %v10515_v35 = vld [vmem:[%s14907_s13 + $0x1d8] ss:$28 sps:$4 sm:$0xff]   ;;  %v10561_v48 = vld [vmem:[%s14907_s13 + $0x3d0] ss:$28 sps:$4 sm:$0xff]  }
 0x436   :  { %8269 = vmatpush1.bf16.msra.mxu1 %v10446_v42  ;;  %v10512_v42 = vld [vmem:[%s14907_s13 + $0x10] ss:$28 sps:$4 sm:$0xff]  }
 0x437   :  { %8433 = vmatpush1.bf16.msra.mxu0 %v10449_v47  ;;  %8270 = vmatprep.subr.bf16.mxu1 %v10454_v17  ;;  %v14263_v47 = vpack.c.bf16 %v5272_v28, %v5272_v28  ;;  %v10516_v17 = vld [vmem:[%s14907_s13 + $0x18] ss:$28 sps:$4 sm:$0xff]  }
 0x438   :  { %8434 = vmatprep.subr.bf16.mxu0 %v10457_v46  ;;  %v10519_v46 = vld [vmem:[%s14907_s13 + $0x4c] ss:$28 sps:$4 sm:$0xff]   ;;  %v10575_v28 = vld [vmem:[%s14907_s13 + $0x638] ss:$28 sps:$4 sm:$0xff]  }
 0x43a   :  { %8271 = vmatpush1.bf16.msra.mxu1 %v10452_v37  ;;  %v10520_v37 = vld [vmem:[%s14907_s13 + $0x210] ss:$28 sps:$4 sm:$0xff]  }
 0x43b   :  { %8435 = vmatpush1.bf16.msra.mxu0 %v10455_v18  ;;  %8272 = vmatprep.subr.bf16.mxu1 %v10460_v12  ;;  %v10517_v18 = vld [vmem:[%s14907_s13 + $0x48] ss:$28 sps:$4 sm:$0xff]   ;;  %v10521_v12 = vld [vmem:[%s14907_s13 + $0x50] ss:$28 sps:$4 sm:$0xff]  }
 0x43c   :  { %8436 = vmatprep.subr.bf16.mxu0 %v10463_v16  ;;  %v10524_v16 = vld [vmem:[%s14907_s13 + $0x84] ss:$28 sps:$4 sm:$0xff]  }
 0x43e   :  { %8273 = vmatpush1.bf16.msra.mxu1 %v10458_v23  ;;  %v10525_v23 = vld [vmem:[%s14907_s13 + $0x248] ss:$28 sps:$4 sm:$0xff]  }
 0x43f   :  { %8437 = vmatpush1.bf16.msra.mxu0 %v10461_v57  ;;  %8274 = vmatprep.subr.bf16.mxu1 %v10466_v26  ;;  %v10522_v57 = vld [vmem:[%s14907_s13 + $0x80] ss:$28 sps:$4 sm:$0xff]   ;;  %v10526_v26 = vld [vmem:[%s14907_s13 + $0x88] ss:$28 sps:$4 sm:$0xff]  }
 0x440   :  { %8438 = vmatprep.subr.bf16.mxu0 %v10469_v8  ;;  %v10530_v8 = vld [vmem:[%s14907_s13 + $0x280] ss:$28 sps:$4 sm:$0xff]  }
 0x442   :  { %8275 = vmatpush1.bf16.msra.mxu1 %v10464_v27  ;;  %v10527_v27 = vld [vmem:[%s14907_s13 + $0xb8] ss:$28 sps:$4 sm:$0xff]  }
 0x443   :  { %8439 = vmatpush1.bf16.msra.mxu0 %v10467_v5  ;;  %8276 = vmatprep.subr.bf16.mxu1 %v10472_v24  ;;  %v10531_v5 = vld [vmem:[%s14907_s13 + $0xc0] ss:$28 sps:$4 sm:$0xff]   ;;  %v10534_v24 = vld [vmem:[%s14907_s13 + $0xf4] ss:$28 sps:$4 sm:$0xff]  }
 0x444   :  { %8440 = vmatprep.subr.bf16.mxu0 %v10475_v4  ;;  %v10535_v4 = vld [vmem:[%s14907_s13 + $0x2b8] ss:$28 sps:$4 sm:$0xff]  }
 0x446   :  { %8277 = vmatpush1.bf16.msra.mxu1 %v10470_v58  ;;  %v10532_v58 = vld [vmem:[%s14907_s13 + $0xf0] ss:$28 sps:$4 sm:$0xff]  }
 0x447   :  { %8441 = vmatpush1.bf16.msra.mxu0 %v10473_v2  ;;  %8278 = vmatprep.subr.bf16.mxu1 %v10478_v49  ;;  %v10536_v2 = vld [vmem:[%s14907_s13 + $0xf8] ss:$28 sps:$4 sm:$0xff]   ;;  %v10539_v49 = vld [vmem:[%s14907_s13 + $0x12c] ss:$28 sps:$4 sm:$0xff]  }
 0x448   :  { %8442 = vmatprep.subr.bf16.mxu0 %v10481_v21  ;;  %v10540_v21 = vld [vmem:[%s14907_s13 + $0x2f0] ss:$28 sps:$4 sm:$0xff]  }
 0x44a   :  { %8279 = vmatpush1.bf16.msra.mxu1 %v10476_v50  ;;  %v10537_v50 = vld [vmem:[%s14907_s13 + $0x128] ss:$28 sps:$4 sm:$0xff]  }
 0x44b   :  { %8443 = vmatpush1.bf16.msra.mxu0 %v10479_v44  ;;  %8280 = vmatprep.subr.bf16.mxu1 %v10484_v19  ;;  %v10541_v44 = vld [vmem:[%s14907_s13 + $0x130] ss:$28 sps:$4 sm:$0xff]   ;;  %v10544_v19 = vld [vmem:[%s14907_s13 + $0x164] ss:$28 sps:$4 sm:$0xff]  }
 0x44c   :  { %8444 = vmatprep.subr.bf16.mxu0 %v10487_v20  ;;  %v10545_v20 = vld [vmem:[%s14907_s13 + $0x328] ss:$28 sps:$4 sm:$0xff]  }
 0x44e   :  { %8281 = vmatpush1.bf16.msra.mxu1 %v10482_v29  ;;  %v10542_v29 = vld [vmem:[%s14907_s13 + $0x160] ss:$28 sps:$4 sm:$0xff]  }
 0x44f   :  { %8445 = vmatpush1.bf16.msra.mxu0 %v10485_v62  ;;  %8282 = vmatprep.subr.bf16.mxu1 %v10490_v52  ;;  %v10546_v62 = vld [vmem:[%s14907_s13 + $0x168] ss:$28 sps:$4 sm:$0xff]   ;;  %v10549_v52 = vld [vmem:[%s14907_s13 + $0x19c] ss:$28 sps:$4 sm:$0xff]  }
 0x450   :  { %8446 = vmatprep.subr.bf16.mxu0 %v10493_v14  ;;  %v10550_v14 = vld [vmem:[%s14907_s13 + $0x360] ss:$28 sps:$4 sm:$0xff]  }
 0x452   :  { %8283 = vmatpush1.bf16.msra.mxu1 %v10488_v33  ;;  %v10547_v33 = vld [vmem:[%s14907_s13 + $0x198] ss:$28 sps:$4 sm:$0xff]  }
 0x453   :  { %8447 = vmatpush1.bf16.msra.mxu0 %v10491_v13  ;;  %8284 = vmatprep.subr.bf16.mxu1 %v10496_v31  ;;  %v10551_v13 = vld [vmem:[%s14907_s13 + $0x1a0] ss:$28 sps:$4 sm:$0xff]   ;;  %v10554_v31 = vld [vmem:[%s14907_s13 + $0x1d4] ss:$28 sps:$4 sm:$0xff]  }
 0x454   :  { %8448 = vmatprep.subr.bf16.mxu0 %v10499_v9  ;;  %v10556_v9 = vld [vmem:[%s14907_s13 + $0x398] ss:$28 sps:$4 sm:$0xff]  }
 0x456   :  { %8285 = vmatpush1.bf16.msra.mxu1 %v10494_v22  ;;  %v10559_v22 = vld [vmem:[%s14907_s13 + $0x20c] ss:$28 sps:$4 sm:$0xff]  }
 0x457   :  { %8449 = vmatpush1.bf16.msra.mxu0 %v10497_v32  ;;  %8286 = vmatprep.subr.bf16.mxu1 %v10502_v60  ;;  %v10560_v32 = vld [vmem:[%s14907_s13 + $0x590] ss:$28 sps:$4 sm:$0xff]   ;;  %v10557_v60 = vld [vmem:[%s14907_s13 + $0x208] ss:$28 sps:$4 sm:$0xff]  }
 0x458   :  { %8450 = vmatprep.subr.bf16.mxu0 %v10505_v10  ;;  %v10564_v10 = vld [vmem:[%s14907_s13 + $0x244] ss:$28 sps:$4 sm:$0xff]  }
 0x45a   :  { %8287 = vmatpush1.bf16.msra.mxu1 %v10500_v40  ;;  %v10565_v40 = vld [vmem:[%s14907_s13 + $0x5c8] ss:$28 sps:$4 sm:$0xff]  }
 0x45b   :  { %8451 = vmatpush1.bf16.msra.mxu0 %v10503_v3  ;;  %8288 = vmatprep.subr.bf16.mxu1 %v10508_v25  ;;  %v10562_v3 = vld [vmem:[%s14907_s13 + $0x240] ss:$28 sps:$4 sm:$0xff]   ;;  %v10566_v25 = vld [vmem:[%s14907_s13 + $0x408] ss:$28 sps:$4 sm:$0xff]  }
 0x45c   :  { %8452 = vmatprep.subr.bf16.mxu0 %v10511_v41  ;;  %v10570_v41 = vld [vmem:[%s14907_s13 + $0x600] ss:$28 sps:$4 sm:$0xff]  }
 0x45e   :  { %8289 = vmatpush1.bf16.msra.mxu1 %v10506_v63  ;;  %v10567_v63 = vld [vmem:[%s14907_s13 + $0x278] ss:$28 sps:$4 sm:$0xff]  }
 0x45f   :  { %8453 = vmatpush1.bf16.msra.mxu0 %v10509_v30  ;;  %8463 = vmatprep.subr.bf16.mxu1 %v10514_v1  ;;  %v10571_v30 = vld [vmem:[%s14907_s13 + $0x440] ss:$28 sps:$4 sm:$0xff]   ;;  %v10574_v1 = vld [vmem:[%s14907_s13 + $0x2b4] ss:$28 sps:$4 sm:$0xff]  }
 0x460   :  { %9893 = vmatprep.subr.bf16.mxu0 %v10515_v35  ;;  %v10572_v35 = vld [vmem:[%s14907_s13 + $0x2b0] ss:$28 sps:$4 sm:$0xff]  }
 0x461   :  { %8291 = vmatmul.mubr.bf16.vlgmr.msra.gmra.mrb[32].mxu1 %v14263_v47 }
 0x462   :  { %8455 = vmatmul.mubr.bf16.vlgmr.msra.gmra.mrb[44].mxu0 %v14263_v47  ;;  %8464 = vmatpush1.bf16.msra.mxu1 %v10512_v42  ;;  %v10576_v42 = vld [vmem:[%s14907_s13 + $0x478] ss:$28 sps:$4 sm:$0xff]  }
 0x463   :  { %8495 = vmatprep.mubr.bf16.mxu1 %v13614_v7  ;;  %9894 = vmatpush3.bf16.msra.mxu0 %v10516_v17  ;;  %v10579_v17 = vld [vmem:[%s14907_s13 + $0x2ec] ss:$28 sps:$4 sm:$0xff]  }
 0x464   :  { %8659 = vmatprep.mubr.bf16.mxu0 %v13614_v7  ;;  %8465 = vmatprep.subr.bf16.mxu1 %v10519_v46  ;;  %v10529_v7 = vld [vmem:[%s14907_s13 + $0xbc] ss:$28 sps:$4 sm:$0xff]   ;;  %v10580_v46 = vld [vmem:[%s14907_s13 + $0x670] ss:$28 sps:$4 sm:$0xff]  }
 0x465   :  { %9895 = vmatprep.subr.bf16.mxu0 %v10520_v37  ;;  %v10577_v37 = vld [vmem:[%s14907_s13 + $0x2e8] ss:$28 sps:$4 sm:$0xff]  }
 0x466   :  { %8466 = vmatpush1.bf16.msra.mxu1 %v10517_v18  ;;  %v10581_v18 = vld [vmem:[%s14907_s13 + $0x4b0] ss:$28 sps:$4 sm:$0xff]  }
 0x467   :  { %9896 = vmatpush3.bf16.msra.mxu0 %v10521_v12  ;;  %8467 = vmatprep.subr.bf16.mxu1 %v10524_v16  ;;  %v10584_v12 = vld [vmem:[%s14907_s13 + $0x324] ss:$28 sps:$4 sm:$0xff]  }
 0x468   :  { %9897 = vmatprep.subr.bf16.mxu0 %v10525_v23  ;;  %v10585_v16 = vld [vmem:[%s14907_s13 + $0x6a8] ss:$28 sps:$4 sm:$0xff]   ;;  %v10582_v23 = vld [vmem:[%s14907_s13 + $0x320] ss:$28 sps:$4 sm:$0xff]  }
 0x46a   :  { %8468 = vmatpush1.bf16.msra.mxu1 %v10522_v57  ;;  %v10586_v57 = vld [vmem:[%s14907_s13 + $0x4e8] ss:$28 sps:$4 sm:$0xff]  }
 0x46b   :  { %9898 = vmatpush3.bf16.msra.mxu0 %v10526_v26  ;;  %8469 = vmatprep.subr.bf16.mxu1 %v10529_v7  ;;  %v10589_v26 = vld [vmem:[%s14907_s13 + $0x35c] ss:$28 sps:$4 sm:$0xff]  }
 0x46c   :  { %9899 = vmatprep.subr.bf16.mxu0 %v10530_v8  ;;  %v10590_v7 = vld [vmem:[%s14907_s13 + $0x6e0] ss:$28 sps:$4 sm:$0xff]   ;;  %v10587_v8 = vld [vmem:[%s14907_s13 + $0x358] ss:$28 sps:$4 sm:$0xff]  }
 0x46e   :  { %8470 = vmatpush1.bf16.msra.mxu1 %v10527_v27  ;;  %v10591_v27 = vld [vmem:[%s14907_s13 + $0x520] ss:$28 sps:$4 sm:$0xff]  }
 0x46f   :  { %9900 = vmatpush3.bf16.msra.mxu0 %v10531_v5  ;;  %8471 = vmatprep.subr.bf16.mxu1 %v10534_v24  ;;  %v10594_v5 = vld [vmem:[%s14907_s13 + $0x394] ss:$28 sps:$4 sm:$0xff]  }
 0x470   :  { %9901 = vmatprep.subr.bf16.mxu0 %v10535_v4  ;;  %v10595_v24 = vld [vmem:[%s14907_s13 + $0x8d8] ss:$28 sps:$4 sm:$0xff]   ;;  %v10592_v4 = vld [vmem:[%s14907_s13 + $0x390] ss:$28 sps:$4 sm:$0xff]  }
 0x472   :  { %8472 = vmatpush1.bf16.msra.mxu1 %v10532_v58  ;;  %v10596_v58 = vld [vmem:[%s14907_s13 + $0x718] ss:$28 sps:$4 sm:$0xff]  }
 0x473   :  { %9902 = vmatpush3.bf16.msra.mxu0 %v10536_v2  ;;  %8473 = vmatprep.subr.bf16.mxu1 %v10539_v49  ;;  %v10599_v2 = vld [vmem:[%s14907_s13 + $0x3cc] ss:$28 sps:$4 sm:$0xff]  }
 0x474   :  { %9903 = vmatprep.subr.bf16.mxu0 %v10540_v21  ;;  %v10600_v49 = vld [vmem:[%s14907_s13 + $0x910] ss:$28 sps:$4 sm:$0xff]   ;;  %v10597_v21 = vld [vmem:[%s14907_s13 + $0x3c8] ss:$28 sps:$4 sm:$0xff]  }
 0x476   :  { %8474 = vmatpush1.bf16.msra.mxu1 %v10537_v50  ;;  %v10601_v50 = vld [vmem:[%s14907_s13 + $0x750] ss:$28 sps:$4 sm:$0xff]  }
 0x477   :  { %9904 = vmatpush3.bf16.msra.mxu0 %v10541_v44  ;;  %8475 = vmatprep.subr.bf16.mxu1 %v10544_v19  ;;  %v10605_v44 = vld [vmem:[%s14907_s13 + $0x948] ss:$28 sps:$4 sm:$0xff]  }
 0x478   :  { %9905 = vmatprep.subr.bf16.mxu0 %v10545_v20  ;;  %v10606_v19 = vld [vmem:[%s14907_s13 + $0x788] ss:$28 sps:$4 sm:$0xff]   ;;  %v10609_v20 = vld [vmem:[%s14907_s13 + $0x43c] ss:$28 sps:$4 sm:$0xff]  }
 0x47a   :  { %8476 = vmatpush1.bf16.msra.mxu1 %v10542_v29  ;;  %v10610_v29 = vld [vmem:[%s14907_s13 + $0x980] ss:$28 sps:$4 sm:$0xff]  }
 0x47b   :  { %9906 = vmatpush3.bf16.msra.mxu0 %v10546_v62  ;;  %8477 = vmatprep.subr.bf16.mxu1 %v10549_v52  ;;  %v10607_v62 = vld [vmem:[%s14907_s13 + $0x438] ss:$28 sps:$4 sm:$0xff]   ;;  %v10611_v52 = vld [vmem:[%s14907_s13 + $0x7c0] ss:$28 sps:$4 sm:$0xff]  }
 0x47c   :  { %9907 = vmatprep.subr.bf16.mxu0 %v10550_v14  ;;  %v10614_v14 = vld [vmem:[%s14907_s13 + $0x474] ss:$28 sps:$4 sm:$0xff]  }
 0x47e   :  { %8478 = vmatpush1.bf16.msra.mxu1 %v10547_v33  ;;  %v10615_v33 = vld [vmem:[%s14907_s13 + $0x9b8] ss:$28 sps:$4 sm:$0xff]  }
 0x47f   :  { %9908 = vmatpush3.bf16.msra.mxu0 %v10551_v13  ;;  %8479 = vmatprep.subr.bf16.mxu1 %v10554_v31  ;;  %v10612_v13 = vld [vmem:[%s14907_s13 + $0x470] ss:$28 sps:$4 sm:$0xff]   ;;  %v10616_v31 = vld [vmem:[%s14907_s13 + $0x7f8] ss:$28 sps:$4 sm:$0xff]  }
 0x480   :  { %9915 = vmatprep.subr.bf16.mxu0 %v10555_v38  ;;  %v10619_v38 = vld [vmem:[%s14907_s13 + $0x4ac] ss:$28 sps:$4 sm:$0xff]  }
 0x482   :  { %8660 = vmatmul.mubr.bf16.vlgmr.msra.gmra.mrb[48].mxu0 %v13616_v11  ;;  %8480 = vmatpush1.bf16.msra.mxu1 %v10552_v59  ;;  %v10620_v59 = vld [vmem:[%s14907_s13 + $0x9f0] ss:$28 sps:$4 sm:$0xff]  }
 0x483   :  { %9916 = vmatpush3.bf16.msra.mxu0 %v10556_v9  ;;  %8699 = vmatprep.mubr.bf16.mxu0 %v13835_v43  ;;  %v10617_v9 = vld [vmem:[%s14907_s13 + $0x4a8] ss:$28 sps:$4 sm:$0xff]  }
 0x484   :  { %8481 = vmatprep.subr.bf16.mxu1 %v10559_v22  ;;  %9917 = vmatprep.subr.bf16.mxu0 %v10560_v32  ;;  %v10621_v22 = vld [vmem:[%s14907_s13 + $0x830] ss:$28 sps:$4 sm:$0xff]   ;;  %v10624_v32 = vld [vmem:[%s14907_s13 + $0x4e4] ss:$28 sps:$4 sm:$0xff]  }
 0x486   :  { %8482 = vmatpush1.bf16.msra.mxu1 %v10557_v60  ;;  %v10625_v60 = vld [vmem:[%s14907_s13 + $0xa28] ss:$28 sps:$4 sm:$0xff]  }
 0x487   :  { %9918 = vmatpush3.bf16.msra.mxu0 %v10561_v48  ;;  %8483 = vmatprep.subr.bf16.mxu1 %v10564_v10  ;;  %v10622_v48 = vld [vmem:[%s14907_s13 + $0x4e0] ss:$28 sps:$4 sm:$0xff]   ;;  %v10626_v10 = vld [vmem:[%s14907_s13 + $0x868] ss:$28 sps:$4 sm:$0xff]  }
 0x488   :  { %9919 = vmatprep.subr.bf16.mxu0 %v10565_v40  ;;  %v10629_v40 = vld [vmem:[%s14907_s13 + $0x51c] ss:$28 sps:$4 sm:$0xff]  }
 0x48a   :  { %8484 = vmatpush1.bf16.msra.mxu1 %v10562_v3  ;;  %v10630_v3 = vld [vmem:[%s14907_s13 + $0xa60] ss:$28 sps:$4 sm:$0xff]  }
 0x48b   :  { %9920 = vmatpush3.bf16.msra.mxu0 %v10566_v25  ;;  %8485 = vmatprep.subr.bf16.mxu1 %v10569_v54  ;;  %v10627_v25 = vld [vmem:[%s14907_s13 + $0x518] ss:$28 sps:$4 sm:$0xff]   ;;  %v10631_v54 = vld [vmem:[%s14907_s13 + $0x8a0] ss:$28 sps:$4 sm:$0xff]  }
 0x48c   :  { %9921 = vmatprep.subr.bf16.mxu0 %v10570_v41  ;;  %v10634_v41 = vld [vmem:[%s14907_s13 + $0x554] ss:$28 sps:$4 sm:$0xff]  }
 0x48e   :  { %8486 = vmatpush1.bf16.msra.mxu1 %v10567_v63  ;;  %v10635_v63 = vld [vmem:[%s14907_s13 + $0xc58] ss:$28 sps:$4 sm:$0xff]  }
 0x48f   :  { %9922 = vmatpush3.bf16.msra.mxu0 %v10571_v30  ;;  %8487 = vmatprep.subr.bf16.mxu1 %v10574_v1  ;;  %v10632_v30 = vld [vmem:[%s14907_s13 + $0x550] ss:$28 sps:$4 sm:$0xff]   ;;  %v10636_v1 = vld [vmem:[%s14907_s13 + $0xa98] ss:$28 sps:$4 sm:$0xff]  }
 0x490   :  { %9923 = vmatprep.subr.bf16.mxu0 %v10575_v28  ;;  %v10639_v28 = vld [vmem:[%s14907_s13 + $0x58c] ss:$28 sps:$4 sm:$0xff]  }
 0x492   :  { %8488 = vmatpush1.bf16.msra.mxu1 %v10572_v35  ;;  %v10640_v35 = vld [vmem:[%s14907_s13 + $0xc90] ss:$28 sps:$4 sm:$0xff]  }
 0x493   :  { %9924 = vmatpush3.bf16.msra.mxu0 %v10576_v42  ;;  %8489 = vmatprep.subr.bf16.mxu1 %v10579_v17  ;;  %v10637_v42 = vld [vmem:[%s14907_s13 + $0x588] ss:$28 sps:$4 sm:$0xff]   ;;  %v10641_v17 = vld [vmem:[%s14907_s13 + $0xad0] ss:$28 sps:$4 sm:$0xff]  }
 0x494   :  { %9925 = vmatprep.subr.bf16.mxu0 %v10580_v46  ;;  %v10644_v46 = vld [vmem:[%s14907_s13 + $0x5c4] ss:$28 sps:$4 sm:$0xff]  }
 0x496   :  { %8490 = vmatpush1.bf16.msra.mxu1 %v10577_v37  ;;  %v10645_v37 = vld [vmem:[%s14907_s13 + $0xcc8] ss:$28 sps:$4 sm:$0xff]  }
 0x497   :  { %9926 = vmatpush3.bf16.msra.mxu0 %v10581_v18  ;;  %8491 = vmatprep.subr.bf16.mxu1 %v10584_v12  ;;  %v10642_v18 = vld [vmem:[%s14907_s13 + $0x5c0] ss:$28 sps:$4 sm:$0xff]   ;;  %v10646_v12 = vld [vmem:[%s14907_s13 + $0xb08] ss:$28 sps:$4 sm:$0xff]  }
 0x498   :  { %9927 = vmatprep.subr.bf16.mxu0 %v10585_v16  ;;  %v10649_v16 = vld [vmem:[%s14907_s13 + $0x5fc] ss:$28 sps:$4 sm:$0xff]  }
 0x49a   :  { %8492 = vmatpush1.bf16.msra.mxu1 %v10582_v23  ;;  %v10650_v23 = vld [vmem:[%s14907_s13 + $0xd00] ss:$28 sps:$4 sm:$0xff]  }
 0x49b   :  { %9928 = vmatpush3.bf16.msra.mxu0 %v10586_v57  ;;  %8493 = vmatprep.subr.bf16.mxu1 %v10589_v26  ;;  %v10647_v57 = vld [vmem:[%s14907_s13 + $0x5f8] ss:$28 sps:$4 sm:$0xff]   ;;  %v10651_v26 = vld [vmem:[%s14907_s13 + $0xb40] ss:$28 sps:$4 sm:$0xff]  }
 0x49c   :  { %9929 = vmatprep.subr.bf16.mxu0 %v10590_v7  ;;  %v10654_v7 = vld [vmem:[%s14907_s13 + $0x634] ss:$28 sps:$4 sm:$0xff]  }
 0x49e   :  { %8494 = vmatpush1.bf16.msra.mxu1 %v10587_v8  ;;  %v10655_v8 = vld [vmem:[%s14907_s13 + $0xd38] ss:$28 sps:$4 sm:$0xff]  }
 0x49f   :  { %9930 = vmatpush3.bf16.msra.mxu0 %v10591_v27  ;;  %8504 = vmatprep.subr.bf16.mxu1 %v10594_v5  ;;  %v10652_v27 = vld [vmem:[%s14907_s13 + $0x630] ss:$28 sps:$4 sm:$0xff]   ;;  %v10656_v5 = vld [vmem:[%s14907_s13 + $0xb78] ss:$28 sps:$4 sm:$0xff]  }
 0x4a0   :  { %9937 = vmatprep.subr.bf16.mxu0 %v10595_v24  ;;  %v10659_v24 = vld [vmem:[%s14907_s13 + $0x66c] ss:$28 sps:$4 sm:$0xff]  }
 0x4a1   :  { %8496 = vmatmul.mubr.bf16.vlgmr.msra.gmra.mrb[36].mxu1 %v13616_v11  ;;  %v10604_v11 = vld [vmem:[%s14907_s13 + $0x404] ss:$28 sps:$4 sm:$0xff]  }
 0x4a2   :  { %8700 = vmatmul.mubr.bf16.vlgmr.msra.gmra.mrb[52].mxu0 %v13843_v6  ;;  %8505 = vmatpush1.bf16.msra.mxu1 %v10592_v4  ;;  %v10660_v4 = vld [vmem:[%s14907_s13 + $0xd70] ss:$28 sps:$4 sm:$0xff]  }
 0x4a3   :  { %8536 = vmatprep.mubr.bf16.mxu1 %v13835_v43  ;;  %9938 = vmatpush3.bf16.msra.mxu0 %v10596_v58  ;;  %v10602_v43 = vld [vmem:[%s14907_s13 + $0x400] ss:$28 sps:$4 sm:$0xff]   ;;  %v10657_v58 = vld [vmem:[%s14907_s13 + $0x668] ss:$28 sps:$4 sm:$0xff]  }
 0x4a4   :  { %8739 = vmatprep.mubr.bf16.mxu0 %v13853_v53  ;;  %8506 = vmatprep.subr.bf16.mxu1 %v10599_v2  ;;  %v10661_v2 = vld [vmem:[%s14907_s13 + $0xbb0] ss:$28 sps:$4 sm:$0xff]  }
 0x4a5   :  { %9939 = vmatprep.subr.bf16.mxu0 %v10600_v49  ;;  %v10664_v49 = vld [vmem:[%s14907_s13 + $0x6a4] ss:$28 sps:$4 sm:$0xff]  }
 0x4a6   :  { %8507 = vmatpush1.bf16.msra.mxu1 %v10597_v21  ;;  %v10665_v21 = vld [vmem:[%s14907_s13 + $0xda8] ss:$28 sps:$4 sm:$0xff]  }
 0x4a7   :  { %9940 = vmatpush3.bf16.msra.mxu0 %v10601_v50  ;;  %8508 = vmatprep.subr.bf16.mxu1 %v10604_v11  ;;  %v10662_v50 = vld [vmem:[%s14907_s13 + $0x6a0] ss:$28 sps:$4 sm:$0xff]   ;;  %v10666_v11 = vld [vmem:[%s14907_s13 + $0xbe8] ss:$28 sps:$4 sm:$0xff]  }
 0x4a8   :  { %9941 = vmatprep.subr.bf16.mxu0 %v10605_v44  ;;  %v10669_v44 = vld [vmem:[%s14907_s13 + $0x6dc] ss:$28 sps:$4 sm:$0xff]  }
 0x4aa   :  { %8509 = vmatpush1.bf16.msra.mxu1 %v10602_v43  ;;  %v10670_v43 = vld [vmem:[%s14907_s13 + $0xde0] ss:$28 sps:$4 sm:$0xff]  }
 0x4ab   :  { %9942 = vmatpush3.bf16.msra.mxu0 %v10606_v19  ;;  %8510 = vmatprep.subr.bf16.mxu1 %v10609_v20  ;;  %v10667_v19 = vld [vmem:[%s14907_s13 + $0x6d8] ss:$28 sps:$4 sm:$0xff]   ;;  %v10671_v20 = vld [vmem:[%s14907_s13 + $0xc20] ss:$28 sps:$4 sm:$0xff]  }
 0x4ac   :  { %9943 = vmatprep.subr.bf16.mxu0 %v10610_v29  ;;  %v10674_v29 = vld [vmem:[%s14907_s13 + $0x714] ss:$28 sps:$4 sm:$0xff]  }
 0x4ae   :  { %8511 = vmatpush1.bf16.msra.mxu1 %v10607_v62  ;;  %v10672_v62 = vld [vmem:[%s14907_s13 + $0x710] ss:$28 sps:$4 sm:$0xff]  }
 0x4af   :  { %9944 = vmatpush3.bf16.msra.mxu0 %v10611_v52  ;;  %8512 = vmatprep.subr.bf16.mxu1 %v10614_v14  ;;  %v10677_v52 = vld [vmem:[%s14907_s13 + $0x74c] ss:$28 sps:$4 sm:$0xff]  }
 0x4b0   :  { %9945 = vmatprep.subr.bf16.mxu0 %v10615_v33  ;;  %v10675_v14 = vld [vmem:[%s14907_s13 + $0x748] ss:$28 sps:$4 sm:$0xff]  }
 0x4b1   :  { %v10680_v33 = vld [vmem:[%s14907_s13 + $0x784] ss:$28 sps:$4 sm:$0xff]  }
 0x4b2   :  { %8513 = vmatpush1.bf16.msra.mxu1 %v10612_v13  ;;  %v10678_v13 = vld [vmem:[%s14907_s13 + $0x780] ss:$28 sps:$4 sm:$0xff]  }
 0x4b3   :  { %9946 = vmatpush3.bf16.msra.mxu0 %v10616_v31  ;;  %8514 = vmatprep.subr.bf16.mxu1 %v10619_v38  ;;  %v10686_v31 = vld [vmem:[%s14907_s13 + $0x7f4] ss:$28 sps:$4 sm:$0xff]  }
 0x4b4   :  { %9947 = vmatprep.subr.bf16.mxu0 %v10620_v59  ;;  %v10684_v38 = vld [vmem:[%s14907_s13 + $0x7f0] ss:$28 sps:$4 sm:$0xff]  }
 0x4b5   :  { %v10689_v59 = vld [vmem:[%s14907_s13 + $0x82c] ss:$28 sps:$4 sm:$0xff]  }
 0x4b6   :  { %8515 = vmatpush1.bf16.msra.mxu1 %v10617_v9  ;;  %v10687_v9 = vld [vmem:[%s14907_s13 + $0x828] ss:$28 sps:$4 sm:$0xff]  }
 0x4b7   :  { %9948 = vmatpush3.bf16.msra.mxu0 %v10621_v22  ;;  %8516 = vmatprep.subr.bf16.mxu1 %v10624_v32  ;;  %v10692_v22 = vld [vmem:[%s14907_s13 + $0x864] ss:$28 sps:$4 sm:$0xff]  }
 0x4b8   :  { %9949 = vmatprep.subr.bf16.mxu0 %v10625_v60  ;;  %v10690_v32 = vld [vmem:[%s14907_s13 + $0x860] ss:$28 sps:$4 sm:$0xff]  }
 0x4b9   :  { %v10695_v60 = vld [vmem:[%s14907_s13 + $0x89c] ss:$28 sps:$4 sm:$0xff]  }
 0x4ba   :  { %8517 = vmatpush1.bf16.msra.mxu1 %v10622_v48  ;;  %v10693_v48 = vld [vmem:[%s14907_s13 + $0x898] ss:$28 sps:$4 sm:$0xff]  }
 0x4bb   :  { %9950 = vmatpush3.bf16.msra.mxu0 %v10626_v10  ;;  %8518 = vmatprep.subr.bf16.mxu1 %v10629_v40  ;;  %v10698_v10 = vld [vmem:[%s14907_s13 + $0x8d4] ss:$28 sps:$4 sm:$0xff]  }
 0x4bc   :  { %9951 = vmatprep.subr.bf16.mxu0 %v10630_v3  ;;  %v10696_v40 = vld [vmem:[%s14907_s13 + $0x8d0] ss:$28 sps:$4 sm:$0xff]  }
 0x4bd   :  { %v10701_v3 = vld [vmem:[%s14907_s13 + $0x90c] ss:$28 sps:$4 sm:$0xff]  }
 0x4be   :  { %8519 = vmatpush1.bf16.msra.mxu1 %v10627_v25  ;;  %v10699_v25 = vld [vmem:[%s14907_s13 + $0x908] ss:$28 sps:$4 sm:$0xff]  }
 0x4bf   :  { %9952 = vmatpush3.bf16.msra.mxu0 %v10631_v54  ;;  %8520 = vmatprep.subr.bf16.mxu1 %v10634_v41  ;;  %v10704_v54 = vld [vmem:[%s14907_s13 + $0x944] ss:$28 sps:$4 sm:$0xff]  }
 0x4c0   :  { %9959 = vmatprep.subr.bf16.mxu0 %v10635_v63  ;;  %v10702_v41 = vld [vmem:[%s14907_s13 + $0x940] ss:$28 sps:$4 sm:$0xff]  }
 0x4c1   :  { %v10707_v63 = vld [vmem:[%s14907_s13 + $0x97c] ss:$28 sps:$4 sm:$0xff]  }
 0x4c2   :  { %8740 = vmatmul.mubr.bf16.vlgmr.msra.gmra.mrb[56].mxu0 %v14056_v45  ;;  %8521 = vmatpush1.bf16.msra.mxu1 %v10632_v30  ;;  %v10705_v30 = vld [vmem:[%s14907_s13 + $0x978] ss:$28 sps:$4 sm:$0xff]  }
 0x4c3   :  { %9960 = vmatpush3.bf16.msra.mxu0 %v10636_v1  ;;  %8779 = vmatprep.mubr.bf16.mxu0 %v14061_v56  ;;  %v10710_v1 = vld [vmem:[%s14907_s13 + $0x9b4] ss:$28 sps:$4 sm:$0xff]  }
 0x4c4   :  { %8522 = vmatprep.subr.bf16.mxu1 %v10639_v28  ;;  %9961 = vmatprep.subr.bf16.mxu0 %v10640_v35  ;;  %v10708_v28 = vld [vmem:[%s14907_s13 + $0x9b0] ss:$28 sps:$4 sm:$0xff]  }
 0x4c5   :  { %v10713_v35 = vld [vmem:[%s14907_s13 + $0x9ec] ss:$28 sps:$4 sm:$0xff]  }
 0x4c6   :  { %8523 = vmatpush1.bf16.msra.mxu1 %v10637_v42  ;;  %v10711_v42 = vld [vmem:[%s14907_s13 + $0x9e8] ss:$28 sps:$4 sm:$0xff]  }
 0x4c7   :  { %9962 = vmatpush3.bf16.msra.mxu0 %v10641_v17  ;;  %8524 = vmatprep.subr.bf16.mxu1 %v10644_v46  ;;  %v10716_v17 = vld [vmem:[%s14907_s13 + $0xa24] ss:$28 sps:$4 sm:$0xff]  }
 0x4c8   :  { %9963 = vmatprep.subr.bf16.mxu0 %v10645_v37  ;;  %v10714_v46 = vld [vmem:[%s14907_s13 + $0xa20] ss:$28 sps:$4 sm:$0xff]  }
 0x4c9   :  { %v10719_v37 = vld [vmem:[%s14907_s13 + $0xa5c] ss:$28 sps:$4 sm:$0xff]  }
 0x4ca   :  { %8525 = vmatpush1.bf16.msra.mxu1 %v10642_v18  ;;  %v10717_v18 = vld [vmem:[%s14907_s13 + $0xa58] ss:$28 sps:$4 sm:$0xff]  }
 0x4cb   :  { %9964 = vmatpush3.bf16.msra.mxu0 %v10646_v12  ;;  %8526 = vmatprep.subr.bf16.mxu1 %v10649_v16  ;;  %v10722_v12 = vld [vmem:[%s14907_s13 + $0xa94] ss:$28 sps:$4 sm:$0xff]  }
 0x4cc   :  { %9965 = vmatprep.subr.bf16.mxu0 %v10650_v23  ;;  %v10720_v16 = vld [vmem:[%s14907_s13 + $0xa90] ss:$28 sps:$4 sm:$0xff]  }
 0x4cd   :  { %v10725_v23 = vld [vmem:[%s14907_s13 + $0xacc] ss:$28 sps:$4 sm:$0xff]  }
 0x4ce   :  { %8527 = vmatpush1.bf16.msra.mxu1 %v10647_v57  ;;  %v10723_v57 = vld [vmem:[%s14907_s13 + $0xac8] ss:$28 sps:$4 sm:$0xff]  }
 0x4cf   :  { %9966 = vmatpush3.bf16.msra.mxu0 %v10651_v26  ;;  %8528 = vmatprep.subr.bf16.mxu1 %v10654_v7  ;;  %v10728_v26 = vld [vmem:[%s14907_s13 + $0xb04] ss:$28 sps:$4 sm:$0xff]  }
 0x4d0   :  { %9967 = vmatprep.subr.bf16.mxu0 %v10655_v8  ;;  %v10726_v7 = vld [vmem:[%s14907_s13 + $0xb00] ss:$28 sps:$4 sm:$0xff]   ;;  %v10734_v8 = vld [vmem:[%s14907_s13 + $0xb74] ss:$28 sps:$4 sm:$0xff]  }
 0x4d2   :  { %8529 = vmatpush1.bf16.msra.mxu1 %v10652_v27  ;;  %v10732_v27 = vld [vmem:[%s14907_s13 + $0xb70] ss:$28 sps:$4 sm:$0xff]  }
 0x4d3   :  { %9968 = vmatpush3.bf16.msra.mxu0 %v10656_v5  ;;  %8530 = vmatprep.subr.bf16.mxu1 %v10659_v24  ;;  %v14786_v5 = vld [vmem:[%s14909_s14] sm:$0xff]  ;;  %v10737_v24 = vld [vmem:[%s14907_s13 + $0xbac] ss:$28 sps:$4 sm:$0xff]  }
 0x4d4   :  { %9969 = vmatprep.subr.bf16.mxu0 %v10660_v4  ;;  %v5799_v4 = vrot.slane %v14786_v5, %v11109_v36  ;;  %v10740_v36 = vld [vmem:[%s14907_s13 + $0xbe4] ss:$28 sps:$4 sm:$0xff]  }
 0x4d6   :  { %8531 = vmatpush1.bf16.msra.mxu1 %v10657_v58  ;;  %v5807_v58 = vrot.slane %v14786_v5, %v5212_v15 }
 0x4d7   :  { %9970 = vmatpush3.bf16.msra.mxu0 %v10661_v2  ;;  %8532 = vmatprep.subr.bf16.mxu1 %v10664_v49  ;;  %v5803_v2 = vrot.slane %v14786_v5, %v11057_v61  ;;  %v10735_v49 = vld [vmem:[%s14907_s13 + $0xba8] ss:$28 sps:$4 sm:$0xff]  }
 0x4d8   :  { %9971 = vmatprep.subr.bf16.mxu0 %v10665_v21  ;;  %v5811_v21 = vrot.slane %v14786_v5, %v5216_v0 }
 0x4da   :  { %8533 = vmatpush1.bf16.msra.mxu1 %v10662_v50 }
 0x4db   :  { %9972 = vmatpush3.bf16.msra.mxu0 %v10666_v11  ;;  %8534 = vmatprep.subr.bf16.mxu1 %v10669_v44 }
 0x4dc   :  { %9973 = vmatprep.subr.bf16.mxu0 %v10670_v43 }
 0x4de   :  { %8535 = vmatpush1.bf16.msra.mxu1 %v10667_v19 }
 0x4df   :  { %9974 = vmatpush3.bf16.msra.mxu0 %v10671_v20  ;;  %8545 = vmatprep.subr.bf16.mxu1 %v10674_v29  ;;  %v10738_v29 = vld [vmem:[%s14907_s13 + $0xbe0] ss:$28 sps:$4 sm:$0xff]  }
 0x4e1   :  { %8537 = vmatmul.mubr.bf16.vlgmr.msra.gmra.mrb[36].mxu1 %v13843_v6  ;;  %v10683_v6 = vld [vmem:[%s14907_s13 + $0x7bc] ss:$28 sps:$4 sm:$0xff]  }
 0x4e2   :  { %8780 = vmatmul.mubr.bf16.vlgmr.msra.gmra.mrb[60].mxu0 %v14263_v47  ;;  %8546 = vmatpush1.bf16.msra.mxu1 %v10672_v62 }
 0x4e3   :  { %8577 = vmatprep.mubr.bf16.mxu1 %v13853_v53  ;;  %8547 = vmatprep.subr.bf16.mxu1 %v10677_v52  ;;  %v10681_v53 = vld [vmem:[%s14907_s13 + $0x7b8] ss:$28 sps:$4 sm:$0xff]  }
 0x4e6   :  { %8548 = vmatpush1.bf16.msra.mxu1 %v10675_v14  ;;  %v10743_v14 = vld [vmem:[%s14907_s13 + $0xc1c] ss:$28 sps:$4 sm:$0xff]  }
 0x4e7   :  { %8549 = vmatprep.subr.bf16.mxu1 %v10680_v33 }
 0x4ea   :  { %8550 = vmatpush1.bf16.msra.mxu1 %v10678_v13  ;;  %v10741_v13 = vld [vmem:[%s14907_s13 + $0xc18] ss:$28 sps:$4 sm:$0xff]  }
 0x4eb   :  { %8551 = vmatprep.subr.bf16.mxu1 %v10683_v6  ;;  %v10746_v6 = vld [vmem:[%s14907_s13 + $0xc54] ss:$28 sps:$4 sm:$0xff]  }
 0x4ee   :  { %8552 = vmatpush1.bf16.msra.mxu1 %v10681_v53  ;;  %v10744_v53 = vld [vmem:[%s14907_s13 + $0xc50] ss:$28 sps:$4 sm:$0xff]  }
 0x4ef   :  { %8553 = vmatprep.subr.bf16.mxu1 %v10686_v31  ;;  %v10749_v31 = vld [vmem:[%s14907_s13 + $0xc8c] ss:$28 sps:$4 sm:$0xff]  }
 0x4f2   :  { %8554 = vmatpush1.bf16.msra.mxu1 %v10684_v38  ;;  %v10747_v38 = vld [vmem:[%s14907_s13 + $0xc88] ss:$28 sps:$4 sm:$0xff]  }
 0x4f3   :  { %8555 = vmatprep.subr.bf16.mxu1 %v10689_v59  ;;  %v10752_v59 = vld [vmem:[%s14907_s13 + $0xcc4] ss:$28 sps:$4 sm:$0xff]  }
 0x4f6   :  { %8556 = vmatpush1.bf16.msra.mxu1 %v10687_v9  ;;  %v10750_v9 = vld [vmem:[%s14907_s13 + $0xcc0] ss:$28 sps:$4 sm:$0xff]  }
 0x4f7   :  { %8557 = vmatprep.subr.bf16.mxu1 %v10692_v22  ;;  %v10755_v22 = vld [vmem:[%s14907_s13 + $0xcfc] ss:$28 sps:$4 sm:$0xff]  }
 0x4fa   :  { %8558 = vmatpush1.bf16.msra.mxu1 %v10690_v32  ;;  %v10753_v32 = vld [vmem:[%s14907_s13 + $0xcf8] ss:$28 sps:$4 sm:$0xff]  }
 0x4fb   :  { %8559 = vmatprep.subr.bf16.mxu1 %v10695_v60  ;;  %v10758_v60 = vld [vmem:[%s14907_s13 + $0xd34] ss:$28 sps:$4 sm:$0xff]  }
 0x4fe   :  { %8560 = vmatpush1.bf16.msra.mxu1 %v10693_v48  ;;  %v10756_v48 = vld [vmem:[%s14907_s13 + $0xd30] ss:$28 sps:$4 sm:$0xff]  }
 0x4ff   :  { %8561 = vmatprep.subr.bf16.mxu1 %v10698_v10  ;;  %v10761_v10 = vld [vmem:[%s14907_s13 + $0xd6c] ss:$28 sps:$4 sm:$0xff]  }
 0x502   :  { %8562 = vmatpush1.bf16.msra.mxu1 %v10696_v40  ;;  %v10759_v40 = vld [vmem:[%s14907_s13 + $0xd68] ss:$28 sps:$4 sm:$0xff]  }
 0x503   :  { %8563 = vmatprep.subr.bf16.mxu1 %v10701_v3  ;;  %v10764_v3 = vld [vmem:[%s14907_s13 + $0xda4] ss:$28 sps:$4 sm:$0xff]  }
 0x506   :  { %8564 = vmatpush1.bf16.msra.mxu1 %v10699_v25 }
 0x507   :  { %8565 = vmatprep.subr.bf16.mxu1 %v10704_v54 }
 0x50a   :  { %8566 = vmatpush1.bf16.msra.mxu1 %v10702_v41  ;;  %v10762_v41 = vld [vmem:[%s14907_s13 + $0xda0] ss:$28 sps:$4 sm:$0xff]  }
 0x50b   :  { %8567 = vmatprep.subr.bf16.mxu1 %v10707_v63 }
 0x50e   :  { %8568 = vmatpush1.bf16.msra.mxu1 %v10705_v30 }
 0x50f   :  { %8569 = vmatprep.subr.bf16.mxu1 %v10710_v1  ;;  %v10767_v1 = vld [vmem:[%s14907_s13 + $0xddc] ss:$28 sps:$4 sm:$0xff]  }
 0x512   :  { %8570 = vmatpush1.bf16.msra.mxu1 %v10708_v28 }
 0x513   :  { %8571 = vmatprep.subr.bf16.mxu1 %v10713_v35  ;;  %v10765_v35 = vld [vmem:[%s14907_s13 + $0xdd8] ss:$28 sps:$4 sm:$0xff]  }
 0x516   :  { %8572 = vmatpush1.bf16.msra.mxu1 %v10711_v42  ;;  %v5823_v42 = vrot.slane %v14786_v5, %v5228_v39  ;;  %v5815_v39 = vrot.slane %v14786_v5, %v5220_v51 }
 0x517   :  { %8573 = vmatprep.subr.bf16.mxu1 %v10716_v17 }
 0x51a   :  { %8574 = vmatpush1.bf16.msra.mxu1 %v10714_v46 }
 0x51b   :  { %8575 = vmatprep.subr.bf16.mxu1 %v10719_v37 }
 0x51e   :  { %8576 = vmatpush1.bf16.msra.mxu1 %v10717_v18 }
 0x51f   :  { %8586 = vmatprep.subr.bf16.mxu1 %v10722_v12 }
 0x521   :  { %8578 = vmatmul.mubr.bf16.vlgmr.msra.gmra.mrb[36].mxu1 %v14056_v45  ;;  %v10731_v45 = vld [vmem:[%s14907_s13 + $0xb3c] ss:$28 sps:$4 sm:$0xff]  }
 0x522   :  { %8587 = vmatpush1.bf16.msra.mxu1 %v10720_v16  ;;  %8618 = vmatprep.mubr.bf16.mxu1 %v14061_v56  ;;  %v10729_v56 = vld [vmem:[%s14907_s13 + $0xb38] ss:$28 sps:$4 sm:$0xff]  }
 0x523   :  { %8588 = vmatprep.subr.bf16.mxu1 %v10725_v23 }
 0x526   :  { %8589 = vmatpush1.bf16.msra.mxu1 %v10723_v57 }
 0x527   :  { %8590 = vmatprep.subr.bf16.mxu1 %v10728_v26 }
 0x52a   :  { %8591 = vmatpush1.bf16.msra.mxu1 %v10726_v7 }
 0x52b   :  { %8592 = vmatprep.subr.bf16.mxu1 %v10731_v45 }
 0x52e   :  { %8593 = vmatpush1.bf16.msra.mxu1 %v10729_v56 }
 0x52f   :  { %8594 = vmatprep.subr.bf16.mxu1 %v10734_v8 }
 0x532   :  { %8595 = vmatpush1.bf16.msra.mxu1 %v10732_v27 }
 0x533   :  { %8596 = vmatprep.subr.bf16.mxu1 %v10737_v24 }
 0x534   :  { %v8292_v50 = vpop.f32.mrb[32].mxu1 }
 0x535   :  { %v9981_v11 = vadd.f32 %v8292_v50, %v5799_v4  ;;  %v8456_v44 = vpop.f32.mrb[44].mxu0  ;;  %v8294_v15 = vpop.f32.mrb[33].mxu1 }
 0x536   :  { %v9983_v43 = vadd.f32 %v8456_v44, %v5807_v58  ;;  %v9982_v19 = vadd.f32 %v8294_v15, %v5803_v2  ;;  %v8458_v61 = vpop.f32.mrb[45].mxu0  ;;  %v8296_v20 = vpop.f32.mrb[34].mxu1  ;;  %8597 = vmatpush1.bf16.msra.mxu1 %v10735_v49  ;;  %v5819_v49 = vrot.slane %v14786_v5, %v5224_v34 }
 0x537   :  { %8787 = vst [vmem:[%s14910_s15] sm:$0xff] %v9981_v11  ;;  %v9984_v0 = vadd.f32 %v8458_v61, %v5811_v21  ;;  %v8460_v62 = vpop.f32.mrb[46].mxu0  ;;  %v8297_v52 = vpop.f32.mrb[35].mxu1  ;;  %8598 = vmatprep.subr.bf16.mxu1 %v10740_v36 }
 0x538   :  { %8789 = vst [vmem:[%s14910_s15 + $0x10] sm:$0xff] %v9983_v43  ;;  %8788 = vst [vmem:[%s14910_s15 + $0x8] sm:$0xff] %v9982_v19  ;;  %v8461_v33 = vpop.f32.mrb[47].mxu0 }
 0x539   :  { %8790 = vst [vmem:[%s14910_s15 + $0x18] sm:$0xff] %v9984_v0 }
 0x53a   :  { %8599 = vmatpush1.bf16.msra.mxu1 %v10738_v29 }
 0x53b   :  { %8600 = vmatprep.subr.bf16.mxu1 %v10743_v14 }
 0x53e   :  { %8601 = vmatpush1.bf16.msra.mxu1 %v10741_v13 }
 0x53f   :  { %8602 = vmatprep.subr.bf16.mxu1 %v10746_v6 }
 0x542   :  { %8603 = vmatpush1.bf16.msra.mxu1 %v10744_v53 }
 0x543   :  { %8604 = vmatprep.subr.bf16.mxu1 %v10749_v31 }
 0x546   :  { %8605 = vmatpush1.bf16.msra.mxu1 %v10747_v38 }
 0x547   :  { %8606 = vmatprep.subr.bf16.mxu1 %v10752_v59 }
 0x54a   :  { %8607 = vmatpush1.bf16.msra.mxu1 %v10750_v9 }
 0x54b   :  { %8608 = vmatprep.subr.bf16.mxu1 %v10755_v22 }
 0x54e   :  { %8609 = vmatpush1.bf16.msra.mxu1 %v10753_v32 }
 0x54f   :  { %8610 = vmatprep.subr.bf16.mxu1 %v10758_v60 }
 0x552   :  { %8611 = vmatpush1.bf16.msra.mxu1 %v10756_v48 }
 0x553   :  { %8612 = vmatprep.subr.bf16.mxu1 %v10761_v10 }
 0x555   :  { %v9909_v25 = vpop.f32.mrb[48].mxu0 }
 0x556   :  { %v9910_v54 = vpop.f32.mrb[49].mxu0  ;;  %8613 = vmatpush1.bf16.msra.mxu1 %v10759_v40 }
 0x557   :  { %v9911_v63 = vadd.f32 %v9910_v54, %v9909_v25  ;;  %v9912_v30 = vpop.f32.mrb[50].mxu0  ;;  %8614 = vmatprep.subr.bf16.mxu1 %v10764_v3 }
 0x558   :  { %v9913_v28 = vpop.f32.mrb[51].mxu0 }
 0x559   :  { %v8662_v37 = vadd.f32 %v9911_v63, %v5823_v42 }
 0x55a   :  { %8615 = vmatpush1.bf16.msra.mxu1 %v10762_v41 }
 0x55b   :  { %8616 = vmatprep.subr.bf16.mxu1 %v10767_v1 }
 0x55e   :  { %8617 = vmatpush1.bf16.msra.mxu1 %v10765_v35 }
 0x561   :  { %8619 = vmatmul.mubr.bf16.vlgmr.msra.gmra.mrb[36].mxu1 %v14263_v47 }
 0x575   :  { %v9931_v17 = vpop.f32.mrb[52].mxu0 }
 0x576   :  { %v9932_v46 = vpop.f32.mrb[53].mxu0 }
 0x577   :  { %v9933_v18 = vadd.f32 %v9932_v46, %v9931_v17  ;;  %v9934_v12 = vpop.f32.mrb[54].mxu0 }
 0x578   :  { %v9935_v16 = vpop.f32.mrb[55].mxu0 }
 0x579   :  { %v8702_v23 = vadd.f32 %v9933_v18, %v8662_v37 }
 0x595   :  { %v9953_v57 = vpop.f32.mrb[56].mxu0 }
 0x596   :  { %v9954_v26 = vpop.f32.mrb[57].mxu0 }
 0x597   :  { %v9955_v7 = vadd.f32 %v9954_v26, %v9953_v57  ;;  %v9956_v45 = vpop.f32.mrb[58].mxu0 }
 0x598   :  { %v9957_v56 = vpop.f32.mrb[59].mxu0 }
 0x599   :  { %v8742_v8 = vadd.f32 %v9955_v7, %v8702_v23 }
 0x5b5   :  { %v9975_v27 = vpop.f32.mrb[60].mxu0 }
 0x5b6   :  { %v9976_v24 = vpop.f32.mrb[61].mxu0 }
 0x5b7   :  { %v9977_v47 = vadd.f32 %v9976_v24, %v9975_v27  ;;  %v9978_v4 = vpop.f32.mrb[62].mxu0 }
 0x5b8   :  { %v9979_v58 = vpop.f32.mrb[63].mxu0 }
 0x5b9   :  { %v8782_v2 = vadd.f32 %v9977_v47, %v8742_v8 }
 0x5bb   :  { %8793 = vst [vmem:[%s14910_s15 + $0x30] sm:$0xff] %v8782_v2 }
 0x634   :  { %v8620_v21 = vpop.f32.mrb[36].mxu1 }
 0x635   :  { %v9985_v36 = vadd.f32 %v8620_v21, %v5815_v39  ;;  %v8622_v50 = vpop.f32.mrb[37].mxu1 }
 0x636   :  { %v9986_v11 = vadd.f32 %v8622_v50, %v5819_v49  ;;  %v8624_v44 = vpop.f32.mrb[38].mxu1 }
 0x637   :  { %8791 = vst [vmem:[%s14910_s15 + $0x20] sm:$0xff] %v9985_v36  ;;  %v8625_v15 = vpop.f32.mrb[39].mxu1 }
 0x638   :  { %8792 = vst [vmem:[%s14910_s15 + $0x28] sm:$0xff] %v9986_v11 }

</bundles_post_ra>
